<compile_context>
chip_gen: v7x
topology: tpu7x:2x2x1
jax: 0.10.0
libtpu: 0.0.40
codegen_flags: <defaults>
</compile_context>

<pallas_src>
import jax
import jax.numpy as jnp
from jax.experimental import pallas as pl
from jax.experimental.pallas import tpu as pltpu

LEAKY_SLOPE = 0.01  # nn.LeakyReLU default negative_slope
BN_EPS = 1e-5       # nn.BatchNorm1d default eps

# (in_features, out_features) for encoder then decoder
LAYER_DIMS = [
    (784, 512), (512, 256), (256, 128), (128, 64), (64, 32),   # Encoder
    (32, 64), (64, 128), (128, 256), (256, 512), (512, 784),   # Decoder
]
N_LAYERS = len(LAYER_DIMS)


def _net_fused_kernel(*refs):
    """Fused forward of all 10 [Linear -> BatchNorm1d -> LeakyReLU] layers.

    refs = (x_ref, w0_hbm..w9_hbm, o_ref, w0_buf..w9_buf, dma_sems)
    Weights are streamed HBM->VMEM with manual async copies that overlap the
    compute of earlier layers; intermediate activations never leave VMEM.
    """
    x_ref = refs[0]
    w_hbm = refs[1:1 + N_LAYERS]
    o_ref = refs[1 + N_LAYERS]
    w_buf = refs[2 + N_LAYERS:2 + 2 * N_LAYERS]
    sem = refs[2 + 2 * N_LAYERS]

    # Issue all weight DMAs up front, in layer order.  The DMA engine drains
    # them in the background; only layer 0's transfer is exposed.
    copies = []
    for i in range(N_LAYERS):
        cp = pltpu.make_async_copy(w_hbm[i], w_buf[i], sem.at[i])
        cp.start()
        copies.append(cp)

    h = x_ref[...]                                        # (B, 784) f32
    for i in range(N_LAYERS):
        copies[i].wait()                                  # weight i now in VMEM

        # Linear, bias-free (bias is cancelled by the BN mean subtraction).
        # bf16 x bf16 MXU matmul with f32 accumulation.
        y = jnp.dot(h.astype(jnp.bfloat16), w_buf[i][...],
                    preferred_element_type=jnp.float32)   # (B, N) f32

        # BatchNorm1d (training-mode batch stats, biased variance, gamma=1,
        # beta=0) folded into one per-feature scale/shift.  Variance clamped
        # at 0 so f32 cancellation can never drive rsqrt to NaN.
        mean = jnp.mean(y, axis=0, keepdims=True)                       # (1, N)
        var = jnp.maximum(
            jnp.mean(y * y, axis=0, keepdims=True) - mean * mean, 0.0)  # (1, N)
        s = jax.lax.rsqrt(var + BN_EPS)                                 # (1, N)
        z = y * s + (-mean * s)                                         # (B, N)

        # LeakyReLU
        h = jnp.where(z >= 0, z, LEAKY_SLOPE * z)

    o_ref[...] = h                                        # (B, 784) f32


# ----------------------------- parameter setup ------------------------------

def init_params(key):
    """PyTorch-style init. Weights stored pre-transposed (K, N) in bf16.

    Linear biases are intentionally omitted: they are exactly cancelled by the
    BatchNorm mean subtraction that immediately follows every Linear.  BN
    affine params are identity (gamma=1, beta=0) for a fresh module and are
    folded away inside the kernel.
    """
    weights = []
    for (k_in, k_out) in LAYER_DIMS:
        key, kw = jax.random.split(key)
        bound = 1.0 / (float(k_in) ** 0.5)
        w = jax.random.uniform(kw, (k_in, k_out), jnp.float32, -bound, bound)
        weights.append(w.astype(jnp.bfloat16))
    return weights


# --------------------------------- forward ----------------------------------

def net_forward(x_nchw, weights):
    """Full Net.forward: flatten -> fused encoder+decoder kernel -> (B,1,28,28)."""
    B = x_nchw.shape[0]
    assert B > 1, "training-mode BatchNorm1d needs batch > 1"
    x2d = x_nchw.reshape(B, 784).astype(jnp.float32)

    vmem_spec = pl.BlockSpec(memory_space=pltpu.MemorySpace.VMEM)
    hbm_spec = pl.BlockSpec(memory_space=pl.ANY)   # raw HBM ref, manual DMA

    flops = 0
    transcendentals = 0
    bytes_accessed = x2d.size * 4 + B * 784 * 4            # input + output
    for w in weights:
        k, n = w.shape
        flops += 2 * B * k * n + 8 * B * n                 # matmul + BN/LeakyReLU
        transcendentals += n                               # rsqrt per feature
        bytes_accessed += w.size * w.dtype.itemsize

    scratch_shapes = [pltpu.VMEM((k, n), jnp.bfloat16) for (k, n) in LAYER_DIMS]
    scratch_shapes.append(pltpu.SemaphoreType.DMA((N_LAYERS,)))

    out2d = pl.pallas_call(
        _net_fused_kernel,
        out_shape=jax.ShapeDtypeStruct((B, 784), jnp.float32),
        in_specs=[vmem_spec] + [hbm_spec] * N_LAYERS,
        out_specs=vmem_spec,
        scratch_shapes=scratch_shapes,
        compiler_params=pltpu.CompilerParams(
            vmem_limit_bytes=32 * 1024 * 1024),
        cost_estimate=pl.CostEstimate(
            flops=int(flops),
            transcendentals=int(transcendentals),
            bytes_accessed=int(bytes_accessed)),
    )(x2d, *weights)

    return out2d.reshape(B, 1, 28, 28)


if __name__ == "__main__":
    key = jax.random.PRNGKey(0)
    key, k_x = jax.random.split(key)

    B = 8  # small batch (>1 required: BatchNorm1d training-mode batch stats)
    x = jax.random.normal(k_x, (B, 1, 28, 28), jnp.float32)  # NCHW, MNIST-like

    weights = init_params(key)

    out = net_forward(x, weights)
    out = jax.block_until_ready(out)

    assert out.shape == (B, 1, 28, 28), out.shape
    assert out.dtype == jnp.float32
    assert bool(jnp.all(jnp.isfinite(out)))
    print("KERNEL_OK")
</pallas_src>

<mosaic_0001>
module attributes {stable_mosaic.version = 11 : i64} {
  func.func @_net_fused_kernel(%arg0: memref<8x784xf32, #tpu.memory_space<vmem>>, %arg1: memref<784x512xbf16, #tpu.memory_space<any>>, %arg2: memref<512x256xbf16, #tpu.memory_space<any>>, %arg3: memref<256x128xbf16, #tpu.memory_space<any>>, %arg4: memref<128x64xbf16, #tpu.memory_space<any>>, %arg5: memref<64x32xbf16, #tpu.memory_space<any>>, %arg6: memref<32x64xbf16, #tpu.memory_space<any>>, %arg7: memref<64x128xbf16, #tpu.memory_space<any>>, %arg8: memref<128x256xbf16, #tpu.memory_space<any>>, %arg9: memref<256x512xbf16, #tpu.memory_space<any>>, %arg10: memref<512x784xbf16, #tpu.memory_space<any>>, %arg11: memref<8x784xf32, #tpu.memory_space<vmem>>, %arg12: memref<784x512xbf16, #tpu.memory_space<vmem>>, %arg13: memref<512x256xbf16, #tpu.memory_space<vmem>>, %arg14: memref<256x128xbf16, #tpu.memory_space<vmem>>, %arg15: memref<128x64xbf16, #tpu.memory_space<vmem>>, %arg16: memref<64x32xbf16, #tpu.memory_space<vmem>>, %arg17: memref<32x64xbf16, #tpu.memory_space<vmem>>, %arg18: memref<64x128xbf16, #tpu.memory_space<vmem>>, %arg19: memref<128x256xbf16, #tpu.memory_space<vmem>>, %arg20: memref<256x512xbf16, #tpu.memory_space<vmem>>, %arg21: memref<512x784xbf16, #tpu.memory_space<vmem>>, %arg22: memref<10x!tpu.dma_semaphore, #tpu.memory_space<semaphore_mem>>) attributes {dimension_semantics = [], scalar_prefetch = 0 : i64, scratch_operands = 11 : i64, tpu.core_type = #tpu.core_type<tc>} {
    %c0_i32 = arith.constant 0 : i32
    %0 = tpu.memref_slice %arg22[%c0_i32] : memref<10x!tpu.dma_semaphore, #tpu.memory_space<semaphore_mem>> -> memref<1x!tpu.dma_semaphore, #tpu.memory_space<semaphore_mem>>
    %1 = tpu.memref_squeeze %0 : memref<1x!tpu.dma_semaphore, #tpu.memory_space<semaphore_mem>> -> memref<!tpu.dma_semaphore, #tpu.memory_space<semaphore_mem>>
    tpu.enqueue_dma source(%arg1 : memref<784x512xbf16, #tpu.memory_space<any>>) target(%arg12 : memref<784x512xbf16, #tpu.memory_space<vmem>>) target_semaphore(%1 : memref<!tpu.dma_semaphore, #tpu.memory_space<semaphore_mem>>)
    %c1_i32 = arith.constant 1 : i32
    %2 = tpu.memref_slice %arg22[%c1_i32] : memref<10x!tpu.dma_semaphore, #tpu.memory_space<semaphore_mem>> -> memref<1x!tpu.dma_semaphore, #tpu.memory_space<semaphore_mem>>
    %3 = tpu.memref_squeeze %2 : memref<1x!tpu.dma_semaphore, #tpu.memory_space<semaphore_mem>> -> memref<!tpu.dma_semaphore, #tpu.memory_space<semaphore_mem>>
    tpu.enqueue_dma source(%arg2 : memref<512x256xbf16, #tpu.memory_space<any>>) target(%arg13 : memref<512x256xbf16, #tpu.memory_space<vmem>>) target_semaphore(%3 : memref<!tpu.dma_semaphore, #tpu.memory_space<semaphore_mem>>)
    %c2_i32 = arith.constant 2 : i32
    %4 = tpu.memref_slice %arg22[%c2_i32] : memref<10x!tpu.dma_semaphore, #tpu.memory_space<semaphore_mem>> -> memref<1x!tpu.dma_semaphore, #tpu.memory_space<semaphore_mem>>
    %5 = tpu.memref_squeeze %4 : memref<1x!tpu.dma_semaphore, #tpu.memory_space<semaphore_mem>> -> memref<!tpu.dma_semaphore, #tpu.memory_space<semaphore_mem>>
    tpu.enqueue_dma source(%arg3 : memref<256x128xbf16, #tpu.memory_space<any>>) target(%arg14 : memref<256x128xbf16, #tpu.memory_space<vmem>>) target_semaphore(%5 : memref<!tpu.dma_semaphore, #tpu.memory_space<semaphore_mem>>)
    %c3_i32 = arith.constant 3 : i32
    %6 = tpu.memref_slice %arg22[%c3_i32] : memref<10x!tpu.dma_semaphore, #tpu.memory_space<semaphore_mem>> -> memref<1x!tpu.dma_semaphore, #tpu.memory_space<semaphore_mem>>
    %7 = tpu.memref_squeeze %6 : memref<1x!tpu.dma_semaphore, #tpu.memory_space<semaphore_mem>> -> memref<!tpu.dma_semaphore, #tpu.memory_space<semaphore_mem>>
    tpu.enqueue_dma source(%arg4 : memref<128x64xbf16, #tpu.memory_space<any>>) target(%arg15 : memref<128x64xbf16, #tpu.memory_space<vmem>>) target_semaphore(%7 : memref<!tpu.dma_semaphore, #tpu.memory_space<semaphore_mem>>)
    %c4_i32 = arith.constant 4 : i32
    %8 = tpu.memref_slice %arg22[%c4_i32] : memref<10x!tpu.dma_semaphore, #tpu.memory_space<semaphore_mem>> -> memref<1x!tpu.dma_semaphore, #tpu.memory_space<semaphore_mem>>
    %9 = tpu.memref_squeeze %8 : memref<1x!tpu.dma_semaphore, #tpu.memory_space<semaphore_mem>> -> memref<!tpu.dma_semaphore, #tpu.memory_space<semaphore_mem>>
    tpu.enqueue_dma source(%arg5 : memref<64x32xbf16, #tpu.memory_space<any>>) target(%arg16 : memref<64x32xbf16, #tpu.memory_space<vmem>>) target_semaphore(%9 : memref<!tpu.dma_semaphore, #tpu.memory_space<semaphore_mem>>)
    %c5_i32 = arith.constant 5 : i32
    %10 = tpu.memref_slice %arg22[%c5_i32] : memref<10x!tpu.dma_semaphore, #tpu.memory_space<semaphore_mem>> -> memref<1x!tpu.dma_semaphore, #tpu.memory_space<semaphore_mem>>
    %11 = tpu.memref_squeeze %10 : memref<1x!tpu.dma_semaphore, #tpu.memory_space<semaphore_mem>> -> memref<!tpu.dma_semaphore, #tpu.memory_space<semaphore_mem>>
    tpu.enqueue_dma source(%arg6 : memref<32x64xbf16, #tpu.memory_space<any>>) target(%arg17 : memref<32x64xbf16, #tpu.memory_space<vmem>>) target_semaphore(%11 : memref<!tpu.dma_semaphore, #tpu.memory_space<semaphore_mem>>)
    %c6_i32 = arith.constant 6 : i32
    %12 = tpu.memref_slice %arg22[%c6_i32] : memref<10x!tpu.dma_semaphore, #tpu.memory_space<semaphore_mem>> -> memref<1x!tpu.dma_semaphore, #tpu.memory_space<semaphore_mem>>
    %13 = tpu.memref_squeeze %12 : memref<1x!tpu.dma_semaphore, #tpu.memory_space<semaphore_mem>> -> memref<!tpu.dma_semaphore, #tpu.memory_space<semaphore_mem>>
    tpu.enqueue_dma source(%arg7 : memref<64x128xbf16, #tpu.memory_space<any>>) target(%arg18 : memref<64x128xbf16, #tpu.memory_space<vmem>>) target_semaphore(%13 : memref<!tpu.dma_semaphore, #tpu.memory_space<semaphore_mem>>)
    %c7_i32 = arith.constant 7 : i32
    %14 = tpu.memref_slice %arg22[%c7_i32] : memref<10x!tpu.dma_semaphore, #tpu.memory_space<semaphore_mem>> -> memref<1x!tpu.dma_semaphore, #tpu.memory_space<semaphore_mem>>
    %15 = tpu.memref_squeeze %14 : memref<1x!tpu.dma_semaphore, #tpu.memory_space<semaphore_mem>> -> memref<!tpu.dma_semaphore, #tpu.memory_space<semaphore_mem>>
    tpu.enqueue_dma source(%arg8 : memref<128x256xbf16, #tpu.memory_space<any>>) target(%arg19 : memref<128x256xbf16, #tpu.memory_space<vmem>>) target_semaphore(%15 : memref<!tpu.dma_semaphore, #tpu.memory_space<semaphore_mem>>)
    %c8_i32 = arith.constant 8 : i32
    %16 = tpu.memref_slice %arg22[%c8_i32] : memref<10x!tpu.dma_semaphore, #tpu.memory_space<semaphore_mem>> -> memref<1x!tpu.dma_semaphore, #tpu.memory_space<semaphore_mem>>
    %17 = tpu.memref_squeeze %16 : memref<1x!tpu.dma_semaphore, #tpu.memory_space<semaphore_mem>> -> memref<!tpu.dma_semaphore, #tpu.memory_space<semaphore_mem>>
    tpu.enqueue_dma source(%arg9 : memref<256x512xbf16, #tpu.memory_space<any>>) target(%arg20 : memref<256x512xbf16, #tpu.memory_space<vmem>>) target_semaphore(%17 : memref<!tpu.dma_semaphore, #tpu.memory_space<semaphore_mem>>)
    %c9_i32 = arith.constant 9 : i32
    %18 = tpu.memref_slice %arg22[%c9_i32] : memref<10x!tpu.dma_semaphore, #tpu.memory_space<semaphore_mem>> -> memref<1x!tpu.dma_semaphore, #tpu.memory_space<semaphore_mem>>
    %19 = tpu.memref_squeeze %18 : memref<1x!tpu.dma_semaphore, #tpu.memory_space<semaphore_mem>> -> memref<!tpu.dma_semaphore, #tpu.memory_space<semaphore_mem>>
    tpu.enqueue_dma source(%arg10 : memref<512x784xbf16, #tpu.memory_space<any>>) target(%arg21 : memref<512x784xbf16, #tpu.memory_space<vmem>>) target_semaphore(%19 : memref<!tpu.dma_semaphore, #tpu.memory_space<semaphore_mem>>)
    %c0 = arith.constant 0 : index
    %c0_0 = arith.constant 0 : index
    %20 = vector.load %arg0[%c0, %c0_0] : memref<8x784xf32, #tpu.memory_space<vmem>>, vector<8x784xf32>
    %c0_i32_1 = arith.constant 0 : i32
    %21 = tpu.memref_slice %arg22[%c0_i32_1] : memref<10x!tpu.dma_semaphore, #tpu.memory_space<semaphore_mem>> -> memref<1x!tpu.dma_semaphore, #tpu.memory_space<semaphore_mem>>
    %22 = tpu.memref_squeeze %21 : memref<1x!tpu.dma_semaphore, #tpu.memory_space<semaphore_mem>> -> memref<!tpu.dma_semaphore, #tpu.memory_space<semaphore_mem>>
    tpu.wait_dma2 semaphore(%22 : memref<!tpu.dma_semaphore, #tpu.memory_space<semaphore_mem>>) src(%arg1 : memref<784x512xbf16, #tpu.memory_space<any>>) dst(%arg12 : memref<784x512xbf16, #tpu.memory_space<vmem>>)
    %23 = arith.truncf %20 : vector<8x784xf32> to vector<8x784xbf16>
    %c0_2 = arith.constant 0 : index
    %c0_3 = arith.constant 0 : index
    %24 = vector.load %arg12[%c0_2, %c0_3] : memref<784x512xbf16, #tpu.memory_space<vmem>>, vector<784x512xbf16>
    %cst = arith.constant dense<0.000000e+00> : vector<8x512xf32>
    %25 = tpu.matmul %23, %24, %cst {dimension_numbers = #tpu.dot_dimension_numbers<[1], [0], [0], [1], [0, 0, 1, 1], [], []>} : vector<8x784xbf16>, vector<784x512xbf16>, vector<8x512xf32> -> vector<8x512xf32>
    %cst_4 = arith.constant dense<0.000000e+00> : vector<512xf32>
    %26 = vector.multi_reduction <add>, %25, %cst_4 [0] : vector<8x512xf32> to vector<512xf32>
    %27 = vector.shape_cast %26 : vector<512xf32> to vector<1x512xf32>
    %cst_5 = arith.constant 8.000000e+00 : f32
    %28 = vector.broadcast %cst_5 : f32 to vector<1x512xf32>
    %29 = arith.divf %27, %28 : vector<1x512xf32>
    %30 = arith.mulf %25, %25 : vector<8x512xf32>
    %cst_6 = arith.constant dense<0.000000e+00> : vector<512xf32>
    %31 = vector.multi_reduction <add>, %30, %cst_6 [0] : vector<8x512xf32> to vector<512xf32>
    %32 = vector.shape_cast %31 : vector<512xf32> to vector<1x512xf32>
    %cst_7 = arith.constant 8.000000e+00 : f32
    %33 = vector.broadcast %cst_7 : f32 to vector<1x512xf32>
    %34 = arith.divf %32, %33 : vector<1x512xf32>
    %35 = arith.mulf %29, %29 : vector<1x512xf32>
    %36 = arith.subf %34, %35 : vector<1x512xf32>
    %cst_8 = arith.constant 0.000000e+00 : f32
    %37 = vector.broadcast %cst_8 : f32 to vector<1x512xf32>
    %38 = arith.maximumf %36, %37 : vector<1x512xf32>
    %cst_9 = arith.constant 9.99999974E-6 : f32
    %39 = vector.broadcast %cst_9 : f32 to vector<1x512xf32>
    %40 = arith.addf %38, %39 : vector<1x512xf32>
    %41 = math.rsqrt %40 : vector<1x512xf32>
    %42 = vector.broadcast %41 : vector<1x512xf32> to vector<8x512xf32>
    %43 = arith.mulf %25, %42 : vector<8x512xf32>
    %cst_10 = arith.constant 0.000000e+00 : f32
    %44 = vector.broadcast %cst_10 : f32 to vector<1x512xf32>
    %45 = arith.subf %44, %29 : vector<1x512xf32>
    %46 = arith.mulf %45, %41 : vector<1x512xf32>
    %47 = vector.broadcast %46 : vector<1x512xf32> to vector<8x512xf32>
    %48 = arith.addf %43, %47 : vector<8x512xf32>
    %cst_11 = arith.constant 0.000000e+00 : f32
    %49 = vector.broadcast %cst_11 : f32 to vector<8x512xf32>
    %50 = arith.cmpf oge, %48, %49 : vector<8x512xf32>
    %cst_12 = arith.constant 0.00999999977 : f32
    %51 = vector.broadcast %cst_12 : f32 to vector<8x512xf32>
    %52 = arith.mulf %51, %48 : vector<8x512xf32>
    %53 = arith.select %50, %48, %52 : vector<8x512xi1>, vector<8x512xf32>
    %c1_i32_13 = arith.constant 1 : i32
    %54 = tpu.memref_slice %arg22[%c1_i32_13] : memref<10x!tpu.dma_semaphore, #tpu.memory_space<semaphore_mem>> -> memref<1x!tpu.dma_semaphore, #tpu.memory_space<semaphore_mem>>
    %55 = tpu.memref_squeeze %54 : memref<1x!tpu.dma_semaphore, #tpu.memory_space<semaphore_mem>> -> memref<!tpu.dma_semaphore, #tpu.memory_space<semaphore_mem>>
    tpu.wait_dma2 semaphore(%55 : memref<!tpu.dma_semaphore, #tpu.memory_space<semaphore_mem>>) src(%arg2 : memref<512x256xbf16, #tpu.memory_space<any>>) dst(%arg13 : memref<512x256xbf16, #tpu.memory_space<vmem>>)
    %56 = arith.truncf %53 : vector<8x512xf32> to vector<8x512xbf16>
    %c0_14 = arith.constant 0 : index
    %c0_15 = arith.constant 0 : index
    %57 = vector.load %arg13[%c0_14, %c0_15] : memref<512x256xbf16, #tpu.memory_space<vmem>>, vector<512x256xbf16>
    %cst_16 = arith.constant dense<0.000000e+00> : vector<8x256xf32>
    %58 = tpu.matmul %56, %57, %cst_16 {dimension_numbers = #tpu.dot_dimension_numbers<[1], [0], [0], [1], [0, 0, 1, 1], [], []>} : vector<8x512xbf16>, vector<512x256xbf16>, vector<8x256xf32> -> vector<8x256xf32>
    %cst_17 = arith.constant dense<0.000000e+00> : vector<256xf32>
    %59 = vector.multi_reduction <add>, %58, %cst_17 [0] : vector<8x256xf32> to vector<256xf32>
    %60 = vector.shape_cast %59 : vector<256xf32> to vector<1x256xf32>
    %cst_18 = arith.constant 8.000000e+00 : f32
    %61 = vector.broadcast %cst_18 : f32 to vector<1x256xf32>
    %62 = arith.divf %60, %61 : vector<1x256xf32>
    %63 = arith.mulf %58, %58 : vector<8x256xf32>
    %cst_19 = arith.constant dense<0.000000e+00> : vector<256xf32>
    %64 = vector.multi_reduction <add>, %63, %cst_19 [0] : vector<8x256xf32> to vector<256xf32>
    %65 = vector.shape_cast %64 : vector<256xf32> to vector<1x256xf32>
    %cst_20 = arith.constant 8.000000e+00 : f32
    %66 = vector.broadcast %cst_20 : f32 to vector<1x256xf32>
    %67 = arith.divf %65, %66 : vector<1x256xf32>
    %68 = arith.mulf %62, %62 : vector<1x256xf32>
    %69 = arith.subf %67, %68 : vector<1x256xf32>
    %cst_21 = arith.constant 0.000000e+00 : f32
    %70 = vector.broadcast %cst_21 : f32 to vector<1x256xf32>
    %71 = arith.maximumf %69, %70 : vector<1x256xf32>
    %cst_22 = arith.constant 9.99999974E-6 : f32
    %72 = vector.broadcast %cst_22 : f32 to vector<1x256xf32>
    %73 = arith.addf %71, %72 : vector<1x256xf32>
    %74 = math.rsqrt %73 : vector<1x256xf32>
    %75 = vector.broadcast %74 : vector<1x256xf32> to vector<8x256xf32>
    %76 = arith.mulf %58, %75 : vector<8x256xf32>
    %cst_23 = arith.constant 0.000000e+00 : f32
    %77 = vector.broadcast %cst_23 : f32 to vector<1x256xf32>
    %78 = arith.subf %77, %62 : vector<1x256xf32>
    %79 = arith.mulf %78, %74 : vector<1x256xf32>
    %80 = vector.broadcast %79 : vector<1x256xf32> to vector<8x256xf32>
    %81 = arith.addf %76, %80 : vector<8x256xf32>
    %cst_24 = arith.constant 0.000000e+00 : f32
    %82 = vector.broadcast %cst_24 : f32 to vector<8x256xf32>
    %83 = arith.cmpf oge, %81, %82 : vector<8x256xf32>
    %cst_25 = arith.constant 0.00999999977 : f32
    %84 = vector.broadcast %cst_25 : f32 to vector<8x256xf32>
    %85 = arith.mulf %84, %81 : vector<8x256xf32>
    %86 = arith.select %83, %81, %85 : vector<8x256xi1>, vector<8x256xf32>
    %c2_i32_26 = arith.constant 2 : i32
    %87 = tpu.memref_slice %arg22[%c2_i32_26] : memref<10x!tpu.dma_semaphore, #tpu.memory_space<semaphore_mem>> -> memref<1x!tpu.dma_semaphore, #tpu.memory_space<semaphore_mem>>
    %88 = tpu.memref_squeeze %87 : memref<1x!tpu.dma_semaphore, #tpu.memory_space<semaphore_mem>> -> memref<!tpu.dma_semaphore, #tpu.memory_space<semaphore_mem>>
    tpu.wait_dma2 semaphore(%88 : memref<!tpu.dma_semaphore, #tpu.memory_space<semaphore_mem>>) src(%arg3 : memref<256x128xbf16, #tpu.memory_space<any>>) dst(%arg14 : memref<256x128xbf16, #tpu.memory_space<vmem>>)
    %89 = arith.truncf %86 : vector<8x256xf32> to vector<8x256xbf16>
    %c0_27 = arith.constant 0 : index
    %c0_28 = arith.constant 0 : index
    %90 = vector.load %arg14[%c0_27, %c0_28] : memref<256x128xbf16, #tpu.memory_space<vmem>>, vector<256x128xbf16>
    %cst_29 = arith.constant dense<0.000000e+00> : vector<8x128xf32>
    %91 = tpu.matmul %89, %90, %cst_29 {dimension_numbers = #tpu.dot_dimension_numbers<[1], [0], [0], [1], [0, 0, 1, 1], [], []>} : vector<8x256xbf16>, vector<256x128xbf16>, vector<8x128xf32> -> vector<8x128xf32>
    %cst_30 = arith.constant dense<0.000000e+00> : vector<128xf32>
    %92 = vector.multi_reduction <add>, %91, %cst_30 [0] : vector<8x128xf32> to vector<128xf32>
    %93 = vector.shape_cast %92 : vector<128xf32> to vector<1x128xf32>
    %cst_31 = arith.constant 8.000000e+00 : f32
    %94 = vector.broadcast %cst_31 : f32 to vector<1x128xf32>
    %95 = arith.divf %93, %94 : vector<1x128xf32>
    %96 = arith.mulf %91, %91 : vector<8x128xf32>
    %cst_32 = arith.constant dense<0.000000e+00> : vector<128xf32>
    %97 = vector.multi_reduction <add>, %96, %cst_32 [0] : vector<8x128xf32> to vector<128xf32>
    %98 = vector.shape_cast %97 : vector<128xf32> to vector<1x128xf32>
    %cst_33 = arith.constant 8.000000e+00 : f32
    %99 = vector.broadcast %cst_33 : f32 to vector<1x128xf32>
    %100 = arith.divf %98, %99 : vector<1x128xf32>
    %101 = arith.mulf %95, %95 : vector<1x128xf32>
    %102 = arith.subf %100, %101 : vector<1x128xf32>
    %cst_34 = arith.constant 0.000000e+00 : f32
    %103 = vector.broadcast %cst_34 : f32 to vector<1x128xf32>
    %104 = arith.maximumf %102, %103 : vector<1x128xf32>
    %cst_35 = arith.constant 9.99999974E-6 : f32
    %105 = vector.broadcast %cst_35 : f32 to vector<1x128xf32>
    %106 = arith.addf %104, %105 : vector<1x128xf32>
    %107 = math.rsqrt %106 : vector<1x128xf32>
    %108 = vector.broadcast %107 : vector<1x128xf32> to vector<8x128xf32>
    %109 = arith.mulf %91, %108 : vector<8x128xf32>
    %cst_36 = arith.constant 0.000000e+00 : f32
    %110 = vector.broadcast %cst_36 : f32 to vector<1x128xf32>
    %111 = arith.subf %110, %95 : vector<1x128xf32>
    %112 = arith.mulf %111, %107 : vector<1x128xf32>
    %113 = vector.broadcast %112 : vector<1x128xf32> to vector<8x128xf32>
    %114 = arith.addf %109, %113 : vector<8x128xf32>
    %cst_37 = arith.constant 0.000000e+00 : f32
    %115 = vector.broadcast %cst_37 : f32 to vector<8x128xf32>
    %116 = arith.cmpf oge, %114, %115 : vector<8x128xf32>
    %cst_38 = arith.constant 0.00999999977 : f32
    %117 = vector.broadcast %cst_38 : f32 to vector<8x128xf32>
    %118 = arith.mulf %117, %114 : vector<8x128xf32>
    %119 = arith.select %116, %114, %118 : vector<8x128xi1>, vector<8x128xf32>
    %c3_i32_39 = arith.constant 3 : i32
    %120 = tpu.memref_slice %arg22[%c3_i32_39] : memref<10x!tpu.dma_semaphore, #tpu.memory_space<semaphore_mem>> -> memref<1x!tpu.dma_semaphore, #tpu.memory_space<semaphore_mem>>
    %121 = tpu.memref_squeeze %120 : memref<1x!tpu.dma_semaphore, #tpu.memory_space<semaphore_mem>> -> memref<!tpu.dma_semaphore, #tpu.memory_space<semaphore_mem>>
    tpu.wait_dma2 semaphore(%121 : memref<!tpu.dma_semaphore, #tpu.memory_space<semaphore_mem>>) src(%arg4 : memref<128x64xbf16, #tpu.memory_space<any>>) dst(%arg15 : memref<128x64xbf16, #tpu.memory_space<vmem>>)
    %122 = arith.truncf %119 : vector<8x128xf32> to vector<8x128xbf16>
    %c0_40 = arith.constant 0 : index
    %c0_41 = arith.constant 0 : index
    %123 = vector.load %arg15[%c0_40, %c0_41] : memref<128x64xbf16, #tpu.memory_space<vmem>>, vector<128x64xbf16>
    %cst_42 = arith.constant dense<0.000000e+00> : vector<8x64xf32>
    %124 = tpu.matmul %122, %123, %cst_42 {dimension_numbers = #tpu.dot_dimension_numbers<[1], [0], [0], [1], [0, 0, 1, 1], [], []>} : vector<8x128xbf16>, vector<128x64xbf16>, vector<8x64xf32> -> vector<8x64xf32>
    %cst_43 = arith.constant dense<0.000000e+00> : vector<64xf32>
    %125 = vector.multi_reduction <add>, %124, %cst_43 [0] : vector<8x64xf32> to vector<64xf32>
    %126 = vector.shape_cast %125 : vector<64xf32> to vector<1x64xf32>
    %cst_44 = arith.constant 8.000000e+00 : f32
    %127 = vector.broadcast %cst_44 : f32 to vector<1x64xf32>
    %128 = arith.divf %126, %127 : vector<1x64xf32>
    %129 = arith.mulf %124, %124 : vector<8x64xf32>
    %cst_45 = arith.constant dense<0.000000e+00> : vector<64xf32>
    %130 = vector.multi_reduction <add>, %129, %cst_45 [0] : vector<8x64xf32> to vector<64xf32>
    %131 = vector.shape_cast %130 : vector<64xf32> to vector<1x64xf32>
    %cst_46 = arith.constant 8.000000e+00 : f32
    %132 = vector.broadcast %cst_46 : f32 to vector<1x64xf32>
    %133 = arith.divf %131, %132 : vector<1x64xf32>
    %134 = arith.mulf %128, %128 : vector<1x64xf32>
    %135 = arith.subf %133, %134 : vector<1x64xf32>
    %cst_47 = arith.constant 0.000000e+00 : f32
    %136 = vector.broadcast %cst_47 : f32 to vector<1x64xf32>
    %137 = arith.maximumf %135, %136 : vector<1x64xf32>
    %cst_48 = arith.constant 9.99999974E-6 : f32
    %138 = vector.broadcast %cst_48 : f32 to vector<1x64xf32>
    %139 = arith.addf %137, %138 : vector<1x64xf32>
    %140 = math.rsqrt %139 : vector<1x64xf32>
    %141 = vector.broadcast %140 : vector<1x64xf32> to vector<8x64xf32>
    %142 = arith.mulf %124, %141 : vector<8x64xf32>
    %cst_49 = arith.constant 0.000000e+00 : f32
    %143 = vector.broadcast %cst_49 : f32 to vector<1x64xf32>
    %144 = arith.subf %143, %128 : vector<1x64xf32>
    %145 = arith.mulf %144, %140 : vector<1x64xf32>
    %146 = vector.broadcast %145 : vector<1x64xf32> to vector<8x64xf32>
    %147 = arith.addf %142, %146 : vector<8x64xf32>
    %cst_50 = arith.constant 0.000000e+00 : f32
    %148 = vector.broadcast %cst_50 : f32 to vector<8x64xf32>
    %149 = arith.cmpf oge, %147, %148 : vector<8x64xf32>
    %cst_51 = arith.constant 0.00999999977 : f32
    %150 = vector.broadcast %cst_51 : f32 to vector<8x64xf32>
    %151 = arith.mulf %150, %147 : vector<8x64xf32>
    %152 = arith.select %149, %147, %151 : vector<8x64xi1>, vector<8x64xf32>
    %c4_i32_52 = arith.constant 4 : i32
    %153 = tpu.memref_slice %arg22[%c4_i32_52] : memref<10x!tpu.dma_semaphore, #tpu.memory_space<semaphore_mem>> -> memref<1x!tpu.dma_semaphore, #tpu.memory_space<semaphore_mem>>
    %154 = tpu.memref_squeeze %153 : memref<1x!tpu.dma_semaphore, #tpu.memory_space<semaphore_mem>> -> memref<!tpu.dma_semaphore, #tpu.memory_space<semaphore_mem>>
    tpu.wait_dma2 semaphore(%154 : memref<!tpu.dma_semaphore, #tpu.memory_space<semaphore_mem>>) src(%arg5 : memref<64x32xbf16, #tpu.memory_space<any>>) dst(%arg16 : memref<64x32xbf16, #tpu.memory_space<vmem>>)
    %155 = arith.truncf %152 : vector<8x64xf32> to vector<8x64xbf16>
    %c0_53 = arith.constant 0 : index
    %c0_54 = arith.constant 0 : index
    %156 = vector.load %arg16[%c0_53, %c0_54] : memref<64x32xbf16, #tpu.memory_space<vmem>>, vector<64x32xbf16>
    %cst_55 = arith.constant dense<0.000000e+00> : vector<8x32xf32>
    %157 = tpu.matmul %155, %156, %cst_55 {dimension_numbers = #tpu.dot_dimension_numbers<[1], [0], [0], [1], [0, 0, 1, 1], [], []>} : vector<8x64xbf16>, vector<64x32xbf16>, vector<8x32xf32> -> vector<8x32xf32>
    %cst_56 = arith.constant dense<0.000000e+00> : vector<32xf32>
    %158 = vector.multi_reduction <add>, %157, %cst_56 [0] : vector<8x32xf32> to vector<32xf32>
    %159 = vector.shape_cast %158 : vector<32xf32> to vector<1x32xf32>
    %cst_57 = arith.constant 8.000000e+00 : f32
    %160 = vector.broadcast %cst_57 : f32 to vector<1x32xf32>
    %161 = arith.divf %159, %160 : vector<1x32xf32>
    %162 = arith.mulf %157, %157 : vector<8x32xf32>
    %cst_58 = arith.constant dense<0.000000e+00> : vector<32xf32>
    %163 = vector.multi_reduction <add>, %162, %cst_58 [0] : vector<8x32xf32> to vector<32xf32>
    %164 = vector.shape_cast %163 : vector<32xf32> to vector<1x32xf32>
    %cst_59 = arith.constant 8.000000e+00 : f32
    %165 = vector.broadcast %cst_59 : f32 to vector<1x32xf32>
    %166 = arith.divf %164, %165 : vector<1x32xf32>
    %167 = arith.mulf %161, %161 : vector<1x32xf32>
    %168 = arith.subf %166, %167 : vector<1x32xf32>
    %cst_60 = arith.constant 0.000000e+00 : f32
    %169 = vector.broadcast %cst_60 : f32 to vector<1x32xf32>
    %170 = arith.maximumf %168, %169 : vector<1x32xf32>
    %cst_61 = arith.constant 9.99999974E-6 : f32
    %171 = vector.broadcast %cst_61 : f32 to vector<1x32xf32>
    %172 = arith.addf %170, %171 : vector<1x32xf32>
    %173 = math.rsqrt %172 : vector<1x32xf32>
    %174 = vector.broadcast %173 : vector<1x32xf32> to vector<8x32xf32>
    %175 = arith.mulf %157, %174 : vector<8x32xf32>
    %cst_62 = arith.constant 0.000000e+00 : f32
    %176 = vector.broadcast %cst_62 : f32 to vector<1x32xf32>
    %177 = arith.subf %176, %161 : vector<1x32xf32>
    %178 = arith.mulf %177, %173 : vector<1x32xf32>
    %179 = vector.broadcast %178 : vector<1x32xf32> to vector<8x32xf32>
    %180 = arith.addf %175, %179 : vector<8x32xf32>
    %cst_63 = arith.constant 0.000000e+00 : f32
    %181 = vector.broadcast %cst_63 : f32 to vector<8x32xf32>
    %182 = arith.cmpf oge, %180, %181 : vector<8x32xf32>
    %cst_64 = arith.constant 0.00999999977 : f32
    %183 = vector.broadcast %cst_64 : f32 to vector<8x32xf32>
    %184 = arith.mulf %183, %180 : vector<8x32xf32>
    %185 = arith.select %182, %180, %184 : vector<8x32xi1>, vector<8x32xf32>
    %c5_i32_65 = arith.constant 5 : i32
    %186 = tpu.memref_slice %arg22[%c5_i32_65] : memref<10x!tpu.dma_semaphore, #tpu.memory_space<semaphore_mem>> -> memref<1x!tpu.dma_semaphore, #tpu.memory_space<semaphore_mem>>
    %187 = tpu.memref_squeeze %186 : memref<1x!tpu.dma_semaphore, #tpu.memory_space<semaphore_mem>> -> memref<!tpu.dma_semaphore, #tpu.memory_space<semaphore_mem>>
    tpu.wait_dma2 semaphore(%187 : memref<!tpu.dma_semaphore, #tpu.memory_space<semaphore_mem>>) src(%arg6 : memref<32x64xbf16, #tpu.memory_space<any>>) dst(%arg17 : memref<32x64xbf16, #tpu.memory_space<vmem>>)
    %188 = arith.truncf %185 : vector<8x32xf32> to vector<8x32xbf16>
    %c0_66 = arith.constant 0 : index
    %c0_67 = arith.constant 0 : index
    %189 = vector.load %arg17[%c0_66, %c0_67] : memref<32x64xbf16, #tpu.memory_space<vmem>>, vector<32x64xbf16>
    %cst_68 = arith.constant dense<0.000000e+00> : vector<8x64xf32>
    %190 = tpu.matmul %188, %189, %cst_68 {dimension_numbers = #tpu.dot_dimension_numbers<[1], [0], [0], [1], [0, 0, 1, 1], [], []>} : vector<8x32xbf16>, vector<32x64xbf16>, vector<8x64xf32> -> vector<8x64xf32>
    %cst_69 = arith.constant dense<0.000000e+00> : vector<64xf32>
    %191 = vector.multi_reduction <add>, %190, %cst_69 [0] : vector<8x64xf32> to vector<64xf32>
    %192 = vector.shape_cast %191 : vector<64xf32> to vector<1x64xf32>
    %cst_70 = arith.constant 8.000000e+00 : f32
    %193 = vector.broadcast %cst_70 : f32 to vector<1x64xf32>
    %194 = arith.divf %192, %193 : vector<1x64xf32>
    %195 = arith.mulf %190, %190 : vector<8x64xf32>
    %cst_71 = arith.constant dense<0.000000e+00> : vector<64xf32>
    %196 = vector.multi_reduction <add>, %195, %cst_71 [0] : vector<8x64xf32> to vector<64xf32>
    %197 = vector.shape_cast %196 : vector<64xf32> to vector<1x64xf32>
    %cst_72 = arith.constant 8.000000e+00 : f32
    %198 = vector.broadcast %cst_72 : f32 to vector<1x64xf32>
    %199 = arith.divf %197, %198 : vector<1x64xf32>
    %200 = arith.mulf %194, %194 : vector<1x64xf32>
    %201 = arith.subf %199, %200 : vector<1x64xf32>
    %cst_73 = arith.constant 0.000000e+00 : f32
    %202 = vector.broadcast %cst_73 : f32 to vector<1x64xf32>
    %203 = arith.maximumf %201, %202 : vector<1x64xf32>
    %cst_74 = arith.constant 9.99999974E-6 : f32
    %204 = vector.broadcast %cst_74 : f32 to vector<1x64xf32>
    %205 = arith.addf %203, %204 : vector<1x64xf32>
    %206 = math.rsqrt %205 : vector<1x64xf32>
    %207 = vector.broadcast %206 : vector<1x64xf32> to vector<8x64xf32>
    %208 = arith.mulf %190, %207 : vector<8x64xf32>
    %cst_75 = arith.constant 0.000000e+00 : f32
    %209 = vector.broadcast %cst_75 : f32 to vector<1x64xf32>
    %210 = arith.subf %209, %194 : vector<1x64xf32>
    %211 = arith.mulf %210, %206 : vector<1x64xf32>
    %212 = vector.broadcast %211 : vector<1x64xf32> to vector<8x64xf32>
    %213 = arith.addf %208, %212 : vector<8x64xf32>
    %cst_76 = arith.constant 0.000000e+00 : f32
    %214 = vector.broadcast %cst_76 : f32 to vector<8x64xf32>
    %215 = arith.cmpf oge, %213, %214 : vector<8x64xf32>
    %cst_77 = arith.constant 0.00999999977 : f32
    %216 = vector.broadcast %cst_77 : f32 to vector<8x64xf32>
    %217 = arith.mulf %216, %213 : vector<8x64xf32>
    %218 = arith.select %215, %213, %217 : vector<8x64xi1>, vector<8x64xf32>
    %c6_i32_78 = arith.constant 6 : i32
    %219 = tpu.memref_slice %arg22[%c6_i32_78] : memref<10x!tpu.dma_semaphore, #tpu.memory_space<semaphore_mem>> -> memref<1x!tpu.dma_semaphore, #tpu.memory_space<semaphore_mem>>
    %220 = tpu.memref_squeeze %219 : memref<1x!tpu.dma_semaphore, #tpu.memory_space<semaphore_mem>> -> memref<!tpu.dma_semaphore, #tpu.memory_space<semaphore_mem>>
    tpu.wait_dma2 semaphore(%220 : memref<!tpu.dma_semaphore, #tpu.memory_space<semaphore_mem>>) src(%arg7 : memref<64x128xbf16, #tpu.memory_space<any>>) dst(%arg18 : memref<64x128xbf16, #tpu.memory_space<vmem>>)
    %221 = arith.truncf %218 : vector<8x64xf32> to vector<8x64xbf16>
    %c0_79 = arith.constant 0 : index
    %c0_80 = arith.constant 0 : index
    %222 = vector.load %arg18[%c0_79, %c0_80] : memref<64x128xbf16, #tpu.memory_space<vmem>>, vector<64x128xbf16>
    %cst_81 = arith.constant dense<0.000000e+00> : vector<8x128xf32>
    %223 = tpu.matmul %221, %222, %cst_81 {dimension_numbers = #tpu.dot_dimension_numbers<[1], [0], [0], [1], [0, 0, 1, 1], [], []>} : vector<8x64xbf16>, vector<64x128xbf16>, vector<8x128xf32> -> vector<8x128xf32>
    %cst_82 = arith.constant dense<0.000000e+00> : vector<128xf32>
    %224 = vector.multi_reduction <add>, %223, %cst_82 [0] : vector<8x128xf32> to vector<128xf32>
    %225 = vector.shape_cast %224 : vector<128xf32> to vector<1x128xf32>
    %cst_83 = arith.constant 8.000000e+00 : f32
    %226 = vector.broadcast %cst_83 : f32 to vector<1x128xf32>
    %227 = arith.divf %225, %226 : vector<1x128xf32>
    %228 = arith.mulf %223, %223 : vector<8x128xf32>
    %cst_84 = arith.constant dense<0.000000e+00> : vector<128xf32>
    %229 = vector.multi_reduction <add>, %228, %cst_84 [0] : vector<8x128xf32> to vector<128xf32>
    %230 = vector.shape_cast %229 : vector<128xf32> to vector<1x128xf32>
    %cst_85 = arith.constant 8.000000e+00 : f32
    %231 = vector.broadcast %cst_85 : f32 to vector<1x128xf32>
    %232 = arith.divf %230, %231 : vector<1x128xf32>
    %233 = arith.mulf %227, %227 : vector<1x128xf32>
    %234 = arith.subf %232, %233 : vector<1x128xf32>
    %cst_86 = arith.constant 0.000000e+00 : f32
    %235 = vector.broadcast %cst_86 : f32 to vector<1x128xf32>
    %236 = arith.maximumf %234, %235 : vector<1x128xf32>
    %cst_87 = arith.constant 9.99999974E-6 : f32
    %237 = vector.broadcast %cst_87 : f32 to vector<1x128xf32>
    %238 = arith.addf %236, %237 : vector<1x128xf32>
    %239 = math.rsqrt %238 : vector<1x128xf32>
    %240 = vector.broadcast %239 : vector<1x128xf32> to vector<8x128xf32>
    %241 = arith.mulf %223, %240 : vector<8x128xf32>
    %cst_88 = arith.constant 0.000000e+00 : f32
    %242 = vector.broadcast %cst_88 : f32 to vector<1x128xf32>
    %243 = arith.subf %242, %227 : vector<1x128xf32>
    %244 = arith.mulf %243, %239 : vector<1x128xf32>
    %245 = vector.broadcast %244 : vector<1x128xf32> to vector<8x128xf32>
    %246 = arith.addf %241, %245 : vector<8x128xf32>
    %cst_89 = arith.constant 0.000000e+00 : f32
    %247 = vector.broadcast %cst_89 : f32 to vector<8x128xf32>
    %248 = arith.cmpf oge, %246, %247 : vector<8x128xf32>
    %cst_90 = arith.constant 0.00999999977 : f32
    %249 = vector.broadcast %cst_90 : f32 to vector<8x128xf32>
    %250 = arith.mulf %249, %246 : vector<8x128xf32>
    %251 = arith.select %248, %246, %250 : vector<8x128xi1>, vector<8x128xf32>
    %c7_i32_91 = arith.constant 7 : i32
    %252 = tpu.memref_slice %arg22[%c7_i32_91] : memref<10x!tpu.dma_semaphore, #tpu.memory_space<semaphore_mem>> -> memref<1x!tpu.dma_semaphore, #tpu.memory_space<semaphore_mem>>
    %253 = tpu.memref_squeeze %252 : memref<1x!tpu.dma_semaphore, #tpu.memory_space<semaphore_mem>> -> memref<!tpu.dma_semaphore, #tpu.memory_space<semaphore_mem>>
    tpu.wait_dma2 semaphore(%253 : memref<!tpu.dma_semaphore, #tpu.memory_space<semaphore_mem>>) src(%arg8 : memref<128x256xbf16, #tpu.memory_space<any>>) dst(%arg19 : memref<128x256xbf16, #tpu.memory_space<vmem>>)
    %254 = arith.truncf %251 : vector<8x128xf32> to vector<8x128xbf16>
    %c0_92 = arith.constant 0 : index
    %c0_93 = arith.constant 0 : index
    %255 = vector.load %arg19[%c0_92, %c0_93] : memref<128x256xbf16, #tpu.memory_space<vmem>>, vector<128x256xbf16>
    %cst_94 = arith.constant dense<0.000000e+00> : vector<8x256xf32>
    %256 = tpu.matmul %254, %255, %cst_94 {dimension_numbers = #tpu.dot_dimension_numbers<[1], [0], [0], [1], [0, 0, 1, 1], [], []>} : vector<8x128xbf16>, vector<128x256xbf16>, vector<8x256xf32> -> vector<8x256xf32>
    %cst_95 = arith.constant dense<0.000000e+00> : vector<256xf32>
    %257 = vector.multi_reduction <add>, %256, %cst_95 [0] : vector<8x256xf32> to vector<256xf32>
    %258 = vector.shape_cast %257 : vector<256xf32> to vector<1x256xf32>
    %cst_96 = arith.constant 8.000000e+00 : f32
    %259 = vector.broadcast %cst_96 : f32 to vector<1x256xf32>
    %260 = arith.divf %258, %259 : vector<1x256xf32>
    %261 = arith.mulf %256, %256 : vector<8x256xf32>
    %cst_97 = arith.constant dense<0.000000e+00> : vector<256xf32>
    %262 = vector.multi_reduction <add>, %261, %cst_97 [0] : vector<8x256xf32> to vector<256xf32>
    %263 = vector.shape_cast %262 : vector<256xf32> to vector<1x256xf32>
    %cst_98 = arith.constant 8.000000e+00 : f32
    %264 = vector.broadcast %cst_98 : f32 to vector<1x256xf32>
    %265 = arith.divf %263, %264 : vector<1x256xf32>
    %266 = arith.mulf %260, %260 : vector<1x256xf32>
    %267 = arith.subf %265, %266 : vector<1x256xf32>
    %cst_99 = arith.constant 0.000000e+00 : f32
    %268 = vector.broadcast %cst_99 : f32 to vector<1x256xf32>
    %269 = arith.maximumf %267, %268 : vector<1x256xf32>
    %cst_100 = arith.constant 9.99999974E-6 : f32
    %270 = vector.broadcast %cst_100 : f32 to vector<1x256xf32>
    %271 = arith.addf %269, %270 : vector<1x256xf32>
    %272 = math.rsqrt %271 : vector<1x256xf32>
    %273 = vector.broadcast %272 : vector<1x256xf32> to vector<8x256xf32>
    %274 = arith.mulf %256, %273 : vector<8x256xf32>
    %cst_101 = arith.constant 0.000000e+00 : f32
    %275 = vector.broadcast %cst_101 : f32 to vector<1x256xf32>
    %276 = arith.subf %275, %260 : vector<1x256xf32>
    %277 = arith.mulf %276, %272 : vector<1x256xf32>
    %278 = vector.broadcast %277 : vector<1x256xf32> to vector<8x256xf32>
    %279 = arith.addf %274, %278 : vector<8x256xf32>
    %cst_102 = arith.constant 0.000000e+00 : f32
    %280 = vector.broadcast %cst_102 : f32 to vector<8x256xf32>
    %281 = arith.cmpf oge, %279, %280 : vector<8x256xf32>
    %cst_103 = arith.constant 0.00999999977 : f32
    %282 = vector.broadcast %cst_103 : f32 to vector<8x256xf32>
    %283 = arith.mulf %282, %279 : vector<8x256xf32>
    %284 = arith.select %281, %279, %283 : vector<8x256xi1>, vector<8x256xf32>
    %c8_i32_104 = arith.constant 8 : i32
    %285 = tpu.memref_slice %arg22[%c8_i32_104] : memref<10x!tpu.dma_semaphore, #tpu.memory_space<semaphore_mem>> -> memref<1x!tpu.dma_semaphore, #tpu.memory_space<semaphore_mem>>
    %286 = tpu.memref_squeeze %285 : memref<1x!tpu.dma_semaphore, #tpu.memory_space<semaphore_mem>> -> memref<!tpu.dma_semaphore, #tpu.memory_space<semaphore_mem>>
    tpu.wait_dma2 semaphore(%286 : memref<!tpu.dma_semaphore, #tpu.memory_space<semaphore_mem>>) src(%arg9 : memref<256x512xbf16, #tpu.memory_space<any>>) dst(%arg20 : memref<256x512xbf16, #tpu.memory_space<vmem>>)
    %287 = arith.truncf %284 : vector<8x256xf32> to vector<8x256xbf16>
    %c0_105 = arith.constant 0 : index
    %c0_106 = arith.constant 0 : index
    %288 = vector.load %arg20[%c0_105, %c0_106] : memref<256x512xbf16, #tpu.memory_space<vmem>>, vector<256x512xbf16>
    %cst_107 = arith.constant dense<0.000000e+00> : vector<8x512xf32>
    %289 = tpu.matmul %287, %288, %cst_107 {dimension_numbers = #tpu.dot_dimension_numbers<[1], [0], [0], [1], [0, 0, 1, 1], [], []>} : vector<8x256xbf16>, vector<256x512xbf16>, vector<8x512xf32> -> vector<8x512xf32>
    %cst_108 = arith.constant dense<0.000000e+00> : vector<512xf32>
    %290 = vector.multi_reduction <add>, %289, %cst_108 [0] : vector<8x512xf32> to vector<512xf32>
    %291 = vector.shape_cast %290 : vector<512xf32> to vector<1x512xf32>
    %cst_109 = arith.constant 8.000000e+00 : f32
    %292 = vector.broadcast %cst_109 : f32 to vector<1x512xf32>
    %293 = arith.divf %291, %292 : vector<1x512xf32>
    %294 = arith.mulf %289, %289 : vector<8x512xf32>
    %cst_110 = arith.constant dense<0.000000e+00> : vector<512xf32>
    %295 = vector.multi_reduction <add>, %294, %cst_110 [0] : vector<8x512xf32> to vector<512xf32>
    %296 = vector.shape_cast %295 : vector<512xf32> to vector<1x512xf32>
    %cst_111 = arith.constant 8.000000e+00 : f32
    %297 = vector.broadcast %cst_111 : f32 to vector<1x512xf32>
    %298 = arith.divf %296, %297 : vector<1x512xf32>
    %299 = arith.mulf %293, %293 : vector<1x512xf32>
    %300 = arith.subf %298, %299 : vector<1x512xf32>
    %cst_112 = arith.constant 0.000000e+00 : f32
    %301 = vector.broadcast %cst_112 : f32 to vector<1x512xf32>
    %302 = arith.maximumf %300, %301 : vector<1x512xf32>
    %cst_113 = arith.constant 9.99999974E-6 : f32
    %303 = vector.broadcast %cst_113 : f32 to vector<1x512xf32>
    %304 = arith.addf %302, %303 : vector<1x512xf32>
    %305 = math.rsqrt %304 : vector<1x512xf32>
    %306 = vector.broadcast %305 : vector<1x512xf32> to vector<8x512xf32>
    %307 = arith.mulf %289, %306 : vector<8x512xf32>
    %cst_114 = arith.constant 0.000000e+00 : f32
    %308 = vector.broadcast %cst_114 : f32 to vector<1x512xf32>
    %309 = arith.subf %308, %293 : vector<1x512xf32>
    %310 = arith.mulf %309, %305 : vector<1x512xf32>
    %311 = vector.broadcast %310 : vector<1x512xf32> to vector<8x512xf32>
    %312 = arith.addf %307, %311 : vector<8x512xf32>
    %cst_115 = arith.constant 0.000000e+00 : f32
    %313 = vector.broadcast %cst_115 : f32 to vector<8x512xf32>
    %314 = arith.cmpf oge, %312, %313 : vector<8x512xf32>
    %cst_116 = arith.constant 0.00999999977 : f32
    %315 = vector.broadcast %cst_116 : f32 to vector<8x512xf32>
    %316 = arith.mulf %315, %312 : vector<8x512xf32>
    %317 = arith.select %314, %312, %316 : vector<8x512xi1>, vector<8x512xf32>
    %c9_i32_117 = arith.constant 9 : i32
    %318 = tpu.memref_slice %arg22[%c9_i32_117] : memref<10x!tpu.dma_semaphore, #tpu.memory_space<semaphore_mem>> -> memref<1x!tpu.dma_semaphore, #tpu.memory_space<semaphore_mem>>
    %319 = tpu.memref_squeeze %318 : memref<1x!tpu.dma_semaphore, #tpu.memory_space<semaphore_mem>> -> memref<!tpu.dma_semaphore, #tpu.memory_space<semaphore_mem>>
    tpu.wait_dma2 semaphore(%319 : memref<!tpu.dma_semaphore, #tpu.memory_space<semaphore_mem>>) src(%arg10 : memref<512x784xbf16, #tpu.memory_space<any>>) dst(%arg21 : memref<512x784xbf16, #tpu.memory_space<vmem>>)
    %320 = arith.truncf %317 : vector<8x512xf32> to vector<8x512xbf16>
    %c0_118 = arith.constant 0 : index
    %c0_119 = arith.constant 0 : index
    %321 = vector.load %arg21[%c0_118, %c0_119] : memref<512x784xbf16, #tpu.memory_space<vmem>>, vector<512x784xbf16>
    %cst_120 = arith.constant dense<0.000000e+00> : vector<8x784xf32>
    %322 = tpu.matmul %320, %321, %cst_120 {dimension_numbers = #tpu.dot_dimension_numbers<[1], [0], [0], [1], [0, 0, 1, 1], [], []>} : vector<8x512xbf16>, vector<512x784xbf16>, vector<8x784xf32> -> vector<8x784xf32>
    %cst_121 = arith.constant dense<0.000000e+00> : vector<784xf32>
    %323 = vector.multi_reduction <add>, %322, %cst_121 [0] : vector<8x784xf32> to vector<784xf32>
    %324 = vector.shape_cast %323 : vector<784xf32> to vector<1x784xf32>
    %cst_122 = arith.constant 8.000000e+00 : f32
    %325 = vector.broadcast %cst_122 : f32 to vector<1x784xf32>
    %326 = arith.divf %324, %325 : vector<1x784xf32>
    %327 = arith.mulf %322, %322 : vector<8x784xf32>
    %cst_123 = arith.constant dense<0.000000e+00> : vector<784xf32>
    %328 = vector.multi_reduction <add>, %327, %cst_123 [0] : vector<8x784xf32> to vector<784xf32>
    %329 = vector.shape_cast %328 : vector<784xf32> to vector<1x784xf32>
    %cst_124 = arith.constant 8.000000e+00 : f32
    %330 = vector.broadcast %cst_124 : f32 to vector<1x784xf32>
    %331 = arith.divf %329, %330 : vector<1x784xf32>
    %332 = arith.mulf %326, %326 : vector<1x784xf32>
    %333 = arith.subf %331, %332 : vector<1x784xf32>
    %cst_125 = arith.constant 0.000000e+00 : f32
    %334 = vector.broadcast %cst_125 : f32 to vector<1x784xf32>
    %335 = arith.maximumf %333, %334 : vector<1x784xf32>
    %cst_126 = arith.constant 9.99999974E-6 : f32
    %336 = vector.broadcast %cst_126 : f32 to vector<1x784xf32>
    %337 = arith.addf %335, %336 : vector<1x784xf32>
    %338 = math.rsqrt %337 : vector<1x784xf32>
    %339 = vector.broadcast %338 : vector<1x784xf32> to vector<8x784xf32>
    %340 = arith.mulf %322, %339 : vector<8x784xf32>
    %cst_127 = arith.constant 0.000000e+00 : f32
    %341 = vector.broadcast %cst_127 : f32 to vector<1x784xf32>
    %342 = arith.subf %341, %326 : vector<1x784xf32>
    %343 = arith.mulf %342, %338 : vector<1x784xf32>
    %344 = vector.broadcast %343 : vector<1x784xf32> to vector<8x784xf32>
    %345 = arith.addf %340, %344 : vector<8x784xf32>
    %cst_128 = arith.constant 0.000000e+00 : f32
    %346 = vector.broadcast %cst_128 : f32 to vector<8x784xf32>
    %347 = arith.cmpf oge, %345, %346 : vector<8x784xf32>
    %cst_129 = arith.constant 0.00999999977 : f32
    %348 = vector.broadcast %cst_129 : f32 to vector<8x784xf32>
    %349 = arith.mulf %348, %345 : vector<8x784xf32>
    %350 = arith.select %347, %345, %349 : vector<8x784xi1>, vector<8x784xf32>
    %c0_130 = arith.constant 0 : index
    %c0_131 = arith.constant 0 : index
    %351 = vector.load %arg11[%c0_130, %c0_131] : memref<8x784xf32, #tpu.memory_space<vmem>>, vector<8x784xf32>
    tpu.vector_store %arg11[%c0_130, %c0_131], %350 {strides = array<i32>} : memref<8x784xf32, #tpu.memory_space<vmem>>, vector<8x784xf32>,
    return
  }
}

</mosaic_0001>

<bundles_post_ra>
// kernel: tpu_custom_call.1
= control target key start
LH: loop header
LB: loop body
LE: loop exit
PB: predicated region body
PF: predicated region fallthrough
CT: control target
= control target key end

     0   :  { %16 = vsyncpa [#allocation14], 0  ;;  %s11425_s0 = inlined_call_operand.vmem [shape: f32[8,784], index: 0, kind: input, shape index: {}]   ;;  %s11426_s1 = inlined_call_operand.vmem [shape: bf16[784,512], index: 1, kind: input, shape index: {}]   ;;  %s11427_s2 = inlined_call_operand.vmem [shape: bf16[512,256], index: 2, kind: input, shape index: {}]   ;;  %s11428_s3 = inlined_call_operand.vmem [shape: bf16[256,128], index: 3, kind: input, shape index: {}]   ;;  %s11429_s4 = inlined_call_operand.vmem [shape: bf16[128,64], index: 4, kind: input, shape index: {}]   ;;  %s11430_s5 = inlined_call_operand.vmem [shape: bf16[64,32], index: 5, kind: input, shape index: {}]   ;;  %s11431_s6 = inlined_call_operand.vmem [shape: bf16[32,64], index: 6, kind: input, shape index: {}]   ;;  %s11432_s7 = inlined_call_operand.vmem [shape: bf16[64,128], index: 7, kind: input, shape index: {}]   ;;  %s11433_s8 = inlined_call_operand.vmem [shape: bf16[128,256], index: 8, kind: input, shape index: {}]   ;;  %s11434_s9 = inlined_call_operand.vmem [shape: bf16[256,512], index: 9, kind: input, shape index: {}]   ;;  %s11435_s10 = inlined_call_operand.vmem [shape: bf16[512,784], index: 10, kind: input, shape index: {}]   ;;  %s11436_s11 = inlined_call_operand.hbm [shape: f32[8,784], index: 11, kind: output, shape index: {}]  }
   0x1   :  { %v37_v0 = vld [vmem:[%s11426_s1] sm:$0xf]  ;;  %v39_v1 = vld [vmem:[%s11426_s1 + $0x10] sm:$0xf]  ;;  %v41_v2 = vld [vmem:[%s11426_s1 + $0x4] sm:$0xf] }
   0x2   :  { %38 = vst [vmem:[#allocation2] sm:$0xf] %v37_v0  ;;  %40 = vst [vmem:[#allocation2 + $0x4] sm:$0xf] %v39_v1  ;;  %v43_v3 = vld [vmem:[%s11426_s1 + $0x14] sm:$0xf] }
   0x3   :  { %v45_v4 = vld [vmem:[%s11426_s1 + $0x8] sm:$0xf]  ;;  %42 = vst [vmem:[#allocation2 + $0x8] sm:$0xf] %v41_v2  ;;  %44 = vst [vmem:[#allocation2 + $0xc] sm:$0xf] %v43_v3 }
   0x4   :  { %46 = vst [vmem:[#allocation2 + $0x10] sm:$0xf] %v45_v4  ;;  %v47_v5 = vld [vmem:[%s11426_s1 + $0x18] sm:$0xf]  ;;  %v49_v6 = vld [vmem:[%s11426_s1 + $0xc] sm:$0xf] }
   0x5   :  { %v51_v7 = vld [vmem:[%s11426_s1 + $0x1c] sm:$0xff]   ;;  %48 = vst [vmem:[#allocation2 + $0x14] sm:$0xf] %v47_v5  ;;  %50 = vst [vmem:[#allocation2 + $0x18] sm:$0xf] %v49_v6 }
   0x6   :  { %52 = vst [vmem:[#allocation2 + $0x1c] sm:$0xff] %v51_v7   ;;  %v55_v8 = vld [vmem:[%s11426_s1 + $0x30] sm:$0xf]  ;;  %v57_v9 = vld [vmem:[%s11426_s1 + $0x24] sm:$0xf]  ;;  %v67_v14 = vld [vmem:[%s11426_s1 + $0x3c] sm:$0xff]  }
   0x7   :  { %v59_v10 = vld [vmem:[%s11426_s1 + $0x34] sm:$0xf]  ;;  %56 = vst [vmem:[#allocation2 + $0x24] sm:$0xf] %v55_v8  ;;  %58 = vst [vmem:[#allocation2 + $0x28] sm:$0xf] %v57_v9 }
   0x8   :  { %60 = vst [vmem:[#allocation2 + $0x2c] sm:$0xf] %v59_v10  ;;  %v61_v11 = vld [vmem:[%s11426_s1 + $0x28] sm:$0xf]  ;;  %v63_v12 = vld [vmem:[%s11426_s1 + $0x38] sm:$0xf] }
   0x9   :  { %v65_v13 = vld [vmem:[%s11426_s1 + $0x2c] sm:$0xf]  ;;  %62 = vst [vmem:[#allocation2 + $0x30] sm:$0xf] %v61_v11  ;;  %64 = vst [vmem:[#allocation2 + $0x34] sm:$0xf] %v63_v12 }
   0xa   :  { %66 = vst [vmem:[#allocation2 + $0x38] sm:$0xf] %v65_v13  ;;  %v71_v15 = vld [vmem:[%s11426_s1 + $0x50] sm:$0xf]  ;;  %v73_v16 = vld [vmem:[%s11426_s1 + $0x44] sm:$0xf] }
   0xb   :  { %68 = vst [vmem:[#allocation2 + $0x3c] sm:$0xff] %v67_v14   ;;  %72 = vst [vmem:[#allocation2 + $0x44] sm:$0xf] %v71_v15  ;;  %v75_v17 = vld [vmem:[%s11426_s1 + $0x54] sm:$0xf]  ;;  %v83_v21 = vld [vmem:[%s11426_s1 + $0x5c] sm:$0xff]  }
   0xc   :  { %74 = vst [vmem:[#allocation2 + $0x48] sm:$0xf] %v73_v16  ;;  %v77_v18 = vld [vmem:[%s11426_s1 + $0x48] sm:$0xf]  ;;  %v79_v19 = vld [vmem:[%s11426_s1 + $0x58] sm:$0xf] }
   0xd   :  { %76 = vst [vmem:[#allocation2 + $0x4c] sm:$0xf] %v75_v17  ;;  %78 = vst [vmem:[#allocation2 + $0x50] sm:$0xf] %v77_v18  ;;  %v81_v20 = vld [vmem:[%s11426_s1 + $0x4c] sm:$0xf] }
   0xe   :  { %80 = vst [vmem:[#allocation2 + $0x54] sm:$0xf] %v79_v19  ;;  %v87_v22 = vld [vmem:[%s11426_s1 + $0x70] sm:$0xf]  ;;  %82 = vst [vmem:[#allocation2 + $0x58] sm:$0xf] %v81_v20 }
   0xf   :  { %84 = vst [vmem:[#allocation2 + $0x5c] sm:$0xff] %v83_v21   ;;  %88 = vst [vmem:[#allocation2 + $0x64] sm:$0xf] %v87_v22  ;;  %v89_v23 = vld [vmem:[%s11426_s1 + $0x64] sm:$0xf]  ;;  %v99_v28 = vld [vmem:[%s11426_s1 + $0x7c] sm:$0xff]  }
  0x10   :  { %v91_v24 = vld [vmem:[%s11426_s1 + $0x74] sm:$0xf]  ;;  %v93_v25 = vld [vmem:[%s11426_s1 + $0x68] sm:$0xf]  ;;  %90 = vst [vmem:[#allocation2 + $0x68] sm:$0xf] %v89_v23 }
  0x11   :  { %92 = vst [vmem:[#allocation2 + $0x6c] sm:$0xf] %v91_v24  ;;  %94 = vst [vmem:[#allocation2 + $0x70] sm:$0xf] %v93_v25  ;;  %v95_v26 = vld [vmem:[%s11426_s1 + $0x78] sm:$0xf] }
  0x12   :  { %v97_v27 = vld [vmem:[%s11426_s1 + $0x6c] sm:$0xf]  ;;  %96 = vst [vmem:[#allocation2 + $0x74] sm:$0xf] %v95_v26  ;;  %100 = vst [vmem:[#allocation2 + $0x7c] sm:$0xff] %v99_v28   ;;  %v115_v35 = vld [vmem:[%s11426_s1 + $0x9c] sm:$0xff]  }
  0x13   :  { %98 = vst [vmem:[#allocation2 + $0x78] sm:$0xf] %v97_v27  ;;  %v103_v29 = vld [vmem:[%s11426_s1 + $0x90] sm:$0xf]  ;;  %v105_v30 = vld [vmem:[%s11426_s1 + $0x84] sm:$0xf] }
  0x14   :  { %v107_v31 = vld [vmem:[%s11426_s1 + $0x94] sm:$0xf]  ;;  %104 = vst [vmem:[#allocation2 + $0x84] sm:$0xf] %v103_v29  ;;  %106 = vst [vmem:[#allocation2 + $0x88] sm:$0xf] %v105_v30 }
  0x15   :  { %108 = vst [vmem:[#allocation2 + $0x8c] sm:$0xf] %v107_v31  ;;  %v109_v32 = vld [vmem:[%s11426_s1 + $0x88] sm:$0xf]  ;;  %v111_v33 = vld [vmem:[%s11426_s1 + $0x98] sm:$0xf] }
  0x16   :  { %v113_v34 = vld [vmem:[%s11426_s1 + $0x8c] sm:$0xf]  ;;  %110 = vst [vmem:[#allocation2 + $0x90] sm:$0xf] %v109_v32  ;;  %112 = vst [vmem:[#allocation2 + $0x94] sm:$0xf] %v111_v33 }
  0x17   :  { %114 = vst [vmem:[#allocation2 + $0x98] sm:$0xf] %v113_v34  ;;  %v119_v36 = vld [vmem:[%s11426_s1 + $0xb0] sm:$0xf]  ;;  %v121_v37 = vld [vmem:[%s11426_s1 + $0xa4] sm:$0xf] }
  0x18   :  { %116 = vst [vmem:[#allocation2 + $0x9c] sm:$0xff] %v115_v35   ;;  %120 = vst [vmem:[#allocation2 + $0xa4] sm:$0xf] %v119_v36  ;;  %v123_v38 = vld [vmem:[%s11426_s1 + $0xb4] sm:$0xf]  ;;  %v131_v42 = vld [vmem:[%s11426_s1 + $0xbc] sm:$0xff]  }
  0x19   :  { %122 = vst [vmem:[#allocation2 + $0xa8] sm:$0xf] %v121_v37  ;;  %v125_v39 = vld [vmem:[%s11426_s1 + $0xa8] sm:$0xf]  ;;  %v127_v40 = vld [vmem:[%s11426_s1 + $0xb8] sm:$0xf] }
  0x1a   :  { %124 = vst [vmem:[#allocation2 + $0xac] sm:$0xf] %v123_v38  ;;  %126 = vst [vmem:[#allocation2 + $0xb0] sm:$0xf] %v125_v39  ;;  %v129_v41 = vld [vmem:[%s11426_s1 + $0xac] sm:$0xf] }
  0x1b   :  { %128 = vst [vmem:[#allocation2 + $0xb4] sm:$0xf] %v127_v40  ;;  %v135_v43 = vld [vmem:[%s11426_s1 + $0xd0] sm:$0xf]  ;;  %130 = vst [vmem:[#allocation2 + $0xb8] sm:$0xf] %v129_v41 }
  0x1c   :  { %132 = vst [vmem:[#allocation2 + $0xbc] sm:$0xff] %v131_v42   ;;  %136 = vst [vmem:[#allocation2 + $0xc4] sm:$0xf] %v135_v43  ;;  %v137_v44 = vld [vmem:[%s11426_s1 + $0xc4] sm:$0xf]  ;;  %v147_v49 = vld [vmem:[%s11426_s1 + $0xdc] sm:$0xff]  }
  0x1d   :  { %v139_v45 = vld [vmem:[%s11426_s1 + $0xd4] sm:$0xf]  ;;  %v141_v46 = vld [vmem:[%s11426_s1 + $0xc8] sm:$0xf]  ;;  %138 = vst [vmem:[#allocation2 + $0xc8] sm:$0xf] %v137_v44 }
  0x1e   :  { %140 = vst [vmem:[#allocation2 + $0xcc] sm:$0xf] %v139_v45  ;;  %142 = vst [vmem:[#allocation2 + $0xd0] sm:$0xf] %v141_v46  ;;  %v143_v47 = vld [vmem:[%s11426_s1 + $0xd8] sm:$0xf] }
  0x1f   :  { %v145_v48 = vld [vmem:[%s11426_s1 + $0xcc] sm:$0xf]  ;;  %144 = vst [vmem:[#allocation2 + $0xd4] sm:$0xf] %v143_v47  ;;  %148 = vst [vmem:[#allocation2 + $0xdc] sm:$0xff] %v147_v49   ;;  %v163_v56 = vld [vmem:[%s11426_s1 + $0xfc] sm:$0xff]  }
  0x20   :  { %146 = vst [vmem:[#allocation2 + $0xd8] sm:$0xf] %v145_v48  ;;  %v151_v50 = vld [vmem:[%s11426_s1 + $0xf0] sm:$0xf]  ;;  %v153_v51 = vld [vmem:[%s11426_s1 + $0xe4] sm:$0xf] }
  0x21   :  { %v155_v52 = vld [vmem:[%s11426_s1 + $0xf4] sm:$0xf]  ;;  %152 = vst [vmem:[#allocation2 + $0xe4] sm:$0xf] %v151_v50  ;;  %154 = vst [vmem:[#allocation2 + $0xe8] sm:$0xf] %v153_v51 }
  0x22   :  { %156 = vst [vmem:[#allocation2 + $0xec] sm:$0xf] %v155_v52  ;;  %v157_v53 = vld [vmem:[%s11426_s1 + $0xe8] sm:$0xf]  ;;  %v159_v54 = vld [vmem:[%s11426_s1 + $0xf8] sm:$0xf] }
  0x23   :  { %v161_v55 = vld [vmem:[%s11426_s1 + $0xec] sm:$0xf]  ;;  %158 = vst [vmem:[#allocation2 + $0xf0] sm:$0xf] %v157_v53  ;;  %160 = vst [vmem:[#allocation2 + $0xf4] sm:$0xf] %v159_v54 }
  0x24   :  { %162 = vst [vmem:[#allocation2 + $0xf8] sm:$0xf] %v161_v55  ;;  %v167_v57 = vld [vmem:[%s11426_s1 + $0x110] sm:$0xf]  ;;  %v169_v58 = vld [vmem:[%s11426_s1 + $0x104] sm:$0xf] }
  0x25   :  { %164 = vst [vmem:[#allocation2 + $0xfc] sm:$0xff] %v163_v56   ;;  %168 = vst [vmem:[#allocation2 + $0x104] sm:$0xf] %v167_v57  ;;  %v171_v59 = vld [vmem:[%s11426_s1 + $0x114] sm:$0xf]  ;;  %v179_v63 = vld [vmem:[%s11426_s1 + $0x11c] sm:$0xff]  }
  0x26   :  { %170 = vst [vmem:[#allocation2 + $0x108] sm:$0xf] %v169_v58  ;;  %v173_v60 = vld [vmem:[%s11426_s1 + $0x108] sm:$0xf]  ;;  %v175_v61 = vld [vmem:[%s11426_s1 + $0x118] sm:$0xf] }
  0x27   :  { %172 = vst [vmem:[#allocation2 + $0x10c] sm:$0xf] %v171_v59  ;;  %174 = vst [vmem:[#allocation2 + $0x110] sm:$0xf] %v173_v60  ;;  %v177_v62 = vld [vmem:[%s11426_s1 + $0x10c] sm:$0xf] }
  0x28   :  { %176 = vst [vmem:[#allocation2 + $0x114] sm:$0xf] %v175_v61  ;;  %v183_v0 = vld [vmem:[%s11426_s1 + $0x130] sm:$0xf]  ;;  %178 = vst [vmem:[#allocation2 + $0x118] sm:$0xf] %v177_v62 }
  0x29   :  { %180 = vst [vmem:[#allocation2 + $0x11c] sm:$0xff] %v179_v63   ;;  %184 = vst [vmem:[#allocation2 + $0x124] sm:$0xf] %v183_v0  ;;  %v185_v1 = vld [vmem:[%s11426_s1 + $0x124] sm:$0xf]  ;;  %v195_v6 = vld [vmem:[%s11426_s1 + $0x13c] sm:$0xff]  }
  0x2a   :  { %v187_v2 = vld [vmem:[%s11426_s1 + $0x134] sm:$0xf]  ;;  %v189_v3 = vld [vmem:[%s11426_s1 + $0x128] sm:$0xf]  ;;  %186 = vst [vmem:[#allocation2 + $0x128] sm:$0xf] %v185_v1 }
  0x2b   :  { %188 = vst [vmem:[#allocation2 + $0x12c] sm:$0xf] %v187_v2  ;;  %190 = vst [vmem:[#allocation2 + $0x130] sm:$0xf] %v189_v3  ;;  %v191_v4 = vld [vmem:[%s11426_s1 + $0x138] sm:$0xf] }
  0x2c   :  { %v193_v5 = vld [vmem:[%s11426_s1 + $0x12c] sm:$0xf]  ;;  %192 = vst [vmem:[#allocation2 + $0x134] sm:$0xf] %v191_v4  ;;  %196 = vst [vmem:[#allocation2 + $0x13c] sm:$0xff] %v195_v6   ;;  %v211_v13 = vld [vmem:[%s11426_s1 + $0x15c] sm:$0xff]  }
  0x2d   :  { %194 = vst [vmem:[#allocation2 + $0x138] sm:$0xf] %v193_v5  ;;  %v199_v7 = vld [vmem:[%s11426_s1 + $0x150] sm:$0xf]  ;;  %v201_v8 = vld [vmem:[%s11426_s1 + $0x144] sm:$0xf] }
  0x2e   :  { %v203_v9 = vld [vmem:[%s11426_s1 + $0x154] sm:$0xf]  ;;  %200 = vst [vmem:[#allocation2 + $0x144] sm:$0xf] %v199_v7  ;;  %202 = vst [vmem:[#allocation2 + $0x148] sm:$0xf] %v201_v8 }
  0x2f   :  { %204 = vst [vmem:[#allocation2 + $0x14c] sm:$0xf] %v203_v9  ;;  %v205_v10 = vld [vmem:[%s11426_s1 + $0x148] sm:$0xf]  ;;  %v207_v11 = vld [vmem:[%s11426_s1 + $0x158] sm:$0xf] }
  0x30   :  { %v209_v12 = vld [vmem:[%s11426_s1 + $0x14c] sm:$0xf]  ;;  %206 = vst [vmem:[#allocation2 + $0x150] sm:$0xf] %v205_v10  ;;  %208 = vst [vmem:[#allocation2 + $0x154] sm:$0xf] %v207_v11 }
  0x31   :  { %210 = vst [vmem:[#allocation2 + $0x158] sm:$0xf] %v209_v12  ;;  %v215_v14 = vld [vmem:[%s11426_s1 + $0x170] sm:$0xf]  ;;  %v217_v15 = vld [vmem:[%s11426_s1 + $0x164] sm:$0xf] }
  0x32   :  { %212 = vst [vmem:[#allocation2 + $0x15c] sm:$0xff] %v211_v13   ;;  %216 = vst [vmem:[#allocation2 + $0x164] sm:$0xf] %v215_v14  ;;  %v219_v16 = vld [vmem:[%s11426_s1 + $0x174] sm:$0xf]  ;;  %v227_v20 = vld [vmem:[%s11426_s1 + $0x17c] sm:$0xff]  }
  0x33   :  { %218 = vst [vmem:[#allocation2 + $0x168] sm:$0xf] %v217_v15  ;;  %v221_v17 = vld [vmem:[%s11426_s1 + $0x168] sm:$0xf]  ;;  %v223_v18 = vld [vmem:[%s11426_s1 + $0x178] sm:$0xf] }
  0x34   :  { %220 = vst [vmem:[#allocation2 + $0x16c] sm:$0xf] %v219_v16  ;;  %222 = vst [vmem:[#allocation2 + $0x170] sm:$0xf] %v221_v17  ;;  %v225_v19 = vld [vmem:[%s11426_s1 + $0x16c] sm:$0xf] }
  0x35   :  { %224 = vst [vmem:[#allocation2 + $0x174] sm:$0xf] %v223_v18  ;;  %v231_v21 = vld [vmem:[%s11426_s1 + $0x190] sm:$0xf]  ;;  %226 = vst [vmem:[#allocation2 + $0x178] sm:$0xf] %v225_v19 }
  0x36   :  { %228 = vst [vmem:[#allocation2 + $0x17c] sm:$0xff] %v227_v20   ;;  %232 = vst [vmem:[#allocation2 + $0x184] sm:$0xf] %v231_v21  ;;  %v233_v22 = vld [vmem:[%s11426_s1 + $0x184] sm:$0xf]  ;;  %v243_v27 = vld [vmem:[%s11426_s1 + $0x19c] sm:$0xff]  }
  0x37   :  { %v235_v23 = vld [vmem:[%s11426_s1 + $0x194] sm:$0xf]  ;;  %v237_v24 = vld [vmem:[%s11426_s1 + $0x188] sm:$0xf]  ;;  %234 = vst [vmem:[#allocation2 + $0x188] sm:$0xf] %v233_v22 }
  0x38   :  { %236 = vst [vmem:[#allocation2 + $0x18c] sm:$0xf] %v235_v23  ;;  %238 = vst [vmem:[#allocation2 + $0x190] sm:$0xf] %v237_v24  ;;  %v239_v25 = vld [vmem:[%s11426_s1 + $0x198] sm:$0xf] }
  0x39   :  { %v241_v26 = vld [vmem:[%s11426_s1 + $0x18c] sm:$0xf]  ;;  %240 = vst [vmem:[#allocation2 + $0x194] sm:$0xf] %v239_v25  ;;  %244 = vst [vmem:[#allocation2 + $0x19c] sm:$0xff] %v243_v27   ;;  %v259_v34 = vld [vmem:[%s11426_s1 + $0x1bc] sm:$0xff]  }
  0x3a   :  { %242 = vst [vmem:[#allocation2 + $0x198] sm:$0xf] %v241_v26  ;;  %v247_v28 = vld [vmem:[%s11426_s1 + $0x1b0] sm:$0xf]  ;;  %v249_v29 = vld [vmem:[%s11426_s1 + $0x1a4] sm:$0xf] }
  0x3b   :  { %v251_v30 = vld [vmem:[%s11426_s1 + $0x1b4] sm:$0xf]  ;;  %248 = vst [vmem:[#allocation2 + $0x1a4] sm:$0xf] %v247_v28  ;;  %250 = vst [vmem:[#allocation2 + $0x1a8] sm:$0xf] %v249_v29 }
  0x3c   :  { %252 = vst [vmem:[#allocation2 + $0x1ac] sm:$0xf] %v251_v30  ;;  %v253_v31 = vld [vmem:[%s11426_s1 + $0x1a8] sm:$0xf]  ;;  %v255_v32 = vld [vmem:[%s11426_s1 + $0x1b8] sm:$0xf] }
  0x3d   :  { %v257_v33 = vld [vmem:[%s11426_s1 + $0x1ac] sm:$0xf]  ;;  %254 = vst [vmem:[#allocation2 + $0x1b0] sm:$0xf] %v253_v31  ;;  %256 = vst [vmem:[#allocation2 + $0x1b4] sm:$0xf] %v255_v32 }
  0x3e   :  { %258 = vst [vmem:[#allocation2 + $0x1b8] sm:$0xf] %v257_v33  ;;  %v263_v35 = vld [vmem:[%s11426_s1 + $0x1d0] sm:$0xf]  ;;  %v265_v36 = vld [vmem:[%s11426_s1 + $0x1c4] sm:$0xf] }
  0x3f   :  { %260 = vst [vmem:[#allocation2 + $0x1bc] sm:$0xff] %v259_v34   ;;  %264 = vst [vmem:[#allocation2 + $0x1c4] sm:$0xf] %v263_v35  ;;  %v267_v37 = vld [vmem:[%s11426_s1 + $0x1d4] sm:$0xf]  ;;  %v275_v41 = vld [vmem:[%s11426_s1 + $0x1dc] sm:$0xff]  }
  0x40   :  { %266 = vst [vmem:[#allocation2 + $0x1c8] sm:$0xf] %v265_v36  ;;  %v269_v38 = vld [vmem:[%s11426_s1 + $0x1c8] sm:$0xf]  ;;  %v271_v39 = vld [vmem:[%s11426_s1 + $0x1d8] sm:$0xf] }
  0x41   :  { %268 = vst [vmem:[#allocation2 + $0x1cc] sm:$0xf] %v267_v37  ;;  %270 = vst [vmem:[#allocation2 + $0x1d0] sm:$0xf] %v269_v38  ;;  %v273_v40 = vld [vmem:[%s11426_s1 + $0x1cc] sm:$0xf] }
  0x42   :  { %272 = vst [vmem:[#allocation2 + $0x1d4] sm:$0xf] %v271_v39  ;;  %v279_v42 = vld [vmem:[%s11426_s1 + $0x1f0] sm:$0xf]  ;;  %274 = vst [vmem:[#allocation2 + $0x1d8] sm:$0xf] %v273_v40 }
  0x43   :  { %276 = vst [vmem:[#allocation2 + $0x1dc] sm:$0xff] %v275_v41   ;;  %280 = vst [vmem:[#allocation2 + $0x1e4] sm:$0xf] %v279_v42  ;;  %v281_v43 = vld [vmem:[%s11426_s1 + $0x1e4] sm:$0xf]  ;;  %v291_v48 = vld [vmem:[%s11426_s1 + $0x1fc] sm:$0xff]  }
  0x44   :  { %v283_v44 = vld [vmem:[%s11426_s1 + $0x1f4] sm:$0xf]  ;;  %v285_v45 = vld [vmem:[%s11426_s1 + $0x1e8] sm:$0xf]  ;;  %282 = vst [vmem:[#allocation2 + $0x1e8] sm:$0xf] %v281_v43 }
  0x45   :  { %284 = vst [vmem:[#allocation2 + $0x1ec] sm:$0xf] %v283_v44  ;;  %286 = vst [vmem:[#allocation2 + $0x1f0] sm:$0xf] %v285_v45  ;;  %v287_v46 = vld [vmem:[%s11426_s1 + $0x1f8] sm:$0xf] }
  0x46   :  { %v289_v47 = vld [vmem:[%s11426_s1 + $0x1ec] sm:$0xf]  ;;  %288 = vst [vmem:[#allocation2 + $0x1f4] sm:$0xf] %v287_v46  ;;  %292 = vst [vmem:[#allocation2 + $0x1fc] sm:$0xff] %v291_v48   ;;  %v307_v55 = vld [vmem:[%s11426_s1 + $0x21c] sm:$0xff]  }
  0x47   :  { %290 = vst [vmem:[#allocation2 + $0x1f8] sm:$0xf] %v289_v47  ;;  %v295_v49 = vld [vmem:[%s11426_s1 + $0x210] sm:$0xf]  ;;  %v297_v50 = vld [vmem:[%s11426_s1 + $0x204] sm:$0xf] }
  0x48   :  { %v299_v51 = vld [vmem:[%s11426_s1 + $0x214] sm:$0xf]  ;;  %296 = vst [vmem:[#allocation2 + $0x204] sm:$0xf] %v295_v49  ;;  %298 = vst [vmem:[#allocation2 + $0x208] sm:$0xf] %v297_v50 }
  0x49   :  { %300 = vst [vmem:[#allocation2 + $0x20c] sm:$0xf] %v299_v51  ;;  %v301_v52 = vld [vmem:[%s11426_s1 + $0x208] sm:$0xf]  ;;  %v303_v53 = vld [vmem:[%s11426_s1 + $0x218] sm:$0xf] }
  0x4a   :  { %v305_v54 = vld [vmem:[%s11426_s1 + $0x20c] sm:$0xf]  ;;  %302 = vst [vmem:[#allocation2 + $0x210] sm:$0xf] %v301_v52  ;;  %304 = vst [vmem:[#allocation2 + $0x214] sm:$0xf] %v303_v53 }
  0x4b   :  { %306 = vst [vmem:[#allocation2 + $0x218] sm:$0xf] %v305_v54  ;;  %v311_v56 = vld [vmem:[%s11426_s1 + $0x230] sm:$0xf]  ;;  %v313_v57 = vld [vmem:[%s11426_s1 + $0x224] sm:$0xf] }
  0x4c   :  { %308 = vst [vmem:[#allocation2 + $0x21c] sm:$0xff] %v307_v55   ;;  %312 = vst [vmem:[#allocation2 + $0x224] sm:$0xf] %v311_v56  ;;  %v315_v58 = vld [vmem:[%s11426_s1 + $0x234] sm:$0xf]  ;;  %v323_v62 = vld [vmem:[%s11426_s1 + $0x23c] sm:$0xff]  }
  0x4d   :  { %314 = vst [vmem:[#allocation2 + $0x228] sm:$0xf] %v313_v57  ;;  %v317_v59 = vld [vmem:[%s11426_s1 + $0x228] sm:$0xf]  ;;  %v319_v60 = vld [vmem:[%s11426_s1 + $0x238] sm:$0xf] }
  0x4e   :  { %316 = vst [vmem:[#allocation2 + $0x22c] sm:$0xf] %v315_v58  ;;  %318 = vst [vmem:[#allocation2 + $0x230] sm:$0xf] %v317_v59  ;;  %v321_v61 = vld [vmem:[%s11426_s1 + $0x22c] sm:$0xf] }
  0x4f   :  { %320 = vst [vmem:[#allocation2 + $0x234] sm:$0xf] %v319_v60  ;;  %v327_v63 = vld [vmem:[%s11426_s1 + $0x250] sm:$0xf]  ;;  %322 = vst [vmem:[#allocation2 + $0x238] sm:$0xf] %v321_v61 }
  0x50   :  { %324 = vst [vmem:[#allocation2 + $0x23c] sm:$0xff] %v323_v62   ;;  %328 = vst [vmem:[#allocation2 + $0x244] sm:$0xf] %v327_v63  ;;  %v329_v0 = vld [vmem:[%s11426_s1 + $0x244] sm:$0xf]  ;;  %v339_v5 = vld [vmem:[%s11426_s1 + $0x25c] sm:$0xff]  }
  0x51   :  { %v331_v1 = vld [vmem:[%s11426_s1 + $0x254] sm:$0xf]  ;;  %v333_v2 = vld [vmem:[%s11426_s1 + $0x248] sm:$0xf]  ;;  %330 = vst [vmem:[#allocation2 + $0x248] sm:$0xf] %v329_v0 }
  0x52   :  { %332 = vst [vmem:[#allocation2 + $0x24c] sm:$0xf] %v331_v1  ;;  %334 = vst [vmem:[#allocation2 + $0x250] sm:$0xf] %v333_v2  ;;  %v335_v3 = vld [vmem:[%s11426_s1 + $0x258] sm:$0xf] }
  0x53   :  { %v337_v4 = vld [vmem:[%s11426_s1 + $0x24c] sm:$0xf]  ;;  %336 = vst [vmem:[#allocation2 + $0x254] sm:$0xf] %v335_v3  ;;  %340 = vst [vmem:[#allocation2 + $0x25c] sm:$0xff] %v339_v5   ;;  %v355_v12 = vld [vmem:[%s11426_s1 + $0x27c] sm:$0xff]  }
  0x54   :  { %338 = vst [vmem:[#allocation2 + $0x258] sm:$0xf] %v337_v4  ;;  %v343_v6 = vld [vmem:[%s11426_s1 + $0x270] sm:$0xf]  ;;  %v345_v7 = vld [vmem:[%s11426_s1 + $0x264] sm:$0xf] }
  0x55   :  { %v347_v8 = vld [vmem:[%s11426_s1 + $0x274] sm:$0xf]  ;;  %344 = vst [vmem:[#allocation2 + $0x264] sm:$0xf] %v343_v6  ;;  %346 = vst [vmem:[#allocation2 + $0x268] sm:$0xf] %v345_v7 }
  0x56   :  { %348 = vst [vmem:[#allocation2 + $0x26c] sm:$0xf] %v347_v8  ;;  %v349_v9 = vld [vmem:[%s11426_s1 + $0x268] sm:$0xf]  ;;  %v351_v10 = vld [vmem:[%s11426_s1 + $0x278] sm:$0xf] }
  0x57   :  { %v353_v11 = vld [vmem:[%s11426_s1 + $0x26c] sm:$0xf]  ;;  %350 = vst [vmem:[#allocation2 + $0x270] sm:$0xf] %v349_v9  ;;  %352 = vst [vmem:[#allocation2 + $0x274] sm:$0xf] %v351_v10 }
  0x58   :  { %354 = vst [vmem:[#allocation2 + $0x278] sm:$0xf] %v353_v11  ;;  %v359_v13 = vld [vmem:[%s11426_s1 + $0x290] sm:$0xf]  ;;  %v361_v14 = vld [vmem:[%s11426_s1 + $0x284] sm:$0xf] }
  0x59   :  { %356 = vst [vmem:[#allocation2 + $0x27c] sm:$0xff] %v355_v12   ;;  %360 = vst [vmem:[#allocation2 + $0x284] sm:$0xf] %v359_v13  ;;  %v363_v15 = vld [vmem:[%s11426_s1 + $0x294] sm:$0xf]  ;;  %v371_v19 = vld [vmem:[%s11426_s1 + $0x29c] sm:$0xff]  }
  0x5a   :  { %362 = vst [vmem:[#allocation2 + $0x288] sm:$0xf] %v361_v14  ;;  %v365_v16 = vld [vmem:[%s11426_s1 + $0x288] sm:$0xf]  ;;  %v367_v17 = vld [vmem:[%s11426_s1 + $0x298] sm:$0xf] }
  0x5b   :  { %364 = vst [vmem:[#allocation2 + $0x28c] sm:$0xf] %v363_v15  ;;  %366 = vst [vmem:[#allocation2 + $0x290] sm:$0xf] %v365_v16  ;;  %v369_v18 = vld [vmem:[%s11426_s1 + $0x28c] sm:$0xf] }
  0x5c   :  { %368 = vst [vmem:[#allocation2 + $0x294] sm:$0xf] %v367_v17  ;;  %v375_v20 = vld [vmem:[%s11426_s1 + $0x2b0] sm:$0xf]  ;;  %370 = vst [vmem:[#allocation2 + $0x298] sm:$0xf] %v369_v18 }
  0x5d   :  { %372 = vst [vmem:[#allocation2 + $0x29c] sm:$0xff] %v371_v19   ;;  %376 = vst [vmem:[#allocation2 + $0x2a4] sm:$0xf] %v375_v20  ;;  %v377_v21 = vld [vmem:[%s11426_s1 + $0x2a4] sm:$0xf]  ;;  %v387_v26 = vld [vmem:[%s11426_s1 + $0x2bc] sm:$0xff]  }
  0x5e   :  { %v379_v22 = vld [vmem:[%s11426_s1 + $0x2b4] sm:$0xf]  ;;  %v381_v23 = vld [vmem:[%s11426_s1 + $0x2a8] sm:$0xf]  ;;  %378 = vst [vmem:[#allocation2 + $0x2a8] sm:$0xf] %v377_v21 }
  0x5f   :  { %380 = vst [vmem:[#allocation2 + $0x2ac] sm:$0xf] %v379_v22  ;;  %382 = vst [vmem:[#allocation2 + $0x2b0] sm:$0xf] %v381_v23  ;;  %v383_v24 = vld [vmem:[%s11426_s1 + $0x2b8] sm:$0xf] }
  0x60   :  { %v385_v25 = vld [vmem:[%s11426_s1 + $0x2ac] sm:$0xf]  ;;  %384 = vst [vmem:[#allocation2 + $0x2b4] sm:$0xf] %v383_v24  ;;  %388 = vst [vmem:[#allocation2 + $0x2bc] sm:$0xff] %v387_v26   ;;  %v403_v33 = vld [vmem:[%s11426_s1 + $0x2dc] sm:$0xff]  }
  0x61   :  { %386 = vst [vmem:[#allocation2 + $0x2b8] sm:$0xf] %v385_v25  ;;  %v391_v27 = vld [vmem:[%s11426_s1 + $0x2d0] sm:$0xf]  ;;  %v393_v28 = vld [vmem:[%s11426_s1 + $0x2c4] sm:$0xf] }
  0x62   :  { %v395_v29 = vld [vmem:[%s11426_s1 + $0x2d4] sm:$0xf]  ;;  %392 = vst [vmem:[#allocation2 + $0x2c4] sm:$0xf] %v391_v27  ;;  %394 = vst [vmem:[#allocation2 + $0x2c8] sm:$0xf] %v393_v28 }
  0x63   :  { %396 = vst [vmem:[#allocation2 + $0x2cc] sm:$0xf] %v395_v29  ;;  %v397_v30 = vld [vmem:[%s11426_s1 + $0x2c8] sm:$0xf]  ;;  %v399_v31 = vld [vmem:[%s11426_s1 + $0x2d8] sm:$0xf] }
  0x64   :  { %v401_v32 = vld [vmem:[%s11426_s1 + $0x2cc] sm:$0xf]  ;;  %398 = vst [vmem:[#allocation2 + $0x2d0] sm:$0xf] %v397_v30  ;;  %400 = vst [vmem:[#allocation2 + $0x2d4] sm:$0xf] %v399_v31 }
  0x65   :  { %402 = vst [vmem:[#allocation2 + $0x2d8] sm:$0xf] %v401_v32  ;;  %v407_v34 = vld [vmem:[%s11426_s1 + $0x2f0] sm:$0xf]  ;;  %v409_v35 = vld [vmem:[%s11426_s1 + $0x2e4] sm:$0xf] }
  0x66   :  { %404 = vst [vmem:[#allocation2 + $0x2dc] sm:$0xff] %v403_v33   ;;  %408 = vst [vmem:[#allocation2 + $0x2e4] sm:$0xf] %v407_v34  ;;  %v411_v36 = vld [vmem:[%s11426_s1 + $0x2f4] sm:$0xf]  ;;  %v419_v40 = vld [vmem:[%s11426_s1 + $0x2fc] sm:$0xff]  }
  0x67   :  { %410 = vst [vmem:[#allocation2 + $0x2e8] sm:$0xf] %v409_v35  ;;  %v413_v37 = vld [vmem:[%s11426_s1 + $0x2e8] sm:$0xf]  ;;  %v415_v38 = vld [vmem:[%s11426_s1 + $0x2f8] sm:$0xf] }
  0x68   :  { %412 = vst [vmem:[#allocation2 + $0x2ec] sm:$0xf] %v411_v36  ;;  %414 = vst [vmem:[#allocation2 + $0x2f0] sm:$0xf] %v413_v37  ;;  %v417_v39 = vld [vmem:[%s11426_s1 + $0x2ec] sm:$0xf] }
  0x69   :  { %416 = vst [vmem:[#allocation2 + $0x2f4] sm:$0xf] %v415_v38  ;;  %v423_v41 = vld [vmem:[%s11426_s1 + $0x310] sm:$0xf]  ;;  %418 = vst [vmem:[#allocation2 + $0x2f8] sm:$0xf] %v417_v39 }
  0x6a   :  { %420 = vst [vmem:[#allocation2 + $0x2fc] sm:$0xff] %v419_v40   ;;  %424 = vst [vmem:[#allocation2 + $0x304] sm:$0xf] %v423_v41  ;;  %v425_v42 = vld [vmem:[%s11426_s1 + $0x304] sm:$0xf]  ;;  %v435_v47 = vld [vmem:[%s11426_s1 + $0x31c] sm:$0xff]  }
  0x6b   :  { %v427_v43 = vld [vmem:[%s11426_s1 + $0x314] sm:$0xf]  ;;  %v429_v44 = vld [vmem:[%s11426_s1 + $0x308] sm:$0xf]  ;;  %426 = vst [vmem:[#allocation2 + $0x308] sm:$0xf] %v425_v42 }
  0x6c   :  { %428 = vst [vmem:[#allocation2 + $0x30c] sm:$0xf] %v427_v43  ;;  %430 = vst [vmem:[#allocation2 + $0x310] sm:$0xf] %v429_v44  ;;  %v431_v45 = vld [vmem:[%s11426_s1 + $0x318] sm:$0xf] }
  0x6d   :  { %v433_v46 = vld [vmem:[%s11426_s1 + $0x30c] sm:$0xf]  ;;  %432 = vst [vmem:[#allocation2 + $0x314] sm:$0xf] %v431_v45  ;;  %436 = vst [vmem:[#allocation2 + $0x31c] sm:$0xff] %v435_v47   ;;  %v451_v54 = vld [vmem:[%s11426_s1 + $0x33c] sm:$0xff]  }
  0x6e   :  { %434 = vst [vmem:[#allocation2 + $0x318] sm:$0xf] %v433_v46  ;;  %v439_v48 = vld [vmem:[%s11426_s1 + $0x330] sm:$0xf]  ;;  %v441_v49 = vld [vmem:[%s11426_s1 + $0x324] sm:$0xf] }
  0x6f   :  { %v443_v50 = vld [vmem:[%s11426_s1 + $0x334] sm:$0xf]  ;;  %440 = vst [vmem:[#allocation2 + $0x324] sm:$0xf] %v439_v48  ;;  %442 = vst [vmem:[#allocation2 + $0x328] sm:$0xf] %v441_v49 }
  0x70   :  { %444 = vst [vmem:[#allocation2 + $0x32c] sm:$0xf] %v443_v50  ;;  %v445_v51 = vld [vmem:[%s11426_s1 + $0x328] sm:$0xf]  ;;  %v447_v52 = vld [vmem:[%s11426_s1 + $0x338] sm:$0xf] }
  0x71   :  { %v449_v53 = vld [vmem:[%s11426_s1 + $0x32c] sm:$0xf]  ;;  %446 = vst [vmem:[#allocation2 + $0x330] sm:$0xf] %v445_v51  ;;  %448 = vst [vmem:[#allocation2 + $0x334] sm:$0xf] %v447_v52 }
  0x72   :  { %450 = vst [vmem:[#allocation2 + $0x338] sm:$0xf] %v449_v53  ;;  %v455_v55 = vld [vmem:[%s11426_s1 + $0x350] sm:$0xf]  ;;  %v457_v56 = vld [vmem:[%s11426_s1 + $0x344] sm:$0xf] }
  0x73   :  { %452 = vst [vmem:[#allocation2 + $0x33c] sm:$0xff] %v451_v54   ;;  %456 = vst [vmem:[#allocation2 + $0x344] sm:$0xf] %v455_v55  ;;  %v459_v57 = vld [vmem:[%s11426_s1 + $0x354] sm:$0xf]  ;;  %v467_v61 = vld [vmem:[%s11426_s1 + $0x35c] sm:$0xff]  }
  0x74   :  { %458 = vst [vmem:[#allocation2 + $0x348] sm:$0xf] %v457_v56  ;;  %v461_v58 = vld [vmem:[%s11426_s1 + $0x348] sm:$0xf]  ;;  %v463_v59 = vld [vmem:[%s11426_s1 + $0x358] sm:$0xf] }
  0x75   :  { %460 = vst [vmem:[#allocation2 + $0x34c] sm:$0xf] %v459_v57  ;;  %462 = vst [vmem:[#allocation2 + $0x350] sm:$0xf] %v461_v58  ;;  %v465_v60 = vld [vmem:[%s11426_s1 + $0x34c] sm:$0xf] }
  0x76   :  { %464 = vst [vmem:[#allocation2 + $0x354] sm:$0xf] %v463_v59  ;;  %v471_v62 = vld [vmem:[%s11426_s1 + $0x370] sm:$0xf]  ;;  %466 = vst [vmem:[#allocation2 + $0x358] sm:$0xf] %v465_v60 }
  0x77   :  { %468 = vst [vmem:[#allocation2 + $0x35c] sm:$0xff] %v467_v61   ;;  %472 = vst [vmem:[#allocation2 + $0x364] sm:$0xf] %v471_v62  ;;  %v473_v63 = vld [vmem:[%s11426_s1 + $0x364] sm:$0xf]  ;;  %v483_v4 = vld [vmem:[%s11426_s1 + $0x37c] sm:$0xff]  }
  0x78   :  { %v475_v0 = vld [vmem:[%s11426_s1 + $0x374] sm:$0xf]  ;;  %v477_v1 = vld [vmem:[%s11426_s1 + $0x368] sm:$0xf]  ;;  %474 = vst [vmem:[#allocation2 + $0x368] sm:$0xf] %v473_v63 }
  0x79   :  { %476 = vst [vmem:[#allocation2 + $0x36c] sm:$0xf] %v475_v0  ;;  %478 = vst [vmem:[#allocation2 + $0x370] sm:$0xf] %v477_v1  ;;  %v479_v2 = vld [vmem:[%s11426_s1 + $0x378] sm:$0xf] }
  0x7a   :  { %v481_v3 = vld [vmem:[%s11426_s1 + $0x36c] sm:$0xf]  ;;  %480 = vst [vmem:[#allocation2 + $0x374] sm:$0xf] %v479_v2  ;;  %484 = vst [vmem:[#allocation2 + $0x37c] sm:$0xff] %v483_v4   ;;  %v499_v11 = vld [vmem:[%s11426_s1 + $0x39c] sm:$0xff]  }
  0x7b   :  { %482 = vst [vmem:[#allocation2 + $0x378] sm:$0xf] %v481_v3  ;;  %v487_v5 = vld [vmem:[%s11426_s1 + $0x390] sm:$0xf]  ;;  %v489_v6 = vld [vmem:[%s11426_s1 + $0x384] sm:$0xf] }
  0x7c   :  { %v491_v7 = vld [vmem:[%s11426_s1 + $0x394] sm:$0xf]  ;;  %488 = vst [vmem:[#allocation2 + $0x384] sm:$0xf] %v487_v5  ;;  %490 = vst [vmem:[#allocation2 + $0x388] sm:$0xf] %v489_v6 }
  0x7d   :  { %492 = vst [vmem:[#allocation2 + $0x38c] sm:$0xf] %v491_v7  ;;  %v493_v8 = vld [vmem:[%s11426_s1 + $0x388] sm:$0xf]  ;;  %v495_v9 = vld [vmem:[%s11426_s1 + $0x398] sm:$0xf] }
  0x7e   :  { %v497_v10 = vld [vmem:[%s11426_s1 + $0x38c] sm:$0xf]  ;;  %494 = vst [vmem:[#allocation2 + $0x390] sm:$0xf] %v493_v8  ;;  %496 = vst [vmem:[#allocation2 + $0x394] sm:$0xf] %v495_v9 }
  0x7f   :  { %498 = vst [vmem:[#allocation2 + $0x398] sm:$0xf] %v497_v10  ;;  %v503_v12 = vld [vmem:[%s11426_s1 + $0x3b0] sm:$0xf]  ;;  %v505_v13 = vld [vmem:[%s11426_s1 + $0x3a4] sm:$0xf] }
  0x80   :  { %500 = vst [vmem:[#allocation2 + $0x39c] sm:$0xff] %v499_v11   ;;  %504 = vst [vmem:[#allocation2 + $0x3a4] sm:$0xf] %v503_v12  ;;  %v507_v14 = vld [vmem:[%s11426_s1 + $0x3b4] sm:$0xf]  ;;  %v515_v18 = vld [vmem:[%s11426_s1 + $0x3bc] sm:$0xff]  }
  0x81   :  { %506 = vst [vmem:[#allocation2 + $0x3a8] sm:$0xf] %v505_v13  ;;  %v509_v15 = vld [vmem:[%s11426_s1 + $0x3a8] sm:$0xf]  ;;  %v511_v16 = vld [vmem:[%s11426_s1 + $0x3b8] sm:$0xf] }
  0x82   :  { %508 = vst [vmem:[#allocation2 + $0x3ac] sm:$0xf] %v507_v14  ;;  %510 = vst [vmem:[#allocation2 + $0x3b0] sm:$0xf] %v509_v15  ;;  %v513_v17 = vld [vmem:[%s11426_s1 + $0x3ac] sm:$0xf] }
  0x83   :  { %512 = vst [vmem:[#allocation2 + $0x3b4] sm:$0xf] %v511_v16  ;;  %v519_v19 = vld [vmem:[%s11426_s1 + $0x3d0] sm:$0xf]  ;;  %514 = vst [vmem:[#allocation2 + $0x3b8] sm:$0xf] %v513_v17 }
  0x84   :  { %516 = vst [vmem:[#allocation2 + $0x3bc] sm:$0xff] %v515_v18   ;;  %520 = vst [vmem:[#allocation2 + $0x3c4] sm:$0xf] %v519_v19  ;;  %v521_v20 = vld [vmem:[%s11426_s1 + $0x3c4] sm:$0xf]  ;;  %v531_v25 = vld [vmem:[%s11426_s1 + $0x3dc] sm:$0xff]  }
  0x85   :  { %v523_v21 = vld [vmem:[%s11426_s1 + $0x3d4] sm:$0xf]  ;;  %v525_v22 = vld [vmem:[%s11426_s1 + $0x3c8] sm:$0xf]  ;;  %522 = vst [vmem:[#allocation2 + $0x3c8] sm:$0xf] %v521_v20 }
  0x86   :  { %524 = vst [vmem:[#allocation2 + $0x3cc] sm:$0xf] %v523_v21  ;;  %526 = vst [vmem:[#allocation2 + $0x3d0] sm:$0xf] %v525_v22  ;;  %v527_v23 = vld [vmem:[%s11426_s1 + $0x3d8] sm:$0xf] }
  0x87   :  { %v529_v24 = vld [vmem:[%s11426_s1 + $0x3cc] sm:$0xf]  ;;  %528 = vst [vmem:[#allocation2 + $0x3d4] sm:$0xf] %v527_v23  ;;  %532 = vst [vmem:[#allocation2 + $0x3dc] sm:$0xff] %v531_v25   ;;  %v547_v32 = vld [vmem:[%s11426_s1 + $0x3fc] sm:$0xff]  }
  0x88   :  { %530 = vst [vmem:[#allocation2 + $0x3d8] sm:$0xf] %v529_v24  ;;  %v535_v26 = vld [vmem:[%s11426_s1 + $0x3f0] sm:$0xf]  ;;  %v537_v27 = vld [vmem:[%s11426_s1 + $0x3e4] sm:$0xf] }
  0x89   :  { %v539_v28 = vld [vmem:[%s11426_s1 + $0x3f4] sm:$0xf]  ;;  %536 = vst [vmem:[#allocation2 + $0x3e4] sm:$0xf] %v535_v26  ;;  %538 = vst [vmem:[#allocation2 + $0x3e8] sm:$0xf] %v537_v27 }
  0x8a   :  { %540 = vst [vmem:[#allocation2 + $0x3ec] sm:$0xf] %v539_v28  ;;  %v541_v29 = vld [vmem:[%s11426_s1 + $0x3e8] sm:$0xf]  ;;  %v543_v30 = vld [vmem:[%s11426_s1 + $0x3f8] sm:$0xf] }
  0x8b   :  { %v545_v31 = vld [vmem:[%s11426_s1 + $0x3ec] sm:$0xf]  ;;  %542 = vst [vmem:[#allocation2 + $0x3f0] sm:$0xf] %v541_v29  ;;  %544 = vst [vmem:[#allocation2 + $0x3f4] sm:$0xf] %v543_v30 }
  0x8c   :  { %546 = vst [vmem:[#allocation2 + $0x3f8] sm:$0xf] %v545_v31  ;;  %v551_v33 = vld [vmem:[%s11426_s1 + $0x410] sm:$0xf]  ;;  %v553_v34 = vld [vmem:[%s11426_s1 + $0x404] sm:$0xf] }
  0x8d   :  { %548 = vst [vmem:[#allocation2 + $0x3fc] sm:$0xff] %v547_v32   ;;  %552 = vst [vmem:[#allocation2 + $0x404] sm:$0xf] %v551_v33  ;;  %v555_v35 = vld [vmem:[%s11426_s1 + $0x414] sm:$0xf]  ;;  %v563_v39 = vld [vmem:[%s11426_s1 + $0x41c] sm:$0xff]  }
  0x8e   :  { %554 = vst [vmem:[#allocation2 + $0x408] sm:$0xf] %v553_v34  ;;  %v557_v36 = vld [vmem:[%s11426_s1 + $0x408] sm:$0xf]  ;;  %v559_v37 = vld [vmem:[%s11426_s1 + $0x418] sm:$0xf] }
  0x8f   :  { %556 = vst [vmem:[#allocation2 + $0x40c] sm:$0xf] %v555_v35  ;;  %558 = vst [vmem:[#allocation2 + $0x410] sm:$0xf] %v557_v36  ;;  %v561_v38 = vld [vmem:[%s11426_s1 + $0x40c] sm:$0xf] }
  0x90   :  { %560 = vst [vmem:[#allocation2 + $0x414] sm:$0xf] %v559_v37  ;;  %v567_v40 = vld [vmem:[%s11426_s1 + $0x430] sm:$0xf]  ;;  %562 = vst [vmem:[#allocation2 + $0x418] sm:$0xf] %v561_v38 }
  0x91   :  { %564 = vst [vmem:[#allocation2 + $0x41c] sm:$0xff] %v563_v39   ;;  %568 = vst [vmem:[#allocation2 + $0x424] sm:$0xf] %v567_v40  ;;  %v569_v41 = vld [vmem:[%s11426_s1 + $0x424] sm:$0xf]  ;;  %v579_v46 = vld [vmem:[%s11426_s1 + $0x43c] sm:$0xff]  }
  0x92   :  { %v571_v42 = vld [vmem:[%s11426_s1 + $0x434] sm:$0xf]  ;;  %v573_v43 = vld [vmem:[%s11426_s1 + $0x428] sm:$0xf]  ;;  %570 = vst [vmem:[#allocation2 + $0x428] sm:$0xf] %v569_v41 }
  0x93   :  { %572 = vst [vmem:[#allocation2 + $0x42c] sm:$0xf] %v571_v42  ;;  %574 = vst [vmem:[#allocation2 + $0x430] sm:$0xf] %v573_v43  ;;  %v575_v44 = vld [vmem:[%s11426_s1 + $0x438] sm:$0xf] }
  0x94   :  { %v577_v45 = vld [vmem:[%s11426_s1 + $0x42c] sm:$0xf]  ;;  %576 = vst [vmem:[#allocation2 + $0x434] sm:$0xf] %v575_v44  ;;  %580 = vst [vmem:[#allocation2 + $0x43c] sm:$0xff] %v579_v46   ;;  %v595_v53 = vld [vmem:[%s11426_s1 + $0x45c] sm:$0xff]  }
  0x95   :  { %578 = vst [vmem:[#allocation2 + $0x438] sm:$0xf] %v577_v45  ;;  %v583_v47 = vld [vmem:[%s11426_s1 + $0x450] sm:$0xf]  ;;  %v585_v48 = vld [vmem:[%s11426_s1 + $0x444] sm:$0xf] }
  0x96   :  { %v587_v49 = vld [vmem:[%s11426_s1 + $0x454] sm:$0xf]  ;;  %584 = vst [vmem:[#allocation2 + $0x444] sm:$0xf] %v583_v47  ;;  %586 = vst [vmem:[#allocation2 + $0x448] sm:$0xf] %v585_v48 }
  0x97   :  { %588 = vst [vmem:[#allocation2 + $0x44c] sm:$0xf] %v587_v49  ;;  %v589_v50 = vld [vmem:[%s11426_s1 + $0x448] sm:$0xf]  ;;  %v591_v51 = vld [vmem:[%s11426_s1 + $0x458] sm:$0xf] }
  0x98   :  { %v593_v52 = vld [vmem:[%s11426_s1 + $0x44c] sm:$0xf]  ;;  %590 = vst [vmem:[#allocation2 + $0x450] sm:$0xf] %v589_v50  ;;  %592 = vst [vmem:[#allocation2 + $0x454] sm:$0xf] %v591_v51 }
  0x99   :  { %594 = vst [vmem:[#allocation2 + $0x458] sm:$0xf] %v593_v52  ;;  %v599_v54 = vld [vmem:[%s11426_s1 + $0x470] sm:$0xf]  ;;  %v601_v55 = vld [vmem:[%s11426_s1 + $0x464] sm:$0xf] }
  0x9a   :  { %596 = vst [vmem:[#allocation2 + $0x45c] sm:$0xff] %v595_v53   ;;  %600 = vst [vmem:[#allocation2 + $0x464] sm:$0xf] %v599_v54  ;;  %v603_v56 = vld [vmem:[%s11426_s1 + $0x474] sm:$0xf]  ;;  %v611_v60 = vld [vmem:[%s11426_s1 + $0x47c] sm:$0xff]  }
  0x9b   :  { %602 = vst [vmem:[#allocation2 + $0x468] sm:$0xf] %v601_v55  ;;  %v605_v57 = vld [vmem:[%s11426_s1 + $0x468] sm:$0xf]  ;;  %v607_v58 = vld [vmem:[%s11426_s1 + $0x478] sm:$0xf] }
  0x9c   :  { %604 = vst [vmem:[#allocation2 + $0x46c] sm:$0xf] %v603_v56  ;;  %606 = vst [vmem:[#allocation2 + $0x470] sm:$0xf] %v605_v57  ;;  %v609_v59 = vld [vmem:[%s11426_s1 + $0x46c] sm:$0xf] }
  0x9d   :  { %608 = vst [vmem:[#allocation2 + $0x474] sm:$0xf] %v607_v58  ;;  %v615_v61 = vld [vmem:[%s11426_s1 + $0x490] sm:$0xf]  ;;  %610 = vst [vmem:[#allocation2 + $0x478] sm:$0xf] %v609_v59 }
  0x9e   :  { %612 = vst [vmem:[#allocation2 + $0x47c] sm:$0xff] %v611_v60   ;;  %616 = vst [vmem:[#allocation2 + $0x484] sm:$0xf] %v615_v61  ;;  %v617_v62 = vld [vmem:[%s11426_s1 + $0x484] sm:$0xf]  ;;  %v627_v3 = vld [vmem:[%s11426_s1 + $0x49c] sm:$0xff]  }
  0x9f   :  { %v619_v63 = vld [vmem:[%s11426_s1 + $0x494] sm:$0xf]  ;;  %v621_v0 = vld [vmem:[%s11426_s1 + $0x488] sm:$0xf]  ;;  %618 = vst [vmem:[#allocation2 + $0x488] sm:$0xf] %v617_v62 }
  0xa0   :  { %620 = vst [vmem:[#allocation2 + $0x48c] sm:$0xf] %v619_v63  ;;  %622 = vst [vmem:[#allocation2 + $0x490] sm:$0xf] %v621_v0  ;;  %v623_v1 = vld [vmem:[%s11426_s1 + $0x498] sm:$0xf] }
  0xa1   :  { %v625_v2 = vld [vmem:[%s11426_s1 + $0x48c] sm:$0xf]  ;;  %624 = vst [vmem:[#allocation2 + $0x494] sm:$0xf] %v623_v1  ;;  %628 = vst [vmem:[#allocation2 + $0x49c] sm:$0xff] %v627_v3   ;;  %v643_v10 = vld [vmem:[%s11426_s1 + $0x4bc] sm:$0xff]  }
  0xa2   :  { %626 = vst [vmem:[#allocation2 + $0x498] sm:$0xf] %v625_v2  ;;  %v631_v4 = vld [vmem:[%s11426_s1 + $0x4b0] sm:$0xf]  ;;  %v633_v5 = vld [vmem:[%s11426_s1 + $0x4a4] sm:$0xf] }
  0xa3   :  { %v635_v6 = vld [vmem:[%s11426_s1 + $0x4b4] sm:$0xf]  ;;  %632 = vst [vmem:[#allocation2 + $0x4a4] sm:$0xf] %v631_v4  ;;  %634 = vst [vmem:[#allocation2 + $0x4a8] sm:$0xf] %v633_v5 }
  0xa4   :  { %636 = vst [vmem:[#allocation2 + $0x4ac] sm:$0xf] %v635_v6  ;;  %v637_v7 = vld [vmem:[%s11426_s1 + $0x4a8] sm:$0xf]  ;;  %v639_v8 = vld [vmem:[%s11426_s1 + $0x4b8] sm:$0xf] }
  0xa5   :  { %v641_v9 = vld [vmem:[%s11426_s1 + $0x4ac] sm:$0xf]  ;;  %638 = vst [vmem:[#allocation2 + $0x4b0] sm:$0xf] %v637_v7  ;;  %640 = vst [vmem:[#allocation2 + $0x4b4] sm:$0xf] %v639_v8 }
  0xa6   :  { %642 = vst [vmem:[#allocation2 + $0x4b8] sm:$0xf] %v641_v9  ;;  %v647_v11 = vld [vmem:[%s11426_s1 + $0x4d0] sm:$0xf]  ;;  %v649_v12 = vld [vmem:[%s11426_s1 + $0x4c4] sm:$0xf] }
  0xa7   :  { %644 = vst [vmem:[#allocation2 + $0x4bc] sm:$0xff] %v643_v10   ;;  %648 = vst [vmem:[#allocation2 + $0x4c4] sm:$0xf] %v647_v11  ;;  %v651_v13 = vld [vmem:[%s11426_s1 + $0x4d4] sm:$0xf]  ;;  %v659_v17 = vld [vmem:[%s11426_s1 + $0x4dc] sm:$0xff]  }
  0xa8   :  { %650 = vst [vmem:[#allocation2 + $0x4c8] sm:$0xf] %v649_v12  ;;  %v653_v14 = vld [vmem:[%s11426_s1 + $0x4c8] sm:$0xf]  ;;  %v655_v15 = vld [vmem:[%s11426_s1 + $0x4d8] sm:$0xf] }
  0xa9   :  { %652 = vst [vmem:[#allocation2 + $0x4cc] sm:$0xf] %v651_v13  ;;  %654 = vst [vmem:[#allocation2 + $0x4d0] sm:$0xf] %v653_v14  ;;  %v657_v16 = vld [vmem:[%s11426_s1 + $0x4cc] sm:$0xf] }
  0xaa   :  { %656 = vst [vmem:[#allocation2 + $0x4d4] sm:$0xf] %v655_v15  ;;  %v663_v18 = vld [vmem:[%s11426_s1 + $0x4f0] sm:$0xf]  ;;  %658 = vst [vmem:[#allocation2 + $0x4d8] sm:$0xf] %v657_v16 }
  0xab   :  { %660 = vst [vmem:[#allocation2 + $0x4dc] sm:$0xff] %v659_v17   ;;  %664 = vst [vmem:[#allocation2 + $0x4e4] sm:$0xf] %v663_v18  ;;  %v665_v19 = vld [vmem:[%s11426_s1 + $0x4e4] sm:$0xf]  ;;  %v675_v24 = vld [vmem:[%s11426_s1 + $0x4fc] sm:$0xff]  }
  0xac   :  { %v667_v20 = vld [vmem:[%s11426_s1 + $0x4f4] sm:$0xf]  ;;  %v669_v21 = vld [vmem:[%s11426_s1 + $0x4e8] sm:$0xf]  ;;  %666 = vst [vmem:[#allocation2 + $0x4e8] sm:$0xf] %v665_v19 }
  0xad   :  { %668 = vst [vmem:[#allocation2 + $0x4ec] sm:$0xf] %v667_v20  ;;  %670 = vst [vmem:[#allocation2 + $0x4f0] sm:$0xf] %v669_v21  ;;  %v671_v22 = vld [vmem:[%s11426_s1 + $0x4f8] sm:$0xf] }
  0xae   :  { %v673_v23 = vld [vmem:[%s11426_s1 + $0x4ec] sm:$0xf]  ;;  %672 = vst [vmem:[#allocation2 + $0x4f4] sm:$0xf] %v671_v22  ;;  %676 = vst [vmem:[#allocation2 + $0x4fc] sm:$0xff] %v675_v24   ;;  %v691_v31 = vld [vmem:[%s11426_s1 + $0x51c] sm:$0xff]  }
  0xaf   :  { %674 = vst [vmem:[#allocation2 + $0x4f8] sm:$0xf] %v673_v23  ;;  %v679_v25 = vld [vmem:[%s11426_s1 + $0x510] sm:$0xf]  ;;  %v681_v26 = vld [vmem:[%s11426_s1 + $0x504] sm:$0xf] }
  0xb0   :  { %v683_v27 = vld [vmem:[%s11426_s1 + $0x514] sm:$0xf]  ;;  %680 = vst [vmem:[#allocation2 + $0x504] sm:$0xf] %v679_v25  ;;  %682 = vst [vmem:[#allocation2 + $0x508] sm:$0xf] %v681_v26 }
  0xb1   :  { %684 = vst [vmem:[#allocation2 + $0x50c] sm:$0xf] %v683_v27  ;;  %v685_v28 = vld [vmem:[%s11426_s1 + $0x508] sm:$0xf]  ;;  %v687_v29 = vld [vmem:[%s11426_s1 + $0x518] sm:$0xf] }
  0xb2   :  { %v689_v30 = vld [vmem:[%s11426_s1 + $0x50c] sm:$0xf]  ;;  %686 = vst [vmem:[#allocation2 + $0x510] sm:$0xf] %v685_v28  ;;  %688 = vst [vmem:[#allocation2 + $0x514] sm:$0xf] %v687_v29 }
  0xb3   :  { %690 = vst [vmem:[#allocation2 + $0x518] sm:$0xf] %v689_v30  ;;  %v695_v32 = vld [vmem:[%s11426_s1 + $0x530] sm:$0xf]  ;;  %v697_v33 = vld [vmem:[%s11426_s1 + $0x524] sm:$0xf] }
  0xb4   :  { %692 = vst [vmem:[#allocation2 + $0x51c] sm:$0xff] %v691_v31   ;;  %696 = vst [vmem:[#allocation2 + $0x524] sm:$0xf] %v695_v32  ;;  %v699_v34 = vld [vmem:[%s11426_s1 + $0x534] sm:$0xf]  ;;  %v707_v38 = vld [vmem:[%s11426_s1 + $0x53c] sm:$0xff]  }
  0xb5   :  { %698 = vst [vmem:[#allocation2 + $0x528] sm:$0xf] %v697_v33  ;;  %v701_v35 = vld [vmem:[%s11426_s1 + $0x528] sm:$0xf]  ;;  %v703_v36 = vld [vmem:[%s11426_s1 + $0x538] sm:$0xf] }
  0xb6   :  { %700 = vst [vmem:[#allocation2 + $0x52c] sm:$0xf] %v699_v34  ;;  %702 = vst [vmem:[#allocation2 + $0x530] sm:$0xf] %v701_v35  ;;  %v705_v37 = vld [vmem:[%s11426_s1 + $0x52c] sm:$0xf] }
  0xb7   :  { %704 = vst [vmem:[#allocation2 + $0x534] sm:$0xf] %v703_v36  ;;  %v711_v39 = vld [vmem:[%s11426_s1 + $0x550] sm:$0xf]  ;;  %706 = vst [vmem:[#allocation2 + $0x538] sm:$0xf] %v705_v37 }
  0xb8   :  { %708 = vst [vmem:[#allocation2 + $0x53c] sm:$0xff] %v707_v38   ;;  %712 = vst [vmem:[#allocation2 + $0x544] sm:$0xf] %v711_v39  ;;  %v713_v40 = vld [vmem:[%s11426_s1 + $0x544] sm:$0xf]  ;;  %v723_v45 = vld [vmem:[%s11426_s1 + $0x55c] sm:$0xff]  }
  0xb9   :  { %v715_v41 = vld [vmem:[%s11426_s1 + $0x554] sm:$0xf]  ;;  %v717_v42 = vld [vmem:[%s11426_s1 + $0x548] sm:$0xf]  ;;  %714 = vst [vmem:[#allocation2 + $0x548] sm:$0xf] %v713_v40 }
  0xba   :  { %716 = vst [vmem:[#allocation2 + $0x54c] sm:$0xf] %v715_v41  ;;  %718 = vst [vmem:[#allocation2 + $0x550] sm:$0xf] %v717_v42  ;;  %v719_v43 = vld [vmem:[%s11426_s1 + $0x558] sm:$0xf] }
  0xbb   :  { %v721_v44 = vld [vmem:[%s11426_s1 + $0x54c] sm:$0xf]  ;;  %720 = vst [vmem:[#allocation2 + $0x554] sm:$0xf] %v719_v43  ;;  %724 = vst [vmem:[#allocation2 + $0x55c] sm:$0xff] %v723_v45   ;;  %v739_v52 = vld [vmem:[%s11426_s1 + $0x57c] sm:$0xff]  }
  0xbc   :  { %722 = vst [vmem:[#allocation2 + $0x558] sm:$0xf] %v721_v44  ;;  %v727_v46 = vld [vmem:[%s11426_s1 + $0x570] sm:$0xf]  ;;  %v729_v47 = vld [vmem:[%s11426_s1 + $0x564] sm:$0xf] }
  0xbd   :  { %v731_v48 = vld [vmem:[%s11426_s1 + $0x574] sm:$0xf]  ;;  %728 = vst [vmem:[#allocation2 + $0x564] sm:$0xf] %v727_v46  ;;  %730 = vst [vmem:[#allocation2 + $0x568] sm:$0xf] %v729_v47 }
  0xbe   :  { %732 = vst [vmem:[#allocation2 + $0x56c] sm:$0xf] %v731_v48  ;;  %v733_v49 = vld [vmem:[%s11426_s1 + $0x568] sm:$0xf]  ;;  %v735_v50 = vld [vmem:[%s11426_s1 + $0x578] sm:$0xf] }
  0xbf   :  { %v737_v51 = vld [vmem:[%s11426_s1 + $0x56c] sm:$0xf]  ;;  %734 = vst [vmem:[#allocation2 + $0x570] sm:$0xf] %v733_v49  ;;  %736 = vst [vmem:[#allocation2 + $0x574] sm:$0xf] %v735_v50 }
  0xc0   :  { %738 = vst [vmem:[#allocation2 + $0x578] sm:$0xf] %v737_v51  ;;  %v743_v53 = vld [vmem:[%s11426_s1 + $0x590] sm:$0xf]  ;;  %v745_v54 = vld [vmem:[%s11426_s1 + $0x584] sm:$0xf] }
  0xc1   :  { %740 = vst [vmem:[#allocation2 + $0x57c] sm:$0xff] %v739_v52   ;;  %744 = vst [vmem:[#allocation2 + $0x584] sm:$0xf] %v743_v53  ;;  %v747_v55 = vld [vmem:[%s11426_s1 + $0x594] sm:$0xf]  ;;  %v755_v59 = vld [vmem:[%s11426_s1 + $0x59c] sm:$0xff]  }
  0xc2   :  { %746 = vst [vmem:[#allocation2 + $0x588] sm:$0xf] %v745_v54  ;;  %v749_v56 = vld [vmem:[%s11426_s1 + $0x588] sm:$0xf]  ;;  %v751_v57 = vld [vmem:[%s11426_s1 + $0x598] sm:$0xf] }
  0xc3   :  { %748 = vst [vmem:[#allocation2 + $0x58c] sm:$0xf] %v747_v55  ;;  %750 = vst [vmem:[#allocation2 + $0x590] sm:$0xf] %v749_v56  ;;  %v753_v58 = vld [vmem:[%s11426_s1 + $0x58c] sm:$0xf] }
  0xc4   :  { %752 = vst [vmem:[#allocation2 + $0x594] sm:$0xf] %v751_v57  ;;  %v759_v60 = vld [vmem:[%s11426_s1 + $0x5b0] sm:$0xf]  ;;  %754 = vst [vmem:[#allocation2 + $0x598] sm:$0xf] %v753_v58 }
  0xc5   :  { %756 = vst [vmem:[#allocation2 + $0x59c] sm:$0xff] %v755_v59   ;;  %760 = vst [vmem:[#allocation2 + $0x5a4] sm:$0xf] %v759_v60  ;;  %v761_v61 = vld [vmem:[%s11426_s1 + $0x5a4] sm:$0xf]  ;;  %v771_v2 = vld [vmem:[%s11426_s1 + $0x5bc] sm:$0xff]  }
  0xc6   :  { %v763_v62 = vld [vmem:[%s11426_s1 + $0x5b4] sm:$0xf]  ;;  %v765_v63 = vld [vmem:[%s11426_s1 + $0x5a8] sm:$0xf]  ;;  %762 = vst [vmem:[#allocation2 + $0x5a8] sm:$0xf] %v761_v61 }
  0xc7   :  { %764 = vst [vmem:[#allocation2 + $0x5ac] sm:$0xf] %v763_v62  ;;  %766 = vst [vmem:[#allocation2 + $0x5b0] sm:$0xf] %v765_v63  ;;  %v767_v0 = vld [vmem:[%s11426_s1 + $0x5b8] sm:$0xf] }
  0xc8   :  { %v769_v1 = vld [vmem:[%s11426_s1 + $0x5ac] sm:$0xf]  ;;  %768 = vst [vmem:[#allocation2 + $0x5b4] sm:$0xf] %v767_v0  ;;  %772 = vst [vmem:[#allocation2 + $0x5bc] sm:$0xff] %v771_v2   ;;  %v787_v9 = vld [vmem:[%s11426_s1 + $0x5dc] sm:$0xff]  }
  0xc9   :  { %770 = vst [vmem:[#allocation2 + $0x5b8] sm:$0xf] %v769_v1  ;;  %v775_v3 = vld [vmem:[%s11426_s1 + $0x5d0] sm:$0xf]  ;;  %v777_v4 = vld [vmem:[%s11426_s1 + $0x5c4] sm:$0xf] }
  0xca   :  { %v779_v5 = vld [vmem:[%s11426_s1 + $0x5d4] sm:$0xf]  ;;  %776 = vst [vmem:[#allocation2 + $0x5c4] sm:$0xf] %v775_v3  ;;  %778 = vst [vmem:[#allocation2 + $0x5c8] sm:$0xf] %v777_v4 }
  0xcb   :  { %780 = vst [vmem:[#allocation2 + $0x5cc] sm:$0xf] %v779_v5  ;;  %v781_v6 = vld [vmem:[%s11426_s1 + $0x5c8] sm:$0xf]  ;;  %v783_v7 = vld [vmem:[%s11426_s1 + $0x5d8] sm:$0xf] }
  0xcc   :  { %v785_v8 = vld [vmem:[%s11426_s1 + $0x5cc] sm:$0xf]  ;;  %782 = vst [vmem:[#allocation2 + $0x5d0] sm:$0xf] %v781_v6  ;;  %784 = vst [vmem:[#allocation2 + $0x5d4] sm:$0xf] %v783_v7 }
  0xcd   :  { %786 = vst [vmem:[#allocation2 + $0x5d8] sm:$0xf] %v785_v8  ;;  %v791_v10 = vld [vmem:[%s11426_s1 + $0x5f0] sm:$0xf]  ;;  %v793_v11 = vld [vmem:[%s11426_s1 + $0x5e4] sm:$0xf] }
  0xce   :  { %788 = vst [vmem:[#allocation2 + $0x5dc] sm:$0xff] %v787_v9   ;;  %792 = vst [vmem:[#allocation2 + $0x5e4] sm:$0xf] %v791_v10  ;;  %v795_v12 = vld [vmem:[%s11426_s1 + $0x5f4] sm:$0xf]  ;;  %v803_v16 = vld [vmem:[%s11426_s1 + $0x5fc] sm:$0xff]  }
  0xcf   :  { %794 = vst [vmem:[#allocation2 + $0x5e8] sm:$0xf] %v793_v11  ;;  %v797_v13 = vld [vmem:[%s11426_s1 + $0x5e8] sm:$0xf]  ;;  %v799_v14 = vld [vmem:[%s11426_s1 + $0x5f8] sm:$0xf] }
  0xd0   :  { %796 = vst [vmem:[#allocation2 + $0x5ec] sm:$0xf] %v795_v12  ;;  %798 = vst [vmem:[#allocation2 + $0x5f0] sm:$0xf] %v797_v13  ;;  %v801_v15 = vld [vmem:[%s11426_s1 + $0x5ec] sm:$0xf] }
  0xd1   :  { %800 = vst [vmem:[#allocation2 + $0x5f4] sm:$0xf] %v799_v14  ;;  %v807_v17 = vld [vmem:[%s11426_s1 + $0x610] sm:$0xf]  ;;  %802 = vst [vmem:[#allocation2 + $0x5f8] sm:$0xf] %v801_v15 }
  0xd2   :  { %804 = vst [vmem:[#allocation2 + $0x5fc] sm:$0xff] %v803_v16   ;;  %808 = vst [vmem:[#allocation2 + $0x604] sm:$0xf] %v807_v17  ;;  %v809_v18 = vld [vmem:[%s11426_s1 + $0x604] sm:$0xf] }
  0xd3   :  { %v811_v19 = vld [vmem:[%s11426_s1 + $0x614] sm:$0xf]  ;;  %v813_v20 = vld [vmem:[%s11426_s1 + $0x608] sm:$0xf]  ;;  %810 = vst [vmem:[#allocation2 + $0x608] sm:$0xf] %v809_v18 }
  0xd4   :  { %812 = vst [vmem:[#allocation2 + $0x60c] sm:$0xf] %v811_v19  ;;  %814 = vst [vmem:[#allocation2 + $0x610] sm:$0xf] %v813_v20  ;;  %v815_v21 = vld [vmem:[%s11426_s1 + $0x618] sm:$0xf] }
  0xd5   :  { %v817_v22 = vld [vmem:[%s11426_s1 + $0x60c] sm:$0xf]  ;;  %v819_v23 = vld [vmem:[%s11426_s1 + $0x61c] sm:$0xf]  ;;  %816 = vst [vmem:[#allocation2 + $0x614] sm:$0xf] %v815_v21 }
  0xd6   :  { %818 = vst [vmem:[#allocation2 + $0x618] sm:$0xf] %v817_v22  ;;  %820 = vst [vmem:[#allocation2 + $0x61c] sm:$0xf] %v819_v23 }
  0xd7   :  { %1635 = vsyncadd [#allocation12], 25088  ;;  %v1654_v24 = vld [vmem:[%s11427_s2] sm:$0xf]  ;;  %v1656_v25 = vld [vmem:[%s11427_s2 + $0x8] sm:$0xf] }
  0xd8   :  { %1655 = vst [vmem:[#allocation3] sm:$0xf] %v1654_v24  ;;  %1657 = vst [vmem:[#allocation3 + $0x4] sm:$0xf] %v1656_v25  ;;  %v1658_v26 = vld [vmem:[%s11427_s2 + $0x4] sm:$0xf] }
  0xd9   :  { %v1660_v27 = vld [vmem:[%s11427_s2 + $0xc] sm:$0xff]   ;;  %v1664_v28 = vld [vmem:[%s11427_s2 + $0x18] sm:$0xf]  ;;  %1659 = vst [vmem:[#allocation3 + $0x8] sm:$0xf] %v1658_v26  ;;  %v1668_v30 = vld [vmem:[%s11427_s2 + $0x1c] sm:$0xff]  }
  0xda   :  { %1661 = vst [vmem:[#allocation3 + $0xc] sm:$0xff] %v1660_v27   ;;  %1665 = vst [vmem:[#allocation3 + $0x14] sm:$0xf] %v1664_v28  ;;  %v1666_v29 = vld [vmem:[%s11427_s2 + $0x14] sm:$0xf]  ;;  %v1676_v33 = vld [vmem:[%s11427_s2 + $0x2c] sm:$0xff]  }
  0xdb   :  { %v1672_v31 = vld [vmem:[%s11427_s2 + $0x28] sm:$0xf]  ;;  %1667 = vst [vmem:[#allocation3 + $0x18] sm:$0xf] %v1666_v29  ;;  %1669 = vst [vmem:[#allocation3 + $0x1c] sm:$0xff] %v1668_v30   ;;  %v1684_v36 = vld [vmem:[%s11427_s2 + $0x3c] sm:$0xff]  }
  0xdc   :  { %1673 = vst [vmem:[#allocation3 + $0x24] sm:$0xf] %v1672_v31  ;;  %v1674_v32 = vld [vmem:[%s11427_s2 + $0x24] sm:$0xf]  ;;  %v1680_v34 = vld [vmem:[%s11427_s2 + $0x38] sm:$0xf] }
  0xdd   :  { %1675 = vst [vmem:[#allocation3 + $0x28] sm:$0xf] %v1674_v32  ;;  %1677 = vst [vmem:[#allocation3 + $0x2c] sm:$0xff] %v1676_v33   ;;  %v1682_v35 = vld [vmem:[%s11427_s2 + $0x34] sm:$0xf]  ;;  %v1692_v39 = vld [vmem:[%s11427_s2 + $0x4c] sm:$0xff]  }
  0xde   :  { %1681 = vst [vmem:[#allocation3 + $0x34] sm:$0xf] %v1680_v34  ;;  %v1688_v37 = vld [vmem:[%s11427_s2 + $0x48] sm:$0xf]  ;;  %1683 = vst [vmem:[#allocation3 + $0x38] sm:$0xf] %v1682_v35 }
  0xdf   :  { %1685 = vst [vmem:[#allocation3 + $0x3c] sm:$0xff] %v1684_v36   ;;  %1689 = vst [vmem:[#allocation3 + $0x44] sm:$0xf] %v1688_v37  ;;  %v1690_v38 = vld [vmem:[%s11427_s2 + $0x44] sm:$0xf]  ;;  %v1700_v42 = vld [vmem:[%s11427_s2 + $0x5c] sm:$0xff]  }
  0xe0   :  { %v1696_v40 = vld [vmem:[%s11427_s2 + $0x58] sm:$0xf]  ;;  %1691 = vst [vmem:[#allocation3 + $0x48] sm:$0xf] %v1690_v38  ;;  %1693 = vst [vmem:[#allocation3 + $0x4c] sm:$0xff] %v1692_v39   ;;  %v1708_v45 = vld [vmem:[%s11427_s2 + $0x6c] sm:$0xff]  }
  0xe1   :  { %1697 = vst [vmem:[#allocation3 + $0x54] sm:$0xf] %v1696_v40  ;;  %v1698_v41 = vld [vmem:[%s11427_s2 + $0x54] sm:$0xf]  ;;  %v1704_v43 = vld [vmem:[%s11427_s2 + $0x68] sm:$0xf] }
  0xe2   :  { %1699 = vst [vmem:[#allocation3 + $0x58] sm:$0xf] %v1698_v41  ;;  %1701 = vst [vmem:[#allocation3 + $0x5c] sm:$0xff] %v1700_v42   ;;  %v1706_v44 = vld [vmem:[%s11427_s2 + $0x64] sm:$0xf]  ;;  %v1716_v48 = vld [vmem:[%s11427_s2 + $0x7c] sm:$0xff]  }
  0xe3   :  { %1705 = vst [vmem:[#allocation3 + $0x64] sm:$0xf] %v1704_v43  ;;  %v1712_v46 = vld [vmem:[%s11427_s2 + $0x78] sm:$0xf]  ;;  %1707 = vst [vmem:[#allocation3 + $0x68] sm:$0xf] %v1706_v44 }
  0xe4   :  { %1709 = vst [vmem:[#allocation3 + $0x6c] sm:$0xff] %v1708_v45   ;;  %1713 = vst [vmem:[#allocation3 + $0x74] sm:$0xf] %v1712_v46  ;;  %v1714_v47 = vld [vmem:[%s11427_s2 + $0x74] sm:$0xf]  ;;  %v1724_v51 = vld [vmem:[%s11427_s2 + $0x8c] sm:$0xff]  }
  0xe5   :  { %v1720_v49 = vld [vmem:[%s11427_s2 + $0x88] sm:$0xf]  ;;  %1715 = vst [vmem:[#allocation3 + $0x78] sm:$0xf] %v1714_v47  ;;  %1717 = vst [vmem:[#allocation3 + $0x7c] sm:$0xff] %v1716_v48   ;;  %v1732_v54 = vld [vmem:[%s11427_s2 + $0x9c] sm:$0xff]  }
  0xe6   :  { %1721 = vst [vmem:[#allocation3 + $0x84] sm:$0xf] %v1720_v49  ;;  %v1722_v50 = vld [vmem:[%s11427_s2 + $0x84] sm:$0xf]  ;;  %v1728_v52 = vld [vmem:[%s11427_s2 + $0x98] sm:$0xf] }
  0xe7   :  { %1723 = vst [vmem:[#allocation3 + $0x88] sm:$0xf] %v1722_v50  ;;  %1725 = vst [vmem:[#allocation3 + $0x8c] sm:$0xff] %v1724_v51   ;;  %v1730_v53 = vld [vmem:[%s11427_s2 + $0x94] sm:$0xf]  ;;  %v1740_v57 = vld [vmem:[%s11427_s2 + $0xac] sm:$0xff]  }
  0xe8   :  { %1729 = vst [vmem:[#allocation3 + $0x94] sm:$0xf] %v1728_v52  ;;  %v1736_v55 = vld [vmem:[%s11427_s2 + $0xa8] sm:$0xf]  ;;  %1731 = vst [vmem:[#allocation3 + $0x98] sm:$0xf] %v1730_v53 }
  0xe9   :  { %1733 = vst [vmem:[#allocation3 + $0x9c] sm:$0xff] %v1732_v54   ;;  %1737 = vst [vmem:[#allocation3 + $0xa4] sm:$0xf] %v1736_v55  ;;  %v1738_v56 = vld [vmem:[%s11427_s2 + $0xa4] sm:$0xf]  ;;  %v1748_v60 = vld [vmem:[%s11427_s2 + $0xbc] sm:$0xff]  }
  0xea   :  { %v1744_v58 = vld [vmem:[%s11427_s2 + $0xb8] sm:$0xf]  ;;  %1739 = vst [vmem:[#allocation3 + $0xa8] sm:$0xf] %v1738_v56  ;;  %1741 = vst [vmem:[#allocation3 + $0xac] sm:$0xff] %v1740_v57   ;;  %v1756_v63 = vld [vmem:[%s11427_s2 + $0xcc] sm:$0xff]  }
  0xeb   :  { %1745 = vst [vmem:[#allocation3 + $0xb4] sm:$0xf] %v1744_v58  ;;  %v1746_v59 = vld [vmem:[%s11427_s2 + $0xb4] sm:$0xf]  ;;  %v1752_v61 = vld [vmem:[%s11427_s2 + $0xc8] sm:$0xf] }
  0xec   :  { %1747 = vst [vmem:[#allocation3 + $0xb8] sm:$0xf] %v1746_v59  ;;  %1749 = vst [vmem:[#allocation3 + $0xbc] sm:$0xff] %v1748_v60   ;;  %v1754_v62 = vld [vmem:[%s11427_s2 + $0xc4] sm:$0xf]  ;;  %v1764_v2 = vld [vmem:[%s11427_s2 + $0xdc] sm:$0xff]  }
  0xed   :  { %1753 = vst [vmem:[#allocation3 + $0xc4] sm:$0xf] %v1752_v61  ;;  %v1760_v0 = vld [vmem:[%s11427_s2 + $0xd8] sm:$0xf]  ;;  %1755 = vst [vmem:[#allocation3 + $0xc8] sm:$0xf] %v1754_v62 }
  0xee   :  { %1757 = vst [vmem:[#allocation3 + $0xcc] sm:$0xff] %v1756_v63   ;;  %1761 = vst [vmem:[#allocation3 + $0xd4] sm:$0xf] %v1760_v0  ;;  %v1762_v1 = vld [vmem:[%s11427_s2 + $0xd4] sm:$0xf]  ;;  %v1772_v5 = vld [vmem:[%s11427_s2 + $0xec] sm:$0xff]  }
  0xef   :  { %v1768_v3 = vld [vmem:[%s11427_s2 + $0xe8] sm:$0xf]  ;;  %1763 = vst [vmem:[#allocation3 + $0xd8] sm:$0xf] %v1762_v1  ;;  %1765 = vst [vmem:[#allocation3 + $0xdc] sm:$0xff] %v1764_v2   ;;  %v1780_v8 = vld [vmem:[%s11427_s2 + $0xfc] sm:$0xff]  }
  0xf0   :  { %1769 = vst [vmem:[#allocation3 + $0xe4] sm:$0xf] %v1768_v3  ;;  %v1770_v4 = vld [vmem:[%s11427_s2 + $0xe4] sm:$0xf]  ;;  %v1776_v6 = vld [vmem:[%s11427_s2 + $0xf8] sm:$0xf] }
  0xf1   :  { %1771 = vst [vmem:[#allocation3 + $0xe8] sm:$0xf] %v1770_v4  ;;  %1773 = vst [vmem:[#allocation3 + $0xec] sm:$0xff] %v1772_v5   ;;  %v1778_v7 = vld [vmem:[%s11427_s2 + $0xf4] sm:$0xf]  ;;  %v1788_v11 = vld [vmem:[%s11427_s2 + $0x10c] sm:$0xff]  }
  0xf2   :  { %1777 = vst [vmem:[#allocation3 + $0xf4] sm:$0xf] %v1776_v6  ;;  %v1784_v9 = vld [vmem:[%s11427_s2 + $0x108] sm:$0xf]  ;;  %1779 = vst [vmem:[#allocation3 + $0xf8] sm:$0xf] %v1778_v7 }
  0xf3   :  { %1781 = vst [vmem:[#allocation3 + $0xfc] sm:$0xff] %v1780_v8   ;;  %1785 = vst [vmem:[#allocation3 + $0x104] sm:$0xf] %v1784_v9  ;;  %v1786_v10 = vld [vmem:[%s11427_s2 + $0x104] sm:$0xf]  ;;  %v1796_v14 = vld [vmem:[%s11427_s2 + $0x11c] sm:$0xff]  }
  0xf4   :  { %v1792_v12 = vld [vmem:[%s11427_s2 + $0x118] sm:$0xf]  ;;  %1787 = vst [vmem:[#allocation3 + $0x108] sm:$0xf] %v1786_v10  ;;  %1789 = vst [vmem:[#allocation3 + $0x10c] sm:$0xff] %v1788_v11   ;;  %v1804_v17 = vld [vmem:[%s11427_s2 + $0x12c] sm:$0xff]  }
  0xf5   :  { %1793 = vst [vmem:[#allocation3 + $0x114] sm:$0xf] %v1792_v12  ;;  %v1794_v13 = vld [vmem:[%s11427_s2 + $0x114] sm:$0xf]  ;;  %v1800_v15 = vld [vmem:[%s11427_s2 + $0x128] sm:$0xf] }
  0xf6   :  { %1795 = vst [vmem:[#allocation3 + $0x118] sm:$0xf] %v1794_v13  ;;  %1797 = vst [vmem:[#allocation3 + $0x11c] sm:$0xff] %v1796_v14   ;;  %v1802_v16 = vld [vmem:[%s11427_s2 + $0x124] sm:$0xf]  ;;  %v1812_v20 = vld [vmem:[%s11427_s2 + $0x13c] sm:$0xff]  }
  0xf7   :  { %1801 = vst [vmem:[#allocation3 + $0x124] sm:$0xf] %v1800_v15  ;;  %v1808_v18 = vld [vmem:[%s11427_s2 + $0x138] sm:$0xf]  ;;  %1803 = vst [vmem:[#allocation3 + $0x128] sm:$0xf] %v1802_v16 }
  0xf8   :  { %1805 = vst [vmem:[#allocation3 + $0x12c] sm:$0xff] %v1804_v17   ;;  %1809 = vst [vmem:[#allocation3 + $0x134] sm:$0xf] %v1808_v18  ;;  %v1810_v19 = vld [vmem:[%s11427_s2 + $0x134] sm:$0xf]  ;;  %v1820_v23 = vld [vmem:[%s11427_s2 + $0x14c] sm:$0xff]  }
  0xf9   :  { %v1816_v21 = vld [vmem:[%s11427_s2 + $0x148] sm:$0xf]  ;;  %1811 = vst [vmem:[#allocation3 + $0x138] sm:$0xf] %v1810_v19  ;;  %1813 = vst [vmem:[#allocation3 + $0x13c] sm:$0xff] %v1812_v20   ;;  %v1828_v26 = vld [vmem:[%s11427_s2 + $0x15c] sm:$0xff]  }
  0xfa   :  { %1817 = vst [vmem:[#allocation3 + $0x144] sm:$0xf] %v1816_v21  ;;  %v1818_v22 = vld [vmem:[%s11427_s2 + $0x144] sm:$0xf]  ;;  %v1824_v24 = vld [vmem:[%s11427_s2 + $0x158] sm:$0xf] }
  0xfb   :  { %1819 = vst [vmem:[#allocation3 + $0x148] sm:$0xf] %v1818_v22  ;;  %1821 = vst [vmem:[#allocation3 + $0x14c] sm:$0xff] %v1820_v23   ;;  %v1826_v25 = vld [vmem:[%s11427_s2 + $0x154] sm:$0xf]  ;;  %v1836_v29 = vld [vmem:[%s11427_s2 + $0x16c] sm:$0xff]  }
  0xfc   :  { %1825 = vst [vmem:[#allocation3 + $0x154] sm:$0xf] %v1824_v24  ;;  %v1832_v27 = vld [vmem:[%s11427_s2 + $0x168] sm:$0xf]  ;;  %1827 = vst [vmem:[#allocation3 + $0x158] sm:$0xf] %v1826_v25 }
  0xfd   :  { %1829 = vst [vmem:[#allocation3 + $0x15c] sm:$0xff] %v1828_v26   ;;  %1833 = vst [vmem:[#allocation3 + $0x164] sm:$0xf] %v1832_v27  ;;  %v1834_v28 = vld [vmem:[%s11427_s2 + $0x164] sm:$0xf]  ;;  %v1844_v32 = vld [vmem:[%s11427_s2 + $0x17c] sm:$0xff]  }
  0xfe   :  { %v1840_v30 = vld [vmem:[%s11427_s2 + $0x178] sm:$0xf]  ;;  %1835 = vst [vmem:[#allocation3 + $0x168] sm:$0xf] %v1834_v28  ;;  %1837 = vst [vmem:[#allocation3 + $0x16c] sm:$0xff] %v1836_v29   ;;  %v1852_v35 = vld [vmem:[%s11427_s2 + $0x18c] sm:$0xff]  }
  0xff   :  { %1841 = vst [vmem:[#allocation3 + $0x174] sm:$0xf] %v1840_v30  ;;  %v1842_v31 = vld [vmem:[%s11427_s2 + $0x174] sm:$0xf]  ;;  %v1848_v33 = vld [vmem:[%s11427_s2 + $0x188] sm:$0xf] }
 0x100   :  { %1843 = vst [vmem:[#allocation3 + $0x178] sm:$0xf] %v1842_v31  ;;  %1845 = vst [vmem:[#allocation3 + $0x17c] sm:$0xff] %v1844_v32   ;;  %v1850_v34 = vld [vmem:[%s11427_s2 + $0x184] sm:$0xf]  ;;  %v1860_v38 = vld [vmem:[%s11427_s2 + $0x19c] sm:$0xff]  }
 0x101   :  { %1849 = vst [vmem:[#allocation3 + $0x184] sm:$0xf] %v1848_v33  ;;  %v1856_v36 = vld [vmem:[%s11427_s2 + $0x198] sm:$0xf]  ;;  %1851 = vst [vmem:[#allocation3 + $0x188] sm:$0xf] %v1850_v34 }
 0x102   :  { %1853 = vst [vmem:[#allocation3 + $0x18c] sm:$0xff] %v1852_v35   ;;  %1857 = vst [vmem:[#allocation3 + $0x194] sm:$0xf] %v1856_v36  ;;  %v1858_v37 = vld [vmem:[%s11427_s2 + $0x194] sm:$0xf]  ;;  %v1868_v41 = vld [vmem:[%s11427_s2 + $0x1ac] sm:$0xff]  }
 0x103   :  { %v1864_v39 = vld [vmem:[%s11427_s2 + $0x1a8] sm:$0xf]  ;;  %1859 = vst [vmem:[#allocation3 + $0x198] sm:$0xf] %v1858_v37  ;;  %1861 = vst [vmem:[#allocation3 + $0x19c] sm:$0xff] %v1860_v38   ;;  %v1876_v44 = vld [vmem:[%s11427_s2 + $0x1bc] sm:$0xff]  }
 0x104   :  { %1865 = vst [vmem:[#allocation3 + $0x1a4] sm:$0xf] %v1864_v39  ;;  %v1866_v40 = vld [vmem:[%s11427_s2 + $0x1a4] sm:$0xf]  ;;  %v1872_v42 = vld [vmem:[%s11427_s2 + $0x1b8] sm:$0xf] }
 0x105   :  { %1867 = vst [vmem:[#allocation3 + $0x1a8] sm:$0xf] %v1866_v40  ;;  %1869 = vst [vmem:[#allocation3 + $0x1ac] sm:$0xff] %v1868_v41   ;;  %v1874_v43 = vld [vmem:[%s11427_s2 + $0x1b4] sm:$0xf]  ;;  %v1884_v47 = vld [vmem:[%s11427_s2 + $0x1cc] sm:$0xff]  }
 0x106   :  { %1873 = vst [vmem:[#allocation3 + $0x1b4] sm:$0xf] %v1872_v42  ;;  %v1880_v45 = vld [vmem:[%s11427_s2 + $0x1c8] sm:$0xf]  ;;  %1875 = vst [vmem:[#allocation3 + $0x1b8] sm:$0xf] %v1874_v43 }
 0x107   :  { %1877 = vst [vmem:[#allocation3 + $0x1bc] sm:$0xff] %v1876_v44   ;;  %1881 = vst [vmem:[#allocation3 + $0x1c4] sm:$0xf] %v1880_v45  ;;  %v1882_v46 = vld [vmem:[%s11427_s2 + $0x1c4] sm:$0xf]  ;;  %v1892_v50 = vld [vmem:[%s11427_s2 + $0x1dc] sm:$0xff]  }
 0x108   :  { %v1888_v48 = vld [vmem:[%s11427_s2 + $0x1d8] sm:$0xf]  ;;  %1883 = vst [vmem:[#allocation3 + $0x1c8] sm:$0xf] %v1882_v46  ;;  %1885 = vst [vmem:[#allocation3 + $0x1cc] sm:$0xff] %v1884_v47   ;;  %v1900_v53 = vld [vmem:[%s11427_s2 + $0x1ec] sm:$0xff]  }
 0x109   :  { %1889 = vst [vmem:[#allocation3 + $0x1d4] sm:$0xf] %v1888_v48  ;;  %v1890_v49 = vld [vmem:[%s11427_s2 + $0x1d4] sm:$0xf]  ;;  %v1896_v51 = vld [vmem:[%s11427_s2 + $0x1e8] sm:$0xf] }
 0x10a   :  { %1891 = vst [vmem:[#allocation3 + $0x1d8] sm:$0xf] %v1890_v49  ;;  %1893 = vst [vmem:[#allocation3 + $0x1dc] sm:$0xff] %v1892_v50   ;;  %v1898_v52 = vld [vmem:[%s11427_s2 + $0x1e4] sm:$0xf] }
 0x10b   :  { %1897 = vst [vmem:[#allocation3 + $0x1e4] sm:$0xf] %v1896_v51  ;;  %v1904_v54 = vld [vmem:[%s11427_s2 + $0x1f8] sm:$0xf]  ;;  %1899 = vst [vmem:[#allocation3 + $0x1e8] sm:$0xf] %v1898_v52 }
 0x10c   :  { %1901 = vst [vmem:[#allocation3 + $0x1ec] sm:$0xff] %v1900_v53   ;;  %1905 = vst [vmem:[#allocation3 + $0x1f4] sm:$0xf] %v1904_v54  ;;  %v1906_v55 = vld [vmem:[%s11427_s2 + $0x1f4] sm:$0xf] }
 0x10d   :  { %v1908_v56 = vld [vmem:[%s11427_s2 + $0x1fc] sm:$0xf]  ;;  %1907 = vst [vmem:[#allocation3 + $0x1f8] sm:$0xf] %v1906_v55 }
 0x10e   :  { %1909 = vst [vmem:[#allocation3 + $0x1fc] sm:$0xf] %v1908_v56 }
 0x10f   :  { %2196 = vsyncadd [#allocation12 + $0x1], 8192  ;;  %v9323_v57 = vld [vmem:[%s11428_s3] sm:$0xff]  ;;  %v9328_v58 = vld [vmem:[%s11428_s3 + $0x8] sm:$0xff] }
 0x110   :  { %v9333_v59 = vld [vmem:[%s11428_s3 + $0x10] sm:$0xff]  ;;  %v9338_v60 = vld [vmem:[%s11428_s3 + $0x18] sm:$0xff]  ;;  %v9343_v61 = vld [vmem:[%s11428_s3 + $0x20] sm:$0xff] }
 0x111   :  { %v9348_v62 = vld [vmem:[%s11428_s3 + $0x28] sm:$0xff]  ;;  %v9353_v63 = vld [vmem:[%s11428_s3 + $0x30] sm:$0xff]  ;;  %v9358_v0 = vld [vmem:[%s11428_s3 + $0x38] sm:$0xff] }
 0x112   :  { %v9363_v1 = vld [vmem:[%s11428_s3 + $0x40] sm:$0xff]  ;;  %v9368_v2 = vld [vmem:[%s11428_s3 + $0x48] sm:$0xff]  ;;  %v9373_v3 = vld [vmem:[%s11428_s3 + $0x50] sm:$0xff] }
 0x113   :  { %v9378_v4 = vld [vmem:[%s11428_s3 + $0x58] sm:$0xff]  ;;  %v9383_v5 = vld [vmem:[%s11428_s3 + $0x60] sm:$0xff]  ;;  %v9388_v6 = vld [vmem:[%s11428_s3 + $0x68] sm:$0xff] }
 0x114   :  { %v9393_v7 = vld [vmem:[%s11428_s3 + $0x70] sm:$0xff]  ;;  %v9398_v8 = vld [vmem:[%s11428_s3 + $0x78] sm:$0xff] }
 0x115   :  { %2269 = vsyncadd [#allocation12 + $0x2], 2048  ;;  %v9403_v9 = vld [vmem:[%s11429_s4] sm:$0xff]  ;;  %v9408_v10 = vld [vmem:[%s11429_s4 + $0x8] sm:$0xff] }
 0x116   :  { %v9413_v11 = vld [vmem:[%s11429_s4 + $0x10] sm:$0xff]  ;;  %v9418_v12 = vld [vmem:[%s11429_s4 + $0x18] sm:$0xff]  ;;  %v9423_v13 = vld [vmem:[%s11429_s4 + $0x20] sm:$0xff] }
 0x117   :  { %v9428_v14 = vld [vmem:[%s11429_s4 + $0x28] sm:$0xff]  ;;  %v9433_v15 = vld [vmem:[%s11429_s4 + $0x30] sm:$0xff]  ;;  %v9438_v16 = vld [vmem:[%s11429_s4 + $0x38] sm:$0xff] }
 0x118   :  { %2326 = vsyncadd [#allocation12 + $0x3], 1024  ;;  %v9443_v17 = vld [vmem:[%s11430_s5] sm:$0xff]  ;;  %v9448_v18 = vld [vmem:[%s11430_s5 + $0x8] sm:$0xff] }
 0x119   :  { %v9453_v19 = vld [vmem:[%s11430_s5 + $0x10] sm:$0xff]  ;;  %v9458_v20 = vld [vmem:[%s11430_s5 + $0x18] sm:$0xff] }
 0x11a   :  { %2375 = vsyncadd [#allocation12 + $0x4], 512  ;;  %v9463_v21 = vld [vmem:[%s11431_s6] sm:$0xff]  ;;  %v9468_v22 = vld [vmem:[%s11431_s6 + $0x8] sm:$0xff] }
 0x11b   :  { %2420 = vsyncadd [#allocation12 + $0x5], 256  ;;  %v9473_v23 = vld [vmem:[%s11432_s7] sm:$0xff]  ;;  %v9478_v24 = vld [vmem:[%s11432_s7 + $0x8] sm:$0xff] }
 0x11c   :  { %11438 = vst [vmem:[#allocation36_spill] sm:$0xff] %v9478_v24  ;;  %v9483_v25 = vld [vmem:[%s11432_s7 + $0x10] sm:$0xff]  ;;  %v9488_v26 = vld [vmem:[%s11432_s7 + $0x18] sm:$0xff] }
 0x11d   :  { %11439 = vst [vmem:[#allocation37_spill] sm:$0xff] %v9483_v25  ;;  %11440 = vst [vmem:[#allocation38_spill] sm:$0xff] %v9488_v26 }
 0x11e   :  { %2469 = vsyncadd [#allocation12 + $0x6], 512  ;;  %v2488_v27 = vld [vmem:[%s11433_s8] sm:$0xf]  ;;  %v2490_v28 = vld [vmem:[%s11433_s8 + $0x8] sm:$0xf] }
 0x11f   :  { %2489 = vst [vmem:[#allocation9] sm:$0xf] %v2488_v27  ;;  %2491 = vst [vmem:[#allocation9 + $0x4] sm:$0xf] %v2490_v28  ;;  %v2492_v29 = vld [vmem:[%s11433_s8 + $0x4] sm:$0xf] }
 0x120   :  { %v2494_v30 = vld [vmem:[%s11433_s8 + $0xc] sm:$0xff]   ;;  %v2498_v31 = vld [vmem:[%s11433_s8 + $0x18] sm:$0xf]  ;;  %2493 = vst [vmem:[#allocation9 + $0x8] sm:$0xf] %v2492_v29  ;;  %v2502_v33 = vld [vmem:[%s11433_s8 + $0x1c] sm:$0xff]  }
 0x121   :  { %2495 = vst [vmem:[#allocation9 + $0xc] sm:$0xff] %v2494_v30   ;;  %2499 = vst [vmem:[#allocation9 + $0x14] sm:$0xf] %v2498_v31  ;;  %v2500_v32 = vld [vmem:[%s11433_s8 + $0x14] sm:$0xf]  ;;  %v2510_v36 = vld [vmem:[%s11433_s8 + $0x2c] sm:$0xff]  }
 0x122   :  { %v2506_v34 = vld [vmem:[%s11433_s8 + $0x28] sm:$0xf]  ;;  %2501 = vst [vmem:[#allocation9 + $0x18] sm:$0xf] %v2500_v32  ;;  %2503 = vst [vmem:[#allocation9 + $0x1c] sm:$0xff] %v2502_v33   ;;  %v2518_v39 = vld [vmem:[%s11433_s8 + $0x3c] sm:$0xff]  }
 0x123   :  { %2507 = vst [vmem:[#allocation9 + $0x24] sm:$0xf] %v2506_v34  ;;  %v2508_v35 = vld [vmem:[%s11433_s8 + $0x24] sm:$0xf]  ;;  %v2514_v37 = vld [vmem:[%s11433_s8 + $0x38] sm:$0xf] }
 0x124   :  { %2509 = vst [vmem:[#allocation9 + $0x28] sm:$0xf] %v2508_v35  ;;  %2511 = vst [vmem:[#allocation9 + $0x2c] sm:$0xff] %v2510_v36   ;;  %v2516_v38 = vld [vmem:[%s11433_s8 + $0x34] sm:$0xf]  ;;  %v2526_v42 = vld [vmem:[%s11433_s8 + $0x4c] sm:$0xff]  }
 0x125   :  { %2515 = vst [vmem:[#allocation9 + $0x34] sm:$0xf] %v2514_v37  ;;  %v2522_v40 = vld [vmem:[%s11433_s8 + $0x48] sm:$0xf]  ;;  %2517 = vst [vmem:[#allocation9 + $0x38] sm:$0xf] %v2516_v38 }
 0x126   :  { %2519 = vst [vmem:[#allocation9 + $0x3c] sm:$0xff] %v2518_v39   ;;  %2523 = vst [vmem:[#allocation9 + $0x44] sm:$0xf] %v2522_v40  ;;  %v2524_v41 = vld [vmem:[%s11433_s8 + $0x44] sm:$0xf]  ;;  %v2534_v45 = vld [vmem:[%s11433_s8 + $0x5c] sm:$0xff]  }
 0x127   :  { %v2530_v43 = vld [vmem:[%s11433_s8 + $0x58] sm:$0xf]  ;;  %2525 = vst [vmem:[#allocation9 + $0x48] sm:$0xf] %v2524_v41  ;;  %2527 = vst [vmem:[#allocation9 + $0x4c] sm:$0xff] %v2526_v42   ;;  %v2542_v48 = vld [vmem:[%s11433_s8 + $0x6c] sm:$0xff]  }
 0x128   :  { %2531 = vst [vmem:[#allocation9 + $0x54] sm:$0xf] %v2530_v43  ;;  %v2532_v44 = vld [vmem:[%s11433_s8 + $0x54] sm:$0xf]  ;;  %v2538_v46 = vld [vmem:[%s11433_s8 + $0x68] sm:$0xf] }
 0x129   :  { %2533 = vst [vmem:[#allocation9 + $0x58] sm:$0xf] %v2532_v44  ;;  %2535 = vst [vmem:[#allocation9 + $0x5c] sm:$0xff] %v2534_v45   ;;  %v2540_v47 = vld [vmem:[%s11433_s8 + $0x64] sm:$0xf] }
 0x12a   :  { %2539 = vst [vmem:[#allocation9 + $0x64] sm:$0xf] %v2538_v46  ;;  %v2546_v49 = vld [vmem:[%s11433_s8 + $0x78] sm:$0xf]  ;;  %2541 = vst [vmem:[#allocation9 + $0x68] sm:$0xf] %v2540_v47 }
 0x12b   :  { %2543 = vst [vmem:[#allocation9 + $0x6c] sm:$0xff] %v2542_v48   ;;  %2547 = vst [vmem:[#allocation9 + $0x74] sm:$0xf] %v2546_v49  ;;  %v2548_v50 = vld [vmem:[%s11433_s8 + $0x74] sm:$0xf] }
 0x12c   :  { %v2550_v51 = vld [vmem:[%s11433_s8 + $0x7c] sm:$0xf]  ;;  %2549 = vst [vmem:[#allocation9 + $0x78] sm:$0xf] %v2548_v50 }
 0x12d   :  { %2551 = vst [vmem:[#allocation9 + $0x7c] sm:$0xf] %v2550_v51 }
 0x12e   :  { %2646 = vsyncadd [#allocation12 + $0x7], 2048  ;;  %v2665_v52 = vld [vmem:[%s11434_s9] sm:$0xf]  ;;  %v2667_v53 = vld [vmem:[%s11434_s9 + $0x10] sm:$0xf] }
 0x12f   :  { %2666 = vst [vmem:[#allocation10] sm:$0xf] %v2665_v52  ;;  %2668 = vst [vmem:[#allocation10 + $0x4] sm:$0xf] %v2667_v53  ;;  %v2669_v54 = vld [vmem:[%s11434_s9 + $0x4] sm:$0xf] }
 0x130   :  { %v2671_v55 = vld [vmem:[%s11434_s9 + $0x14] sm:$0xf]  ;;  %v2673_v56 = vld [vmem:[%s11434_s9 + $0x8] sm:$0xf]  ;;  %2670 = vst [vmem:[#allocation10 + $0x8] sm:$0xf] %v2669_v54 }
 0x131   :  { %2672 = vst [vmem:[#allocation10 + $0xc] sm:$0xf] %v2671_v55  ;;  %2674 = vst [vmem:[#allocation10 + $0x10] sm:$0xf] %v2673_v56  ;;  %v2675_v27 = vld [vmem:[%s11434_s9 + $0x18] sm:$0xf] }
 0x132   :  { %v2677_v28 = vld [vmem:[%s11434_s9 + $0xc] sm:$0xf]  ;;  %v2679_v29 = vld [vmem:[%s11434_s9 + $0x1c] sm:$0xff]   ;;  %2676 = vst [vmem:[#allocation10 + $0x14] sm:$0xf] %v2675_v27 }
 0x133   :  { %2678 = vst [vmem:[#allocation10 + $0x18] sm:$0xf] %v2677_v28  ;;  %2680 = vst [vmem:[#allocation10 + $0x1c] sm:$0xff] %v2679_v29   ;;  %v2683_v30 = vld [vmem:[%s11434_s9 + $0x30] sm:$0xf]  ;;  %v2695_v36 = vld [vmem:[%s11434_s9 + $0x3c] sm:$0xff]  }
 0x134   :  { %v2685_v31 = vld [vmem:[%s11434_s9 + $0x24] sm:$0xf]  ;;  %v2687_v32 = vld [vmem:[%s11434_s9 + $0x34] sm:$0xf]  ;;  %2684 = vst [vmem:[#allocation10 + $0x24] sm:$0xf] %v2683_v30 }
 0x135   :  { %2686 = vst [vmem:[#allocation10 + $0x28] sm:$0xf] %v2685_v31  ;;  %2688 = vst [vmem:[#allocation10 + $0x2c] sm:$0xf] %v2687_v32  ;;  %v2689_v33 = vld [vmem:[%s11434_s9 + $0x28] sm:$0xf] }
 0x136   :  { %v2691_v34 = vld [vmem:[%s11434_s9 + $0x38] sm:$0xf]  ;;  %v2693_v35 = vld [vmem:[%s11434_s9 + $0x2c] sm:$0xf]  ;;  %2690 = vst [vmem:[#allocation10 + $0x30] sm:$0xf] %v2689_v33 }
 0x137   :  { %2692 = vst [vmem:[#allocation10 + $0x34] sm:$0xf] %v2691_v34  ;;  %2694 = vst [vmem:[#allocation10 + $0x38] sm:$0xf] %v2693_v35  ;;  %v2699_v37 = vld [vmem:[%s11434_s9 + $0x50] sm:$0xf] }
 0x138   :  { %v2701_v38 = vld [vmem:[%s11434_s9 + $0x44] sm:$0xf]  ;;  %2696 = vst [vmem:[#allocation10 + $0x3c] sm:$0xff] %v2695_v36   ;;  %2700 = vst [vmem:[#allocation10 + $0x44] sm:$0xf] %v2699_v37  ;;  %v2711_v43 = vld [vmem:[%s11434_s9 + $0x5c] sm:$0xff]  }
 0x139   :  { %2702 = vst [vmem:[#allocation10 + $0x48] sm:$0xf] %v2701_v38  ;;  %v2703_v39 = vld [vmem:[%s11434_s9 + $0x54] sm:$0xf]  ;;  %v2705_v40 = vld [vmem:[%s11434_s9 + $0x48] sm:$0xf] }
 0x13a   :  { %v2707_v41 = vld [vmem:[%s11434_s9 + $0x58] sm:$0xf]  ;;  %2704 = vst [vmem:[#allocation10 + $0x4c] sm:$0xf] %v2703_v39  ;;  %2706 = vst [vmem:[#allocation10 + $0x50] sm:$0xf] %v2705_v40 }
 0x13b   :  { %2708 = vst [vmem:[#allocation10 + $0x54] sm:$0xf] %v2707_v41  ;;  %v2709_v42 = vld [vmem:[%s11434_s9 + $0x4c] sm:$0xf]  ;;  %v2715_v44 = vld [vmem:[%s11434_s9 + $0x70] sm:$0xf] }
 0x13c   :  { %2710 = vst [vmem:[#allocation10 + $0x58] sm:$0xf] %v2709_v42  ;;  %2712 = vst [vmem:[#allocation10 + $0x5c] sm:$0xff] %v2711_v43   ;;  %v2717_v45 = vld [vmem:[%s11434_s9 + $0x64] sm:$0xf]  ;;  %v2727_v50 = vld [vmem:[%s11434_s9 + $0x7c] sm:$0xff]  }
 0x13d   :  { %2716 = vst [vmem:[#allocation10 + $0x64] sm:$0xf] %v2715_v44  ;;  %v2719_v46 = vld [vmem:[%s11434_s9 + $0x74] sm:$0xf]  ;;  %v2721_v47 = vld [vmem:[%s11434_s9 + $0x68] sm:$0xf] }
 0x13e   :  { %2718 = vst [vmem:[#allocation10 + $0x68] sm:$0xf] %v2717_v45  ;;  %2720 = vst [vmem:[#allocation10 + $0x6c] sm:$0xf] %v2719_v46  ;;  %v2723_v48 = vld [vmem:[%s11434_s9 + $0x78] sm:$0xf] }
 0x13f   :  { %2722 = vst [vmem:[#allocation10 + $0x70] sm:$0xf] %v2721_v47  ;;  %v2725_v49 = vld [vmem:[%s11434_s9 + $0x6c] sm:$0xf]  ;;  %2724 = vst [vmem:[#allocation10 + $0x74] sm:$0xf] %v2723_v48 }
 0x140   :  { %2726 = vst [vmem:[#allocation10 + $0x78] sm:$0xf] %v2725_v49  ;;  %2728 = vst [vmem:[#allocation10 + $0x7c] sm:$0xff] %v2727_v50   ;;  %v2731_v51 = vld [vmem:[%s11434_s9 + $0x90] sm:$0xf]  ;;  %v2743_v27 = vld [vmem:[%s11434_s9 + $0x9c] sm:$0xff]  }
 0x141   :  { %v2733_v52 = vld [vmem:[%s11434_s9 + $0x84] sm:$0xf]  ;;  %v2735_v53 = vld [vmem:[%s11434_s9 + $0x94] sm:$0xf]  ;;  %2732 = vst [vmem:[#allocation10 + $0x84] sm:$0xf] %v2731_v51 }
 0x142   :  { %2734 = vst [vmem:[#allocation10 + $0x88] sm:$0xf] %v2733_v52  ;;  %2736 = vst [vmem:[#allocation10 + $0x8c] sm:$0xf] %v2735_v53  ;;  %v2737_v54 = vld [vmem:[%s11434_s9 + $0x88] sm:$0xf] }
 0x143   :  { %v2739_v55 = vld [vmem:[%s11434_s9 + $0x98] sm:$0xf]  ;;  %v2741_v56 = vld [vmem:[%s11434_s9 + $0x8c] sm:$0xf]  ;;  %2738 = vst [vmem:[#allocation10 + $0x90] sm:$0xf] %v2737_v54 }
 0x144   :  { %2740 = vst [vmem:[#allocation10 + $0x94] sm:$0xf] %v2739_v55  ;;  %2742 = vst [vmem:[#allocation10 + $0x98] sm:$0xf] %v2741_v56  ;;  %v2747_v28 = vld [vmem:[%s11434_s9 + $0xb0] sm:$0xf] }
 0x145   :  { %v2749_v29 = vld [vmem:[%s11434_s9 + $0xa4] sm:$0xf]  ;;  %2744 = vst [vmem:[#allocation10 + $0x9c] sm:$0xff] %v2743_v27   ;;  %2748 = vst [vmem:[#allocation10 + $0xa4] sm:$0xf] %v2747_v28  ;;  %v2759_v34 = vld [vmem:[%s11434_s9 + $0xbc] sm:$0xff]  }
 0x146   :  { %2750 = vst [vmem:[#allocation10 + $0xa8] sm:$0xf] %v2749_v29  ;;  %v2751_v30 = vld [vmem:[%s11434_s9 + $0xb4] sm:$0xf]  ;;  %v2753_v31 = vld [vmem:[%s11434_s9 + $0xa8] sm:$0xf] }
 0x147   :  { %v2755_v32 = vld [vmem:[%s11434_s9 + $0xb8] sm:$0xf]  ;;  %2752 = vst [vmem:[#allocation10 + $0xac] sm:$0xf] %v2751_v30  ;;  %2754 = vst [vmem:[#allocation10 + $0xb0] sm:$0xf] %v2753_v31 }
 0x148   :  { %2756 = vst [vmem:[#allocation10 + $0xb4] sm:$0xf] %v2755_v32  ;;  %v2757_v33 = vld [vmem:[%s11434_s9 + $0xac] sm:$0xf]  ;;  %v2763_v35 = vld [vmem:[%s11434_s9 + $0xd0] sm:$0xf] }
 0x149   :  { %2758 = vst [vmem:[#allocation10 + $0xb8] sm:$0xf] %v2757_v33  ;;  %2760 = vst [vmem:[#allocation10 + $0xbc] sm:$0xff] %v2759_v34   ;;  %v2765_v36 = vld [vmem:[%s11434_s9 + $0xc4] sm:$0xf]  ;;  %v2775_v41 = vld [vmem:[%s11434_s9 + $0xdc] sm:$0xff]  }
 0x14a   :  { %2764 = vst [vmem:[#allocation10 + $0xc4] sm:$0xf] %v2763_v35  ;;  %v2767_v37 = vld [vmem:[%s11434_s9 + $0xd4] sm:$0xf]  ;;  %v2769_v38 = vld [vmem:[%s11434_s9 + $0xc8] sm:$0xf] }
 0x14b   :  { %2766 = vst [vmem:[#allocation10 + $0xc8] sm:$0xf] %v2765_v36  ;;  %2768 = vst [vmem:[#allocation10 + $0xcc] sm:$0xf] %v2767_v37  ;;  %v2771_v39 = vld [vmem:[%s11434_s9 + $0xd8] sm:$0xf] }
 0x14c   :  { %2770 = vst [vmem:[#allocation10 + $0xd0] sm:$0xf] %v2769_v38  ;;  %v2773_v40 = vld [vmem:[%s11434_s9 + $0xcc] sm:$0xf]  ;;  %2772 = vst [vmem:[#allocation10 + $0xd4] sm:$0xf] %v2771_v39 }
 0x14d   :  { %2774 = vst [vmem:[#allocation10 + $0xd8] sm:$0xf] %v2773_v40  ;;  %2776 = vst [vmem:[#allocation10 + $0xdc] sm:$0xff] %v2775_v41   ;;  %v2779_v42 = vld [vmem:[%s11434_s9 + $0xf0] sm:$0xf]  ;;  %v2791_v48 = vld [vmem:[%s11434_s9 + $0xfc] sm:$0xff]  }
 0x14e   :  { %v2781_v43 = vld [vmem:[%s11434_s9 + $0xe4] sm:$0xf]  ;;  %v2783_v44 = vld [vmem:[%s11434_s9 + $0xf4] sm:$0xf]  ;;  %2780 = vst [vmem:[#allocation10 + $0xe4] sm:$0xf] %v2779_v42 }
 0x14f   :  { %2782 = vst [vmem:[#allocation10 + $0xe8] sm:$0xf] %v2781_v43  ;;  %2784 = vst [vmem:[#allocation10 + $0xec] sm:$0xf] %v2783_v44  ;;  %v2785_v45 = vld [vmem:[%s11434_s9 + $0xe8] sm:$0xf] }
 0x150   :  { %v2787_v46 = vld [vmem:[%s11434_s9 + $0xf8] sm:$0xf]  ;;  %v2789_v47 = vld [vmem:[%s11434_s9 + $0xec] sm:$0xf]  ;;  %2786 = vst [vmem:[#allocation10 + $0xf0] sm:$0xf] %v2785_v45 }
 0x151   :  { %2788 = vst [vmem:[#allocation10 + $0xf4] sm:$0xf] %v2787_v46  ;;  %2790 = vst [vmem:[#allocation10 + $0xf8] sm:$0xf] %v2789_v47  ;;  %v2795_v49 = vld [vmem:[%s11434_s9 + $0x110] sm:$0xf] }
 0x152   :  { %v2797_v50 = vld [vmem:[%s11434_s9 + $0x104] sm:$0xf]  ;;  %2792 = vst [vmem:[#allocation10 + $0xfc] sm:$0xff] %v2791_v48   ;;  %2796 = vst [vmem:[#allocation10 + $0x104] sm:$0xf] %v2795_v49  ;;  %v2807_v55 = vld [vmem:[%s11434_s9 + $0x11c] sm:$0xff]  }
 0x153   :  { %2798 = vst [vmem:[#allocation10 + $0x108] sm:$0xf] %v2797_v50  ;;  %v2799_v51 = vld [vmem:[%s11434_s9 + $0x114] sm:$0xf]  ;;  %v2801_v52 = vld [vmem:[%s11434_s9 + $0x108] sm:$0xf] }
 0x154   :  { %v2803_v53 = vld [vmem:[%s11434_s9 + $0x118] sm:$0xf]  ;;  %2800 = vst [vmem:[#allocation10 + $0x10c] sm:$0xf] %v2799_v51  ;;  %2802 = vst [vmem:[#allocation10 + $0x110] sm:$0xf] %v2801_v52 }
 0x155   :  { %2804 = vst [vmem:[#allocation10 + $0x114] sm:$0xf] %v2803_v53  ;;  %v2805_v54 = vld [vmem:[%s11434_s9 + $0x10c] sm:$0xf]  ;;  %v2811_v56 = vld [vmem:[%s11434_s9 + $0x130] sm:$0xf] }
 0x156   :  { %2806 = vst [vmem:[#allocation10 + $0x118] sm:$0xf] %v2805_v54  ;;  %2808 = vst [vmem:[#allocation10 + $0x11c] sm:$0xff] %v2807_v55   ;;  %v2813_v27 = vld [vmem:[%s11434_s9 + $0x124] sm:$0xf]  ;;  %v2823_v32 = vld [vmem:[%s11434_s9 + $0x13c] sm:$0xff]  }
 0x157   :  { %2812 = vst [vmem:[#allocation10 + $0x124] sm:$0xf] %v2811_v56  ;;  %v2815_v28 = vld [vmem:[%s11434_s9 + $0x134] sm:$0xf]  ;;  %v2817_v29 = vld [vmem:[%s11434_s9 + $0x128] sm:$0xf] }
 0x158   :  { %2814 = vst [vmem:[#allocation10 + $0x128] sm:$0xf] %v2813_v27  ;;  %2816 = vst [vmem:[#allocation10 + $0x12c] sm:$0xf] %v2815_v28  ;;  %v2819_v30 = vld [vmem:[%s11434_s9 + $0x138] sm:$0xf] }
 0x159   :  { %2818 = vst [vmem:[#allocation10 + $0x130] sm:$0xf] %v2817_v29  ;;  %v2821_v31 = vld [vmem:[%s11434_s9 + $0x12c] sm:$0xf]  ;;  %2820 = vst [vmem:[#allocation10 + $0x134] sm:$0xf] %v2819_v30 }
 0x15a   :  { %2822 = vst [vmem:[#allocation10 + $0x138] sm:$0xf] %v2821_v31  ;;  %2824 = vst [vmem:[#allocation10 + $0x13c] sm:$0xff] %v2823_v32   ;;  %v2827_v33 = vld [vmem:[%s11434_s9 + $0x150] sm:$0xf]  ;;  %v2839_v39 = vld [vmem:[%s11434_s9 + $0x15c] sm:$0xff]  }
 0x15b   :  { %v2829_v34 = vld [vmem:[%s11434_s9 + $0x144] sm:$0xf]  ;;  %v2831_v35 = vld [vmem:[%s11434_s9 + $0x154] sm:$0xf]  ;;  %2828 = vst [vmem:[#allocation10 + $0x144] sm:$0xf] %v2827_v33 }
 0x15c   :  { %2830 = vst [vmem:[#allocation10 + $0x148] sm:$0xf] %v2829_v34  ;;  %2832 = vst [vmem:[#allocation10 + $0x14c] sm:$0xf] %v2831_v35  ;;  %v2833_v36 = vld [vmem:[%s11434_s9 + $0x148] sm:$0xf] }
 0x15d   :  { %v2835_v37 = vld [vmem:[%s11434_s9 + $0x158] sm:$0xf]  ;;  %v2837_v38 = vld [vmem:[%s11434_s9 + $0x14c] sm:$0xf]  ;;  %2834 = vst [vmem:[#allocation10 + $0x150] sm:$0xf] %v2833_v36 }
 0x15e   :  { %2836 = vst [vmem:[#allocation10 + $0x154] sm:$0xf] %v2835_v37  ;;  %2838 = vst [vmem:[#allocation10 + $0x158] sm:$0xf] %v2837_v38  ;;  %v2843_v40 = vld [vmem:[%s11434_s9 + $0x170] sm:$0xf] }
 0x15f   :  { %v2845_v41 = vld [vmem:[%s11434_s9 + $0x164] sm:$0xf]  ;;  %2840 = vst [vmem:[#allocation10 + $0x15c] sm:$0xff] %v2839_v39   ;;  %2844 = vst [vmem:[#allocation10 + $0x164] sm:$0xf] %v2843_v40  ;;  %v2855_v46 = vld [vmem:[%s11434_s9 + $0x17c] sm:$0xff]  }
 0x160   :  { %2846 = vst [vmem:[#allocation10 + $0x168] sm:$0xf] %v2845_v41  ;;  %v2847_v42 = vld [vmem:[%s11434_s9 + $0x174] sm:$0xf]  ;;  %v2849_v43 = vld [vmem:[%s11434_s9 + $0x168] sm:$0xf] }
 0x161   :  { %v2851_v44 = vld [vmem:[%s11434_s9 + $0x178] sm:$0xf]  ;;  %2848 = vst [vmem:[#allocation10 + $0x16c] sm:$0xf] %v2847_v42  ;;  %2850 = vst [vmem:[#allocation10 + $0x170] sm:$0xf] %v2849_v43 }
 0x162   :  { %2852 = vst [vmem:[#allocation10 + $0x174] sm:$0xf] %v2851_v44  ;;  %v2853_v45 = vld [vmem:[%s11434_s9 + $0x16c] sm:$0xf]  ;;  %v2859_v47 = vld [vmem:[%s11434_s9 + $0x190] sm:$0xf] }
 0x163   :  { %2854 = vst [vmem:[#allocation10 + $0x178] sm:$0xf] %v2853_v45  ;;  %2856 = vst [vmem:[#allocation10 + $0x17c] sm:$0xff] %v2855_v46   ;;  %v2861_v48 = vld [vmem:[%s11434_s9 + $0x184] sm:$0xf]  ;;  %v2871_v53 = vld [vmem:[%s11434_s9 + $0x19c] sm:$0xff]  }
 0x164   :  { %2860 = vst [vmem:[#allocation10 + $0x184] sm:$0xf] %v2859_v47  ;;  %v2863_v49 = vld [vmem:[%s11434_s9 + $0x194] sm:$0xf]  ;;  %v2865_v50 = vld [vmem:[%s11434_s9 + $0x188] sm:$0xf] }
 0x165   :  { %2862 = vst [vmem:[#allocation10 + $0x188] sm:$0xf] %v2861_v48  ;;  %2864 = vst [vmem:[#allocation10 + $0x18c] sm:$0xf] %v2863_v49  ;;  %v2867_v51 = vld [vmem:[%s11434_s9 + $0x198] sm:$0xf] }
 0x166   :  { %2866 = vst [vmem:[#allocation10 + $0x190] sm:$0xf] %v2865_v50  ;;  %v2869_v52 = vld [vmem:[%s11434_s9 + $0x18c] sm:$0xf]  ;;  %2868 = vst [vmem:[#allocation10 + $0x194] sm:$0xf] %v2867_v51 }
 0x167   :  { %2870 = vst [vmem:[#allocation10 + $0x198] sm:$0xf] %v2869_v52  ;;  %2872 = vst [vmem:[#allocation10 + $0x19c] sm:$0xff] %v2871_v53   ;;  %v2875_v54 = vld [vmem:[%s11434_s9 + $0x1b0] sm:$0xf]  ;;  %v2887_v30 = vld [vmem:[%s11434_s9 + $0x1bc] sm:$0xff]  }
 0x168   :  { %v2877_v55 = vld [vmem:[%s11434_s9 + $0x1a4] sm:$0xf]  ;;  %v2879_v56 = vld [vmem:[%s11434_s9 + $0x1b4] sm:$0xf]  ;;  %2876 = vst [vmem:[#allocation10 + $0x1a4] sm:$0xf] %v2875_v54 }
 0x169   :  { %2878 = vst [vmem:[#allocation10 + $0x1a8] sm:$0xf] %v2877_v55  ;;  %2880 = vst [vmem:[#allocation10 + $0x1ac] sm:$0xf] %v2879_v56  ;;  %v2881_v27 = vld [vmem:[%s11434_s9 + $0x1a8] sm:$0xf] }
 0x16a   :  { %v2883_v28 = vld [vmem:[%s11434_s9 + $0x1b8] sm:$0xf]  ;;  %v2885_v29 = vld [vmem:[%s11434_s9 + $0x1ac] sm:$0xf]  ;;  %2882 = vst [vmem:[#allocation10 + $0x1b0] sm:$0xf] %v2881_v27 }
 0x16b   :  { %2884 = vst [vmem:[#allocation10 + $0x1b4] sm:$0xf] %v2883_v28  ;;  %2886 = vst [vmem:[#allocation10 + $0x1b8] sm:$0xf] %v2885_v29  ;;  %v2891_v31 = vld [vmem:[%s11434_s9 + $0x1d0] sm:$0xf] }
 0x16c   :  { %v2893_v32 = vld [vmem:[%s11434_s9 + $0x1c4] sm:$0xf]  ;;  %2888 = vst [vmem:[#allocation10 + $0x1bc] sm:$0xff] %v2887_v30   ;;  %2892 = vst [vmem:[#allocation10 + $0x1c4] sm:$0xf] %v2891_v31  ;;  %v2903_v37 = vld [vmem:[%s11434_s9 + $0x1dc] sm:$0xff]  }
 0x16d   :  { %2894 = vst [vmem:[#allocation10 + $0x1c8] sm:$0xf] %v2893_v32  ;;  %v2895_v33 = vld [vmem:[%s11434_s9 + $0x1d4] sm:$0xf]  ;;  %v2897_v34 = vld [vmem:[%s11434_s9 + $0x1c8] sm:$0xf] }
 0x16e   :  { %v2899_v35 = vld [vmem:[%s11434_s9 + $0x1d8] sm:$0xf]  ;;  %2896 = vst [vmem:[#allocation10 + $0x1cc] sm:$0xf] %v2895_v33  ;;  %2898 = vst [vmem:[#allocation10 + $0x1d0] sm:$0xf] %v2897_v34 }
 0x16f   :  { %2900 = vst [vmem:[#allocation10 + $0x1d4] sm:$0xf] %v2899_v35  ;;  %v2901_v36 = vld [vmem:[%s11434_s9 + $0x1cc] sm:$0xf]  ;;  %v2907_v38 = vld [vmem:[%s11434_s9 + $0x1f0] sm:$0xf] }
 0x170   :  { %2902 = vst [vmem:[#allocation10 + $0x1d8] sm:$0xf] %v2901_v36  ;;  %2904 = vst [vmem:[#allocation10 + $0x1dc] sm:$0xff] %v2903_v37   ;;  %v2909_v39 = vld [vmem:[%s11434_s9 + $0x1e4] sm:$0xf] }
 0x171   :  { %2908 = vst [vmem:[#allocation10 + $0x1e4] sm:$0xf] %v2907_v38  ;;  %v2911_v40 = vld [vmem:[%s11434_s9 + $0x1f4] sm:$0xf]  ;;  %v2913_v41 = vld [vmem:[%s11434_s9 + $0x1e8] sm:$0xf] }
 0x172   :  { %2910 = vst [vmem:[#allocation10 + $0x1e8] sm:$0xf] %v2909_v39  ;;  %2912 = vst [vmem:[#allocation10 + $0x1ec] sm:$0xf] %v2911_v40  ;;  %v2915_v42 = vld [vmem:[%s11434_s9 + $0x1f8] sm:$0xf] }
 0x173   :  { %2914 = vst [vmem:[#allocation10 + $0x1f0] sm:$0xf] %v2913_v41  ;;  %v2917_v43 = vld [vmem:[%s11434_s9 + $0x1ec] sm:$0xf]  ;;  %v2919_v44 = vld [vmem:[%s11434_s9 + $0x1fc] sm:$0xf] }
 0x174   :  { %2916 = vst [vmem:[#allocation10 + $0x1f4] sm:$0xf] %v2915_v42  ;;  %2918 = vst [vmem:[#allocation10 + $0x1f8] sm:$0xf] %v2917_v43 }
 0x175   :  { %2920 = vst [vmem:[#allocation10 + $0x1fc] sm:$0xf] %v2919_v44 }
 0x176   :  { %3207 = vsyncadd [#allocation12 + $0x8], 8192  ;;  %v3226_v45 = vld [vmem:[%s11435_s10] sm:$0xf]  ;;  %v3228_v46 = vld [vmem:[%s11435_s10 + $0x1c] sm:$0xf] }
 0x177   :  { %3227 = vst [vmem:[#allocation11] sm:$0xf] %v3226_v45  ;;  %3229 = vst [vmem:[#allocation11 + $0x4] sm:$0xf] %v3228_v46  ;;  %v3230_v47 = vld [vmem:[%s11435_s10 + $0x4] sm:$0xf] }
 0x178   :  { %v3232_v48 = vld [vmem:[%s11435_s10 + $0x20] sm:$0xf]  ;;  %v3234_v49 = vld [vmem:[%s11435_s10 + $0x8] sm:$0xf]  ;;  %3231 = vst [vmem:[#allocation11 + $0x8] sm:$0xf] %v3230_v47 }
 0x179   :  { %3233 = vst [vmem:[#allocation11 + $0xc] sm:$0xf] %v3232_v48  ;;  %3235 = vst [vmem:[#allocation11 + $0x10] sm:$0xf] %v3234_v49  ;;  %v3236_v50 = vld [vmem:[%s11435_s10 + $0x24] sm:$0xf] }
 0x17a   :  { %v3238_v51 = vld [vmem:[%s11435_s10 + $0xc] sm:$0xf]  ;;  %v3240_v52 = vld [vmem:[%s11435_s10 + $0x28] sm:$0xf]  ;;  %3237 = vst [vmem:[#allocation11 + $0x14] sm:$0xf] %v3236_v50 }
 0x17b   :  { %3239 = vst [vmem:[#allocation11 + $0x18] sm:$0xf] %v3238_v51  ;;  %3241 = vst [vmem:[#allocation11 + $0x1c] sm:$0xf] %v3240_v52  ;;  %v3242_v53 = vld [vmem:[%s11435_s10 + $0x10] sm:$0xf] }
 0x17c   :  { %v3244_v54 = vld [vmem:[%s11435_s10 + $0x2c] sm:$0xf]  ;;  %v3246_v55 = vld [vmem:[%s11435_s10 + $0x14] sm:$0xf]  ;;  %3243 = vst [vmem:[#allocation11 + $0x20] sm:$0xf] %v3242_v53 }
 0x17d   :  { %3245 = vst [vmem:[#allocation11 + $0x24] sm:$0xf] %v3244_v54  ;;  %3247 = vst [vmem:[#allocation11 + $0x28] sm:$0xf] %v3246_v55  ;;  %v3248_v56 = vld [vmem:[%s11435_s10 + $0x30] sm:$0xf] }
 0x17e   :  { %v3250_v27 = vld [vmem:[%s11435_s10 + $0x18] sm:$0xf]  ;;  %3249 = vst [vmem:[#allocation11 + $0x2c] sm:$0xf] %v3248_v56  ;;  %v3256_v29 = vld [vmem:[%s11435_s10 + $0x54] sm:$0xf] }
 0x17f   :  { %v3252_v28 = vld [vmem:[%s11435_s10 + $0x34] sm:$0xff]   ;;  %3251 = vst [vmem:[#allocation11 + $0x30] sm:$0xf] %v3250_v27  ;;  %v3258_v30 = vld [vmem:[%s11435_s10 + $0x3c] sm:$0xf]  ;;  %v3280_v41 = vld [vmem:[%s11435_s10 + $0x6c] sm:$0xff]  }
 0x180   :  { %3253 = vst [vmem:[#allocation11 + $0x34] sm:$0xff] %v3252_v28   ;;  %v3260_v31 = vld [vmem:[%s11435_s10 + $0x58] sm:$0xf]  ;;  %3257 = vst [vmem:[#allocation11 + $0x3c] sm:$0xf] %v3256_v29  ;;  %v3308_v54 = vld [vmem:[%s11435_s10 + $0xa4] sm:$0xff]  }
 0x181   :  { %3259 = vst [vmem:[#allocation11 + $0x40] sm:$0xf] %v3258_v30  ;;  %3261 = vst [vmem:[#allocation11 + $0x44] sm:$0xf] %v3260_v31  ;;  %v3262_v32 = vld [vmem:[%s11435_s10 + $0x40] sm:$0xf] }
 0x182   :  { %v3264_v33 = vld [vmem:[%s11435_s10 + $0x5c] sm:$0xf]  ;;  %v3266_v34 = vld [vmem:[%s11435_s10 + $0x44] sm:$0xf]  ;;  %3263 = vst [vmem:[#allocation11 + $0x48] sm:$0xf] %v3262_v32 }
 0x183   :  { %3265 = vst [vmem:[#allocation11 + $0x4c] sm:$0xf] %v3264_v33  ;;  %3267 = vst [vmem:[#allocation11 + $0x50] sm:$0xf] %v3266_v34  ;;  %v3268_v35 = vld [vmem:[%s11435_s10 + $0x60] sm:$0xf] }
 0x184   :  { %v3270_v36 = vld [vmem:[%s11435_s10 + $0x48] sm:$0xf]  ;;  %v3272_v37 = vld [vmem:[%s11435_s10 + $0x64] sm:$0xf]  ;;  %3269 = vst [vmem:[#allocation11 + $0x54] sm:$0xf] %v3268_v35 }
 0x185   :  { %3271 = vst [vmem:[#allocation11 + $0x58] sm:$0xf] %v3270_v36  ;;  %3273 = vst [vmem:[#allocation11 + $0x5c] sm:$0xf] %v3272_v37  ;;  %v3274_v38 = vld [vmem:[%s11435_s10 + $0x4c] sm:$0xf] }
 0x186   :  { %v3276_v39 = vld [vmem:[%s11435_s10 + $0x68] sm:$0xf]  ;;  %v3278_v40 = vld [vmem:[%s11435_s10 + $0x50] sm:$0xf]  ;;  %3275 = vst [vmem:[#allocation11 + $0x60] sm:$0xf] %v3274_v38 }
 0x187   :  { %3277 = vst [vmem:[#allocation11 + $0x64] sm:$0xf] %v3276_v39  ;;  %3279 = vst [vmem:[#allocation11 + $0x68] sm:$0xf] %v3278_v40  ;;  %v3284_v42 = vld [vmem:[%s11435_s10 + $0x8c] sm:$0xf] }
 0x188   :  { %v3286_v43 = vld [vmem:[%s11435_s10 + $0x74] sm:$0xf]  ;;  %3281 = vst [vmem:[#allocation11 + $0x6c] sm:$0xff] %v3280_v41   ;;  %3285 = vst [vmem:[#allocation11 + $0x74] sm:$0xf] %v3284_v42  ;;  %v3336_v37 = vld [vmem:[%s11435_s10 + $0xdc] sm:$0xff]  }
 0x189   :  { %3287 = vst [vmem:[#allocation11 + $0x78] sm:$0xf] %v3286_v43  ;;  %v3288_v44 = vld [vmem:[%s11435_s10 + $0x90] sm:$0xf]  ;;  %v3290_v45 = vld [vmem:[%s11435_s10 + $0x78] sm:$0xf] }
 0x18a   :  { %v3292_v46 = vld [vmem:[%s11435_s10 + $0x94] sm:$0xf]  ;;  %3289 = vst [vmem:[#allocation11 + $0x7c] sm:$0xf] %v3288_v44  ;;  %3291 = vst [vmem:[#allocation11 + $0x80] sm:$0xf] %v3290_v45 }
 0x18b   :  { %3293 = vst [vmem:[#allocation11 + $0x84] sm:$0xf] %v3292_v46  ;;  %v3294_v47 = vld [vmem:[%s11435_s10 + $0x7c] sm:$0xf]  ;;  %v3296_v48 = vld [vmem:[%s11435_s10 + $0x98] sm:$0xf] }
 0x18c   :  { %v3298_v49 = vld [vmem:[%s11435_s10 + $0x80] sm:$0xf]  ;;  %3295 = vst [vmem:[#allocation11 + $0x88] sm:$0xf] %v3294_v47  ;;  %3297 = vst [vmem:[#allocation11 + $0x8c] sm:$0xf] %v3296_v48 }
 0x18d   :  { %3299 = vst [vmem:[#allocation11 + $0x90] sm:$0xf] %v3298_v49  ;;  %v3300_v50 = vld [vmem:[%s11435_s10 + $0x9c] sm:$0xf]  ;;  %v3302_v51 = vld [vmem:[%s11435_s10 + $0x84] sm:$0xf] }
 0x18e   :  { %v3304_v52 = vld [vmem:[%s11435_s10 + $0xa0] sm:$0xf]  ;;  %3301 = vst [vmem:[#allocation11 + $0x94] sm:$0xf] %v3300_v50  ;;  %3303 = vst [vmem:[#allocation11 + $0x98] sm:$0xf] %v3302_v51 }
 0x18f   :  { %3305 = vst [vmem:[#allocation11 + $0x9c] sm:$0xf] %v3304_v52  ;;  %v3306_v53 = vld [vmem:[%s11435_s10 + $0x88] sm:$0xf]  ;;  %v3312_v55 = vld [vmem:[%s11435_s10 + $0xc4] sm:$0xf] }
 0x190   :  { %3307 = vst [vmem:[#allocation11 + $0xa0] sm:$0xf] %v3306_v53  ;;  %3309 = vst [vmem:[#allocation11 + $0xa4] sm:$0xff] %v3308_v54   ;;  %v3314_v56 = vld [vmem:[%s11435_s10 + $0xac] sm:$0xf]  ;;  %v3364_v50 = vld [vmem:[%s11435_s10 + $0x114] sm:$0xff]  }
 0x191   :  { %3313 = vst [vmem:[#allocation11 + $0xac] sm:$0xf] %v3312_v55  ;;  %v3316_v27 = vld [vmem:[%s11435_s10 + $0xc8] sm:$0xf]  ;;  %v3318_v28 = vld [vmem:[%s11435_s10 + $0xb0] sm:$0xf] }
 0x192   :  { %3315 = vst [vmem:[#allocation11 + $0xb0] sm:$0xf] %v3314_v56  ;;  %3317 = vst [vmem:[#allocation11 + $0xb4] sm:$0xf] %v3316_v27  ;;  %v3320_v29 = vld [vmem:[%s11435_s10 + $0xcc] sm:$0xf] }
 0x193   :  { %3319 = vst [vmem:[#allocation11 + $0xb8] sm:$0xf] %v3318_v28  ;;  %v3322_v30 = vld [vmem:[%s11435_s10 + $0xb4] sm:$0xf]  ;;  %v3324_v31 = vld [vmem:[%s11435_s10 + $0xd0] sm:$0xf] }
 0x194   :  { %3321 = vst [vmem:[#allocation11 + $0xbc] sm:$0xf] %v3320_v29  ;;  %3323 = vst [vmem:[#allocation11 + $0xc0] sm:$0xf] %v3322_v30  ;;  %v3326_v32 = vld [vmem:[%s11435_s10 + $0xb8] sm:$0xf] }
 0x195   :  { %3325 = vst [vmem:[#allocation11 + $0xc4] sm:$0xf] %v3324_v31  ;;  %v3328_v33 = vld [vmem:[%s11435_s10 + $0xd4] sm:$0xf]  ;;  %v3330_v34 = vld [vmem:[%s11435_s10 + $0xbc] sm:$0xf] }
 0x196   :  { %3327 = vst [vmem:[#allocation11 + $0xc8] sm:$0xf] %v3326_v32  ;;  %3329 = vst [vmem:[#allocation11 + $0xcc] sm:$0xf] %v3328_v33  ;;  %v3332_v35 = vld [vmem:[%s11435_s10 + $0xd8] sm:$0xf] }
 0x197   :  { %3331 = vst [vmem:[#allocation11 + $0xd0] sm:$0xf] %v3330_v34  ;;  %v3334_v36 = vld [vmem:[%s11435_s10 + $0xc0] sm:$0xf]  ;;  %3333 = vst [vmem:[#allocation11 + $0xd4] sm:$0xf] %v3332_v35 }
 0x198   :  { %3335 = vst [vmem:[#allocation11 + $0xd8] sm:$0xf] %v3334_v36  ;;  %3337 = vst [vmem:[#allocation11 + $0xdc] sm:$0xff] %v3336_v37   ;;  %v3340_v38 = vld [vmem:[%s11435_s10 + $0xfc] sm:$0xf]  ;;  %v3392_v33 = vld [vmem:[%s11435_s10 + $0x14c] sm:$0xff]  }
 0x199   :  { %v3342_v39 = vld [vmem:[%s11435_s10 + $0xe4] sm:$0xf]  ;;  %v3344_v40 = vld [vmem:[%s11435_s10 + $0x100] sm:$0xf]  ;;  %3341 = vst [vmem:[#allocation11 + $0xe4] sm:$0xf] %v3340_v38 }
 0x19a   :  { %3343 = vst [vmem:[#allocation11 + $0xe8] sm:$0xf] %v3342_v39  ;;  %3345 = vst [vmem:[#allocation11 + $0xec] sm:$0xf] %v3344_v40  ;;  %v3346_v41 = vld [vmem:[%s11435_s10 + $0xe8] sm:$0xf] }
 0x19b   :  { %v3348_v42 = vld [vmem:[%s11435_s10 + $0x104] sm:$0xf]  ;;  %v3350_v43 = vld [vmem:[%s11435_s10 + $0xec] sm:$0xf]  ;;  %3347 = vst [vmem:[#allocation11 + $0xf0] sm:$0xf] %v3346_v41 }
 0x19c   :  { %3349 = vst [vmem:[#allocation11 + $0xf4] sm:$0xf] %v3348_v42  ;;  %3351 = vst [vmem:[#allocation11 + $0xf8] sm:$0xf] %v3350_v43  ;;  %v3352_v44 = vld [vmem:[%s11435_s10 + $0x108] sm:$0xf] }
 0x19d   :  { %v3354_v45 = vld [vmem:[%s11435_s10 + $0xf0] sm:$0xf]  ;;  %v3356_v46 = vld [vmem:[%s11435_s10 + $0x10c] sm:$0xf]  ;;  %3353 = vst [vmem:[#allocation11 + $0xfc] sm:$0xf] %v3352_v44 }
 0x19e   :  { %3355 = vst [vmem:[#allocation11 + $0x100] sm:$0xf] %v3354_v45  ;;  %3357 = vst [vmem:[#allocation11 + $0x104] sm:$0xf] %v3356_v46  ;;  %v3358_v47 = vld [vmem:[%s11435_s10 + $0xf4] sm:$0xf] }
 0x19f   :  { %v3360_v48 = vld [vmem:[%s11435_s10 + $0x110] sm:$0xf]  ;;  %v3362_v49 = vld [vmem:[%s11435_s10 + $0xf8] sm:$0xf]  ;;  %3359 = vst [vmem:[#allocation11 + $0x108] sm:$0xf] %v3358_v47 }
 0x1a0   :  { %3361 = vst [vmem:[#allocation11 + $0x10c] sm:$0xf] %v3360_v48  ;;  %3363 = vst [vmem:[#allocation11 + $0x110] sm:$0xf] %v3362_v49  ;;  %v3368_v51 = vld [vmem:[%s11435_s10 + $0x134] sm:$0xf] }
 0x1a1   :  { %v3370_v52 = vld [vmem:[%s11435_s10 + $0x11c] sm:$0xf]  ;;  %3365 = vst [vmem:[#allocation11 + $0x114] sm:$0xff] %v3364_v50   ;;  %3369 = vst [vmem:[#allocation11 + $0x11c] sm:$0xf] %v3368_v51  ;;  %v3420_v46 = vld [vmem:[%s11435_s10 + $0x184] sm:$0xff]  }
 0x1a2   :  { %3371 = vst [vmem:[#allocation11 + $0x120] sm:$0xf] %v3370_v52  ;;  %v3372_v53 = vld [vmem:[%s11435_s10 + $0x138] sm:$0xf]  ;;  %v3374_v54 = vld [vmem:[%s11435_s10 + $0x120] sm:$0xf] }
 0x1a3   :  { %v3376_v55 = vld [vmem:[%s11435_s10 + $0x13c] sm:$0xf]  ;;  %3373 = vst [vmem:[#allocation11 + $0x124] sm:$0xf] %v3372_v53  ;;  %3375 = vst [vmem:[#allocation11 + $0x128] sm:$0xf] %v3374_v54 }
 0x1a4   :  { %3377 = vst [vmem:[#allocation11 + $0x12c] sm:$0xf] %v3376_v55  ;;  %v3378_v56 = vld [vmem:[%s11435_s10 + $0x124] sm:$0xf]  ;;  %v3380_v27 = vld [vmem:[%s11435_s10 + $0x140] sm:$0xf] }
 0x1a5   :  { %v3382_v28 = vld [vmem:[%s11435_s10 + $0x128] sm:$0xf]  ;;  %3379 = vst [vmem:[#allocation11 + $0x130] sm:$0xf] %v3378_v56  ;;  %3381 = vst [vmem:[#allocation11 + $0x134] sm:$0xf] %v3380_v27 }
 0x1a6   :  { %3383 = vst [vmem:[#allocation11 + $0x138] sm:$0xf] %v3382_v28  ;;  %v3384_v29 = vld [vmem:[%s11435_s10 + $0x144] sm:$0xf]  ;;  %v3386_v30 = vld [vmem:[%s11435_s10 + $0x12c] sm:$0xf] }
 0x1a7   :  { %v3388_v31 = vld [vmem:[%s11435_s10 + $0x148] sm:$0xf]  ;;  %3385 = vst [vmem:[#allocation11 + $0x13c] sm:$0xf] %v3384_v29  ;;  %3387 = vst [vmem:[#allocation11 + $0x140] sm:$0xf] %v3386_v30 }
 0x1a8   :  { %3389 = vst [vmem:[#allocation11 + $0x144] sm:$0xf] %v3388_v31  ;;  %v3390_v32 = vld [vmem:[%s11435_s10 + $0x130] sm:$0xf]  ;;  %v3396_v34 = vld [vmem:[%s11435_s10 + $0x16c] sm:$0xf] }
 0x1a9   :  { %3391 = vst [vmem:[#allocation11 + $0x148] sm:$0xf] %v3390_v32  ;;  %3393 = vst [vmem:[#allocation11 + $0x14c] sm:$0xff] %v3392_v33   ;;  %v3398_v35 = vld [vmem:[%s11435_s10 + $0x154] sm:$0xf]  ;;  %v3448_v29 = vld [vmem:[%s11435_s10 + $0x1bc] sm:$0xff]  }
 0x1aa   :  { %3397 = vst [vmem:[#allocation11 + $0x154] sm:$0xf] %v3396_v34  ;;  %v3400_v36 = vld [vmem:[%s11435_s10 + $0x170] sm:$0xf]  ;;  %v3402_v37 = vld [vmem:[%s11435_s10 + $0x158] sm:$0xf] }
 0x1ab   :  { %3399 = vst [vmem:[#allocation11 + $0x158] sm:$0xf] %v3398_v35  ;;  %3401 = vst [vmem:[#allocation11 + $0x15c] sm:$0xf] %v3400_v36  ;;  %v3404_v38 = vld [vmem:[%s11435_s10 + $0x174] sm:$0xf] }
 0x1ac   :  { %3403 = vst [vmem:[#allocation11 + $0x160] sm:$0xf] %v3402_v37  ;;  %v3406_v39 = vld [vmem:[%s11435_s10 + $0x15c] sm:$0xf]  ;;  %v3408_v40 = vld [vmem:[%s11435_s10 + $0x178] sm:$0xf] }
 0x1ad   :  { %3405 = vst [vmem:[#allocation11 + $0x164] sm:$0xf] %v3404_v38  ;;  %3407 = vst [vmem:[#allocation11 + $0x168] sm:$0xf] %v3406_v39  ;;  %v3410_v41 = vld [vmem:[%s11435_s10 + $0x160] sm:$0xf] }
 0x1ae   :  { %3409 = vst [vmem:[#allocation11 + $0x16c] sm:$0xf] %v3408_v40  ;;  %v3412_v42 = vld [vmem:[%s11435_s10 + $0x17c] sm:$0xf]  ;;  %v3414_v43 = vld [vmem:[%s11435_s10 + $0x164] sm:$0xf] }
 0x1af   :  { %3411 = vst [vmem:[#allocation11 + $0x170] sm:$0xf] %v3410_v41  ;;  %3413 = vst [vmem:[#allocation11 + $0x174] sm:$0xf] %v3412_v42  ;;  %v3416_v44 = vld [vmem:[%s11435_s10 + $0x180] sm:$0xf] }
 0x1b0   :  { %3415 = vst [vmem:[#allocation11 + $0x178] sm:$0xf] %v3414_v43  ;;  %v3418_v45 = vld [vmem:[%s11435_s10 + $0x168] sm:$0xf]  ;;  %3417 = vst [vmem:[#allocation11 + $0x17c] sm:$0xf] %v3416_v44 }
 0x1b1   :  { %3419 = vst [vmem:[#allocation11 + $0x180] sm:$0xf] %v3418_v45  ;;  %3421 = vst [vmem:[#allocation11 + $0x184] sm:$0xff] %v3420_v46   ;;  %v3424_v47 = vld [vmem:[%s11435_s10 + $0x1a4] sm:$0xf]  ;;  %v3476_v42 = vld [vmem:[%s11435_s10 + $0x1f4] sm:$0xff]  }
 0x1b2   :  { %v3426_v48 = vld [vmem:[%s11435_s10 + $0x18c] sm:$0xf]  ;;  %v3428_v49 = vld [vmem:[%s11435_s10 + $0x1a8] sm:$0xf]  ;;  %3425 = vst [vmem:[#allocation11 + $0x18c] sm:$0xf] %v3424_v47 }
 0x1b3   :  { %3427 = vst [vmem:[#allocation11 + $0x190] sm:$0xf] %v3426_v48  ;;  %3429 = vst [vmem:[#allocation11 + $0x194] sm:$0xf] %v3428_v49  ;;  %v3430_v50 = vld [vmem:[%s11435_s10 + $0x190] sm:$0xf] }
 0x1b4   :  { %v3432_v51 = vld [vmem:[%s11435_s10 + $0x1ac] sm:$0xf]  ;;  %v3434_v52 = vld [vmem:[%s11435_s10 + $0x194] sm:$0xf]  ;;  %3431 = vst [vmem:[#allocation11 + $0x198] sm:$0xf] %v3430_v50 }
 0x1b5   :  { %3433 = vst [vmem:[#allocation11 + $0x19c] sm:$0xf] %v3432_v51  ;;  %3435 = vst [vmem:[#allocation11 + $0x1a0] sm:$0xf] %v3434_v52  ;;  %v3436_v53 = vld [vmem:[%s11435_s10 + $0x1b0] sm:$0xf] }
 0x1b6   :  { %v3438_v54 = vld [vmem:[%s11435_s10 + $0x198] sm:$0xf]  ;;  %v3440_v55 = vld [vmem:[%s11435_s10 + $0x1b4] sm:$0xf]  ;;  %3437 = vst [vmem:[#allocation11 + $0x1a4] sm:$0xf] %v3436_v53 }
 0x1b7   :  { %3439 = vst [vmem:[#allocation11 + $0x1a8] sm:$0xf] %v3438_v54  ;;  %3441 = vst [vmem:[#allocation11 + $0x1ac] sm:$0xf] %v3440_v55  ;;  %v3442_v56 = vld [vmem:[%s11435_s10 + $0x19c] sm:$0xf] }
 0x1b8   :  { %v3444_v27 = vld [vmem:[%s11435_s10 + $0x1b8] sm:$0xf]  ;;  %v3446_v28 = vld [vmem:[%s11435_s10 + $0x1a0] sm:$0xf]  ;;  %3443 = vst [vmem:[#allocation11 + $0x1b0] sm:$0xf] %v3442_v56 }
 0x1b9   :  { %3445 = vst [vmem:[#allocation11 + $0x1b4] sm:$0xf] %v3444_v27  ;;  %3447 = vst [vmem:[#allocation11 + $0x1b8] sm:$0xf] %v3446_v28  ;;  %v3452_v30 = vld [vmem:[%s11435_s10 + $0x1dc] sm:$0xf] }
 0x1ba   :  { %v3454_v31 = vld [vmem:[%s11435_s10 + $0x1c4] sm:$0xf]  ;;  %3449 = vst [vmem:[#allocation11 + $0x1bc] sm:$0xff] %v3448_v29   ;;  %3453 = vst [vmem:[#allocation11 + $0x1c4] sm:$0xf] %v3452_v30  ;;  %v3504_v55 = vld [vmem:[%s11435_s10 + $0x22c] sm:$0xff]  }
 0x1bb   :  { %3455 = vst [vmem:[#allocation11 + $0x1c8] sm:$0xf] %v3454_v31  ;;  %v3456_v32 = vld [vmem:[%s11435_s10 + $0x1e0] sm:$0xf]  ;;  %v3458_v33 = vld [vmem:[%s11435_s10 + $0x1c8] sm:$0xf] }
 0x1bc   :  { %v3460_v34 = vld [vmem:[%s11435_s10 + $0x1e4] sm:$0xf]  ;;  %3457 = vst [vmem:[#allocation11 + $0x1cc] sm:$0xf] %v3456_v32  ;;  %3459 = vst [vmem:[#allocation11 + $0x1d0] sm:$0xf] %v3458_v33 }
 0x1bd   :  { %3461 = vst [vmem:[#allocation11 + $0x1d4] sm:$0xf] %v3460_v34  ;;  %v3462_v35 = vld [vmem:[%s11435_s10 + $0x1cc] sm:$0xf]  ;;  %v3464_v36 = vld [vmem:[%s11435_s10 + $0x1e8] sm:$0xf] }
 0x1be   :  { %v3466_v37 = vld [vmem:[%s11435_s10 + $0x1d0] sm:$0xf]  ;;  %3463 = vst [vmem:[#allocation11 + $0x1d8] sm:$0xf] %v3462_v35  ;;  %3465 = vst [vmem:[#allocation11 + $0x1dc] sm:$0xf] %v3464_v36 }
 0x1bf   :  { %3467 = vst [vmem:[#allocation11 + $0x1e0] sm:$0xf] %v3466_v37  ;;  %v3468_v38 = vld [vmem:[%s11435_s10 + $0x1ec] sm:$0xf]  ;;  %v3470_v39 = vld [vmem:[%s11435_s10 + $0x1d4] sm:$0xf] }
 0x1c0   :  { %v3472_v40 = vld [vmem:[%s11435_s10 + $0x1f0] sm:$0xf]  ;;  %3469 = vst [vmem:[#allocation11 + $0x1e4] sm:$0xf] %v3468_v38  ;;  %3471 = vst [vmem:[#allocation11 + $0x1e8] sm:$0xf] %v3470_v39 }
 0x1c1   :  { %3473 = vst [vmem:[#allocation11 + $0x1ec] sm:$0xf] %v3472_v40  ;;  %v3474_v41 = vld [vmem:[%s11435_s10 + $0x1d8] sm:$0xf]  ;;  %v3480_v43 = vld [vmem:[%s11435_s10 + $0x214] sm:$0xf] }
 0x1c2   :  { %3475 = vst [vmem:[#allocation11 + $0x1f0] sm:$0xf] %v3474_v41  ;;  %3477 = vst [vmem:[#allocation11 + $0x1f4] sm:$0xff] %v3476_v42   ;;  %v3482_v44 = vld [vmem:[%s11435_s10 + $0x1fc] sm:$0xf]  ;;  %v3532_v38 = vld [vmem:[%s11435_s10 + $0x264] sm:$0xff]  }
 0x1c3   :  { %3481 = vst [vmem:[#allocation11 + $0x1fc] sm:$0xf] %v3480_v43  ;;  %v3484_v45 = vld [vmem:[%s11435_s10 + $0x218] sm:$0xf]  ;;  %v3486_v46 = vld [vmem:[%s11435_s10 + $0x200] sm:$0xf] }
 0x1c4   :  { %3483 = vst [vmem:[#allocation11 + $0x200] sm:$0xf] %v3482_v44  ;;  %3485 = vst [vmem:[#allocation11 + $0x204] sm:$0xf] %v3484_v45  ;;  %v3488_v47 = vld [vmem:[%s11435_s10 + $0x21c] sm:$0xf] }
 0x1c5   :  { %3487 = vst [vmem:[#allocation11 + $0x208] sm:$0xf] %v3486_v46  ;;  %v3490_v48 = vld [vmem:[%s11435_s10 + $0x204] sm:$0xf]  ;;  %v3492_v49 = vld [vmem:[%s11435_s10 + $0x220] sm:$0xf] }
 0x1c6   :  { %3489 = vst [vmem:[#allocation11 + $0x20c] sm:$0xf] %v3488_v47  ;;  %3491 = vst [vmem:[#allocation11 + $0x210] sm:$0xf] %v3490_v48  ;;  %v3494_v50 = vld [vmem:[%s11435_s10 + $0x208] sm:$0xf] }
 0x1c7   :  { %3493 = vst [vmem:[#allocation11 + $0x214] sm:$0xf] %v3492_v49  ;;  %v3496_v51 = vld [vmem:[%s11435_s10 + $0x224] sm:$0xf]  ;;  %v3498_v52 = vld [vmem:[%s11435_s10 + $0x20c] sm:$0xf] }
 0x1c8   :  { %3495 = vst [vmem:[#allocation11 + $0x218] sm:$0xf] %v3494_v50  ;;  %3497 = vst [vmem:[#allocation11 + $0x21c] sm:$0xf] %v3496_v51  ;;  %v3500_v53 = vld [vmem:[%s11435_s10 + $0x228] sm:$0xf] }
 0x1c9   :  { %3499 = vst [vmem:[#allocation11 + $0x220] sm:$0xf] %v3498_v52  ;;  %v3502_v54 = vld [vmem:[%s11435_s10 + $0x210] sm:$0xf]  ;;  %3501 = vst [vmem:[#allocation11 + $0x224] sm:$0xf] %v3500_v53 }
 0x1ca   :  { %3503 = vst [vmem:[#allocation11 + $0x228] sm:$0xf] %v3502_v54  ;;  %3505 = vst [vmem:[#allocation11 + $0x22c] sm:$0xff] %v3504_v55   ;;  %v3508_v56 = vld [vmem:[%s11435_s10 + $0x24c] sm:$0xf]  ;;  %v3560_v51 = vld [vmem:[%s11435_s10 + $0x29c] sm:$0xff]  }
 0x1cb   :  { %v3510_v27 = vld [vmem:[%s11435_s10 + $0x234] sm:$0xf]  ;;  %v3512_v28 = vld [vmem:[%s11435_s10 + $0x250] sm:$0xf]  ;;  %3509 = vst [vmem:[#allocation11 + $0x234] sm:$0xf] %v3508_v56 }
 0x1cc   :  { %3511 = vst [vmem:[#allocation11 + $0x238] sm:$0xf] %v3510_v27  ;;  %3513 = vst [vmem:[#allocation11 + $0x23c] sm:$0xf] %v3512_v28  ;;  %v3514_v29 = vld [vmem:[%s11435_s10 + $0x238] sm:$0xf] }
 0x1cd   :  { %v3516_v30 = vld [vmem:[%s11435_s10 + $0x254] sm:$0xf]  ;;  %v3518_v31 = vld [vmem:[%s11435_s10 + $0x23c] sm:$0xf]  ;;  %3515 = vst [vmem:[#allocation11 + $0x240] sm:$0xf] %v3514_v29 }
 0x1ce   :  { %3517 = vst [vmem:[#allocation11 + $0x244] sm:$0xf] %v3516_v30  ;;  %3519 = vst [vmem:[#allocation11 + $0x248] sm:$0xf] %v3518_v31  ;;  %v3520_v32 = vld [vmem:[%s11435_s10 + $0x258] sm:$0xf] }
 0x1cf   :  { %v3522_v33 = vld [vmem:[%s11435_s10 + $0x240] sm:$0xf]  ;;  %v3524_v34 = vld [vmem:[%s11435_s10 + $0x25c] sm:$0xf]  ;;  %3521 = vst [vmem:[#allocation11 + $0x24c] sm:$0xf] %v3520_v32 }
 0x1d0   :  { %3523 = vst [vmem:[#allocation11 + $0x250] sm:$0xf] %v3522_v33  ;;  %3525 = vst [vmem:[#allocation11 + $0x254] sm:$0xf] %v3524_v34  ;;  %v3526_v35 = vld [vmem:[%s11435_s10 + $0x244] sm:$0xf] }
 0x1d1   :  { %v3528_v36 = vld [vmem:[%s11435_s10 + $0x260] sm:$0xf]  ;;  %v3530_v37 = vld [vmem:[%s11435_s10 + $0x248] sm:$0xf]  ;;  %3527 = vst [vmem:[#allocation11 + $0x258] sm:$0xf] %v3526_v35 }
 0x1d2   :  { %3529 = vst [vmem:[#allocation11 + $0x25c] sm:$0xf] %v3528_v36  ;;  %3531 = vst [vmem:[#allocation11 + $0x260] sm:$0xf] %v3530_v37  ;;  %v3536_v39 = vld [vmem:[%s11435_s10 + $0x284] sm:$0xf] }
 0x1d3   :  { %v3538_v40 = vld [vmem:[%s11435_s10 + $0x26c] sm:$0xf]  ;;  %3533 = vst [vmem:[#allocation11 + $0x264] sm:$0xff] %v3532_v38   ;;  %3537 = vst [vmem:[#allocation11 + $0x26c] sm:$0xf] %v3536_v39  ;;  %v3588_v34 = vld [vmem:[%s11435_s10 + $0x2d4] sm:$0xff]  }
 0x1d4   :  { %3539 = vst [vmem:[#allocation11 + $0x270] sm:$0xf] %v3538_v40  ;;  %v3540_v41 = vld [vmem:[%s11435_s10 + $0x288] sm:$0xf]  ;;  %v3542_v42 = vld [vmem:[%s11435_s10 + $0x270] sm:$0xf] }
 0x1d5   :  { %v3544_v43 = vld [vmem:[%s11435_s10 + $0x28c] sm:$0xf]  ;;  %3541 = vst [vmem:[#allocation11 + $0x274] sm:$0xf] %v3540_v41  ;;  %3543 = vst [vmem:[#allocation11 + $0x278] sm:$0xf] %v3542_v42 }
 0x1d6   :  { %3545 = vst [vmem:[#allocation11 + $0x27c] sm:$0xf] %v3544_v43  ;;  %v3546_v44 = vld [vmem:[%s11435_s10 + $0x274] sm:$0xf]  ;;  %v3548_v45 = vld [vmem:[%s11435_s10 + $0x290] sm:$0xf] }
 0x1d7   :  { %v3550_v46 = vld [vmem:[%s11435_s10 + $0x278] sm:$0xf]  ;;  %3547 = vst [vmem:[#allocation11 + $0x280] sm:$0xf] %v3546_v44  ;;  %3549 = vst [vmem:[#allocation11 + $0x284] sm:$0xf] %v3548_v45 }
 0x1d8   :  { %3551 = vst [vmem:[#allocation11 + $0x288] sm:$0xf] %v3550_v46  ;;  %v3552_v47 = vld [vmem:[%s11435_s10 + $0x294] sm:$0xf]  ;;  %v3554_v48 = vld [vmem:[%s11435_s10 + $0x27c] sm:$0xf] }
 0x1d9   :  { %v3556_v49 = vld [vmem:[%s11435_s10 + $0x298] sm:$0xf]  ;;  %3553 = vst [vmem:[#allocation11 + $0x28c] sm:$0xf] %v3552_v47  ;;  %3555 = vst [vmem:[#allocation11 + $0x290] sm:$0xf] %v3554_v48 }
 0x1da   :  { %3557 = vst [vmem:[#allocation11 + $0x294] sm:$0xf] %v3556_v49  ;;  %v3558_v50 = vld [vmem:[%s11435_s10 + $0x280] sm:$0xf]  ;;  %v3564_v52 = vld [vmem:[%s11435_s10 + $0x2bc] sm:$0xf] }
 0x1db   :  { %3559 = vst [vmem:[#allocation11 + $0x298] sm:$0xf] %v3558_v50  ;;  %3561 = vst [vmem:[#allocation11 + $0x29c] sm:$0xff] %v3560_v51   ;;  %v3566_v53 = vld [vmem:[%s11435_s10 + $0x2a4] sm:$0xf]  ;;  %v3616_v47 = vld [vmem:[%s11435_s10 + $0x30c] sm:$0xff]  }
 0x1dc   :  { %3565 = vst [vmem:[#allocation11 + $0x2a4] sm:$0xf] %v3564_v52  ;;  %v3568_v54 = vld [vmem:[%s11435_s10 + $0x2c0] sm:$0xf]  ;;  %v3570_v55 = vld [vmem:[%s11435_s10 + $0x2a8] sm:$0xf] }
 0x1dd   :  { %3567 = vst [vmem:[#allocation11 + $0x2a8] sm:$0xf] %v3566_v53  ;;  %3569 = vst [vmem:[#allocation11 + $0x2ac] sm:$0xf] %v3568_v54  ;;  %v3572_v56 = vld [vmem:[%s11435_s10 + $0x2c4] sm:$0xf] }
 0x1de   :  { %3571 = vst [vmem:[#allocation11 + $0x2b0] sm:$0xf] %v3570_v55  ;;  %v3574_v27 = vld [vmem:[%s11435_s10 + $0x2ac] sm:$0xf]  ;;  %v3576_v28 = vld [vmem:[%s11435_s10 + $0x2c8] sm:$0xf] }
 0x1df   :  { %3573 = vst [vmem:[#allocation11 + $0x2b4] sm:$0xf] %v3572_v56  ;;  %3575 = vst [vmem:[#allocation11 + $0x2b8] sm:$0xf] %v3574_v27  ;;  %v3578_v29 = vld [vmem:[%s11435_s10 + $0x2b0] sm:$0xf] }
 0x1e0   :  { %3577 = vst [vmem:[#allocation11 + $0x2bc] sm:$0xf] %v3576_v28  ;;  %v3580_v30 = vld [vmem:[%s11435_s10 + $0x2cc] sm:$0xf]  ;;  %v3582_v31 = vld [vmem:[%s11435_s10 + $0x2b4] sm:$0xf] }
 0x1e1   :  { %3579 = vst [vmem:[#allocation11 + $0x2c0] sm:$0xf] %v3578_v29  ;;  %3581 = vst [vmem:[#allocation11 + $0x2c4] sm:$0xf] %v3580_v30  ;;  %v3584_v32 = vld [vmem:[%s11435_s10 + $0x2d0] sm:$0xf] }
 0x1e2   :  { %3583 = vst [vmem:[#allocation11 + $0x2c8] sm:$0xf] %v3582_v31  ;;  %v3586_v33 = vld [vmem:[%s11435_s10 + $0x2b8] sm:$0xf]  ;;  %3585 = vst [vmem:[#allocation11 + $0x2cc] sm:$0xf] %v3584_v32 }
 0x1e3   :  { %3587 = vst [vmem:[#allocation11 + $0x2d0] sm:$0xf] %v3586_v33  ;;  %3589 = vst [vmem:[#allocation11 + $0x2d4] sm:$0xff] %v3588_v34   ;;  %v3592_v35 = vld [vmem:[%s11435_s10 + $0x2f4] sm:$0xf]  ;;  %v3644_v30 = vld [vmem:[%s11435_s10 + $0x344] sm:$0xff]  }
 0x1e4   :  { %v3594_v36 = vld [vmem:[%s11435_s10 + $0x2dc] sm:$0xf]  ;;  %v3596_v37 = vld [vmem:[%s11435_s10 + $0x2f8] sm:$0xf]  ;;  %3593 = vst [vmem:[#allocation11 + $0x2dc] sm:$0xf] %v3592_v35 }
 0x1e5   :  { %3595 = vst [vmem:[#allocation11 + $0x2e0] sm:$0xf] %v3594_v36  ;;  %3597 = vst [vmem:[#allocation11 + $0x2e4] sm:$0xf] %v3596_v37  ;;  %v3598_v38 = vld [vmem:[%s11435_s10 + $0x2e0] sm:$0xf] }
 0x1e6   :  { %v3600_v39 = vld [vmem:[%s11435_s10 + $0x2fc] sm:$0xf]  ;;  %v3602_v40 = vld [vmem:[%s11435_s10 + $0x2e4] sm:$0xf]  ;;  %3599 = vst [vmem:[#allocation11 + $0x2e8] sm:$0xf] %v3598_v38 }
 0x1e7   :  { %3601 = vst [vmem:[#allocation11 + $0x2ec] sm:$0xf] %v3600_v39  ;;  %3603 = vst [vmem:[#allocation11 + $0x2f0] sm:$0xf] %v3602_v40  ;;  %v3604_v41 = vld [vmem:[%s11435_s10 + $0x300] sm:$0xf] }
 0x1e8   :  { %v3606_v42 = vld [vmem:[%s11435_s10 + $0x2e8] sm:$0xf]  ;;  %v3608_v43 = vld [vmem:[%s11435_s10 + $0x304] sm:$0xf]  ;;  %3605 = vst [vmem:[#allocation11 + $0x2f4] sm:$0xf] %v3604_v41 }
 0x1e9   :  { %3607 = vst [vmem:[#allocation11 + $0x2f8] sm:$0xf] %v3606_v42  ;;  %3609 = vst [vmem:[#allocation11 + $0x2fc] sm:$0xf] %v3608_v43  ;;  %v3610_v44 = vld [vmem:[%s11435_s10 + $0x2ec] sm:$0xf] }
 0x1ea   :  { %v3612_v45 = vld [vmem:[%s11435_s10 + $0x308] sm:$0xf]  ;;  %v3614_v46 = vld [vmem:[%s11435_s10 + $0x2f0] sm:$0xf]  ;;  %3611 = vst [vmem:[#allocation11 + $0x300] sm:$0xf] %v3610_v44 }
 0x1eb   :  { %3613 = vst [vmem:[#allocation11 + $0x304] sm:$0xf] %v3612_v45  ;;  %3615 = vst [vmem:[#allocation11 + $0x308] sm:$0xf] %v3614_v46  ;;  %v3620_v48 = vld [vmem:[%s11435_s10 + $0x32c] sm:$0xf] }
 0x1ec   :  { %v3622_v49 = vld [vmem:[%s11435_s10 + $0x314] sm:$0xf]  ;;  %3617 = vst [vmem:[#allocation11 + $0x30c] sm:$0xff] %v3616_v47   ;;  %3621 = vst [vmem:[#allocation11 + $0x314] sm:$0xf] %v3620_v48  ;;  %v3672_v43 = vld [vmem:[%s11435_s10 + $0x37c] sm:$0xff]  }
 0x1ed   :  { %3623 = vst [vmem:[#allocation11 + $0x318] sm:$0xf] %v3622_v49  ;;  %v3624_v50 = vld [vmem:[%s11435_s10 + $0x330] sm:$0xf]  ;;  %v3626_v51 = vld [vmem:[%s11435_s10 + $0x318] sm:$0xf] }
 0x1ee   :  { %v3628_v52 = vld [vmem:[%s11435_s10 + $0x334] sm:$0xf]  ;;  %3625 = vst [vmem:[#allocation11 + $0x31c] sm:$0xf] %v3624_v50  ;;  %3627 = vst [vmem:[#allocation11 + $0x320] sm:$0xf] %v3626_v51 }
 0x1ef   :  { %3629 = vst [vmem:[#allocation11 + $0x324] sm:$0xf] %v3628_v52  ;;  %v3630_v53 = vld [vmem:[%s11435_s10 + $0x31c] sm:$0xf]  ;;  %v3632_v54 = vld [vmem:[%s11435_s10 + $0x338] sm:$0xf] }
 0x1f0   :  { %v3634_v55 = vld [vmem:[%s11435_s10 + $0x320] sm:$0xf]  ;;  %3631 = vst [vmem:[#allocation11 + $0x328] sm:$0xf] %v3630_v53  ;;  %3633 = vst [vmem:[#allocation11 + $0x32c] sm:$0xf] %v3632_v54 }
 0x1f1   :  { %3635 = vst [vmem:[#allocation11 + $0x330] sm:$0xf] %v3634_v55  ;;  %v3636_v56 = vld [vmem:[%s11435_s10 + $0x33c] sm:$0xf]  ;;  %v3638_v27 = vld [vmem:[%s11435_s10 + $0x324] sm:$0xf] }
 0x1f2   :  { %v3640_v28 = vld [vmem:[%s11435_s10 + $0x340] sm:$0xf]  ;;  %3637 = vst [vmem:[#allocation11 + $0x334] sm:$0xf] %v3636_v56  ;;  %3639 = vst [vmem:[#allocation11 + $0x338] sm:$0xf] %v3638_v27 }
 0x1f3   :  { %3641 = vst [vmem:[#allocation11 + $0x33c] sm:$0xf] %v3640_v28  ;;  %v3642_v29 = vld [vmem:[%s11435_s10 + $0x328] sm:$0xf]  ;;  %v3648_v31 = vld [vmem:[%s11435_s10 + $0x364] sm:$0xf] }
 0x1f4   :  { %3643 = vst [vmem:[#allocation11 + $0x340] sm:$0xf] %v3642_v29  ;;  %3645 = vst [vmem:[#allocation11 + $0x344] sm:$0xff] %v3644_v30   ;;  %v3650_v32 = vld [vmem:[%s11435_s10 + $0x34c] sm:$0xf]  ;;  %v3700_v56 = vld [vmem:[%s11435_s10 + $0x3b4] sm:$0xff]  }
 0x1f5   :  { %3649 = vst [vmem:[#allocation11 + $0x34c] sm:$0xf] %v3648_v31  ;;  %v3652_v33 = vld [vmem:[%s11435_s10 + $0x368] sm:$0xf]  ;;  %v3654_v34 = vld [vmem:[%s11435_s10 + $0x350] sm:$0xf] }
 0x1f6   :  { %3651 = vst [vmem:[#allocation11 + $0x350] sm:$0xf] %v3650_v32  ;;  %3653 = vst [vmem:[#allocation11 + $0x354] sm:$0xf] %v3652_v33  ;;  %v3656_v35 = vld [vmem:[%s11435_s10 + $0x36c] sm:$0xf] }
 0x1f7   :  { %3655 = vst [vmem:[#allocation11 + $0x358] sm:$0xf] %v3654_v34  ;;  %v3658_v36 = vld [vmem:[%s11435_s10 + $0x354] sm:$0xf]  ;;  %v3660_v37 = vld [vmem:[%s11435_s10 + $0x370] sm:$0xf] }
 0x1f8   :  { %3657 = vst [vmem:[#allocation11 + $0x35c] sm:$0xf] %v3656_v35  ;;  %3659 = vst [vmem:[#allocation11 + $0x360] sm:$0xf] %v3658_v36  ;;  %v3662_v38 = vld [vmem:[%s11435_s10 + $0x358] sm:$0xf] }
 0x1f9   :  { %3661 = vst [vmem:[#allocation11 + $0x364] sm:$0xf] %v3660_v37  ;;  %v3664_v39 = vld [vmem:[%s11435_s10 + $0x374] sm:$0xf]  ;;  %v3666_v40 = vld [vmem:[%s11435_s10 + $0x35c] sm:$0xf] }
 0x1fa   :  { %3663 = vst [vmem:[#allocation11 + $0x368] sm:$0xf] %v3662_v38  ;;  %3665 = vst [vmem:[#allocation11 + $0x36c] sm:$0xf] %v3664_v39  ;;  %v3668_v41 = vld [vmem:[%s11435_s10 + $0x378] sm:$0xf] }
 0x1fb   :  { %3667 = vst [vmem:[#allocation11 + $0x370] sm:$0xf] %v3666_v40  ;;  %v3670_v42 = vld [vmem:[%s11435_s10 + $0x360] sm:$0xf]  ;;  %3669 = vst [vmem:[#allocation11 + $0x374] sm:$0xf] %v3668_v41 }
 0x1fc   :  { %3671 = vst [vmem:[#allocation11 + $0x378] sm:$0xf] %v3670_v42  ;;  %3673 = vst [vmem:[#allocation11 + $0x37c] sm:$0xff] %v3672_v43   ;;  %v3676_v44 = vld [vmem:[%s11435_s10 + $0x39c] sm:$0xf]  ;;  %v3728_v39 = vld [vmem:[%s11435_s10 + $0x3ec] sm:$0xff]  }
 0x1fd   :  { %v3678_v45 = vld [vmem:[%s11435_s10 + $0x384] sm:$0xf]  ;;  %v3680_v46 = vld [vmem:[%s11435_s10 + $0x3a0] sm:$0xf]  ;;  %3677 = vst [vmem:[#allocation11 + $0x384] sm:$0xf] %v3676_v44 }
 0x1fe   :  { %3679 = vst [vmem:[#allocation11 + $0x388] sm:$0xf] %v3678_v45  ;;  %3681 = vst [vmem:[#allocation11 + $0x38c] sm:$0xf] %v3680_v46  ;;  %v3682_v47 = vld [vmem:[%s11435_s10 + $0x388] sm:$0xf] }
 0x1ff   :  { %v3684_v48 = vld [vmem:[%s11435_s10 + $0x3a4] sm:$0xf]  ;;  %v3686_v49 = vld [vmem:[%s11435_s10 + $0x38c] sm:$0xf]  ;;  %3683 = vst [vmem:[#allocation11 + $0x390] sm:$0xf] %v3682_v47 }
 0x200   :  { %3685 = vst [vmem:[#allocation11 + $0x394] sm:$0xf] %v3684_v48  ;;  %3687 = vst [vmem:[#allocation11 + $0x398] sm:$0xf] %v3686_v49  ;;  %v3688_v50 = vld [vmem:[%s11435_s10 + $0x3a8] sm:$0xf] }
 0x201   :  { %v3690_v51 = vld [vmem:[%s11435_s10 + $0x390] sm:$0xf]  ;;  %v3692_v52 = vld [vmem:[%s11435_s10 + $0x3ac] sm:$0xf]  ;;  %3689 = vst [vmem:[#allocation11 + $0x39c] sm:$0xf] %v3688_v50 }
 0x202   :  { %3691 = vst [vmem:[#allocation11 + $0x3a0] sm:$0xf] %v3690_v51  ;;  %3693 = vst [vmem:[#allocation11 + $0x3a4] sm:$0xf] %v3692_v52  ;;  %v3694_v53 = vld [vmem:[%s11435_s10 + $0x394] sm:$0xf] }
 0x203   :  { %v3696_v54 = vld [vmem:[%s11435_s10 + $0x3b0] sm:$0xf]  ;;  %v3698_v55 = vld [vmem:[%s11435_s10 + $0x398] sm:$0xf]  ;;  %3695 = vst [vmem:[#allocation11 + $0x3a8] sm:$0xf] %v3694_v53 }
 0x204   :  { %3697 = vst [vmem:[#allocation11 + $0x3ac] sm:$0xf] %v3696_v54  ;;  %3699 = vst [vmem:[#allocation11 + $0x3b0] sm:$0xf] %v3698_v55  ;;  %v3704_v27 = vld [vmem:[%s11435_s10 + $0x3d4] sm:$0xf] }
 0x205   :  { %v3706_v28 = vld [vmem:[%s11435_s10 + $0x3bc] sm:$0xf]  ;;  %3701 = vst [vmem:[#allocation11 + $0x3b4] sm:$0xff] %v3700_v56   ;;  %3705 = vst [vmem:[#allocation11 + $0x3bc] sm:$0xf] %v3704_v27  ;;  %v3756_v52 = vld [vmem:[%s11435_s10 + $0x424] sm:$0xff]  }
 0x206   :  { %3707 = vst [vmem:[#allocation11 + $0x3c0] sm:$0xf] %v3706_v28  ;;  %v3708_v29 = vld [vmem:[%s11435_s10 + $0x3d8] sm:$0xf]  ;;  %v3710_v30 = vld [vmem:[%s11435_s10 + $0x3c0] sm:$0xf] }
 0x207   :  { %v3712_v31 = vld [vmem:[%s11435_s10 + $0x3dc] sm:$0xf]  ;;  %3709 = vst [vmem:[#allocation11 + $0x3c4] sm:$0xf] %v3708_v29  ;;  %3711 = vst [vmem:[#allocation11 + $0x3c8] sm:$0xf] %v3710_v30 }
 0x208   :  { %3713 = vst [vmem:[#allocation11 + $0x3cc] sm:$0xf] %v3712_v31  ;;  %v3714_v32 = vld [vmem:[%s11435_s10 + $0x3c4] sm:$0xf]  ;;  %v3716_v33 = vld [vmem:[%s11435_s10 + $0x3e0] sm:$0xf] }
 0x209   :  { %v3718_v34 = vld [vmem:[%s11435_s10 + $0x3c8] sm:$0xf]  ;;  %3715 = vst [vmem:[#allocation11 + $0x3d0] sm:$0xf] %v3714_v32  ;;  %3717 = vst [vmem:[#allocation11 + $0x3d4] sm:$0xf] %v3716_v33 }
 0x20a   :  { %3719 = vst [vmem:[#allocation11 + $0x3d8] sm:$0xf] %v3718_v34  ;;  %v3720_v35 = vld [vmem:[%s11435_s10 + $0x3e4] sm:$0xf]  ;;  %v3722_v36 = vld [vmem:[%s11435_s10 + $0x3cc] sm:$0xf] }
 0x20b   :  { %v3724_v37 = vld [vmem:[%s11435_s10 + $0x3e8] sm:$0xf]  ;;  %3721 = vst [vmem:[#allocation11 + $0x3dc] sm:$0xf] %v3720_v35  ;;  %3723 = vst [vmem:[#allocation11 + $0x3e0] sm:$0xf] %v3722_v36 }
 0x20c   :  { %3725 = vst [vmem:[#allocation11 + $0x3e4] sm:$0xf] %v3724_v37  ;;  %v3726_v38 = vld [vmem:[%s11435_s10 + $0x3d0] sm:$0xf]  ;;  %v3732_v40 = vld [vmem:[%s11435_s10 + $0x40c] sm:$0xf] }
 0x20d   :  { %3727 = vst [vmem:[#allocation11 + $0x3e8] sm:$0xf] %v3726_v38  ;;  %3729 = vst [vmem:[#allocation11 + $0x3ec] sm:$0xff] %v3728_v39   ;;  %v3734_v41 = vld [vmem:[%s11435_s10 + $0x3f4] sm:$0xf]  ;;  %v3784_v35 = vld [vmem:[%s11435_s10 + $0x45c] sm:$0xff]  }
 0x20e   :  { %3733 = vst [vmem:[#allocation11 + $0x3f4] sm:$0xf] %v3732_v40  ;;  %v3736_v42 = vld [vmem:[%s11435_s10 + $0x410] sm:$0xf]  ;;  %v3738_v43 = vld [vmem:[%s11435_s10 + $0x3f8] sm:$0xf] }
 0x20f   :  { %3735 = vst [vmem:[#allocation11 + $0x3f8] sm:$0xf] %v3734_v41  ;;  %3737 = vst [vmem:[#allocation11 + $0x3fc] sm:$0xf] %v3736_v42  ;;  %v3740_v44 = vld [vmem:[%s11435_s10 + $0x414] sm:$0xf] }
 0x210   :  { %3739 = vst [vmem:[#allocation11 + $0x400] sm:$0xf] %v3738_v43  ;;  %v3742_v45 = vld [vmem:[%s11435_s10 + $0x3fc] sm:$0xf]  ;;  %v3744_v46 = vld [vmem:[%s11435_s10 + $0x418] sm:$0xf] }
 0x211   :  { %3741 = vst [vmem:[#allocation11 + $0x404] sm:$0xf] %v3740_v44  ;;  %3743 = vst [vmem:[#allocation11 + $0x408] sm:$0xf] %v3742_v45  ;;  %v3746_v47 = vld [vmem:[%s11435_s10 + $0x400] sm:$0xf] }
 0x212   :  { %3745 = vst [vmem:[#allocation11 + $0x40c] sm:$0xf] %v3744_v46  ;;  %v3748_v48 = vld [vmem:[%s11435_s10 + $0x41c] sm:$0xf]  ;;  %v3750_v49 = vld [vmem:[%s11435_s10 + $0x404] sm:$0xf] }
 0x213   :  { %3747 = vst [vmem:[#allocation11 + $0x410] sm:$0xf] %v3746_v47  ;;  %3749 = vst [vmem:[#allocation11 + $0x414] sm:$0xf] %v3748_v48  ;;  %v3752_v50 = vld [vmem:[%s11435_s10 + $0x420] sm:$0xf] }
 0x214   :  { %3751 = vst [vmem:[#allocation11 + $0x418] sm:$0xf] %v3750_v49  ;;  %v3754_v51 = vld [vmem:[%s11435_s10 + $0x408] sm:$0xf]  ;;  %3753 = vst [vmem:[#allocation11 + $0x41c] sm:$0xf] %v3752_v50 }
 0x215   :  { %3755 = vst [vmem:[#allocation11 + $0x420] sm:$0xf] %v3754_v51  ;;  %3757 = vst [vmem:[#allocation11 + $0x424] sm:$0xff] %v3756_v52   ;;  %v3760_v53 = vld [vmem:[%s11435_s10 + $0x444] sm:$0xf]  ;;  %v3812_v48 = vld [vmem:[%s11435_s10 + $0x494] sm:$0xff]  }
 0x216   :  { %v3762_v54 = vld [vmem:[%s11435_s10 + $0x42c] sm:$0xf]  ;;  %v3764_v55 = vld [vmem:[%s11435_s10 + $0x448] sm:$0xf]  ;;  %3761 = vst [vmem:[#allocation11 + $0x42c] sm:$0xf] %v3760_v53 }
 0x217   :  { %3763 = vst [vmem:[#allocation11 + $0x430] sm:$0xf] %v3762_v54  ;;  %3765 = vst [vmem:[#allocation11 + $0x434] sm:$0xf] %v3764_v55  ;;  %v3766_v56 = vld [vmem:[%s11435_s10 + $0x430] sm:$0xf] }
 0x218   :  { %v3768_v27 = vld [vmem:[%s11435_s10 + $0x44c] sm:$0xf]  ;;  %v3770_v28 = vld [vmem:[%s11435_s10 + $0x434] sm:$0xf]  ;;  %3767 = vst [vmem:[#allocation11 + $0x438] sm:$0xf] %v3766_v56 }
 0x219   :  { %3769 = vst [vmem:[#allocation11 + $0x43c] sm:$0xf] %v3768_v27  ;;  %3771 = vst [vmem:[#allocation11 + $0x440] sm:$0xf] %v3770_v28  ;;  %v3772_v29 = vld [vmem:[%s11435_s10 + $0x450] sm:$0xf] }
 0x21a   :  { %v3774_v30 = vld [vmem:[%s11435_s10 + $0x438] sm:$0xf]  ;;  %v3776_v31 = vld [vmem:[%s11435_s10 + $0x454] sm:$0xf]  ;;  %3773 = vst [vmem:[#allocation11 + $0x444] sm:$0xf] %v3772_v29 }
 0x21b   :  { %3775 = vst [vmem:[#allocation11 + $0x448] sm:$0xf] %v3774_v30  ;;  %3777 = vst [vmem:[#allocation11 + $0x44c] sm:$0xf] %v3776_v31  ;;  %v3778_v32 = vld [vmem:[%s11435_s10 + $0x43c] sm:$0xf] }
 0x21c   :  { %v3780_v33 = vld [vmem:[%s11435_s10 + $0x458] sm:$0xf]  ;;  %v3782_v34 = vld [vmem:[%s11435_s10 + $0x440] sm:$0xf]  ;;  %3779 = vst [vmem:[#allocation11 + $0x450] sm:$0xf] %v3778_v32 }
 0x21d   :  { %3781 = vst [vmem:[#allocation11 + $0x454] sm:$0xf] %v3780_v33  ;;  %3783 = vst [vmem:[#allocation11 + $0x458] sm:$0xf] %v3782_v34  ;;  %v3788_v36 = vld [vmem:[%s11435_s10 + $0x47c] sm:$0xf] }
 0x21e   :  { %v3790_v37 = vld [vmem:[%s11435_s10 + $0x464] sm:$0xf]  ;;  %3785 = vst [vmem:[#allocation11 + $0x45c] sm:$0xff] %v3784_v35   ;;  %3789 = vst [vmem:[#allocation11 + $0x464] sm:$0xf] %v3788_v36  ;;  %v3840_v31 = vld [vmem:[%s11435_s10 + $0x4cc] sm:$0xff]  }
 0x21f   :  { %3791 = vst [vmem:[#allocation11 + $0x468] sm:$0xf] %v3790_v37  ;;  %v3792_v38 = vld [vmem:[%s11435_s10 + $0x480] sm:$0xf]  ;;  %v3794_v39 = vld [vmem:[%s11435_s10 + $0x468] sm:$0xf] }
 0x220   :  { %v3796_v40 = vld [vmem:[%s11435_s10 + $0x484] sm:$0xf]  ;;  %3793 = vst [vmem:[#allocation11 + $0x46c] sm:$0xf] %v3792_v38  ;;  %3795 = vst [vmem:[#allocation11 + $0x470] sm:$0xf] %v3794_v39 }
 0x221   :  { %3797 = vst [vmem:[#allocation11 + $0x474] sm:$0xf] %v3796_v40  ;;  %v3798_v41 = vld [vmem:[%s11435_s10 + $0x46c] sm:$0xf]  ;;  %v3800_v42 = vld [vmem:[%s11435_s10 + $0x488] sm:$0xf] }
 0x222   :  { %v3802_v43 = vld [vmem:[%s11435_s10 + $0x470] sm:$0xf]  ;;  %3799 = vst [vmem:[#allocation11 + $0x478] sm:$0xf] %v3798_v41  ;;  %3801 = vst [vmem:[#allocation11 + $0x47c] sm:$0xf] %v3800_v42 }
 0x223   :  { %3803 = vst [vmem:[#allocation11 + $0x480] sm:$0xf] %v3802_v43  ;;  %v3804_v44 = vld [vmem:[%s11435_s10 + $0x48c] sm:$0xf]  ;;  %v3806_v45 = vld [vmem:[%s11435_s10 + $0x474] sm:$0xf] }
 0x224   :  { %v3808_v46 = vld [vmem:[%s11435_s10 + $0x490] sm:$0xf]  ;;  %3805 = vst [vmem:[#allocation11 + $0x484] sm:$0xf] %v3804_v44  ;;  %3807 = vst [vmem:[#allocation11 + $0x488] sm:$0xf] %v3806_v45 }
 0x225   :  { %3809 = vst [vmem:[#allocation11 + $0x48c] sm:$0xf] %v3808_v46  ;;  %v3810_v47 = vld [vmem:[%s11435_s10 + $0x478] sm:$0xf]  ;;  %v3816_v49 = vld [vmem:[%s11435_s10 + $0x4b4] sm:$0xf] }
 0x226   :  { %3811 = vst [vmem:[#allocation11 + $0x490] sm:$0xf] %v3810_v47  ;;  %3813 = vst [vmem:[#allocation11 + $0x494] sm:$0xff] %v3812_v48   ;;  %v3818_v50 = vld [vmem:[%s11435_s10 + $0x49c] sm:$0xf]  ;;  %v3868_v44 = vld [vmem:[%s11435_s10 + $0x504] sm:$0xff]  }
 0x227   :  { %3817 = vst [vmem:[#allocation11 + $0x49c] sm:$0xf] %v3816_v49  ;;  %v3820_v51 = vld [vmem:[%s11435_s10 + $0x4b8] sm:$0xf]  ;;  %v3822_v52 = vld [vmem:[%s11435_s10 + $0x4a0] sm:$0xf] }
 0x228   :  { %3819 = vst [vmem:[#allocation11 + $0x4a0] sm:$0xf] %v3818_v50  ;;  %3821 = vst [vmem:[#allocation11 + $0x4a4] sm:$0xf] %v3820_v51  ;;  %v3824_v53 = vld [vmem:[%s11435_s10 + $0x4bc] sm:$0xf] }
 0x229   :  { %3823 = vst [vmem:[#allocation11 + $0x4a8] sm:$0xf] %v3822_v52  ;;  %v3826_v54 = vld [vmem:[%s11435_s10 + $0x4a4] sm:$0xf]  ;;  %v3828_v55 = vld [vmem:[%s11435_s10 + $0x4c0] sm:$0xf] }
 0x22a   :  { %3825 = vst [vmem:[#allocation11 + $0x4ac] sm:$0xf] %v3824_v53  ;;  %3827 = vst [vmem:[#allocation11 + $0x4b0] sm:$0xf] %v3826_v54  ;;  %v3830_v56 = vld [vmem:[%s11435_s10 + $0x4a8] sm:$0xf] }
 0x22b   :  { %3829 = vst [vmem:[#allocation11 + $0x4b4] sm:$0xf] %v3828_v55  ;;  %v3832_v27 = vld [vmem:[%s11435_s10 + $0x4c4] sm:$0xf]  ;;  %v3834_v28 = vld [vmem:[%s11435_s10 + $0x4ac] sm:$0xf] }
 0x22c   :  { %3831 = vst [vmem:[#allocation11 + $0x4b8] sm:$0xf] %v3830_v56  ;;  %3833 = vst [vmem:[#allocation11 + $0x4bc] sm:$0xf] %v3832_v27  ;;  %v3836_v29 = vld [vmem:[%s11435_s10 + $0x4c8] sm:$0xf] }
 0x22d   :  { %3835 = vst [vmem:[#allocation11 + $0x4c0] sm:$0xf] %v3834_v28  ;;  %v3838_v30 = vld [vmem:[%s11435_s10 + $0x4b0] sm:$0xf]  ;;  %3837 = vst [vmem:[#allocation11 + $0x4c4] sm:$0xf] %v3836_v29 }
 0x22e   :  { %3839 = vst [vmem:[#allocation11 + $0x4c8] sm:$0xf] %v3838_v30  ;;  %3841 = vst [vmem:[#allocation11 + $0x4cc] sm:$0xff] %v3840_v31   ;;  %v3844_v32 = vld [vmem:[%s11435_s10 + $0x4ec] sm:$0xf]  ;;  %v3896_v27 = vld [vmem:[%s11435_s10 + $0x53c] sm:$0xff]  }
 0x22f   :  { %v3846_v33 = vld [vmem:[%s11435_s10 + $0x4d4] sm:$0xf]  ;;  %v3848_v34 = vld [vmem:[%s11435_s10 + $0x4f0] sm:$0xf]  ;;  %3845 = vst [vmem:[#allocation11 + $0x4d4] sm:$0xf] %v3844_v32 }
 0x230   :  { %3847 = vst [vmem:[#allocation11 + $0x4d8] sm:$0xf] %v3846_v33  ;;  %3849 = vst [vmem:[#allocation11 + $0x4dc] sm:$0xf] %v3848_v34  ;;  %v3850_v35 = vld [vmem:[%s11435_s10 + $0x4d8] sm:$0xf] }
 0x231   :  { %v3852_v36 = vld [vmem:[%s11435_s10 + $0x4f4] sm:$0xf]  ;;  %v3854_v37 = vld [vmem:[%s11435_s10 + $0x4dc] sm:$0xf]  ;;  %3851 = vst [vmem:[#allocation11 + $0x4e0] sm:$0xf] %v3850_v35 }
 0x232   :  { %3853 = vst [vmem:[#allocation11 + $0x4e4] sm:$0xf] %v3852_v36  ;;  %3855 = vst [vmem:[#allocation11 + $0x4e8] sm:$0xf] %v3854_v37  ;;  %v3856_v38 = vld [vmem:[%s11435_s10 + $0x4f8] sm:$0xf] }
 0x233   :  { %v3858_v39 = vld [vmem:[%s11435_s10 + $0x4e0] sm:$0xf]  ;;  %v3860_v40 = vld [vmem:[%s11435_s10 + $0x4fc] sm:$0xf]  ;;  %3857 = vst [vmem:[#allocation11 + $0x4ec] sm:$0xf] %v3856_v38 }
 0x234   :  { %3859 = vst [vmem:[#allocation11 + $0x4f0] sm:$0xf] %v3858_v39  ;;  %3861 = vst [vmem:[#allocation11 + $0x4f4] sm:$0xf] %v3860_v40  ;;  %v3862_v41 = vld [vmem:[%s11435_s10 + $0x4e4] sm:$0xf] }
 0x235   :  { %v3864_v42 = vld [vmem:[%s11435_s10 + $0x500] sm:$0xf]  ;;  %v3866_v43 = vld [vmem:[%s11435_s10 + $0x4e8] sm:$0xf]  ;;  %3863 = vst [vmem:[#allocation11 + $0x4f8] sm:$0xf] %v3862_v41 }
 0x236   :  { %3865 = vst [vmem:[#allocation11 + $0x4fc] sm:$0xf] %v3864_v42  ;;  %3867 = vst [vmem:[#allocation11 + $0x500] sm:$0xf] %v3866_v43  ;;  %v3872_v45 = vld [vmem:[%s11435_s10 + $0x524] sm:$0xf] }
 0x237   :  { %v3874_v46 = vld [vmem:[%s11435_s10 + $0x50c] sm:$0xf]  ;;  %3869 = vst [vmem:[#allocation11 + $0x504] sm:$0xff] %v3868_v44   ;;  %3873 = vst [vmem:[#allocation11 + $0x50c] sm:$0xf] %v3872_v45  ;;  %v3924_v40 = vld [vmem:[%s11435_s10 + $0x574] sm:$0xff]  }
 0x238   :  { %3875 = vst [vmem:[#allocation11 + $0x510] sm:$0xf] %v3874_v46  ;;  %v3876_v47 = vld [vmem:[%s11435_s10 + $0x528] sm:$0xf]  ;;  %v3878_v48 = vld [vmem:[%s11435_s10 + $0x510] sm:$0xf] }
 0x239   :  { %v3880_v49 = vld [vmem:[%s11435_s10 + $0x52c] sm:$0xf]  ;;  %3877 = vst [vmem:[#allocation11 + $0x514] sm:$0xf] %v3876_v47  ;;  %3879 = vst [vmem:[#allocation11 + $0x518] sm:$0xf] %v3878_v48 }
 0x23a   :  { %3881 = vst [vmem:[#allocation11 + $0x51c] sm:$0xf] %v3880_v49  ;;  %v3882_v50 = vld [vmem:[%s11435_s10 + $0x514] sm:$0xf]  ;;  %v3884_v51 = vld [vmem:[%s11435_s10 + $0x530] sm:$0xf] }
 0x23b   :  { %v3886_v52 = vld [vmem:[%s11435_s10 + $0x518] sm:$0xf]  ;;  %3883 = vst [vmem:[#allocation11 + $0x520] sm:$0xf] %v3882_v50  ;;  %3885 = vst [vmem:[#allocation11 + $0x524] sm:$0xf] %v3884_v51 }
 0x23c   :  { %3887 = vst [vmem:[#allocation11 + $0x528] sm:$0xf] %v3886_v52  ;;  %v3888_v53 = vld [vmem:[%s11435_s10 + $0x534] sm:$0xf]  ;;  %v3890_v54 = vld [vmem:[%s11435_s10 + $0x51c] sm:$0xf] }
 0x23d   :  { %v3892_v55 = vld [vmem:[%s11435_s10 + $0x538] sm:$0xf]  ;;  %3889 = vst [vmem:[#allocation11 + $0x52c] sm:$0xf] %v3888_v53  ;;  %3891 = vst [vmem:[#allocation11 + $0x530] sm:$0xf] %v3890_v54 }
 0x23e   :  { %3893 = vst [vmem:[#allocation11 + $0x534] sm:$0xf] %v3892_v55  ;;  %v3894_v56 = vld [vmem:[%s11435_s10 + $0x520] sm:$0xf]  ;;  %v3900_v28 = vld [vmem:[%s11435_s10 + $0x55c] sm:$0xf] }
 0x23f   :  { %3895 = vst [vmem:[#allocation11 + $0x538] sm:$0xf] %v3894_v56  ;;  %3897 = vst [vmem:[#allocation11 + $0x53c] sm:$0xff] %v3896_v27   ;;  %v3902_v29 = vld [vmem:[%s11435_s10 + $0x544] sm:$0xf]  ;;  %v3952_v53 = vld [vmem:[%s11435_s10 + $0x5ac] sm:$0xff]  }
 0x240   :  { %3901 = vst [vmem:[#allocation11 + $0x544] sm:$0xf] %v3900_v28  ;;  %v3904_v30 = vld [vmem:[%s11435_s10 + $0x560] sm:$0xf]  ;;  %v3906_v31 = vld [vmem:[%s11435_s10 + $0x548] sm:$0xf] }
 0x241   :  { %3903 = vst [vmem:[#allocation11 + $0x548] sm:$0xf] %v3902_v29  ;;  %3905 = vst [vmem:[#allocation11 + $0x54c] sm:$0xf] %v3904_v30  ;;  %v3908_v32 = vld [vmem:[%s11435_s10 + $0x564] sm:$0xf] }
 0x242   :  { %3907 = vst [vmem:[#allocation11 + $0x550] sm:$0xf] %v3906_v31  ;;  %v3910_v33 = vld [vmem:[%s11435_s10 + $0x54c] sm:$0xf]  ;;  %v3912_v34 = vld [vmem:[%s11435_s10 + $0x568] sm:$0xf] }
 0x243   :  { %3909 = vst [vmem:[#allocation11 + $0x554] sm:$0xf] %v3908_v32  ;;  %3911 = vst [vmem:[#allocation11 + $0x558] sm:$0xf] %v3910_v33  ;;  %v3914_v35 = vld [vmem:[%s11435_s10 + $0x550] sm:$0xf] }
 0x244   :  { %3913 = vst [vmem:[#allocation11 + $0x55c] sm:$0xf] %v3912_v34  ;;  %v3916_v36 = vld [vmem:[%s11435_s10 + $0x56c] sm:$0xf]  ;;  %v3918_v37 = vld [vmem:[%s11435_s10 + $0x554] sm:$0xf] }
 0x245   :  { %3915 = vst [vmem:[#allocation11 + $0x560] sm:$0xf] %v3914_v35  ;;  %3917 = vst [vmem:[#allocation11 + $0x564] sm:$0xf] %v3916_v36  ;;  %v3920_v38 = vld [vmem:[%s11435_s10 + $0x570] sm:$0xf] }
 0x246   :  { %3919 = vst [vmem:[#allocation11 + $0x568] sm:$0xf] %v3918_v37  ;;  %v3922_v39 = vld [vmem:[%s11435_s10 + $0x558] sm:$0xf]  ;;  %3921 = vst [vmem:[#allocation11 + $0x56c] sm:$0xf] %v3920_v38 }
 0x247   :  { %3923 = vst [vmem:[#allocation11 + $0x570] sm:$0xf] %v3922_v39  ;;  %3925 = vst [vmem:[#allocation11 + $0x574] sm:$0xff] %v3924_v40   ;;  %v3928_v41 = vld [vmem:[%s11435_s10 + $0x594] sm:$0xf]  ;;  %v3980_v36 = vld [vmem:[%s11435_s10 + $0x5e4] sm:$0xff]  }
 0x248   :  { %v3930_v42 = vld [vmem:[%s11435_s10 + $0x57c] sm:$0xf]  ;;  %v3932_v43 = vld [vmem:[%s11435_s10 + $0x598] sm:$0xf]  ;;  %3929 = vst [vmem:[#allocation11 + $0x57c] sm:$0xf] %v3928_v41 }
 0x249   :  { %3931 = vst [vmem:[#allocation11 + $0x580] sm:$0xf] %v3930_v42  ;;  %3933 = vst [vmem:[#allocation11 + $0x584] sm:$0xf] %v3932_v43  ;;  %v3934_v44 = vld [vmem:[%s11435_s10 + $0x580] sm:$0xf] }
 0x24a   :  { %v3936_v45 = vld [vmem:[%s11435_s10 + $0x59c] sm:$0xf]  ;;  %v3938_v46 = vld [vmem:[%s11435_s10 + $0x584] sm:$0xf]  ;;  %3935 = vst [vmem:[#allocation11 + $0x588] sm:$0xf] %v3934_v44 }
 0x24b   :  { %3937 = vst [vmem:[#allocation11 + $0x58c] sm:$0xf] %v3936_v45  ;;  %3939 = vst [vmem:[#allocation11 + $0x590] sm:$0xf] %v3938_v46  ;;  %v3940_v47 = vld [vmem:[%s11435_s10 + $0x5a0] sm:$0xf] }
 0x24c   :  { %v3942_v48 = vld [vmem:[%s11435_s10 + $0x588] sm:$0xf]  ;;  %v3944_v49 = vld [vmem:[%s11435_s10 + $0x5a4] sm:$0xf]  ;;  %3941 = vst [vmem:[#allocation11 + $0x594] sm:$0xf] %v3940_v47 }
 0x24d   :  { %3943 = vst [vmem:[#allocation11 + $0x598] sm:$0xf] %v3942_v48  ;;  %3945 = vst [vmem:[#allocation11 + $0x59c] sm:$0xf] %v3944_v49  ;;  %v3946_v50 = vld [vmem:[%s11435_s10 + $0x58c] sm:$0xf] }
 0x24e   :  { %v3948_v51 = vld [vmem:[%s11435_s10 + $0x5a8] sm:$0xf]  ;;  %v3950_v52 = vld [vmem:[%s11435_s10 + $0x590] sm:$0xf]  ;;  %3947 = vst [vmem:[#allocation11 + $0x5a0] sm:$0xf] %v3946_v50 }
 0x24f   :  { %3949 = vst [vmem:[#allocation11 + $0x5a4] sm:$0xf] %v3948_v51  ;;  %3951 = vst [vmem:[#allocation11 + $0x5a8] sm:$0xf] %v3950_v52  ;;  %v3956_v54 = vld [vmem:[%s11435_s10 + $0x5cc] sm:$0xf] }
 0x250   :  { %v3958_v55 = vld [vmem:[%s11435_s10 + $0x5b4] sm:$0xf]  ;;  %3953 = vst [vmem:[#allocation11 + $0x5ac] sm:$0xff] %v3952_v53   ;;  %3957 = vst [vmem:[#allocation11 + $0x5b4] sm:$0xf] %v3956_v54  ;;  %v4008_v49 = vld [vmem:[%s11435_s10 + $0x61c] sm:$0xff]  }
 0x251   :  { %3959 = vst [vmem:[#allocation11 + $0x5b8] sm:$0xf] %v3958_v55  ;;  %v3960_v56 = vld [vmem:[%s11435_s10 + $0x5d0] sm:$0xf]  ;;  %v3962_v27 = vld [vmem:[%s11435_s10 + $0x5b8] sm:$0xf] }
 0x252   :  { %v3964_v28 = vld [vmem:[%s11435_s10 + $0x5d4] sm:$0xf]  ;;  %3961 = vst [vmem:[#allocation11 + $0x5bc] sm:$0xf] %v3960_v56  ;;  %3963 = vst [vmem:[#allocation11 + $0x5c0] sm:$0xf] %v3962_v27 }
 0x253   :  { %3965 = vst [vmem:[#allocation11 + $0x5c4] sm:$0xf] %v3964_v28  ;;  %v3966_v29 = vld [vmem:[%s11435_s10 + $0x5bc] sm:$0xf]  ;;  %v3968_v30 = vld [vmem:[%s11435_s10 + $0x5d8] sm:$0xf] }
 0x254   :  { %v3970_v31 = vld [vmem:[%s11435_s10 + $0x5c0] sm:$0xf]  ;;  %3967 = vst [vmem:[#allocation11 + $0x5c8] sm:$0xf] %v3966_v29  ;;  %3969 = vst [vmem:[#allocation11 + $0x5cc] sm:$0xf] %v3968_v30 }
 0x255   :  { %3971 = vst [vmem:[#allocation11 + $0x5d0] sm:$0xf] %v3970_v31  ;;  %v3972_v32 = vld [vmem:[%s11435_s10 + $0x5dc] sm:$0xf]  ;;  %v3974_v33 = vld [vmem:[%s11435_s10 + $0x5c4] sm:$0xf] }
 0x256   :  { %v3976_v34 = vld [vmem:[%s11435_s10 + $0x5e0] sm:$0xf]  ;;  %3973 = vst [vmem:[#allocation11 + $0x5d4] sm:$0xf] %v3972_v32  ;;  %3975 = vst [vmem:[#allocation11 + $0x5d8] sm:$0xf] %v3974_v33 }
 0x257   :  { %3977 = vst [vmem:[#allocation11 + $0x5dc] sm:$0xf] %v3976_v34  ;;  %v3978_v35 = vld [vmem:[%s11435_s10 + $0x5c8] sm:$0xf]  ;;  %v3984_v37 = vld [vmem:[%s11435_s10 + $0x604] sm:$0xf] }
 0x258   :  { %3979 = vst [vmem:[#allocation11 + $0x5e0] sm:$0xf] %v3978_v35  ;;  %3981 = vst [vmem:[#allocation11 + $0x5e4] sm:$0xff] %v3980_v36   ;;  %v3986_v38 = vld [vmem:[%s11435_s10 + $0x5ec] sm:$0xf]  ;;  %v4036_v32 = vld [vmem:[%s11435_s10 + $0x654] sm:$0xff]  }
 0x259   :  { %3985 = vst [vmem:[#allocation11 + $0x5ec] sm:$0xf] %v3984_v37  ;;  %v3988_v39 = vld [vmem:[%s11435_s10 + $0x608] sm:$0xf]  ;;  %v3990_v40 = vld [vmem:[%s11435_s10 + $0x5f0] sm:$0xf] }
 0x25a   :  { %3987 = vst [vmem:[#allocation11 + $0x5f0] sm:$0xf] %v3986_v38  ;;  %3989 = vst [vmem:[#allocation11 + $0x5f4] sm:$0xf] %v3988_v39  ;;  %v3992_v41 = vld [vmem:[%s11435_s10 + $0x60c] sm:$0xf] }
 0x25b   :  { %3991 = vst [vmem:[#allocation11 + $0x5f8] sm:$0xf] %v3990_v40  ;;  %v3994_v42 = vld [vmem:[%s11435_s10 + $0x5f4] sm:$0xf]  ;;  %v3996_v43 = vld [vmem:[%s11435_s10 + $0x610] sm:$0xf] }
 0x25c   :  { %3993 = vst [vmem:[#allocation11 + $0x5fc] sm:$0xf] %v3992_v41  ;;  %3995 = vst [vmem:[#allocation11 + $0x600] sm:$0xf] %v3994_v42  ;;  %v3998_v44 = vld [vmem:[%s11435_s10 + $0x5f8] sm:$0xf] }
 0x25d   :  { %3997 = vst [vmem:[#allocation11 + $0x604] sm:$0xf] %v3996_v43  ;;  %v4000_v45 = vld [vmem:[%s11435_s10 + $0x614] sm:$0xf]  ;;  %v4002_v46 = vld [vmem:[%s11435_s10 + $0x5fc] sm:$0xf] }
 0x25e   :  { %3999 = vst [vmem:[#allocation11 + $0x608] sm:$0xf] %v3998_v44  ;;  %4001 = vst [vmem:[#allocation11 + $0x60c] sm:$0xf] %v4000_v45  ;;  %v4004_v47 = vld [vmem:[%s11435_s10 + $0x618] sm:$0xf] }
 0x25f   :  { %4003 = vst [vmem:[#allocation11 + $0x610] sm:$0xf] %v4002_v46  ;;  %v4006_v48 = vld [vmem:[%s11435_s10 + $0x600] sm:$0xf]  ;;  %4005 = vst [vmem:[#allocation11 + $0x614] sm:$0xf] %v4004_v47 }
 0x260   :  { %4007 = vst [vmem:[#allocation11 + $0x618] sm:$0xf] %v4006_v48  ;;  %4009 = vst [vmem:[#allocation11 + $0x61c] sm:$0xff] %v4008_v49   ;;  %v4012_v50 = vld [vmem:[%s11435_s10 + $0x63c] sm:$0xf]  ;;  %v4064_v45 = vld [vmem:[%s11435_s10 + $0x68c] sm:$0xff]  }
 0x261   :  { %v4014_v51 = vld [vmem:[%s11435_s10 + $0x624] sm:$0xf]  ;;  %v4016_v52 = vld [vmem:[%s11435_s10 + $0x640] sm:$0xf]  ;;  %4013 = vst [vmem:[#allocation11 + $0x624] sm:$0xf] %v4012_v50 }
 0x262   :  { %4015 = vst [vmem:[#allocation11 + $0x628] sm:$0xf] %v4014_v51  ;;  %4017 = vst [vmem:[#allocation11 + $0x62c] sm:$0xf] %v4016_v52  ;;  %v4018_v53 = vld [vmem:[%s11435_s10 + $0x628] sm:$0xf] }
 0x263   :  { %v4020_v54 = vld [vmem:[%s11435_s10 + $0x644] sm:$0xf]  ;;  %v4022_v55 = vld [vmem:[%s11435_s10 + $0x62c] sm:$0xf]  ;;  %4019 = vst [vmem:[#allocation11 + $0x630] sm:$0xf] %v4018_v53 }
 0x264   :  { %4021 = vst [vmem:[#allocation11 + $0x634] sm:$0xf] %v4020_v54  ;;  %4023 = vst [vmem:[#allocation11 + $0x638] sm:$0xf] %v4022_v55  ;;  %v4024_v56 = vld [vmem:[%s11435_s10 + $0x648] sm:$0xf] }
 0x265   :  { %v4026_v27 = vld [vmem:[%s11435_s10 + $0x630] sm:$0xf]  ;;  %v4028_v28 = vld [vmem:[%s11435_s10 + $0x64c] sm:$0xf]  ;;  %4025 = vst [vmem:[#allocation11 + $0x63c] sm:$0xf] %v4024_v56 }
 0x266   :  { %4027 = vst [vmem:[#allocation11 + $0x640] sm:$0xf] %v4026_v27  ;;  %4029 = vst [vmem:[#allocation11 + $0x644] sm:$0xf] %v4028_v28  ;;  %v4030_v29 = vld [vmem:[%s11435_s10 + $0x634] sm:$0xf] }
 0x267   :  { %v4032_v30 = vld [vmem:[%s11435_s10 + $0x650] sm:$0xf]  ;;  %v4034_v31 = vld [vmem:[%s11435_s10 + $0x638] sm:$0xf]  ;;  %4031 = vst [vmem:[#allocation11 + $0x648] sm:$0xf] %v4030_v29 }
 0x268   :  { %4033 = vst [vmem:[#allocation11 + $0x64c] sm:$0xf] %v4032_v30  ;;  %4035 = vst [vmem:[#allocation11 + $0x650] sm:$0xf] %v4034_v31  ;;  %v4040_v33 = vld [vmem:[%s11435_s10 + $0x674] sm:$0xf] }
 0x269   :  { %v4042_v34 = vld [vmem:[%s11435_s10 + $0x65c] sm:$0xf]  ;;  %4037 = vst [vmem:[#allocation11 + $0x654] sm:$0xff] %v4036_v32   ;;  %4041 = vst [vmem:[#allocation11 + $0x65c] sm:$0xf] %v4040_v33  ;;  %v4092_v28 = vld [vmem:[%s11435_s10 + $0x6c4] sm:$0xff]  }
 0x26a   :  { %4043 = vst [vmem:[#allocation11 + $0x660] sm:$0xf] %v4042_v34  ;;  %v4044_v35 = vld [vmem:[%s11435_s10 + $0x678] sm:$0xf]  ;;  %v4046_v36 = vld [vmem:[%s11435_s10 + $0x660] sm:$0xf] }
 0x26b   :  { %v4048_v37 = vld [vmem:[%s11435_s10 + $0x67c] sm:$0xf]  ;;  %4045 = vst [vmem:[#allocation11 + $0x664] sm:$0xf] %v4044_v35  ;;  %4047 = vst [vmem:[#allocation11 + $0x668] sm:$0xf] %v4046_v36 }
 0x26c   :  { %4049 = vst [vmem:[#allocation11 + $0x66c] sm:$0xf] %v4048_v37  ;;  %v4050_v38 = vld [vmem:[%s11435_s10 + $0x664] sm:$0xf]  ;;  %v4052_v39 = vld [vmem:[%s11435_s10 + $0x680] sm:$0xf] }
 0x26d   :  { %v4054_v40 = vld [vmem:[%s11435_s10 + $0x668] sm:$0xf]  ;;  %4051 = vst [vmem:[#allocation11 + $0x670] sm:$0xf] %v4050_v38  ;;  %4053 = vst [vmem:[#allocation11 + $0x674] sm:$0xf] %v4052_v39 }
 0x26e   :  { %4055 = vst [vmem:[#allocation11 + $0x678] sm:$0xf] %v4054_v40  ;;  %v4056_v41 = vld [vmem:[%s11435_s10 + $0x684] sm:$0xf]  ;;  %v4058_v42 = vld [vmem:[%s11435_s10 + $0x66c] sm:$0xf] }
 0x26f   :  { %v4060_v43 = vld [vmem:[%s11435_s10 + $0x688] sm:$0xf]  ;;  %4057 = vst [vmem:[#allocation11 + $0x67c] sm:$0xf] %v4056_v41  ;;  %4059 = vst [vmem:[#allocation11 + $0x680] sm:$0xf] %v4058_v42 }
 0x270   :  { %4061 = vst [vmem:[#allocation11 + $0x684] sm:$0xf] %v4060_v43  ;;  %v4062_v44 = vld [vmem:[%s11435_s10 + $0x670] sm:$0xf]  ;;  %v4068_v46 = vld [vmem:[%s11435_s10 + $0x6ac] sm:$0xf] }
 0x271   :  { %4063 = vst [vmem:[#allocation11 + $0x688] sm:$0xf] %v4062_v44  ;;  %4065 = vst [vmem:[#allocation11 + $0x68c] sm:$0xff] %v4064_v45   ;;  %v4070_v47 = vld [vmem:[%s11435_s10 + $0x694] sm:$0xf] }
 0x272   :  { %4069 = vst [vmem:[#allocation11 + $0x694] sm:$0xf] %v4068_v46  ;;  %v4072_v48 = vld [vmem:[%s11435_s10 + $0x6b0] sm:$0xf]  ;;  %v4074_v49 = vld [vmem:[%s11435_s10 + $0x698] sm:$0xf] }
 0x273   :  { %4071 = vst [vmem:[#allocation11 + $0x698] sm:$0xf] %v4070_v47  ;;  %4073 = vst [vmem:[#allocation11 + $0x69c] sm:$0xf] %v4072_v48  ;;  %v4076_v50 = vld [vmem:[%s11435_s10 + $0x6b4] sm:$0xf] }
 0x274   :  { %4075 = vst [vmem:[#allocation11 + $0x6a0] sm:$0xf] %v4074_v49  ;;  %v4078_v51 = vld [vmem:[%s11435_s10 + $0x69c] sm:$0xf]  ;;  %v4080_v52 = vld [vmem:[%s11435_s10 + $0x6b8] sm:$0xf] }
 0x275   :  { %4077 = vst [vmem:[#allocation11 + $0x6a4] sm:$0xf] %v4076_v50  ;;  %4079 = vst [vmem:[#allocation11 + $0x6a8] sm:$0xf] %v4078_v51  ;;  %v4082_v53 = vld [vmem:[%s11435_s10 + $0x6a0] sm:$0xf] }
 0x276   :  { %4081 = vst [vmem:[#allocation11 + $0x6ac] sm:$0xf] %v4080_v52  ;;  %v4084_v54 = vld [vmem:[%s11435_s10 + $0x6bc] sm:$0xf]  ;;  %v4086_v55 = vld [vmem:[%s11435_s10 + $0x6a4] sm:$0xf] }
 0x277   :  { %4083 = vst [vmem:[#allocation11 + $0x6b0] sm:$0xf] %v4082_v53  ;;  %4085 = vst [vmem:[#allocation11 + $0x6b4] sm:$0xf] %v4084_v54  ;;  %v4088_v56 = vld [vmem:[%s11435_s10 + $0x6c0] sm:$0xf] }
 0x278   :  { %4087 = vst [vmem:[#allocation11 + $0x6b8] sm:$0xf] %v4086_v55  ;;  %v4090_v27 = vld [vmem:[%s11435_s10 + $0x6a8] sm:$0xf]  ;;  %4089 = vst [vmem:[#allocation11 + $0x6bc] sm:$0xf] %v4088_v56 }
 0x279   :  { %4091 = vst [vmem:[#allocation11 + $0x6c0] sm:$0xf] %v4090_v27  ;;  %4093 = vst [vmem:[#allocation11 + $0x6c4] sm:$0xff] %v4092_v28   ;;  %v4096_v29 = vld [vmem:[%s11435_s10 + $0x6e4] sm:$0xf] }
 0x27a   :  { %v4098_v30 = vld [vmem:[%s11435_s10 + $0x6cc] sm:$0xf]  ;;  %v4100_v31 = vld [vmem:[%s11435_s10 + $0x6e8] sm:$0xf]  ;;  %4097 = vst [vmem:[#allocation11 + $0x6cc] sm:$0xf] %v4096_v29 }
 0x27b   :  { %4099 = vst [vmem:[#allocation11 + $0x6d0] sm:$0xf] %v4098_v30  ;;  %4101 = vst [vmem:[#allocation11 + $0x6d4] sm:$0xf] %v4100_v31  ;;  %v4102_v32 = vld [vmem:[%s11435_s10 + $0x6d0] sm:$0xf] }
 0x27c   :  { %v4104_v33 = vld [vmem:[%s11435_s10 + $0x6ec] sm:$0xf]  ;;  %v4106_v34 = vld [vmem:[%s11435_s10 + $0x6d4] sm:$0xf]  ;;  %4103 = vst [vmem:[#allocation11 + $0x6d8] sm:$0xf] %v4102_v32 }
 0x27d   :  { %4105 = vst [vmem:[#allocation11 + $0x6dc] sm:$0xf] %v4104_v33  ;;  %4107 = vst [vmem:[#allocation11 + $0x6e0] sm:$0xf] %v4106_v34  ;;  %v4108_v35 = vld [vmem:[%s11435_s10 + $0x6f0] sm:$0xf] }
 0x27e   :  { %v4110_v36 = vld [vmem:[%s11435_s10 + $0x6d8] sm:$0xf]  ;;  %v4112_v37 = vld [vmem:[%s11435_s10 + $0x6f4] sm:$0xf]  ;;  %4109 = vst [vmem:[#allocation11 + $0x6e4] sm:$0xf] %v4108_v35 }
 0x27f   :  { %4111 = vst [vmem:[#allocation11 + $0x6e8] sm:$0xf] %v4110_v36  ;;  %4113 = vst [vmem:[#allocation11 + $0x6ec] sm:$0xf] %v4112_v37  ;;  %v4114_v38 = vld [vmem:[%s11435_s10 + $0x6dc] sm:$0xf] }
 0x280   :  { %v4116_v39 = vld [vmem:[%s11435_s10 + $0x6f8] sm:$0xf]  ;;  %v4118_v40 = vld [vmem:[%s11435_s10 + $0x6e0] sm:$0xf]  ;;  %4115 = vst [vmem:[#allocation11 + $0x6f0] sm:$0xf] %v4114_v38 }
 0x281   :  { %4117 = vst [vmem:[#allocation11 + $0x6f4] sm:$0xf] %v4116_v39  ;;  %4119 = vst [vmem:[#allocation11 + $0x6f8] sm:$0xf] %v4118_v40  ;;  %v4120_v41 = vld [vmem:[%s11435_s10 + $0x6fc] sm:$0xf] }
 0x282   :  { %4121 = vst [vmem:[#allocation11 + $0x6fc] sm:$0xf] %v4120_v41 }
 0x283   :  { %5048 = vsyncadd [#allocation12 + $0x9], 28672  ;;  %v11158_v42 = vld [vmem:[%s11425_s0] sm:$0xff]  ;;  %v5050_v43 = vld [vmem:[%s11425_s0 + $0x8] sm:$0xff] }
 0x284   :  { %v11166_v44 = vld [vmem:[%s11425_s0 + $0x10] sm:$0xff]  ;;  %v11171_v45 = vld [vmem:[%s11425_s0 + $0x18] sm:$0xff]  ;;  %v11176_v46 = vld [vmem:[%s11425_s0 + $0x20] sm:$0xff] }
 0x285   :  { %v11181_v47 = vld [vmem:[%s11425_s0 + $0x28] sm:$0xff]  ;;  %v5055_v48 = vld [vmem:[%s11425_s0 + $0x30] sm:$0xff] }
 0x286   :  { %7911 = dma.done.wait [#allocation12], 25088 }
 0x287   :  { %7912 = vsyncadd [#allocation12], 4294942208  ;;  %v5061_v49 = vpack.c.bf16 %v5050_v43, %v5050_v43  ;;  %v11437_v50 = vmov 0   ;;  %v5068_v51 = vld [vmem:[#allocation2 + $0x8] sm:$0xff]  ;;  %v5067_v53 = vld [vmem:[#allocation2] sm:$0xff]  ;;  %v11187_v56 = vpack.c.bf16 %v5055_v48, %v5055_v48  ;;  %vm5263_vm0 = vcmask 130048  }
 0x288   :  { %5422 = vmatprep.mubr.bf16.mxu1 %v11437_v50  ;;  %v5260_v52 = vld [vmem:[#allocation2 + $0x608] sm:$0xff]  ;;  %5267 = vmatprep.subr.bf16.mxu0 %v5068_v51  ;;  %v5259_v54 = vld [vmem:[#allocation2 + $0x600] sm:$0xff]  ;;  %v5070_v27 = vld [vmem:[#allocation2 + $0x18] sm:$0xff] }
 0x289   :  { %5299 = vmatprep.mubr.bf16.mxu0 %v5061_v49  ;;  %5390 = vmatprep.subr.bf16.mxu1 %v5260_v52  ;;  %v5072_v55 = vld [vmem:[#allocation2 + $0x28] sm:$0xff]  ;;  %v5071_v28 = vld [vmem:[#allocation2 + $0x20] sm:$0xff]  ;;  %v5069_v29 = vld [vmem:[#allocation2 + $0x10] sm:$0xff] }
 0x28a   :  { %5268 = vmatpush1.bf16.msra.mxu0 %v5067_v53  ;;  %5391 = vmatpush1.bf16.msra.mxu1 %v5259_v54  ;;  %v5076_v30 = vld [vmem:[#allocation2 + $0x48] sm:$0xff]  ;;  %v5074_v31 = vld [vmem:[#allocation2 + $0x38] sm:$0xff]  ;;  %v5075_v32 = vld [vmem:[#allocation2 + $0x40] sm:$0xff] }
 0x28b   :  { %5269 = vmatprep.subr.bf16.mxu0 %v5072_v55  ;;  %5431 = vmatprep.subr.bf16.mxu1 %v5070_v27  ;;  %v5073_v33 = vld [vmem:[#allocation2 + $0x30] sm:$0xff]  ;;  %v5080_v34 = vld [vmem:[#allocation2 + $0x68] sm:$0xff]  ;;  %v5078_v35 = vld [vmem:[#allocation2 + $0x58] sm:$0xff] }
 0x28c   :  { %v5079_v36 = vld [vmem:[#allocation2 + $0x60] sm:$0xff]  ;;  %v5077_v37 = vld [vmem:[#allocation2 + $0x50] sm:$0xff]  ;;  %v5084_v38 = vld [vmem:[#allocation2 + $0x88] sm:$0xff] }
 0x28d   :  { %7644 = vmatmul.mubr.msk.bf16.vlgmr.msra.gmra.mrb[0].mxu1 %vm5263_vm0, %v11187_v56  ;;  %v5082_v39 = vld [vmem:[#allocation2 + $0x78] sm:$0xff]  ;;  %v5083_v40 = vld [vmem:[#allocation2 + $0x80] sm:$0xff]  ;;  %v5081_v41 = vld [vmem:[#allocation2 + $0x70] sm:$0xff] }
 0x28e   :  { %5270 = vmatpush1.bf16.msra.mxu0 %v5071_v28  ;;  %5432 = vmatpush1.bf16.msra.mxu1 %v5069_v29  ;;  %v5088_v43 = vld [vmem:[#allocation2 + $0xa8] sm:$0xff]  ;;  %v5086_v48 = vld [vmem:[#allocation2 + $0x98] sm:$0xff]  ;;  %v5085_v51 = vld [vmem:[#allocation2 + $0x90] sm:$0xff] }
 0x28f   :  { %5271 = vmatprep.subr.bf16.mxu0 %v5076_v30  ;;  %5433 = vmatprep.subr.bf16.mxu1 %v5074_v31  ;;  %v5092_v52 = vld [vmem:[#allocation2 + $0xc8] sm:$0xff]  ;;  %v5090_v53 = vld [vmem:[#allocation2 + $0xb8] sm:$0xff]  ;;  %v5091_v54 = vld [vmem:[#allocation2 + $0xc0] sm:$0xff] }
 0x290   :  { %5463 = vmatprep.mubr.bf16.mxu1 %v5061_v49  ;;  %v5087_v49 = vld [vmem:[#allocation2 + $0xa0] sm:$0xff]  ;;  %v5089_v55 = vld [vmem:[#allocation2 + $0xb0] sm:$0xff]  ;;  %v5096_v27 = vld [vmem:[#allocation2 + $0xe8] sm:$0xff] }
 0x291   :  { %v5094_v28 = vld [vmem:[#allocation2 + $0xd8] sm:$0xff]  ;;  %v5095_v29 = vld [vmem:[#allocation2 + $0xe0] sm:$0xff]  ;;  %v5093_v30 = vld [vmem:[#allocation2 + $0xd0] sm:$0xff] }
 0x292   :  { %5272 = vmatpush1.bf16.msra.mxu0 %v5075_v32  ;;  %5434 = vmatpush1.bf16.msra.mxu1 %v5073_v33  ;;  %v5100_v31 = vld [vmem:[#allocation2 + $0x108] sm:$0xff]  ;;  %v5098_v32 = vld [vmem:[#allocation2 + $0xf8] sm:$0xff]  ;;  %v5099_v33 = vld [vmem:[#allocation2 + $0x100] sm:$0xff] }
 0x293   :  { %5273 = vmatprep.subr.bf16.mxu0 %v5080_v34  ;;  %5435 = vmatprep.subr.bf16.mxu1 %v5078_v35  ;;  %v5097_v34 = vld [vmem:[#allocation2 + $0xf0] sm:$0xff]  ;;  %v5104_v35 = vld [vmem:[#allocation2 + $0x128] sm:$0xff] }
 0x296   :  { %5274 = vmatpush1.bf16.msra.mxu0 %v5079_v36  ;;  %5436 = vmatpush1.bf16.msra.mxu1 %v5077_v37  ;;  %v5102_v36 = vld [vmem:[#allocation2 + $0x118] sm:$0xff]  ;;  %v5103_v37 = vld [vmem:[#allocation2 + $0x120] sm:$0xff] }
 0x297   :  { %5275 = vmatprep.subr.bf16.mxu0 %v5084_v38  ;;  %5437 = vmatprep.subr.bf16.mxu1 %v5082_v39  ;;  %v5101_v38 = vld [vmem:[#allocation2 + $0x110] sm:$0xff]  ;;  %v5108_v39 = vld [vmem:[#allocation2 + $0x148] sm:$0xff] }
 0x29a   :  { %5276 = vmatpush1.bf16.msra.mxu0 %v5083_v40  ;;  %5438 = vmatpush1.bf16.msra.mxu1 %v5081_v41  ;;  %v5106_v40 = vld [vmem:[#allocation2 + $0x138] sm:$0xff]  ;;  %v5107_v41 = vld [vmem:[#allocation2 + $0x140] sm:$0xff] }
 0x29b   :  { %5277 = vmatprep.subr.bf16.mxu0 %v5088_v43  ;;  %5439 = vmatprep.subr.bf16.mxu1 %v5086_v48  ;;  %v5105_v43 = vld [vmem:[#allocation2 + $0x130] sm:$0xff]  ;;  %v5112_v48 = vld [vmem:[#allocation2 + $0x168] sm:$0xff] }
 0x29e   :  { %5278 = vmatpush1.bf16.msra.mxu0 %v5087_v49  ;;  %5440 = vmatpush1.bf16.msra.mxu1 %v5085_v51  ;;  %v5110_v49 = vld [vmem:[#allocation2 + $0x158] sm:$0xff]  ;;  %v5111_v51 = vld [vmem:[#allocation2 + $0x160] sm:$0xff] }
 0x29f   :  { %5279 = vmatprep.subr.bf16.mxu0 %v5092_v52  ;;  %5441 = vmatprep.subr.bf16.mxu1 %v5090_v53  ;;  %v5109_v52 = vld [vmem:[#allocation2 + $0x150] sm:$0xff]  ;;  %v5116_v53 = vld [vmem:[#allocation2 + $0x188] sm:$0xff] }
 0x2a2   :  { %5280 = vmatpush1.bf16.msra.mxu0 %v5091_v54  ;;  %5442 = vmatpush1.bf16.msra.mxu1 %v5089_v55  ;;  %v5114_v54 = vld [vmem:[#allocation2 + $0x178] sm:$0xff]  ;;  %v5115_v55 = vld [vmem:[#allocation2 + $0x180] sm:$0xff] }
 0x2a3   :  { %5281 = vmatprep.subr.bf16.mxu0 %v5096_v27  ;;  %5443 = vmatprep.subr.bf16.mxu1 %v5094_v28  ;;  %v5113_v27 = vld [vmem:[#allocation2 + $0x170] sm:$0xff]  ;;  %v5120_v28 = vld [vmem:[#allocation2 + $0x1a8] sm:$0xff] }
 0x2a6   :  { %5282 = vmatpush1.bf16.msra.mxu0 %v5095_v29  ;;  %5444 = vmatpush1.bf16.msra.mxu1 %v5093_v30  ;;  %v5118_v29 = vld [vmem:[#allocation2 + $0x198] sm:$0xff]  ;;  %v5119_v30 = vld [vmem:[#allocation2 + $0x1a0] sm:$0xff] }
 0x2a7   :  { %5283 = vmatprep.subr.bf16.mxu0 %v5100_v31  ;;  %5445 = vmatprep.subr.bf16.mxu1 %v5098_v32  ;;  %v5117_v31 = vld [vmem:[#allocation2 + $0x190] sm:$0xff]  ;;  %v5124_v32 = vld [vmem:[#allocation2 + $0x1c8] sm:$0xff] }
 0x2aa   :  { %5284 = vmatpush1.bf16.msra.mxu0 %v5099_v33  ;;  %5446 = vmatpush1.bf16.msra.mxu1 %v5097_v34  ;;  %v5122_v33 = vld [vmem:[#allocation2 + $0x1b8] sm:$0xff]  ;;  %v5123_v34 = vld [vmem:[#allocation2 + $0x1c0] sm:$0xff] }
 0x2ab   :  { %5285 = vmatprep.subr.bf16.mxu0 %v5104_v35  ;;  %5447 = vmatprep.subr.bf16.mxu1 %v5102_v36  ;;  %v5121_v35 = vld [vmem:[#allocation2 + $0x1b0] sm:$0xff]  ;;  %v5128_v36 = vld [vmem:[#allocation2 + $0x1e8] sm:$0xff] }
 0x2ae   :  { %5286 = vmatpush1.bf16.msra.mxu0 %v5103_v37  ;;  %5448 = vmatpush1.bf16.msra.mxu1 %v5101_v38  ;;  %v5126_v37 = vld [vmem:[#allocation2 + $0x1d8] sm:$0xff]  ;;  %v5127_v38 = vld [vmem:[#allocation2 + $0x1e0] sm:$0xff] }
 0x2af   :  { %5287 = vmatprep.subr.bf16.mxu0 %v5108_v39  ;;  %5449 = vmatprep.subr.bf16.mxu1 %v5106_v40  ;;  %v5125_v39 = vld [vmem:[#allocation2 + $0x1d0] sm:$0xff]  ;;  %v5132_v40 = vld [vmem:[#allocation2 + $0x208] sm:$0xff] }
 0x2b2   :  { %5288 = vmatpush1.bf16.msra.mxu0 %v5107_v41  ;;  %5450 = vmatpush1.bf16.msra.mxu1 %v5105_v43  ;;  %v5130_v41 = vld [vmem:[#allocation2 + $0x1f8] sm:$0xff]  ;;  %v5060_v43 = vpack.c.bf16 %v11158_v42, %v11158_v42 }
 0x2b3   :  { %5289 = vmatprep.subr.bf16.mxu0 %v5112_v48  ;;  %5451 = vmatprep.subr.bf16.mxu1 %v5110_v49  ;;  %v5131_v48 = vld [vmem:[#allocation2 + $0x200] sm:$0xff]  ;;  %v5129_v49 = vld [vmem:[#allocation2 + $0x1f0] sm:$0xff]  ;;  %v5138_v42 = vld [vmem:[#allocation2 + $0x238] sm:$0xff] }
 0x2b6   :  { %5290 = vmatpush1.bf16.msra.mxu0 %v5111_v51  ;;  %5452 = vmatpush1.bf16.msra.mxu1 %v5109_v52  ;;  %v5136_v51 = vld [vmem:[#allocation2 + $0x228] sm:$0xff]  ;;  %v5134_v52 = vld [vmem:[#allocation2 + $0x218] sm:$0xff] }
 0x2b7   :  { %5291 = vmatprep.subr.bf16.mxu0 %v5116_v53  ;;  %5453 = vmatprep.subr.bf16.mxu1 %v5114_v54  ;;  %v5063_v53 = vpack.c.bf16 %v11171_v45, %v11171_v45  ;;  %v5135_v54 = vld [vmem:[#allocation2 + $0x220] sm:$0xff] }
 0x2b8   :  { %v5143_v45 = vld [vmem:[#allocation2 + $0x260] sm:$0xff] }
 0x2ba   :  { %5292 = vmatpush1.bf16.msra.mxu0 %v5115_v55  ;;  %5454 = vmatpush1.bf16.msra.mxu1 %v5113_v27  ;;  %v5133_v55 = vld [vmem:[#allocation2 + $0x210] sm:$0xff]  ;;  %v5140_v27 = vld [vmem:[#allocation2 + $0x248] sm:$0xff] }
 0x2bb   :  { %5293 = vmatprep.subr.bf16.mxu0 %v5120_v28  ;;  %5455 = vmatprep.subr.bf16.mxu1 %v5118_v29  ;;  %v5139_v28 = vld [vmem:[#allocation2 + $0x240] sm:$0xff]  ;;  %v5137_v29 = vld [vmem:[#allocation2 + $0x230] sm:$0xff] }
 0x2be   :  { %5294 = vmatpush1.bf16.msra.mxu0 %v5119_v30  ;;  %5456 = vmatpush1.bf16.msra.mxu1 %v5117_v31  ;;  %v5144_v30 = vld [vmem:[#allocation2 + $0x268] sm:$0xff]  ;;  %v5142_v31 = vld [vmem:[#allocation2 + $0x258] sm:$0xff] }
 0x2bf   :  { %5295 = vmatprep.subr.bf16.mxu0 %v5124_v32  ;;  %5457 = vmatprep.subr.bf16.mxu1 %v5122_v33  ;;  %v5141_v32 = vld [vmem:[#allocation2 + $0x250] sm:$0xff]  ;;  %v5148_v33 = vld [vmem:[#allocation2 + $0x288] sm:$0xff] }
 0x2c2   :  { %5296 = vmatpush1.bf16.msra.mxu0 %v5123_v34  ;;  %5458 = vmatpush1.bf16.msra.mxu1 %v5121_v35  ;;  %v5146_v34 = vld [vmem:[#allocation2 + $0x278] sm:$0xff]  ;;  %v5147_v35 = vld [vmem:[#allocation2 + $0x280] sm:$0xff] }
 0x2c3   :  { %5297 = vmatprep.subr.bf16.mxu0 %v5128_v36  ;;  %5459 = vmatprep.subr.bf16.mxu1 %v5126_v37  ;;  %v5145_v36 = vld [vmem:[#allocation2 + $0x270] sm:$0xff]  ;;  %v5152_v37 = vld [vmem:[#allocation2 + $0x2a8] sm:$0xff] }
 0x2c6   :  { %5298 = vmatpush1.bf16.msra.mxu0 %v5127_v38  ;;  %5460 = vmatpush1.bf16.msra.mxu1 %v5125_v39  ;;  %v5150_v38 = vld [vmem:[#allocation2 + $0x298] sm:$0xff]  ;;  %v5151_v39 = vld [vmem:[#allocation2 + $0x2a0] sm:$0xff] }
 0x2c7   :  { %5308 = vmatprep.subr.bf16.mxu0 %v5132_v40  ;;  %5461 = vmatprep.subr.bf16.mxu1 %v5130_v41  ;;  %v5149_v40 = vld [vmem:[#allocation2 + $0x290] sm:$0xff]  ;;  %v5156_v41 = vld [vmem:[#allocation2 + $0x2c8] sm:$0xff] }
 0x2c9   :  { %5300 = vmatmul.mubr.bf16.vlgmr.msra.gmra.mrb[0].mxu0 %v5060_v43 }
 0x2ca   :  { %5309 = vmatpush1.bf16.msra.mxu0 %v5131_v48  ;;  %5462 = vmatpush1.bf16.msra.mxu1 %v5129_v49  ;;  %v5155_v48 = vld [vmem:[#allocation2 + $0x2c0] sm:$0xff]  ;;  %v5153_v49 = vld [vmem:[#allocation2 + $0x2b0] sm:$0xff] }
 0x2cb   :  { %5310 = vmatprep.subr.bf16.mxu0 %v5136_v51  ;;  %5472 = vmatprep.subr.bf16.mxu1 %v5134_v52  ;;  %v5160_v51 = vld [vmem:[#allocation2 + $0x2e8] sm:$0xff]  ;;  %v5158_v52 = vld [vmem:[#allocation2 + $0x2d8] sm:$0xff] }
 0x2cc   :  { %5340 = vmatprep.mubr.bf16.mxu0 %v5063_v53 }
 0x2cd   :  { %5464 = vmatmul.mubr.bf16.vlgmr.msra.gmra.mrb[4].mxu1 %v5060_v43  ;;  %v5154_v43 = vld [vmem:[#allocation2 + $0x2b8] sm:$0xff] }
 0x2ce   :  { %5311 = vmatpush1.bf16.msra.mxu0 %v5135_v54  ;;  %5473 = vmatpush1.bf16.msra.mxu1 %v5133_v55  ;;  %v5157_v54 = vld [vmem:[#allocation2 + $0x2d0] sm:$0xff]  ;;  %v5164_v55 = vld [vmem:[#allocation2 + $0x308] sm:$0xff] }
 0x2cf   :  { %5312 = vmatprep.subr.bf16.mxu0 %v5140_v27  ;;  %5474 = vmatprep.subr.bf16.mxu1 %v5138_v42  ;;  %v5162_v27 = vld [vmem:[#allocation2 + $0x2f8] sm:$0xff]  ;;  %v5163_v42 = vld [vmem:[#allocation2 + $0x300] sm:$0xff] }
 0x2d0   :  { %5504 = vmatprep.mubr.bf16.mxu1 %v5063_v53  ;;  %v5159_v53 = vld [vmem:[#allocation2 + $0x2e0] sm:$0xff] }
 0x2d2   :  { %5313 = vmatpush1.bf16.msra.mxu0 %v5139_v28  ;;  %5475 = vmatpush1.bf16.msra.mxu1 %v5137_v29  ;;  %v5161_v28 = vld [vmem:[#allocation2 + $0x2f0] sm:$0xff]  ;;  %v5168_v29 = vld [vmem:[#allocation2 + $0x328] sm:$0xff] }
 0x2d3   :  { %5314 = vmatprep.subr.bf16.mxu0 %v5144_v30  ;;  %5476 = vmatprep.subr.bf16.mxu1 %v5142_v31  ;;  %v5166_v30 = vld [vmem:[#allocation2 + $0x318] sm:$0xff]  ;;  %v5167_v31 = vld [vmem:[#allocation2 + $0x320] sm:$0xff] }
 0x2d6   :  { %5315 = vmatpush1.bf16.msra.mxu0 %v5143_v45  ;;  %5477 = vmatpush1.bf16.msra.mxu1 %v5141_v32  ;;  %v5165_v45 = vld [vmem:[#allocation2 + $0x310] sm:$0xff]  ;;  %v5172_v32 = vld [vmem:[#allocation2 + $0x348] sm:$0xff] }
 0x2d7   :  { %5316 = vmatprep.subr.bf16.mxu0 %v5148_v33  ;;  %5478 = vmatprep.subr.bf16.mxu1 %v5146_v34  ;;  %v5170_v33 = vld [vmem:[#allocation2 + $0x338] sm:$0xff]  ;;  %v5171_v34 = vld [vmem:[#allocation2 + $0x340] sm:$0xff] }
 0x2da   :  { %5317 = vmatpush1.bf16.msra.mxu0 %v5147_v35  ;;  %5479 = vmatpush1.bf16.msra.mxu1 %v5145_v36  ;;  %v5169_v35 = vld [vmem:[#allocation2 + $0x330] sm:$0xff]  ;;  %v5176_v36 = vld [vmem:[#allocation2 + $0x368] sm:$0xff] }
 0x2db   :  { %5318 = vmatprep.subr.bf16.mxu0 %v5152_v37  ;;  %5480 = vmatprep.subr.bf16.mxu1 %v5150_v38  ;;  %v5174_v37 = vld [vmem:[#allocation2 + $0x358] sm:$0xff]  ;;  %v5175_v38 = vld [vmem:[#allocation2 + $0x360] sm:$0xff] }
 0x2de   :  { %5319 = vmatpush1.bf16.msra.mxu0 %v5151_v39  ;;  %5481 = vmatpush1.bf16.msra.mxu1 %v5149_v40  ;;  %v5173_v39 = vld [vmem:[#allocation2 + $0x350] sm:$0xff]  ;;  %v5180_v40 = vld [vmem:[#allocation2 + $0x388] sm:$0xff] }
 0x2df   :  { %5320 = vmatprep.subr.bf16.mxu0 %v5156_v41  ;;  %5482 = vmatprep.subr.bf16.mxu1 %v5154_v43  ;;  %v5178_v41 = vld [vmem:[#allocation2 + $0x378] sm:$0xff]  ;;  %v5179_v43 = vld [vmem:[#allocation2 + $0x380] sm:$0xff] }
 0x2e2   :  { %5321 = vmatpush1.bf16.msra.mxu0 %v5155_v48  ;;  %5483 = vmatpush1.bf16.msra.mxu1 %v5153_v49  ;;  %v5177_v48 = vld [vmem:[#allocation2 + $0x370] sm:$0xff]  ;;  %v5184_v49 = vld [vmem:[#allocation2 + $0x3a8] sm:$0xff] }
 0x2e3   :  { %5322 = vmatprep.subr.bf16.mxu0 %v5160_v51  ;;  %5484 = vmatprep.subr.bf16.mxu1 %v5158_v52  ;;  %v5182_v51 = vld [vmem:[#allocation2 + $0x398] sm:$0xff]  ;;  %v5183_v52 = vld [vmem:[#allocation2 + $0x3a0] sm:$0xff] }
 0x2e6   :  { %5323 = vmatpush1.bf16.msra.mxu0 %v5159_v53  ;;  %5485 = vmatpush1.bf16.msra.mxu1 %v5157_v54  ;;  %v5181_v53 = vld [vmem:[#allocation2 + $0x390] sm:$0xff]  ;;  %v5188_v54 = vld [vmem:[#allocation2 + $0x3c8] sm:$0xff] }
 0x2e7   :  { %5324 = vmatprep.subr.bf16.mxu0 %v5164_v55  ;;  %5486 = vmatprep.subr.bf16.mxu1 %v5162_v27  ;;  %v5186_v55 = vld [vmem:[#allocation2 + $0x3b8] sm:$0xff]  ;;  %v5187_v27 = vld [vmem:[#allocation2 + $0x3c0] sm:$0xff] }
 0x2ea   :  { %5325 = vmatpush1.bf16.msra.mxu0 %v5163_v42  ;;  %5487 = vmatpush1.bf16.msra.mxu1 %v5161_v28  ;;  %v5185_v42 = vld [vmem:[#allocation2 + $0x3b0] sm:$0xff]  ;;  %v5192_v28 = vld [vmem:[#allocation2 + $0x3e8] sm:$0xff] }
 0x2eb   :  { %5326 = vmatprep.subr.bf16.mxu0 %v5168_v29  ;;  %5488 = vmatprep.subr.bf16.mxu1 %v5166_v30  ;;  %v5190_v29 = vld [vmem:[#allocation2 + $0x3d8] sm:$0xff]  ;;  %v5191_v30 = vld [vmem:[#allocation2 + $0x3e0] sm:$0xff] }
 0x2ee   :  { %5327 = vmatpush1.bf16.msra.mxu0 %v5167_v31  ;;  %5489 = vmatpush1.bf16.msra.mxu1 %v5165_v45  ;;  %v5189_v31 = vld [vmem:[#allocation2 + $0x3d0] sm:$0xff]  ;;  %v5196_v45 = vld [vmem:[#allocation2 + $0x408] sm:$0xff] }
 0x2ef   :  { %5328 = vmatprep.subr.bf16.mxu0 %v5172_v32  ;;  %5490 = vmatprep.subr.bf16.mxu1 %v5170_v33  ;;  %v5194_v32 = vld [vmem:[#allocation2 + $0x3f8] sm:$0xff]  ;;  %v5062_v33 = vpack.c.bf16 %v11166_v44, %v11166_v44 }
 0x2f0   :  { %v5202_v44 = vld [vmem:[#allocation2 + $0x438] sm:$0xff] }
 0x2f2   :  { %5329 = vmatpush1.bf16.msra.mxu0 %v5171_v34  ;;  %5491 = vmatpush1.bf16.msra.mxu1 %v5169_v35  ;;  %v5195_v34 = vld [vmem:[#allocation2 + $0x400] sm:$0xff]  ;;  %v5193_v35 = vld [vmem:[#allocation2 + $0x3f0] sm:$0xff] }
 0x2f3   :  { %5330 = vmatprep.subr.bf16.mxu0 %v5176_v36  ;;  %5492 = vmatprep.subr.bf16.mxu1 %v5174_v37  ;;  %v5200_v36 = vld [vmem:[#allocation2 + $0x428] sm:$0xff]  ;;  %v5198_v37 = vld [vmem:[#allocation2 + $0x418] sm:$0xff] }
 0x2f6   :  { %5331 = vmatpush1.bf16.msra.mxu0 %v5175_v38  ;;  %5493 = vmatpush1.bf16.msra.mxu1 %v5173_v39  ;;  %v5065_v38 = vpack.c.bf16 %v11181_v47, %v11181_v47  ;;  %v5199_v39 = vld [vmem:[#allocation2 + $0x420] sm:$0xff] }
 0x2f7   :  { %5332 = vmatprep.subr.bf16.mxu0 %v5180_v40  ;;  %5494 = vmatprep.subr.bf16.mxu1 %v5178_v41  ;;  %v5197_v40 = vld [vmem:[#allocation2 + $0x410] sm:$0xff]  ;;  %v5204_v41 = vld [vmem:[#allocation2 + $0x448] sm:$0xff]  ;;  %v5207_v47 = vld [vmem:[#allocation2 + $0x460] sm:$0xff] }
 0x2fa   :  { %5333 = vmatpush1.bf16.msra.mxu0 %v5179_v43  ;;  %5495 = vmatpush1.bf16.msra.mxu1 %v5177_v48  ;;  %v5203_v43 = vld [vmem:[#allocation2 + $0x440] sm:$0xff]  ;;  %v5201_v48 = vld [vmem:[#allocation2 + $0x430] sm:$0xff] }
 0x2fb   :  { %5334 = vmatprep.subr.bf16.mxu0 %v5184_v49  ;;  %5496 = vmatprep.subr.bf16.mxu1 %v5182_v51  ;;  %v5208_v49 = vld [vmem:[#allocation2 + $0x468] sm:$0xff]  ;;  %v5206_v51 = vld [vmem:[#allocation2 + $0x458] sm:$0xff] }
 0x2fe   :  { %5335 = vmatpush1.bf16.msra.mxu0 %v5183_v52  ;;  %5497 = vmatpush1.bf16.msra.mxu1 %v5181_v53  ;;  %v5205_v52 = vld [vmem:[#allocation2 + $0x450] sm:$0xff]  ;;  %v5212_v53 = vld [vmem:[#allocation2 + $0x488] sm:$0xff] }
 0x2ff   :  { %5336 = vmatprep.subr.bf16.mxu0 %v5188_v54  ;;  %5498 = vmatprep.subr.bf16.mxu1 %v5186_v55  ;;  %v5210_v54 = vld [vmem:[#allocation2 + $0x478] sm:$0xff]  ;;  %v5211_v55 = vld [vmem:[#allocation2 + $0x480] sm:$0xff] }
 0x302   :  { %5337 = vmatpush1.bf16.msra.mxu0 %v5187_v27  ;;  %5499 = vmatpush1.bf16.msra.mxu1 %v5185_v42  ;;  %v5209_v27 = vld [vmem:[#allocation2 + $0x470] sm:$0xff]  ;;  %v5216_v42 = vld [vmem:[#allocation2 + $0x4a8] sm:$0xff] }
 0x303   :  { %5338 = vmatprep.subr.bf16.mxu0 %v5192_v28  ;;  %5500 = vmatprep.subr.bf16.mxu1 %v5190_v29  ;;  %v5214_v28 = vld [vmem:[#allocation2 + $0x498] sm:$0xff]  ;;  %v5215_v29 = vld [vmem:[#allocation2 + $0x4a0] sm:$0xff] }
 0x306   :  { %5339 = vmatpush1.bf16.msra.mxu0 %v5191_v30  ;;  %5501 = vmatpush1.bf16.msra.mxu1 %v5189_v31  ;;  %v5213_v30 = vld [vmem:[#allocation2 + $0x490] sm:$0xff]  ;;  %v5220_v31 = vld [vmem:[#allocation2 + $0x4c8] sm:$0xff] }
 0x307   :  { %5349 = vmatprep.subr.bf16.mxu0 %v5196_v45  ;;  %5502 = vmatprep.subr.bf16.mxu1 %v5194_v32  ;;  %v5218_v45 = vld [vmem:[#allocation2 + $0x4b8] sm:$0xff]  ;;  %v5219_v32 = vld [vmem:[#allocation2 + $0x4c0] sm:$0xff] }
 0x309   :  { %5341 = vmatmul.mubr.bf16.vlgmr.msra.gmra.mrb[0].mxu0 %v5062_v33 }
 0x30a   :  { %5350 = vmatpush1.bf16.msra.mxu0 %v5195_v34  ;;  %5503 = vmatpush1.bf16.msra.mxu1 %v5193_v35  ;;  %v5224_v34 = vld [vmem:[#allocation2 + $0x4e8] sm:$0xff]  ;;  %v5222_v35 = vld [vmem:[#allocation2 + $0x4d8] sm:$0xff] }
 0x30b   :  { %5351 = vmatprep.subr.bf16.mxu0 %v5200_v36  ;;  %5513 = vmatprep.subr.bf16.mxu1 %v5198_v37  ;;  %v5223_v36 = vld [vmem:[#allocation2 + $0x4e0] sm:$0xff]  ;;  %v5221_v37 = vld [vmem:[#allocation2 + $0x4d0] sm:$0xff] }
 0x30c   :  { %5381 = vmatprep.mubr.bf16.mxu0 %v5065_v38 }
 0x30d   :  { %5505 = vmatmul.mubr.bf16.vlgmr.msra.gmra.mrb[4].mxu1 %v5062_v33  ;;  %v5217_v33 = vld [vmem:[#allocation2 + $0x4b0] sm:$0xff] }
 0x30e   :  { %5352 = vmatpush1.bf16.msra.mxu0 %v5199_v39  ;;  %5514 = vmatpush1.bf16.msra.mxu1 %v5197_v40  ;;  %v5226_v39 = vld [vmem:[#allocation2 + $0x4f8] sm:$0xff]  ;;  %v5227_v40 = vld [vmem:[#allocation2 + $0x500] sm:$0xff] }
 0x30f   :  { %5353 = vmatprep.subr.bf16.mxu0 %v5204_v41  ;;  %5515 = vmatprep.subr.bf16.mxu1 %v5202_v44  ;;  %v5225_v41 = vld [vmem:[#allocation2 + $0x4f0] sm:$0xff]  ;;  %v5232_v44 = vld [vmem:[#allocation2 + $0x528] sm:$0xff] }
 0x310   :  { %5545 = vmatprep.mubr.bf16.mxu1 %v5065_v38  ;;  %v5228_v38 = vld [vmem:[#allocation2 + $0x508] sm:$0xff] }
 0x312   :  { %5354 = vmatpush1.bf16.msra.mxu0 %v5203_v43  ;;  %5516 = vmatpush1.bf16.msra.mxu1 %v5201_v48  ;;  %v5230_v43 = vld [vmem:[#allocation2 + $0x518] sm:$0xff]  ;;  %v5231_v48 = vld [vmem:[#allocation2 + $0x520] sm:$0xff] }
 0x313   :  { %5355 = vmatprep.subr.bf16.mxu0 %v5208_v49  ;;  %5517 = vmatprep.subr.bf16.mxu1 %v5206_v51  ;;  %v5229_v49 = vld [vmem:[#allocation2 + $0x510] sm:$0xff]  ;;  %v5236_v51 = vld [vmem:[#allocation2 + $0x548] sm:$0xff] }
 0x316   :  { %5356 = vmatpush1.bf16.msra.mxu0 %v5207_v47  ;;  %5518 = vmatpush1.bf16.msra.mxu1 %v5205_v52  ;;  %v5234_v47 = vld [vmem:[#allocation2 + $0x538] sm:$0xff]  ;;  %v5235_v52 = vld [vmem:[#allocation2 + $0x540] sm:$0xff] }
 0x317   :  { %5357 = vmatprep.subr.bf16.mxu0 %v5212_v53  ;;  %5519 = vmatprep.subr.bf16.mxu1 %v5210_v54  ;;  %v5233_v53 = vld [vmem:[#allocation2 + $0x530] sm:$0xff]  ;;  %v5240_v54 = vld [vmem:[#allocation2 + $0x568] sm:$0xff] }
 0x31a   :  { %5358 = vmatpush1.bf16.msra.mxu0 %v5211_v55  ;;  %5520 = vmatpush1.bf16.msra.mxu1 %v5209_v27  ;;  %v5238_v55 = vld [vmem:[#allocation2 + $0x558] sm:$0xff]  ;;  %v5239_v27 = vld [vmem:[#allocation2 + $0x560] sm:$0xff] }
 0x31b   :  { %5359 = vmatprep.subr.bf16.mxu0 %v5216_v42  ;;  %5521 = vmatprep.subr.bf16.mxu1 %v5214_v28  ;;  %v5237_v42 = vld [vmem:[#allocation2 + $0x550] sm:$0xff]  ;;  %v5244_v28 = vld [vmem:[#allocation2 + $0x588] sm:$0xff] }
 0x31e   :  { %5360 = vmatpush1.bf16.msra.mxu0 %v5215_v29  ;;  %5522 = vmatpush1.bf16.msra.mxu1 %v5213_v30  ;;  %v5242_v29 = vld [vmem:[#allocation2 + $0x578] sm:$0xff]  ;;  %v5243_v30 = vld [vmem:[#allocation2 + $0x580] sm:$0xff] }
 0x31f   :  { %5361 = vmatprep.subr.bf16.mxu0 %v5220_v31  ;;  %5523 = vmatprep.subr.bf16.mxu1 %v5218_v45  ;;  %v5241_v31 = vld [vmem:[#allocation2 + $0x570] sm:$0xff]  ;;  %v5248_v45 = vld [vmem:[#allocation2 + $0x5a8] sm:$0xff] }
 0x322   :  { %5362 = vmatpush1.bf16.msra.mxu0 %v5219_v32  ;;  %5524 = vmatpush1.bf16.msra.mxu1 %v5217_v33  ;;  %v5246_v32 = vld [vmem:[#allocation2 + $0x598] sm:$0xff]  ;;  %v5247_v33 = vld [vmem:[#allocation2 + $0x5a0] sm:$0xff] }
 0x323   :  { %5363 = vmatprep.subr.bf16.mxu0 %v5224_v34  ;;  %5525 = vmatprep.subr.bf16.mxu1 %v5222_v35  ;;  %v5245_v34 = vld [vmem:[#allocation2 + $0x590] sm:$0xff]  ;;  %v5252_v35 = vld [vmem:[#allocation2 + $0x5c8] sm:$0xff] }
 0x326   :  { %5364 = vmatpush1.bf16.msra.mxu0 %v5223_v36  ;;  %5526 = vmatpush1.bf16.msra.mxu1 %v5221_v37  ;;  %v5250_v36 = vld [vmem:[#allocation2 + $0x5b8] sm:$0xff]  ;;  %v5251_v37 = vld [vmem:[#allocation2 + $0x5c0] sm:$0xff] }
 0x327   :  { %5365 = vmatprep.subr.bf16.mxu0 %v5228_v38  ;;  %5527 = vmatprep.subr.bf16.mxu1 %v5226_v39  ;;  %v5249_v38 = vld [vmem:[#allocation2 + $0x5b0] sm:$0xff]  ;;  %v5256_v39 = vld [vmem:[#allocation2 + $0x5e8] sm:$0xff] }
 0x32a   :  { %5366 = vmatpush1.bf16.msra.mxu0 %v5227_v40  ;;  %5528 = vmatpush1.bf16.msra.mxu1 %v5225_v41  ;;  %v5254_v40 = vld [vmem:[#allocation2 + $0x5d8] sm:$0xff]  ;;  %v5255_v41 = vld [vmem:[#allocation2 + $0x5e0] sm:$0xff] }
 0x32b   :  { %5367 = vmatprep.subr.bf16.mxu0 %v5232_v44  ;;  %5529 = vmatprep.subr.bf16.mxu1 %v5230_v43  ;;  %v5253_v44 = vld [vmem:[#allocation2 + $0x5d0] sm:$0xff]  ;;  %v5258_v43 = vld [vmem:[#allocation2 + $0x5f8] sm:$0xff] }
 0x32e   :  { %5368 = vmatpush1.bf16.msra.mxu0 %v5231_v48  ;;  %5530 = vmatpush1.bf16.msra.mxu1 %v5229_v49  ;;  %v5064_v48 = vpack.c.bf16 %v11176_v46, %v11176_v46  ;;  %v5257_v49 = vld [vmem:[#allocation2 + $0x5f0] sm:$0xff] }
 0x32f   :  { %5369 = vmatprep.subr.bf16.mxu0 %v5236_v51  ;;  %5531 = vmatprep.subr.bf16.mxu1 %v5234_v47  ;;  %v5262_v51 = vld [vmem:[#allocation2 + $0x618] sm:$0xff]  ;;  %v5261_v47 = vld [vmem:[#allocation2 + $0x610] sm:$0xff] }
 0x332   :  { %5370 = vmatpush1.bf16.msra.mxu0 %v5235_v52  ;;  %5532 = vmatpush1.bf16.msra.mxu1 %v5233_v53 }
 0x333   :  { %5371 = vmatprep.subr.bf16.mxu0 %v5240_v54  ;;  %5533 = vmatprep.subr.bf16.mxu1 %v5238_v55 }
 0x336   :  { %5372 = vmatpush1.bf16.msra.mxu0 %v5239_v27  ;;  %5534 = vmatpush1.bf16.msra.mxu1 %v5237_v42 }
 0x337   :  { %5373 = vmatprep.subr.bf16.mxu0 %v5244_v28  ;;  %5535 = vmatprep.subr.bf16.mxu1 %v5242_v29 }
 0x33a   :  { %5374 = vmatpush1.bf16.msra.mxu0 %v5243_v30  ;;  %5536 = vmatpush1.bf16.msra.mxu1 %v5241_v31 }
 0x33b   :  { %5375 = vmatprep.subr.bf16.mxu0 %v5248_v45  ;;  %5537 = vmatprep.subr.bf16.mxu1 %v5246_v32 }
 0x33e   :  { %5376 = vmatpush1.bf16.msra.mxu0 %v5247_v33  ;;  %5538 = vmatpush1.bf16.msra.mxu1 %v5245_v34 }
 0x33f   :  { %5377 = vmatprep.subr.bf16.mxu0 %v5252_v35  ;;  %5539 = vmatprep.subr.bf16.mxu1 %v5250_v36 }
 0x342   :  { %5378 = vmatpush1.bf16.msra.mxu0 %v5251_v37  ;;  %5540 = vmatpush1.bf16.msra.mxu1 %v5249_v38 }
 0x343   :  { %5379 = vmatprep.subr.bf16.mxu0 %v5256_v39  ;;  %5541 = vmatprep.subr.bf16.mxu1 %v5254_v40 }
 0x346   :  { %5380 = vmatpush1.bf16.msra.mxu0 %v5255_v41  ;;  %5542 = vmatpush1.bf16.msra.mxu1 %v5253_v44 }
 0x347   :  { %5543 = vmatprep.subr.bf16.mxu1 %v5258_v43 }
 0x349   :  { %5382 = vmatmul.mubr.bf16.vlgmr.msra.gmra.mrb[0].mxu0 %v5064_v48 }
 0x34a   :  { %5544 = vmatpush1.bf16.msra.mxu1 %v5257_v49 }
 0x34b   :  { %5554 = vmatprep.subr.bf16.mxu1 %v5262_v51 }
 0x34d   :  { %5546 = vmatmul.mubr.bf16.vlgmr.msra.gmra.mrb[4].mxu1 %v5064_v48 }
 0x34e   :  { %5555 = vmatpush1.bf16.msra.mxu1 %v5261_v47  ;;  %5586 = vmatprep.mubr.bf16.mxu1 %v11437_v50 }
 0x359   :  { %7645 = vmatmul.mubr.msk.bf16.vlgmr.msra.gmra.mrb[4].mxu1 %vm5263_vm0, %v11187_v56 }
 0x360   :  { %v5424_v52 = vpop.f32.mrb[0].mxu1 }
 0x361   :  { %v5426_v53 = vpop.f32.mrb[1].mxu1 }
 0x362   :  { %v5428_v54 = vpop.f32.mrb[2].mxu1 }
 0x363   :  { %v5429_v46 = vpop.f32.mrb[3].mxu1 }
 0x41c   :  { %v5383_v55 = vpop.f32.mrb[0].mxu0 }
 0x41d   :  { %v11204_v27 = vadd.f32 %v5424_v52, %v5383_v55  ;;  %v5385_v42 = vpop.f32.mrb[1].mxu0 }
 0x41e   :  { %v11206_v28 = vadd.f32 %v5426_v53, %v5385_v42  ;;  %v5387_v29 = vpop.f32.mrb[2].mxu0 }
 0x41f   :  { %v5595_v30 = vrot.slane %v11204_v27, 4  ;;  %v5624_v31 = vmul.f32 %v11204_v27, %v11204_v27  ;;  %v5388_v45 = vpop.f32.mrb[3].mxu0 }
 0x420   :  { %v5601_v32 = vrot.slane %v11206_v28, 4  ;;  %v5625_v56 = vmul.f32 %v11206_v28, %v11206_v28 }
 0x421   :  { %v5596_v33 = vadd.f32 %v11204_v27, %v5595_v30  ;;  %v5628_v34 = vrot.slane %v5624_v31, 4 }
 0x422   :  { %v5602_v35 = vadd.f32 %v11206_v28, %v5601_v32  ;;  %v5634_v36 = vrot.slane %v5625_v56, 4 }
 0x423   :  { %v5597_v37 = vrot.slane %v5596_v33, 2  ;;  %v5629_v38 = vadd.f32 %v5628_v34, %v5624_v31 }
 0x424   :  { %v5603_v39 = vrot.slane %v5602_v35, 2  ;;  %v5635_v40 = vadd.f32 %v5634_v36, %v5625_v56 }
 0x425   :  { %v5598_v41 = vadd.f32 %v5597_v37, %v5596_v33  ;;  %v5630_v44 = vrot.slane %v5629_v38, 2 }
 0x426   :  { %v5604_v43 = vadd.f32 %v5603_v39, %v5602_v35  ;;  %v5636_v48 = vrot.slane %v5635_v40, 2 }
 0x427   :  { %v5599_v49 = vrot.slane %v5598_v41, 1  ;;  %v5631_v51 = vadd.f32 %v5630_v44, %v5629_v38 }
 0x428   :  { %v5605_v47 = vrot.slane %v5604_v43, 1  ;;  %v5637_v52 = vadd.f32 %v5636_v48, %v5635_v40 }
 0x429   :  { %v5600_v53 = vadd.f32 %v5599_v49, %v5598_v41  ;;  %v5632_v54 = vrot.slane %v5631_v51, 1 }
 0x42a   :  { %v5606_v46 = vadd.f32 %v5605_v47, %v5604_v43  ;;  %v5638_v55 = vrot.slane %v5637_v52, 1 }
 0x42b   :  { %v5620_v42 = vmul.f32 0.125, %v5600_v53  ;;  %v5633_v29 = vadd.f32 %v5632_v54, %v5631_v51 }
 0x42c   :  { %v5621_v30 = vmul.f32 0.125, %v5606_v46  ;;  %v5639_v45 = vadd.f32 %v5638_v55, %v5637_v52  ;;  %v11216_v32 = vpop.f32.mrb[4].mxu1 }
 0x42d   :  { %v5652_v31 = vmul.f32 0.125, %v5633_v29  ;;  %v5656_v56 = vmul.f32 %v5620_v42, %v5620_v42  ;;  %v5607_v33 = vrot.slane %v11216_v32, 4  ;;  %v11219_v34 = vpop.f32.mrb[5].mxu1  ;;  %v5626_v37 = vmul.f32 %v11216_v32, %v11216_v32 }
 0x42e   :  { %v5653_v35 = vmul.f32 0.125, %v5639_v45  ;;  %v5657_v36 = vmul.f32 %v5621_v30, %v5621_v30  ;;  %v5592_v38 = vpop.f32.mrb[6].mxu1  ;;  %v5613_v41 = vrot.slane %v11219_v34, 4  ;;  %v5627_v44 = vmul.f32 %v11219_v34, %v11219_v34 }
 0x42f   :  { %v5660_v39 = vsub.f32 %v5652_v31, %v5656_v56  ;;  %v5608_v40 = vadd.f32 %v5607_v33, %v11216_v32  ;;  %v5593_v43 = vpop.f32.mrb[7].mxu1  ;;  %v5640_v49 = vrot.slane %v5626_v37, 4 }
 0x430   :  { %v5661_v48 = vsub.f32 %v5653_v35, %v5657_v36  ;;  %v5614_v52 = vadd.f32 %v5613_v41, %v11219_v34  ;;  %v5646_v53 = vrot.slane %v5627_v44, 4 }
 0x431   :  { %v5664_v51 = vmax.f32 %v5660_v39, 0.0  ;;  %v5609_v47 = vrot.slane %v5608_v40, 2  ;;  %v5641_v46 = vadd.f32 %v5640_v49, %v5626_v37 }
 0x432   :  { %v5665_v54 = vmax.f32 %v5661_v48, 0.0  ;;  %v5615_v45 = vrot.slane %v5614_v52, 2  ;;  %v5647_v31 = vadd.f32 %v5646_v53, %v5627_v44 }
 0x433   :  { %v5668_v55 = vadd.f32 1e-05, %v5664_v51  ;;  %v5610_v29 = vadd.f32 %v5609_v47, %v5608_v40  ;;  %v5642_v33 = vrot.slane %v5641_v46, 2 }
 0x434   :  { %v5669_v56 = vadd.f32 1e-05, %v5665_v54  ;;  %v5616_v50 = vadd.f32 %v5615_v45, %v5614_v52  ;;  %v5648_v26 = vrot.slane %v5647_v31, 2  ;;  %v5680_v54 = vsub.f32 0.0, %v5620_v42 }
 0x435   :  { %7841 = vrsqrt.f32 %v5668_v55  ;;  %v5611_v38 = vrot.slane %v5610_v29, 1  ;;  %v5643_v35 = vadd.f32 %v5642_v33, %v5641_v46  ;;  %v5681_v45 = vsub.f32 0.0, %v5621_v30 }
 0x436   :  { %7843 = vrsqrt.f32 %v5669_v56  ;;  %v5617_v39 = vrot.slane %v5616_v50, 1  ;;  %v5649_v43 = vadd.f32 %v5648_v26, %v5647_v31 }
 0x437   :  { %v5612_v36 = vadd.f32 %v5611_v38, %v5610_v29  ;;  %v5644_v25 = vrot.slane %v5643_v35, 1 }
 0x438   :  { %v5618_v24 = vadd.f32 %v5617_v39, %v5616_v50  ;;  %v5650_v48 = vrot.slane %v5649_v43, 1 }
 0x439   :  { %v5622_v41 = vmul.f32 0.125, %v5612_v36  ;;  %v5645_v37 = vadd.f32 %v5644_v25, %v5643_v35 }
 0x43a   :  { %v5623_v40 = vmul.f32 0.125, %v5618_v24  ;;  %v5651_v51 = vadd.f32 %v5650_v48, %v5649_v43 }
 0x43b   :  { %v5658_v49 = vmul.f32 %v5622_v41, %v5622_v41  ;;  %v5654_v44 = vmul.f32 0.125, %v5645_v37 }
 0x43c   :  { %v5655_v47 = vmul.f32 0.125, %v5651_v51  ;;  %v5659_v53 = vmul.f32 %v5623_v40, %v5623_v40  ;;  %v5683_v37 = vsub.f32 0.0, %v5623_v40 }
 0x43d   :  { %v5662_v55 = vsub.f32 %v5654_v44, %v5658_v49 }
 0x43e   :  { %v5663_v56 = vsub.f32 %v5655_v47, %v5659_v53 }
 0x43f   :  { %v7842_v52 = vpop.eup %7841  ;;  %v5666_v31 = vmax.f32 %v5662_v55, 0.0 }
 0x440   :  { %v7844_v46 = vpop.eup %7843  ;;  %v5676_v29 = vmul.f32 %v7842_v52, %v11204_v27  ;;  %v5684_v26 = vmul.f32 %v7842_v52, %v5680_v54  ;;  %v5667_v25 = vmax.f32 %v5663_v56, 0.0  ;;  %v5682_v27 = vsub.f32 0.0, %v5622_v41 }
 0x441   :  { %v5677_v50 = vmul.f32 %v7844_v46, %v11206_v28  ;;  %v5685_v33 = vmul.f32 %v7844_v46, %v5681_v45  ;;  %v5670_v24 = vadd.f32 1e-05, %v5666_v31 }
 0x442   :  { %v5688_v38 = vadd.f32 %v5684_v26, %v5676_v29  ;;  %v5671_v36 = vadd.f32 1e-05, %v5667_v25 }
 0x443   :  { %v5689_v35 = vadd.f32 %v5685_v33, %v5677_v50  ;;  %7845 = vrsqrt.f32 %v5670_v24 }
 0x444   :  { %vm5692_vm1 = vcmp.ge.f32.partialorder %v5688_v38, 0.0  ;;  %v5696_v39 = vmul.f32 0.01, %v5688_v38  ;;  %7847 = vrsqrt.f32 %v5671_v36 }
 0x445   :  { %vm5693_vm2 = vcmp.ge.f32.partialorder %v5689_v35, 0.0  ;;  %v5697_v42 = vmul.f32 0.01, %v5689_v35 }
 0x446   :  { %v11230_v30 = vsel %vm5692_vm1, %v5688_v38, %v5696_v39 }
 0x447   :  { %v5701_v43 = vsel %vm5693_vm2, %v5689_v35, %v5697_v42 }
 0x44d   :  { %v7846_v48 = vpop.eup %7845 }
 0x44e   :  { %v7848_v49 = vpop.eup %7847  ;;  %v5678_v28 = vmul.f32 %v7846_v48, %v11216_v32  ;;  %v5686_v51 = vmul.f32 %v7846_v48, %v5682_v27 }
 0x44f   :  { %v5679_v44 = vmul.f32 %v7848_v49, %v11219_v34  ;;  %v5687_v47 = vmul.f32 %v7848_v49, %v5683_v37 }
 0x450   :  { %v5690_v53 = vadd.f32 %v5686_v51, %v5678_v28 }
 0x451   :  { %v5691_v54 = vadd.f32 %v5687_v47, %v5679_v44 }
 0x452   :  { %vm5694_vm3 = vcmp.ge.f32.partialorder %v5690_v53, 0.0  ;;  %v5698_v55 = vmul.f32 0.01, %v5690_v53 }
 0x453   :  { %vm5695_vm4 = vcmp.ge.f32.partialorder %v5691_v54, 0.0  ;;  %v5699_v52 = vmul.f32 0.01, %v5691_v54 }
 0x454   :  { %v11234_v45 = vsel %vm5694_vm3, %v5690_v53, %v5698_v55 }
 0x455   :  { %v11236_v56 = vsel %vm5695_vm4, %v5691_v54, %v5699_v52 }
 0x456   :  { %7913 = dma.done.wait [#allocation12 + $0x1], 8192 }
 0x457   :  { %7914 = vsyncadd [#allocation12 + $0x1], 4294959104  ;;  %v5709_v41 = vpack.c.bf16 %v5701_v43, %v5701_v43  ;;  %v5713_v40 = vld [vmem:[#allocation3 + $0x8] sm:$0xff]  ;;  %v5712_v32 = vld [vmem:[#allocation3] sm:$0xff]  ;;  %7659 = vmatprep.subr.bf16.mxu1 %v9363_v1 }
 0x458   :  { %v5715_v46 = vld [vmem:[#allocation3 + $0x18] sm:$0xff]  ;;  %5776 = vmatprep.subr.bf16.mxu0 %v5713_v40  ;;  %v5714_v34 = vld [vmem:[#allocation3 + $0x10] sm:$0xff]  ;;  %v5717_v29 = vld [vmem:[#allocation3 + $0x28] sm:$0xff] }
 0x459   :  { %5808 = vmatprep.mubr.bf16.mxu0 %v5709_v41  ;;  %5777 = vmatpush1.bf16.msra.mxu0 %v5712_v32  ;;  %v5716_v26 = vld [vmem:[#allocation3 + $0x20] sm:$0xff]  ;;  %v5719_v31 = vld [vmem:[#allocation3 + $0x38] sm:$0xff]  ;;  %v5718_v50 = vld [vmem:[#allocation3 + $0x30] sm:$0xff] }
 0x45a   :  { %5778 = vmatprep.subr.bf16.mxu0 %v5715_v46  ;;  %v5721_v33 = vld [vmem:[#allocation3 + $0x48] sm:$0xff]  ;;  %v5720_v25 = vld [vmem:[#allocation3 + $0x40] sm:$0xff]  ;;  %v5723_v38 = vld [vmem:[#allocation3 + $0x58] sm:$0xff] }
 0x45b   :  { %v5722_v24 = vld [vmem:[#allocation3 + $0x50] sm:$0xff]  ;;  %v5725_v35 = vld [vmem:[#allocation3 + $0x68] sm:$0xff]  ;;  %v5724_v36 = vld [vmem:[#allocation3 + $0x60] sm:$0xff] }
 0x45c   :  { %v5727_v39 = vld [vmem:[#allocation3 + $0x78] sm:$0xff]  ;;  %v5726_v42 = vld [vmem:[#allocation3 + $0x70] sm:$0xff]  ;;  %v5729_v43 = vld [vmem:[#allocation3 + $0x88] sm:$0xff] }
 0x45d   :  { %5779 = vmatpush1.bf16.msra.mxu0 %v5714_v34  ;;  %v5728_v27 = vld [vmem:[#allocation3 + $0x80] sm:$0xff]  ;;  %v5731_v48 = vld [vmem:[#allocation3 + $0x98] sm:$0xff]  ;;  %v5730_v37 = vld [vmem:[#allocation3 + $0x90] sm:$0xff]  ;;  %v5708_v34 = vpack.c.bf16 %v11230_v30, %v11230_v30 }
 0x45e   :  { %5780 = vmatprep.subr.bf16.mxu0 %v5717_v29  ;;  %v5733_v49 = vld [vmem:[#allocation3 + $0xa8] sm:$0xff]  ;;  %v5732_v28 = vld [vmem:[#allocation3 + $0xa0] sm:$0xff]  ;;  %v5735_v51 = vld [vmem:[#allocation3 + $0xb8] sm:$0xff]  ;;  %v5711_v29 = vpack.c.bf16 %v11236_v56, %v11236_v56 }
 0x45f   :  { %v5734_v44 = vld [vmem:[#allocation3 + $0xb0] sm:$0xff]  ;;  %v5737_v47 = vld [vmem:[#allocation3 + $0xc8] sm:$0xff]  ;;  %v5736_v53 = vld [vmem:[#allocation3 + $0xc0] sm:$0xff] }
 0x460   :  { %v5739_v54 = vld [vmem:[#allocation3 + $0xd8] sm:$0xff]  ;;  %v5738_v55 = vld [vmem:[#allocation3 + $0xd0] sm:$0xff]  ;;  %v5741_v52 = vld [vmem:[#allocation3 + $0xe8] sm:$0xff] }
 0x461   :  { %5781 = vmatpush1.bf16.msra.mxu0 %v5716_v26  ;;  %v5740_v41 = vld [vmem:[#allocation3 + $0xe0] sm:$0xff]  ;;  %v5743_v40 = vld [vmem:[#allocation3 + $0xf8] sm:$0xff]  ;;  %v5742_v32 = vld [vmem:[#allocation3 + $0xf0] sm:$0xff] }
 0x462   :  { %5782 = vmatprep.subr.bf16.mxu0 %v5719_v31  ;;  %v5745_v46 = vld [vmem:[#allocation3 + $0x108] sm:$0xff]  ;;  %v5744_v26 = vld [vmem:[#allocation3 + $0x100] sm:$0xff]  ;;  %v5747_v31 = vld [vmem:[#allocation3 + $0x118] sm:$0xff] }
 0x463   :  { %v5750_v30 = vld [vmem:[#allocation3 + $0x130] sm:$0xff]  ;;  %v5752_v56 = vld [vmem:[#allocation3 + $0x140] sm:$0xff] }
 0x465   :  { %5783 = vmatpush1.bf16.msra.mxu0 %v5718_v50  ;;  %v5746_v50 = vld [vmem:[#allocation3 + $0x110] sm:$0xff] }
 0x466   :  { %5784 = vmatprep.subr.bf16.mxu0 %v5721_v33  ;;  %v5749_v33 = vld [vmem:[#allocation3 + $0x128] sm:$0xff] }
 0x469   :  { %5785 = vmatpush1.bf16.msra.mxu0 %v5720_v25  ;;  %v5748_v25 = vld [vmem:[#allocation3 + $0x120] sm:$0xff] }
 0x46a   :  { %5786 = vmatprep.subr.bf16.mxu0 %v5723_v38  ;;  %v5751_v38 = vld [vmem:[#allocation3 + $0x138] sm:$0xff] }
 0x46d   :  { %5787 = vmatpush1.bf16.msra.mxu0 %v5722_v24  ;;  %v5753_v24 = vld [vmem:[#allocation3 + $0x148] sm:$0xff] }
 0x46e   :  { %5788 = vmatprep.subr.bf16.mxu0 %v5725_v35  ;;  %v5755_v35 = vld [vmem:[#allocation3 + $0x158] sm:$0xff] }
 0x471   :  { %5789 = vmatpush1.bf16.msra.mxu0 %v5724_v36  ;;  %v5754_v36 = vld [vmem:[#allocation3 + $0x150] sm:$0xff] }
 0x472   :  { %5790 = vmatprep.subr.bf16.mxu0 %v5727_v39  ;;  %v5757_v39 = vld [vmem:[#allocation3 + $0x168] sm:$0xff] }
 0x475   :  { %5791 = vmatpush1.bf16.msra.mxu0 %v5726_v42  ;;  %v5756_v42 = vld [vmem:[#allocation3 + $0x160] sm:$0xff] }
 0x476   :  { %5792 = vmatprep.subr.bf16.mxu0 %v5729_v43  ;;  %v5759_v43 = vld [vmem:[#allocation3 + $0x178] sm:$0xff] }
 0x479   :  { %5793 = vmatpush1.bf16.msra.mxu0 %v5728_v27  ;;  %v5758_v27 = vld [vmem:[#allocation3 + $0x170] sm:$0xff] }
 0x47a   :  { %5794 = vmatprep.subr.bf16.mxu0 %v5731_v48  ;;  %v5761_v48 = vld [vmem:[#allocation3 + $0x188] sm:$0xff] }
 0x47d   :  { %5795 = vmatpush1.bf16.msra.mxu0 %v5730_v37  ;;  %v5760_v37 = vld [vmem:[#allocation3 + $0x180] sm:$0xff] }
 0x47e   :  { %5796 = vmatprep.subr.bf16.mxu0 %v5733_v49  ;;  %v5763_v49 = vld [vmem:[#allocation3 + $0x198] sm:$0xff] }
 0x481   :  { %5797 = vmatpush1.bf16.msra.mxu0 %v5732_v28  ;;  %v5762_v28 = vld [vmem:[#allocation3 + $0x190] sm:$0xff] }
 0x482   :  { %5798 = vmatprep.subr.bf16.mxu0 %v5735_v51  ;;  %v5765_v51 = vld [vmem:[#allocation3 + $0x1a8] sm:$0xff] }
 0x485   :  { %5799 = vmatpush1.bf16.msra.mxu0 %v5734_v44  ;;  %v5764_v44 = vld [vmem:[#allocation3 + $0x1a0] sm:$0xff] }
 0x486   :  { %5800 = vmatprep.subr.bf16.mxu0 %v5737_v47  ;;  %v5767_v47 = vld [vmem:[#allocation3 + $0x1b8] sm:$0xff] }
 0x489   :  { %5801 = vmatpush1.bf16.msra.mxu0 %v5736_v53  ;;  %v5766_v53 = vld [vmem:[#allocation3 + $0x1b0] sm:$0xff] }
 0x48a   :  { %5802 = vmatprep.subr.bf16.mxu0 %v5739_v54  ;;  %v5769_v54 = vld [vmem:[#allocation3 + $0x1c8] sm:$0xff] }
 0x48d   :  { %5803 = vmatpush1.bf16.msra.mxu0 %v5738_v55  ;;  %v5768_v55 = vld [vmem:[#allocation3 + $0x1c0] sm:$0xff] }
 0x48e   :  { %5804 = vmatprep.subr.bf16.mxu0 %v5741_v52  ;;  %v5771_v52 = vld [vmem:[#allocation3 + $0x1d8] sm:$0xff] }
 0x491   :  { %5805 = vmatpush1.bf16.msra.mxu0 %v5740_v41  ;;  %v5770_v41 = vld [vmem:[#allocation3 + $0x1d0] sm:$0xff] }
 0x492   :  { %5806 = vmatprep.subr.bf16.mxu0 %v5743_v40  ;;  %v5773_v40 = vld [vmem:[#allocation3 + $0x1e8] sm:$0xff] }
 0x495   :  { %5807 = vmatpush1.bf16.msra.mxu0 %v5742_v32  ;;  %v5772_v32 = vld [vmem:[#allocation3 + $0x1e0] sm:$0xff] }
 0x496   :  { %5817 = vmatprep.subr.bf16.mxu0 %v5745_v46  ;;  %v5775_v46 = vld [vmem:[#allocation3 + $0x1f8] sm:$0xff] }
 0x498   :  { %5809 = vmatmul.mubr.bf16.vlgmr.msra.gmra.mrb[4].mxu0 %v5708_v34  ;;  %v5774_v34 = vld [vmem:[#allocation3 + $0x1f0] sm:$0xff] }
 0x499   :  { %5818 = vmatpush1.bf16.msra.mxu0 %v5744_v26  ;;  %5849 = vmatprep.mubr.bf16.mxu0 %v5711_v29  ;;  %v5710_v29 = vpack.c.bf16 %v11234_v45, %v11234_v45 }
 0x49a   :  { %5819 = vmatprep.subr.bf16.mxu0 %v5747_v31 }
 0x49d   :  { %5820 = vmatpush1.bf16.msra.mxu0 %v5746_v50 }
 0x49e   :  { %5821 = vmatprep.subr.bf16.mxu0 %v5749_v33 }
 0x4a1   :  { %5822 = vmatpush1.bf16.msra.mxu0 %v5748_v25 }
 0x4a2   :  { %5823 = vmatprep.subr.bf16.mxu0 %v5751_v38 }
 0x4a5   :  { %5824 = vmatpush1.bf16.msra.mxu0 %v5750_v30 }
 0x4a6   :  { %5825 = vmatprep.subr.bf16.mxu0 %v5753_v24 }
 0x4a9   :  { %5826 = vmatpush1.bf16.msra.mxu0 %v5752_v56 }
 0x4aa   :  { %5827 = vmatprep.subr.bf16.mxu0 %v5755_v35 }
 0x4ad   :  { %5828 = vmatpush1.bf16.msra.mxu0 %v5754_v36 }
 0x4ae   :  { %5829 = vmatprep.subr.bf16.mxu0 %v5757_v39 }
 0x4b1   :  { %5830 = vmatpush1.bf16.msra.mxu0 %v5756_v42 }
 0x4b2   :  { %5831 = vmatprep.subr.bf16.mxu0 %v5759_v43 }
 0x4b5   :  { %5832 = vmatpush1.bf16.msra.mxu0 %v5758_v27 }
 0x4b6   :  { %5833 = vmatprep.subr.bf16.mxu0 %v5761_v48 }
 0x4b9   :  { %5834 = vmatpush1.bf16.msra.mxu0 %v5760_v37 }
 0x4ba   :  { %5835 = vmatprep.subr.bf16.mxu0 %v5763_v49 }
 0x4bd   :  { %5836 = vmatpush1.bf16.msra.mxu0 %v5762_v28 }
 0x4be   :  { %5837 = vmatprep.subr.bf16.mxu0 %v5765_v51 }
 0x4c1   :  { %5838 = vmatpush1.bf16.msra.mxu0 %v5764_v44 }
 0x4c2   :  { %5839 = vmatprep.subr.bf16.mxu0 %v5767_v47 }
 0x4c5   :  { %5840 = vmatpush1.bf16.msra.mxu0 %v5766_v53 }
 0x4c6   :  { %5841 = vmatprep.subr.bf16.mxu0 %v5769_v54 }
 0x4c9   :  { %5842 = vmatpush1.bf16.msra.mxu0 %v5768_v55 }
 0x4ca   :  { %5843 = vmatprep.subr.bf16.mxu0 %v5771_v52 }
 0x4cd   :  { %5844 = vmatpush1.bf16.msra.mxu0 %v5770_v41 }
 0x4ce   :  { %5845 = vmatprep.subr.bf16.mxu0 %v5773_v40 }
 0x4d1   :  { %5846 = vmatpush1.bf16.msra.mxu0 %v5772_v32 }
 0x4d2   :  { %5847 = vmatprep.subr.bf16.mxu0 %v5775_v46 }
 0x4d5   :  { %5848 = vmatpush1.bf16.msra.mxu0 %v5774_v34 }
 0x4d8   :  { %5850 = vmatmul.mubr.bf16.vlgmr.msra.gmra.mrb[4].mxu0 %v5710_v29 }
 0x5ab   :  { %v5851_v26 = vpop.f32.mrb[4].mxu0 }
 0x5ac   :  { %v5858_v31 = vrot.slane %v5851_v26, 4  ;;  %v5872_v50 = vmul.f32 %v5851_v26, %v5851_v26  ;;  %v5853_v33 = vpop.f32.mrb[5].mxu0 }
 0x5ad   :  { %v5864_v25 = vrot.slane %v5853_v33, 4  ;;  %v5873_v38 = vmul.f32 %v5853_v33, %v5853_v33  ;;  %v5855_v30 = vpop.f32.mrb[6].mxu0 }
 0x5ae   :  { %v5859_v24 = vadd.f32 %v5858_v31, %v5851_v26  ;;  %v5874_v56 = vrot.slane %v5872_v50, 4  ;;  %v5856_v35 = vpop.f32.mrb[7].mxu0 }
 0x5af   :  { %v5865_v36 = vadd.f32 %v5864_v25, %v5853_v33  ;;  %v5880_v39 = vrot.slane %v5873_v38, 4 }
 0x5b0   :  { %v5860_v42 = vrot.slane %v5859_v24, 2  ;;  %v5875_v43 = vadd.f32 %v5874_v56, %v5872_v50 }
 0x5b1   :  { %v5866_v27 = vrot.slane %v5865_v36, 2  ;;  %v5881_v48 = vadd.f32 %v5880_v39, %v5873_v38 }
 0x5b2   :  { %v5861_v37 = vadd.f32 %v5860_v42, %v5859_v24  ;;  %v5876_v45 = vrot.slane %v5875_v43, 2 }
 0x5b3   :  { %v5867_v49 = vadd.f32 %v5866_v27, %v5865_v36  ;;  %v5882_v28 = vrot.slane %v5881_v48, 2 }
 0x5b4   :  { %v5862_v51 = vrot.slane %v5861_v37, 1  ;;  %v5877_v44 = vadd.f32 %v5876_v45, %v5875_v43 }
 0x5b5   :  { %v5868_v47 = vrot.slane %v5867_v49, 1  ;;  %v5883_v53 = vadd.f32 %v5882_v28, %v5881_v48 }
 0x5b6   :  { %v5863_v54 = vadd.f32 %v5862_v51, %v5861_v37  ;;  %v5878_v55 = vrot.slane %v5877_v44, 1 }
 0x5b7   :  { %v5869_v52 = vadd.f32 %v5868_v47, %v5867_v49  ;;  %v5884_v41 = vrot.slane %v5883_v53, 1 }
 0x5b8   :  { %v5870_v40 = vmul.f32 0.125, %v5863_v54  ;;  %v5879_v32 = vadd.f32 %v5878_v55, %v5877_v44 }
 0x5b9   :  { %v5871_v46 = vmul.f32 0.125, %v5869_v52  ;;  %v5885_v34 = vadd.f32 %v5884_v41, %v5883_v53 }
 0x5ba   :  { %v5886_v29 = vmul.f32 0.125, %v5879_v32  ;;  %v5888_v31 = vmul.f32 %v5870_v40, %v5870_v40  ;;  %v5900_v39 = vsub.f32 0.0, %v5870_v40 }
 0x5bb   :  { %v5887_v50 = vmul.f32 0.125, %v5885_v34  ;;  %v5889_v25 = vmul.f32 %v5871_v46, %v5871_v46  ;;  %v5901_v43 = vsub.f32 0.0, %v5871_v46 }
 0x5bc   :  { %v5890_v38 = vsub.f32 %v5886_v29, %v5888_v31 }
 0x5bd   :  { %v5891_v30 = vsub.f32 %v5887_v50, %v5889_v25 }
 0x5be   :  { %v5892_v24 = vmax.f32 %v5890_v38, 0.0 }
 0x5bf   :  { %v5893_v56 = vmax.f32 %v5891_v30, 0.0 }
 0x5c0   :  { %v5894_v35 = vadd.f32 1e-05, %v5892_v24 }
 0x5c1   :  { %v5895_v36 = vadd.f32 1e-05, %v5893_v56 }
 0x5c2   :  { %7849 = vrsqrt.f32 %v5894_v35 }
 0x5c3   :  { %7851 = vrsqrt.f32 %v5895_v36 }
 0x5cc   :  { %v7850_v42 = vpop.eup %7849 }
 0x5cd   :  { %v7852_v27 = vpop.eup %7851  ;;  %v5898_v48 = vmul.f32 %v7850_v42, %v5851_v26  ;;  %v5902_v37 = vmul.f32 %v7850_v42, %v5900_v39 }
 0x5ce   :  { %v5899_v45 = vmul.f32 %v7852_v27, %v5853_v33  ;;  %v5903_v49 = vmul.f32 %v7852_v27, %v5901_v43 }
 0x5cf   :  { %v5904_v28 = vadd.f32 %v5902_v37, %v5898_v48 }
 0x5d0   :  { %v5905_v51 = vadd.f32 %v5903_v49, %v5899_v45 }
 0x5d1   :  { %vm5906_vm5 = vcmp.ge.f32.partialorder %v5904_v28, 0.0  ;;  %v5908_v44 = vmul.f32 0.01, %v5904_v28 }
 0x5d2   :  { %vm5907_vm6 = vcmp.ge.f32.partialorder %v5905_v51, 0.0  ;;  %v5909_v47 = vmul.f32 0.01, %v5905_v51 }
 0x5d3   :  { %v5910_v53 = vsel %vm5906_vm5, %v5904_v28, %v5908_v44 }
 0x5d4   :  { %v5911_v54 = vsel %vm5907_vm6, %v5905_v51, %v5909_v47 }
 0x5d5   :  { %v5917_v55 = vpack.c.bf16 %v5911_v54, %v5911_v54 }
 0x5d6   :  { %7915 = dma.done.wait [#allocation12 + $0x2], 2048 }
 0x5d7   :  { %7916 = vsyncadd [#allocation12 + $0x2], 4294965248  ;;  %7660 = vmatpush3.bf16.msra.mxu1 %v9323_v57  ;;  %5966 = vmatprep.mubr.bf16.mxu1 %v5917_v55  ;;  %v5916_v57 = vpack.c.bf16 %v5910_v53, %v5910_v53 }
 0x5d8   :  { %7661 = vmatprep.subr.bf16.mxu1 %v9368_v2 }
 0x5db   :  { %7662 = vmatpush3.bf16.msra.mxu1 %v9328_v58 }
 0x5dc   :  { %7663 = vmatprep.subr.bf16.mxu1 %v9373_v3 }
 0x5df   :  { %7664 = vmatpush3.bf16.msra.mxu1 %v9333_v59 }
 0x5e0   :  { %7665 = vmatprep.subr.bf16.mxu1 %v9378_v4 }
 0x5e3   :  { %7666 = vmatpush3.bf16.msra.mxu1 %v9338_v60 }
 0x5e4   :  { %7667 = vmatprep.subr.bf16.mxu1 %v9383_v5 }
 0x5e7   :  { %7668 = vmatpush3.bf16.msra.mxu1 %v9343_v61 }
 0x5e8   :  { %7669 = vmatprep.subr.bf16.mxu1 %v9388_v6 }
 0x5eb   :  { %7670 = vmatpush3.bf16.msra.mxu1 %v9348_v62 }
 0x5ec   :  { %7671 = vmatprep.subr.bf16.mxu1 %v9393_v7 }
 0x5ef   :  { %7672 = vmatpush3.bf16.msra.mxu1 %v9353_v63 }
 0x5f0   :  { %7673 = vmatprep.subr.bf16.mxu1 %v9398_v8 }
 0x5f3   :  { %7674 = vmatpush3.bf16.msra.mxu1 %v9358_v0 }
 0x5f6   :  { %5967 = vmatmul.mubr.bf16.vlgmr.msra.gmra.mrb[8].mxu1 %v5916_v57 }
 0x6c9   :  { %v7675_v58 = vpop.f32.mrb[8].mxu1 }
 0x6ca   :  { %v7676_v59 = vpop.f32.mrb[9].mxu1 }
 0x6cb   :  { %v7677_v60 = vadd.f32 %v7676_v59, %v7675_v58  ;;  %v7678_v1 = vpop.f32.mrb[10].mxu1 }
 0x6cc   :  { %v7679_v2 = vpop.f32.mrb[11].mxu1 }
 0x6cd   :  { %v5974_v61 = vrot.slane %v7677_v60, 4  ;;  %v5981_v3 = vmul.f32 %v7677_v60, %v7677_v60 }
 0x6cf   :  { %v5975_v4 = vadd.f32 %v7677_v60, %v5974_v61  ;;  %v5982_v5 = vrot.slane %v5981_v3, 4 }
 0x6d1   :  { %v5976_v62 = vrot.slane %v5975_v4, 2  ;;  %v5983_v6 = vadd.f32 %v5982_v5, %v5981_v3 }
 0x6d3   :  { %v5977_v7 = vadd.f32 %v5976_v62, %v5975_v4  ;;  %v5984_v26 = vrot.slane %v5983_v6, 2 }
 0x6d5   :  { %v5978_v63 = vrot.slane %v5977_v7, 1  ;;  %v5985_v33 = vadd.f32 %v5984_v26, %v5983_v6 }
 0x6d7   :  { %v5979_v8 = vadd.f32 %v5978_v63, %v5977_v7  ;;  %v5986_v52 = vrot.slane %v5985_v33, 1 }
 0x6d9   :  { %v5980_v41 = vmul.f32 0.125, %v5979_v8  ;;  %v5987_v0 = vadd.f32 %v5986_v52, %v5985_v33 }
 0x6db   :  { %v5988_v40 = vmul.f32 0.125, %v5987_v0  ;;  %v5989_v32 = vmul.f32 %v5980_v41, %v5980_v41  ;;  %v5995_v31 = vsub.f32 0.0, %v5980_v41 }
 0x6dd   :  { %v5990_v46 = vsub.f32 %v5988_v40, %v5989_v32 }
 0x6df   :  { %v5991_v34 = vmax.f32 %v5990_v46, 0.0 }
 0x6e1   :  { %v5992_v29 = vadd.f32 1e-05, %v5991_v34 }
 0x6e3   :  { %7853 = vrsqrt.f32 %v5992_v29 }
 0x6ed   :  { %v7854_v50 = vpop.eup %7853 }
 0x6ee   :  { %v5994_v25 = vmul.f32 %v7854_v50, %v7677_v60  ;;  %v5996_v38 = vmul.f32 %v7854_v50, %v5995_v31 }
 0x6f0   :  { %v5997_v30 = vadd.f32 %v5996_v38, %v5994_v25 }
 0x6f2   :  { %vm5998_vm7 = vcmp.ge.f32.partialorder %v5997_v30, 0.0  ;;  %v5999_v24 = vmul.f32 0.01, %v5997_v30 }
 0x6f4   :  { %v6000_v56 = vsel %vm5998_vm7, %v5997_v30, %v5999_v24 }
 0x6f5   :  { %7917 = dma.done.wait [#allocation12 + $0x3], 1024 }
 0x6f6   :  { %7918 = vsyncadd [#allocation12 + $0x3], 4294966272  ;;  %v7934_v35 = vmov 0.0   ;;  %vm7935_vm8 = vmmov 0   ;;  %vm6054_vm9 = vcmask 523264  }
 0x6f7   :  { %7747 = vmatprep.subr.bf16.mxu1 %v7934_v35  ;;  %7763 = vmatprep.mubr.msk.bf16.mxu1 %vm7935_vm8, %v7934_v35 }
 0x6f8   :  { %7748 = vmatpush3.bf16.msra.mxu1 %v9403_v9  ;;  %v6005_v9 = vpack.c.bf16 %v6000_v56, %v6000_v56 }
 0x6f9   :  { %7749 = vmatprep.subr.bf16.mxu1 %v7934_v35 }
 0x6fc   :  { %7750 = vmatpush3.bf16.msra.mxu1 %v9408_v10 }
 0x6fd   :  { %7751 = vmatprep.subr.bf16.mxu1 %v7934_v35 }
 0x700   :  { %7752 = vmatpush3.bf16.msra.mxu1 %v9413_v11 }
 0x701   :  { %7753 = vmatprep.subr.bf16.mxu1 %v7934_v35 }
 0x704   :  { %7754 = vmatpush3.bf16.msra.mxu1 %v9418_v12 }
 0x705   :  { %7755 = vmatprep.subr.bf16.mxu1 %v7934_v35 }
 0x708   :  { %7756 = vmatpush3.bf16.msra.mxu1 %v9423_v13 }
 0x709   :  { %7757 = vmatprep.subr.bf16.mxu1 %v7934_v35 }
 0x70c   :  { %7758 = vmatpush3.bf16.msra.mxu1 %v9428_v14 }
 0x70d   :  { %7759 = vmatprep.subr.bf16.mxu1 %v7934_v35 }
 0x710   :  { %7760 = vmatpush3.bf16.msra.mxu1 %v9433_v15 }
 0x711   :  { %7761 = vmatprep.subr.bf16.mxu1 %v7934_v35 }
 0x714   :  { %7762 = vmatpush3.bf16.msra.mxu1 %v9438_v16 }
 0x715   :  { %7767 = vmatprep.subr.bf16.mxu1 %v7934_v35 }
 0x717   :  { %7764 = vmatmul.mubr.bf16.vlgmr.msra.gmra.mrb[12].mxu1 %v6005_v9 }
 0x718   :  { %7775 = vmatprep.mubr.msk.bf16.mxu1 %vm7935_vm8, %v7934_v35 }
 0x7ea   :  { %v6048_v10 = vpop.f32.mrb[12].mxu1 }
 0x7eb   :  { %v6055_v11 = vsel %vm6054_vm9, %v6048_v10, 0.0  ;;  %v6063_v12 = vmul.f32 %v6048_v10, %v6048_v10  ;;  %v7765_v13 = vpop.f32.mrb[13].mxu1 }
 0x7ec   :  { %v6056_v36 = vrot.slane %v6055_v11, 4  ;;  %v6051_v39 = vpop.f32.mrb[14].mxu1 }
 0x7ed   :  { %v6064_v14 = vsel %vm6054_vm9, %v6063_v12, 0.0  ;;  %v7766_v42 = vpop.f32.mrb[15].mxu1 }
 0x7ee   :  { %v6057_v43 = vadd.f32 %v6056_v36, %v6055_v11  ;;  %v6065_v27 = vrot.slane %v6064_v14, 4 }
 0x7f0   :  { %v6058_v15 = vrot.slane %v6057_v43, 2  ;;  %v6066_v48 = vadd.f32 %v6065_v27, %v6064_v14 }
 0x7f2   :  { %v6059_v37 = vadd.f32 %v6058_v15, %v6057_v43  ;;  %v6067_v45 = vrot.slane %v6066_v48, 2 }
 0x7f4   :  { %v6060_v49 = vrot.slane %v6059_v37, 1  ;;  %v6068_v16 = vadd.f32 %v6067_v45, %v6066_v48 }
 0x7f6   :  { %v6061_v28 = vadd.f32 %v6060_v49, %v6059_v37  ;;  %v6069_v51 = vrot.slane %v6068_v16, 1 }
 0x7f8   :  { %v6062_v44 = vmul.f32 0.125, %v6061_v28  ;;  %v6070_v47 = vadd.f32 %v6069_v51, %v6068_v16 }
 0x7fa   :  { %v6071_v53 = vmul.f32 0.125, %v6070_v47  ;;  %v6072_v54 = vmul.f32 %v6062_v44, %v6062_v44  ;;  %v6078_v59 = vsub.f32 0.0, %v6062_v44 }
 0x7fc   :  { %v6073_v55 = vsub.f32 %v6071_v53, %v6072_v54 }
 0x7fe   :  { %v6074_v57 = vmax.f32 %v6073_v55, 0.0 }
 0x800   :  { %v6075_v58 = vadd.f32 1e-05, %v6074_v57 }
 0x802   :  { %7855 = vrsqrt.f32 %v6075_v58 }
 0x80c   :  { %v7856_v60 = vpop.eup %7855 }
 0x80d   :  { %v6077_v1 = vmul.f32 %v7856_v60, %v6048_v10  ;;  %v6079_v2 = vmul.f32 %v7856_v60, %v6078_v59 }
 0x80f   :  { %v6080_v61 = vadd.f32 %v6079_v2, %v6077_v1 }
 0x811   :  { %vm6081_vm10 = vcmp.ge.f32.partialorder %v6080_v61, 0.0  ;;  %v6082_v3 = vmul.f32 0.01, %v6080_v61 }
 0x813   :  { %v6083_v4 = vsel %vm6081_vm10, %v6080_v61, %v6082_v3 }
 0x814   :  { %7919 = dma.done.wait [#allocation12 + $0x4], 512 }
 0x815   :  { %7920 = vsyncadd [#allocation12 + $0x4], 4294966784  ;;  %7768 = vmatpush3.bf16.msra.mxu1 %v9443_v17  ;;  %v6088_v5 = vpack.c.bf16 %v6083_v4, %v6083_v4  ;;  %vm6136_vm11 = vcmask 261120  }
 0x816   :  { %7769 = vmatprep.subr.bf16.mxu1 %v7934_v35 }
 0x819   :  { %7770 = vmatpush3.bf16.msra.mxu1 %v9448_v18 }
 0x81a   :  { %7771 = vmatprep.subr.bf16.mxu1 %v7934_v35 }
 0x81d   :  { %7772 = vmatpush3.bf16.msra.mxu1 %v9453_v19 }
 0x81e   :  { %7773 = vmatprep.subr.bf16.mxu1 %v7934_v35 }
 0x821   :  { %7774 = vmatpush3.bf16.msra.mxu1 %v9458_v20 }
 0x822   :  { %7779 = vmatprep.subr.bf16.mxu1 %v7934_v35 }
 0x824   :  { %7776 = vmatmul.mubr.msk.bf16.vlgmr.msra.gmra.mrb[16].mxu1 %vm6054_vm9, %v6088_v5 }
 0x825   :  { %7783 = vmatprep.mubr.msk.bf16.mxu1 %vm7935_vm8, %v7934_v35 }
 0x8f7   :  { %v6130_v62 = vpop.f32.mrb[16].mxu1 }
 0x8f8   :  { %v6137_v6 = vsel %vm6136_vm11, %v6130_v62, 0.0  ;;  %v6145_v17 = vmul.f32 %v6130_v62, %v6130_v62  ;;  %v7777_v7 = vpop.f32.mrb[17].mxu1 }
 0x8f9   :  { %v6138_v26 = vrot.slane %v6137_v6, 4  ;;  %v6133_v63 = vpop.f32.mrb[18].mxu1 }
 0x8fa   :  { %v6146_v18 = vsel %vm6136_vm11, %v6145_v17, 0.0  ;;  %v7778_v33 = vpop.f32.mrb[19].mxu1 }
 0x8fb   :  { %v6139_v8 = vadd.f32 %v6138_v26, %v6137_v6  ;;  %v6147_v19 = vrot.slane %v6146_v18, 4 }
 0x8fd   :  { %v6140_v52 = vrot.slane %v6139_v8, 2  ;;  %v6148_v41 = vadd.f32 %v6147_v19, %v6146_v18 }
 0x8ff   :  { %v6141_v0 = vadd.f32 %v6140_v52, %v6139_v8  ;;  %v6149_v40 = vrot.slane %v6148_v41, 2 }
 0x901   :  { %v6142_v20 = vrot.slane %v6141_v0, 1  ;;  %v6150_v32 = vadd.f32 %v6149_v40, %v6148_v41 }
 0x903   :  { %v6143_v46 = vadd.f32 %v6142_v20, %v6141_v0  ;;  %v6151_v34 = vrot.slane %v6150_v32, 1 }
 0x905   :  { %v6144_v29 = vmul.f32 0.125, %v6143_v46  ;;  %v6152_v31 = vadd.f32 %v6151_v34, %v6150_v32 }
 0x907   :  { %v6153_v50 = vmul.f32 0.125, %v6152_v31  ;;  %v6154_v25 = vmul.f32 %v6144_v29, %v6144_v29  ;;  %v6160_v56 = vsub.f32 0.0, %v6144_v29 }
 0x909   :  { %v6155_v38 = vsub.f32 %v6153_v50, %v6154_v25 }
 0x90b   :  { %v6156_v30 = vmax.f32 %v6155_v38, 0.0 }
 0x90d   :  { %v6157_v24 = vadd.f32 1e-05, %v6156_v30 }
 0x90f   :  { %7857 = vrsqrt.f32 %v6157_v24 }
 0x919   :  { %v7858_v9 = vpop.eup %7857 }
 0x91a   :  { %v6159_v10 = vmul.f32 %v7858_v9, %v6130_v62  ;;  %v6161_v11 = vmul.f32 %v7858_v9, %v6160_v56 }
 0x91c   :  { %v6162_v12 = vadd.f32 %v6161_v11, %v6159_v10 }
 0x91e   :  { %vm6163_vm12 = vcmp.ge.f32.partialorder %v6162_v12, 0.0  ;;  %v6164_v13 = vmul.f32 0.01, %v6162_v12 }
 0x920   :  { %v6165_v36 = vsel %vm6163_vm12, %v6162_v12, %v6164_v13 }
 0x921   :  { %7921 = dma.done.wait [#allocation12 + $0x5], 256 }
 0x922   :  { %7922 = vsyncadd [#allocation12 + $0x5], 4294967040  ;;  %7780 = vmatpush3.bf16.msra.mxu1 %v9463_v21  ;;  %v6170_v39 = vpack.c.bf16 %v6165_v36, %v6165_v36 }
 0x923   :  { %7781 = vmatprep.subr.bf16.mxu1 %v7934_v35 }
 0x926   :  { %7782 = vmatpush3.bf16.msra.mxu1 %v9468_v22 }
 0x927   :  { %7787 = vmatprep.subr.bf16.mxu1 %v7934_v35 }
 0x929   :  { %7784 = vmatmul.mubr.msk.bf16.vlgmr.msra.gmra.mrb[20].mxu1 %vm6136_vm11, %v6170_v39 }
 0x92a   :  { %7795 = vmatprep.mubr.msk.bf16.mxu1 %vm7935_vm8, %v7934_v35 }
 0x9fc   :  { %v6210_v14 = vpop.f32.mrb[20].mxu1 }
 0x9fd   :  { %v6216_v42 = vsel %vm6054_vm9, %v6210_v14, 0.0  ;;  %v6224_v43 = vmul.f32 %v6210_v14, %v6210_v14  ;;  %v7785_v27 = vpop.f32.mrb[21].mxu1 }
 0x9fe   :  { %v6217_v15 = vrot.slane %v6216_v42, 4  ;;  %v6213_v48 = vpop.f32.mrb[22].mxu1 }
 0x9ff   :  { %v6225_v37 = vsel %vm6054_vm9, %v6224_v43, 0.0  ;;  %v7786_v45 = vpop.f32.mrb[23].mxu1 }
 0xa00   :  { %v6218_v49 = vadd.f32 %v6217_v15, %v6216_v42  ;;  %v6226_v16 = vrot.slane %v6225_v37, 4 }
 0xa02   :  { %v6219_v21 = vrot.slane %v6218_v49, 2  ;;  %v6227_v28 = vadd.f32 %v6226_v16, %v6225_v37 }
 0xa04   :  { %v6220_v51 = vadd.f32 %v6219_v21, %v6218_v49  ;;  %v6228_v44 = vrot.slane %v6227_v28, 2 }
 0xa06   :  { %v6221_v47 = vrot.slane %v6220_v51, 1  ;;  %v6229_v22 = vadd.f32 %v6228_v44, %v6227_v28 }
 0xa08   :  { %v6222_v53 = vadd.f32 %v6221_v47, %v6220_v51  ;;  %v6230_v54 = vrot.slane %v6229_v22, 1 }
 0xa0a   :  { %v6223_v55 = vmul.f32 0.125, %v6222_v53  ;;  %v6231_v57 = vadd.f32 %v6230_v54, %v6229_v22 }
 0xa0c   :  { %v6232_v58 = vmul.f32 0.125, %v6231_v57  ;;  %v6233_v59 = vmul.f32 %v6223_v55, %v6223_v55  ;;  %v6239_v61 = vsub.f32 0.0, %v6223_v55 }
 0xa0e   :  { %v6234_v60 = vsub.f32 %v6232_v58, %v6233_v59 }
 0xa10   :  { %v6235_v1 = vmax.f32 %v6234_v60, 0.0 }
 0xa12   :  { %v6236_v2 = vadd.f32 1e-05, %v6235_v1 }
 0xa14   :  { %7859 = vrsqrt.f32 %v6236_v2 }
 0xa1e   :  { %v7860_v3 = vpop.eup %7859 }
 0xa1f   :  { %v6238_v4 = vmul.f32 %v7860_v3, %v6210_v14  ;;  %v6240_v5 = vmul.f32 %v7860_v3, %v6239_v61 }
 0xa21   :  { %v6241_v62 = vadd.f32 %v6240_v5, %v6238_v4 }
 0xa23   :  { %vm6242_vm13 = vcmp.ge.f32.partialorder %v6241_v62, 0.0  ;;  %v6243_v6 = vmul.f32 0.01, %v6241_v62 }
 0xa25   :  { %v6244_v17 = vsel %vm6242_vm13, %v6241_v62, %v6243_v6 }
 0xa26   :  { %7923 = dma.done.wait [#allocation12 + $0x6], 512 }
 0xa27   :  { %7924 = vsyncadd [#allocation12 + $0x6], 4294966784  ;;  %7788 = vmatpush3.bf16.msra.mxu1 %v9473_v23  ;;  %v11441_v7 = vld [vmem:[#allocation36_spill] sm:$0xff]  ;;  %v11442_v26 = vld [vmem:[#allocation37_spill] sm:$0xff]  ;;  %v6247_v63 = vpack.c.bf16 %v6244_v17, %v6244_v17 }
 0xa28   :  { %7789 = vmatprep.subr.bf16.mxu1 %v7934_v35  ;;  %v11443_v18 = vld [vmem:[#allocation38_spill] sm:$0xff] }
 0xa2b   :  { %7790 = vmatpush3.bf16.msra.mxu1 %v11441_v7 }
 0xa2c   :  { %7791 = vmatprep.subr.bf16.mxu1 %v7934_v35 }
 0xa2f   :  { %7792 = vmatpush3.bf16.msra.mxu1 %v11442_v26 }
 0xa30   :  { %7793 = vmatprep.subr.bf16.mxu1 %v7934_v35 }
 0xa33   :  { %7794 = vmatpush3.bf16.msra.mxu1 %v11443_v18 }
 0xa36   :  { %7796 = vmatmul.mubr.msk.bf16.vlgmr.msra.gmra.mrb[24].mxu1 %vm6054_vm9, %v6247_v63 }
 0xb09   :  { %v6289_v33 = vpop.f32.mrb[24].mxu1 }
 0xb0a   :  { %v6295_v8 = vrot.slane %v6289_v33, 4  ;;  %v6302_v19 = vmul.f32 %v6289_v33, %v6289_v33  ;;  %v7797_v52 = vpop.f32.mrb[25].mxu1 }
 0xb0b   :  { %v6292_v23 = vpop.f32.mrb[26].mxu1 }
 0xb0c   :  { %v6296_v41 = vadd.f32 %v6295_v8, %v6289_v33  ;;  %v6303_v0 = vrot.slane %v6302_v19, 4  ;;  %v7798_v40 = vpop.f32.mrb[27].mxu1 }
 0xb0e   :  { %v6297_v20 = vrot.slane %v6296_v41, 2  ;;  %v6304_v32 = vadd.f32 %v6303_v0, %v6302_v19 }
 0xb10   :  { %v6298_v46 = vadd.f32 %v6297_v20, %v6296_v41  ;;  %v6305_v34 = vrot.slane %v6304_v32, 2 }
 0xb12   :  { %v6299_v29 = vrot.slane %v6298_v46, 1  ;;  %v6306_v31 = vadd.f32 %v6305_v34, %v6304_v32 }
 0xb14   :  { %v6300_v35 = vadd.f32 %v6299_v29, %v6298_v46  ;;  %v6307_v50 = vrot.slane %v6306_v31, 1 }
 0xb16   :  { %v6301_v25 = vmul.f32 0.125, %v6300_v35  ;;  %v6308_v38 = vadd.f32 %v6307_v50, %v6306_v31 }
 0xb18   :  { %v6309_v30 = vmul.f32 0.125, %v6308_v38  ;;  %v6310_v24 = vmul.f32 %v6301_v25, %v6301_v25  ;;  %v6316_v11 = vsub.f32 0.0, %v6301_v25 }
 0xb1a   :  { %v6311_v56 = vsub.f32 %v6309_v30, %v6310_v24 }
 0xb1c   :  { %v6312_v9 = vmax.f32 %v6311_v56, 0.0 }
 0xb1e   :  { %v6313_v10 = vadd.f32 1e-05, %v6312_v9 }
 0xb20   :  { %7861 = vrsqrt.f32 %v6313_v10 }
 0xb2a   :  { %v7862_v12 = vpop.eup %7861 }
 0xb2b   :  { %v6315_v13 = vmul.f32 %v7862_v12, %v6289_v33  ;;  %v6317_v36 = vmul.f32 %v7862_v12, %v6316_v11 }
 0xb2d   :  { %v6318_v39 = vadd.f32 %v6317_v36, %v6315_v13 }
 0xb2f   :  { %vm6319_vm14 = vcmp.ge.f32.partialorder %v6318_v39, 0.0  ;;  %v6320_v14 = vmul.f32 0.01, %v6318_v39 }
 0xb31   :  { %v6321_v42 = vsel %vm6319_vm14, %v6318_v39, %v6320_v14 }
 0xb32   :  { %7925 = dma.done.wait [#allocation12 + $0x7], 2048 }
 0xb33   :  { %7926 = vsyncadd [#allocation12 + $0x7], 4294965248  ;;  %v11444_v43 = vmov 0   ;;  %v6327_v27 = vld [vmem:[#allocation9 + $0x8] sm:$0xff]  ;;  %v6326_v15 = vld [vmem:[#allocation9] sm:$0xff]  ;;  %v6325_v57 = vpack.c.bf16 %v6321_v42, %v6321_v42 }
 0xb34   :  { %6374 = vmatprep.mubr.bf16.mxu1 %v11444_v43  ;;  %v6329_v48 = vld [vmem:[#allocation9 + $0x18] sm:$0xff]  ;;  %6342 = vmatprep.subr.bf16.mxu1 %v6327_v27  ;;  %v6328_v37 = vld [vmem:[#allocation9 + $0x10] sm:$0xff]  ;;  %v6331_v45 = vld [vmem:[#allocation9 + $0x28] sm:$0xff] }
 0xb35   :  { %6343 = vmatpush1.bf16.msra.mxu1 %v6326_v15  ;;  %v6330_v49 = vld [vmem:[#allocation9 + $0x20] sm:$0xff]  ;;  %v6333_v16 = vld [vmem:[#allocation9 + $0x38] sm:$0xff]  ;;  %v6332_v21 = vld [vmem:[#allocation9 + $0x30] sm:$0xff] }
 0xb36   :  { %6344 = vmatprep.subr.bf16.mxu1 %v6329_v48  ;;  %v6335_v28 = vld [vmem:[#allocation9 + $0x48] sm:$0xff]  ;;  %v6334_v51 = vld [vmem:[#allocation9 + $0x40] sm:$0xff]  ;;  %v6337_v44 = vld [vmem:[#allocation9 + $0x58] sm:$0xff] }
 0xb37   :  { %v6336_v47 = vld [vmem:[#allocation9 + $0x50] sm:$0xff]  ;;  %v6339_v22 = vld [vmem:[#allocation9 + $0x68] sm:$0xff]  ;;  %v6338_v53 = vld [vmem:[#allocation9 + $0x60] sm:$0xff] }
 0xb38   :  { %v6341_v54 = vld [vmem:[#allocation9 + $0x78] sm:$0xff]  ;;  %v6340_v55 = vld [vmem:[#allocation9 + $0x70] sm:$0xff] }
 0xb39   :  { %6345 = vmatpush1.bf16.msra.mxu1 %v6328_v37 }
 0xb3a   :  { %6346 = vmatprep.subr.bf16.mxu1 %v6331_v45 }
 0xb3d   :  { %6347 = vmatpush1.bf16.msra.mxu1 %v6330_v49 }
 0xb3e   :  { %6348 = vmatprep.subr.bf16.mxu1 %v6333_v16 }
 0xb41   :  { %6349 = vmatpush1.bf16.msra.mxu1 %v6332_v21 }
 0xb42   :  { %6350 = vmatprep.subr.bf16.mxu1 %v6335_v28 }
 0xb45   :  { %6351 = vmatpush1.bf16.msra.mxu1 %v6334_v51 }
 0xb46   :  { %6352 = vmatprep.subr.bf16.mxu1 %v6337_v44 }
 0xb49   :  { %6353 = vmatpush1.bf16.msra.mxu1 %v6336_v47 }
 0xb4a   :  { %6354 = vmatprep.subr.bf16.mxu1 %v6339_v22 }
 0xb4d   :  { %6355 = vmatpush1.bf16.msra.mxu1 %v6338_v53 }
 0xb4e   :  { %6356 = vmatprep.subr.bf16.mxu1 %v6341_v54 }
 0xb51   :  { %6357 = vmatpush1.bf16.msra.mxu1 %v6340_v55 }
 0xb54   :  { %6375 = vmatmul.mubr.bf16.vlgmr.msra.gmra.mrb[28].mxu1 %v6325_v57 }
 0xc27   :  { %v6376_v58 = vpop.f32.mrb[28].mxu1 }
 0xc28   :  { %v6383_v59 = vrot.slane %v6376_v58, 4  ;;  %v6397_v60 = vmul.f32 %v6376_v58, %v6376_v58  ;;  %v6378_v1 = vpop.f32.mrb[29].mxu1 }
 0xc29   :  { %v6389_v2 = vrot.slane %v6378_v1, 4  ;;  %v6398_v61 = vmul.f32 %v6378_v1, %v6378_v1  ;;  %v6380_v3 = vpop.f32.mrb[30].mxu1 }
 0xc2a   :  { %v6384_v4 = vadd.f32 %v6383_v59, %v6376_v58  ;;  %v6399_v5 = vrot.slane %v6397_v60, 4  ;;  %v6381_v62 = vpop.f32.mrb[31].mxu1 }
 0xc2b   :  { %v6390_v6 = vadd.f32 %v6389_v2, %v6378_v1  ;;  %v6405_v17 = vrot.slane %v6398_v61, 4 }
 0xc2c   :  { %v6385_v7 = vrot.slane %v6384_v4, 2  ;;  %v6400_v26 = vadd.f32 %v6399_v5, %v6397_v60 }
 0xc2d   :  { %v6391_v63 = vrot.slane %v6390_v6, 2  ;;  %v6406_v18 = vadd.f32 %v6405_v17, %v6398_v61 }
 0xc2e   :  { %v6386_v33 = vadd.f32 %v6385_v7, %v6384_v4  ;;  %v6401_v8 = vrot.slane %v6400_v26, 2 }
 0xc2f   :  { %v6392_v19 = vadd.f32 %v6391_v63, %v6390_v6  ;;  %v6407_v52 = vrot.slane %v6406_v18, 2 }
 0xc30   :  { %v6387_v23 = vrot.slane %v6386_v33, 1  ;;  %v6402_v41 = vadd.f32 %v6401_v8, %v6400_v26 }
 0xc31   :  { %v6393_v0 = vrot.slane %v6392_v19, 1  ;;  %v6408_v40 = vadd.f32 %v6407_v52, %v6406_v18 }
 0xc32   :  { %v6388_v20 = vadd.f32 %v6387_v23, %v6386_v33  ;;  %v6403_v32 = vrot.slane %v6402_v41, 1 }
 0xc33   :  { %v6394_v46 = vadd.f32 %v6393_v0, %v6392_v19  ;;  %v6409_v34 = vrot.slane %v6408_v40, 1 }
 0xc34   :  { %v6395_v29 = vmul.f32 0.125, %v6388_v20  ;;  %v6404_v31 = vadd.f32 %v6403_v32, %v6402_v41 }
 0xc35   :  { %v6396_v35 = vmul.f32 0.125, %v6394_v46  ;;  %v6410_v50 = vadd.f32 %v6409_v34, %v6408_v40 }
 0xc36   :  { %v6411_v25 = vmul.f32 0.125, %v6404_v31  ;;  %v6413_v38 = vmul.f32 %v6395_v29, %v6395_v29  ;;  %v6425_v36 = vsub.f32 0.0, %v6395_v29 }
 0xc37   :  { %v6412_v30 = vmul.f32 0.125, %v6410_v50  ;;  %v6414_v24 = vmul.f32 %v6396_v35, %v6396_v35  ;;  %v6426_v14 = vsub.f32 0.0, %v6396_v35 }
 0xc38   :  { %v6415_v56 = vsub.f32 %v6411_v25, %v6413_v38 }
 0xc39   :  { %v6416_v9 = vsub.f32 %v6412_v30, %v6414_v24 }
 0xc3a   :  { %v6417_v10 = vmax.f32 %v6415_v56, 0.0 }
 0xc3b   :  { %v6418_v11 = vmax.f32 %v6416_v9, 0.0 }
 0xc3c   :  { %v6419_v12 = vadd.f32 1e-05, %v6417_v10 }
 0xc3d   :  { %v6420_v13 = vadd.f32 1e-05, %v6418_v11 }
 0xc3e   :  { %7863 = vrsqrt.f32 %v6419_v12 }
 0xc3f   :  { %7865 = vrsqrt.f32 %v6420_v13 }
 0xc48   :  { %v7864_v39 = vpop.eup %7863 }
 0xc49   :  { %v7866_v42 = vpop.eup %7865  ;;  %v6423_v43 = vmul.f32 %v7864_v39, %v6376_v58  ;;  %v6427_v27 = vmul.f32 %v7864_v39, %v6425_v36 }
 0xc4a   :  { %v6424_v15 = vmul.f32 %v7866_v42, %v6378_v1  ;;  %v6428_v48 = vmul.f32 %v7866_v42, %v6426_v14 }
 0xc4b   :  { %v6429_v37 = vadd.f32 %v6427_v27, %v6423_v43 }
 0xc4c   :  { %v6430_v45 = vadd.f32 %v6428_v48, %v6424_v15 }
 0xc4d   :  { %vm6431_vm15 = vcmp.ge.f32.partialorder %v6429_v37, 0.0  ;;  %v6433_v49 = vmul.f32 0.01, %v6429_v37 }
 0xc4e   :  { %vm6432_vm1 = vcmp.ge.f32.partialorder %v6430_v45, 0.0  ;;  %v6434_v16 = vmul.f32 0.01, %v6430_v45 }
 0xc4f   :  { %v11314_v21 = vsel %vm6431_vm15, %v6429_v37, %v6433_v49 }
 0xc50   :  { %v6436_v28 = vsel %vm6432_vm1, %v6430_v45, %v6434_v16 }
 0xc51   :  { %7927 = dma.done.wait [#allocation12 + $0x8], 8192 }
 0xc52   :  { %7928 = vsyncadd [#allocation12 + $0x8], 4294959104  ;;  %v6441_v51 = vpack.c.bf16 %v6436_v28, %v6436_v28  ;;  %v6443_v44 = vld [vmem:[#allocation10 + $0x8] sm:$0xff]  ;;  %v6445_v47 = vld [vmem:[#allocation10 + $0x18] sm:$0xff] }
 0xc53   :  { %v6442_v22 = vld [vmem:[#allocation10] sm:$0xff]  ;;  %6506 = vmatprep.subr.bf16.mxu0 %v6443_v44  ;;  %6547 = vmatprep.subr.bf16.mxu1 %v6445_v47  ;;  %v6444_v53 = vld [vmem:[#allocation10 + $0x10] sm:$0xff]  ;;  %v6447_v54 = vld [vmem:[#allocation10 + $0x28] sm:$0xff]  ;;  %v6440_v47 = vpack.c.bf16 %v11314_v21, %v11314_v21 }
 0xc54   :  { %6538 = vmatprep.mubr.bf16.mxu0 %v6441_v51  ;;  %6579 = vmatprep.mubr.bf16.mxu1 %v6441_v51  ;;  %v6449_v55 = vld [vmem:[#allocation10 + $0x38] sm:$0xff]  ;;  %v6446_v57 = vld [vmem:[#allocation10 + $0x20] sm:$0xff]  ;;  %v6448_v58 = vld [vmem:[#allocation10 + $0x30] sm:$0xff] }
 0xc55   :  { %6507 = vmatpush1.bf16.msra.mxu0 %v6442_v22  ;;  %6548 = vmatpush1.bf16.msra.mxu1 %v6444_v53  ;;  %v6451_v59 = vld [vmem:[#allocation10 + $0x48] sm:$0xff]  ;;  %v6453_v60 = vld [vmem:[#allocation10 + $0x58] sm:$0xff]  ;;  %v6450_v1 = vld [vmem:[#allocation10 + $0x40] sm:$0xff] }
 0xc56   :  { %6508 = vmatprep.subr.bf16.mxu0 %v6447_v54  ;;  %6549 = vmatprep.subr.bf16.mxu1 %v6449_v55  ;;  %v6452_v2 = vld [vmem:[#allocation10 + $0x50] sm:$0xff]  ;;  %v6455_v61 = vld [vmem:[#allocation10 + $0x68] sm:$0xff]  ;;  %v6457_v3 = vld [vmem:[#allocation10 + $0x78] sm:$0xff] }
 0xc57   :  { %v6454_v4 = vld [vmem:[#allocation10 + $0x60] sm:$0xff]  ;;  %v6456_v5 = vld [vmem:[#allocation10 + $0x70] sm:$0xff]  ;;  %v6459_v62 = vld [vmem:[#allocation10 + $0x88] sm:$0xff] }
 0xc58   :  { %v6461_v6 = vld [vmem:[#allocation10 + $0x98] sm:$0xff]  ;;  %v6458_v17 = vld [vmem:[#allocation10 + $0x80] sm:$0xff]  ;;  %v6460_v7 = vld [vmem:[#allocation10 + $0x90] sm:$0xff] }
 0xc59   :  { %6509 = vmatpush1.bf16.msra.mxu0 %v6446_v57  ;;  %6550 = vmatpush1.bf16.msra.mxu1 %v6448_v58  ;;  %v6463_v26 = vld [vmem:[#allocation10 + $0xa8] sm:$0xff]  ;;  %v6465_v63 = vld [vmem:[#allocation10 + $0xb8] sm:$0xff]  ;;  %v6462_v18 = vld [vmem:[#allocation10 + $0xa0] sm:$0xff] }
 0xc5a   :  { %6510 = vmatprep.subr.bf16.mxu0 %v6451_v59  ;;  %6551 = vmatprep.subr.bf16.mxu1 %v6453_v60  ;;  %v6464_v33 = vld [vmem:[#allocation10 + $0xb0] sm:$0xff]  ;;  %v6467_v8 = vld [vmem:[#allocation10 + $0xc8] sm:$0xff]  ;;  %v6469_v19 = vld [vmem:[#allocation10 + $0xd8] sm:$0xff] }
 0xc5b   :  { %v6466_v52 = vld [vmem:[#allocation10 + $0xc0] sm:$0xff]  ;;  %v6468_v23 = vld [vmem:[#allocation10 + $0xd0] sm:$0xff]  ;;  %v6471_v41 = vld [vmem:[#allocation10 + $0xe8] sm:$0xff] }
 0xc5c   :  { %v6473_v0 = vld [vmem:[#allocation10 + $0xf8] sm:$0xff]  ;;  %v6470_v40 = vld [vmem:[#allocation10 + $0xe0] sm:$0xff]  ;;  %v6472_v20 = vld [vmem:[#allocation10 + $0xf0] sm:$0xff] }
 0xc5d   :  { %6511 = vmatpush1.bf16.msra.mxu0 %v6450_v1  ;;  %6552 = vmatpush1.bf16.msra.mxu1 %v6452_v2  ;;  %v6475_v32 = vld [vmem:[#allocation10 + $0x108] sm:$0xff]  ;;  %v6477_v46 = vld [vmem:[#allocation10 + $0x118] sm:$0xff]  ;;  %v6474_v34 = vld [vmem:[#allocation10 + $0x100] sm:$0xff] }
 0xc5e   :  { %6512 = vmatprep.subr.bf16.mxu0 %v6455_v61  ;;  %6553 = vmatprep.subr.bf16.mxu1 %v6457_v3  ;;  %v6476_v29 = vld [vmem:[#allocation10 + $0x110] sm:$0xff]  ;;  %v6479_v31 = vld [vmem:[#allocation10 + $0x128] sm:$0xff]  ;;  %v6481_v35 = vld [vmem:[#allocation10 + $0x138] sm:$0xff] }
 0xc5f   :  { %v6478_v50 = vld [vmem:[#allocation10 + $0x120] sm:$0xff]  ;;  %v6480_v25 = vld [vmem:[#allocation10 + $0x130] sm:$0xff]  ;;  %v6483_v38 = vld [vmem:[#allocation10 + $0x148] sm:$0xff] }
 0xc60   :  { %v6485_v30 = vld [vmem:[#allocation10 + $0x158] sm:$0xff]  ;;  %v6482_v24 = vld [vmem:[#allocation10 + $0x140] sm:$0xff]  ;;  %v6484_v56 = vld [vmem:[#allocation10 + $0x150] sm:$0xff] }
 0xc61   :  { %6513 = vmatpush1.bf16.msra.mxu0 %v6454_v4  ;;  %6554 = vmatpush1.bf16.msra.mxu1 %v6456_v5  ;;  %v6487_v9 = vld [vmem:[#allocation10 + $0x168] sm:$0xff]  ;;  %v6489_v10 = vld [vmem:[#allocation10 + $0x178] sm:$0xff]  ;;  %v6486_v11 = vld [vmem:[#allocation10 + $0x160] sm:$0xff] }
 0xc62   :  { %6514 = vmatprep.subr.bf16.mxu0 %v6459_v62  ;;  %6555 = vmatprep.subr.bf16.mxu1 %v6461_v6  ;;  %v6488_v12 = vld [vmem:[#allocation10 + $0x170] sm:$0xff]  ;;  %v6491_v13 = vld [vmem:[#allocation10 + $0x188] sm:$0xff]  ;;  %v6493_v36 = vld [vmem:[#allocation10 + $0x198] sm:$0xff] }
 0xc63   :  { %v6490_v39 = vld [vmem:[#allocation10 + $0x180] sm:$0xff]  ;;  %v6492_v14 = vld [vmem:[#allocation10 + $0x190] sm:$0xff]  ;;  %v6495_v42 = vld [vmem:[#allocation10 + $0x1a8] sm:$0xff] }
 0xc64   :  { %v6497_v43 = vld [vmem:[#allocation10 + $0x1b8] sm:$0xff]  ;;  %v6494_v27 = vld [vmem:[#allocation10 + $0x1a0] sm:$0xff]  ;;  %v6496_v15 = vld [vmem:[#allocation10 + $0x1b0] sm:$0xff] }
 0xc65   :  { %6515 = vmatpush1.bf16.msra.mxu0 %v6458_v17  ;;  %6556 = vmatpush1.bf16.msra.mxu1 %v6460_v7  ;;  %v6499_v48 = vld [vmem:[#allocation10 + $0x1c8] sm:$0xff]  ;;  %v6501_v37 = vld [vmem:[#allocation10 + $0x1d8] sm:$0xff]  ;;  %v6498_v45 = vld [vmem:[#allocation10 + $0x1c0] sm:$0xff] }
 0xc66   :  { %6516 = vmatprep.subr.bf16.mxu0 %v6463_v26  ;;  %6557 = vmatprep.subr.bf16.mxu1 %v6465_v63  ;;  %v6500_v49 = vld [vmem:[#allocation10 + $0x1d0] sm:$0xff]  ;;  %v6503_v16 = vld [vmem:[#allocation10 + $0x1e8] sm:$0xff]  ;;  %v6505_v28 = vld [vmem:[#allocation10 + $0x1f8] sm:$0xff] }
 0xc67   :  { %v6502_v51 = vld [vmem:[#allocation10 + $0x1e0] sm:$0xff]  ;;  %v6504_v44 = vld [vmem:[#allocation10 + $0x1f0] sm:$0xff] }
 0xc69   :  { %6517 = vmatpush1.bf16.msra.mxu0 %v6462_v18  ;;  %6558 = vmatpush1.bf16.msra.mxu1 %v6464_v33 }
 0xc6a   :  { %6518 = vmatprep.subr.bf16.mxu0 %v6467_v8  ;;  %6559 = vmatprep.subr.bf16.mxu1 %v6469_v19 }
 0xc6d   :  { %6519 = vmatpush1.bf16.msra.mxu0 %v6466_v52  ;;  %6560 = vmatpush1.bf16.msra.mxu1 %v6468_v23 }
 0xc6e   :  { %6520 = vmatprep.subr.bf16.mxu0 %v6471_v41  ;;  %6561 = vmatprep.subr.bf16.mxu1 %v6473_v0 }
 0xc71   :  { %6521 = vmatpush1.bf16.msra.mxu0 %v6470_v40  ;;  %6562 = vmatpush1.bf16.msra.mxu1 %v6472_v20 }
 0xc72   :  { %6522 = vmatprep.subr.bf16.mxu0 %v6475_v32  ;;  %6563 = vmatprep.subr.bf16.mxu1 %v6477_v46 }
 0xc75   :  { %6523 = vmatpush1.bf16.msra.mxu0 %v6474_v34  ;;  %6564 = vmatpush1.bf16.msra.mxu1 %v6476_v29 }
 0xc76   :  { %6524 = vmatprep.subr.bf16.mxu0 %v6479_v31  ;;  %6565 = vmatprep.subr.bf16.mxu1 %v6481_v35 }
 0xc79   :  { %6525 = vmatpush1.bf16.msra.mxu0 %v6478_v50  ;;  %6566 = vmatpush1.bf16.msra.mxu1 %v6480_v25 }
 0xc7a   :  { %6526 = vmatprep.subr.bf16.mxu0 %v6483_v38  ;;  %6567 = vmatprep.subr.bf16.mxu1 %v6485_v30 }
 0xc7d   :  { %6527 = vmatpush1.bf16.msra.mxu0 %v6482_v24  ;;  %6568 = vmatpush1.bf16.msra.mxu1 %v6484_v56 }
 0xc7e   :  { %6528 = vmatprep.subr.bf16.mxu0 %v6487_v9  ;;  %6569 = vmatprep.subr.bf16.mxu1 %v6489_v10 }
 0xc81   :  { %6529 = vmatpush1.bf16.msra.mxu0 %v6486_v11  ;;  %6570 = vmatpush1.bf16.msra.mxu1 %v6488_v12 }
 0xc82   :  { %6530 = vmatprep.subr.bf16.mxu0 %v6491_v13  ;;  %6571 = vmatprep.subr.bf16.mxu1 %v6493_v36 }
 0xc85   :  { %6531 = vmatpush1.bf16.msra.mxu0 %v6490_v39  ;;  %6572 = vmatpush1.bf16.msra.mxu1 %v6492_v14 }
 0xc86   :  { %6532 = vmatprep.subr.bf16.mxu0 %v6495_v42  ;;  %6573 = vmatprep.subr.bf16.mxu1 %v6497_v43 }
 0xc89   :  { %6533 = vmatpush1.bf16.msra.mxu0 %v6494_v27  ;;  %6574 = vmatpush1.bf16.msra.mxu1 %v6496_v15 }
 0xc8a   :  { %6534 = vmatprep.subr.bf16.mxu0 %v6499_v48  ;;  %6575 = vmatprep.subr.bf16.mxu1 %v6501_v37 }
 0xc8d   :  { %6535 = vmatpush1.bf16.msra.mxu0 %v6498_v45  ;;  %6576 = vmatpush1.bf16.msra.mxu1 %v6500_v49 }
 0xc8e   :  { %6536 = vmatprep.subr.bf16.mxu0 %v6503_v16  ;;  %6577 = vmatprep.subr.bf16.mxu1 %v6505_v28 }
 0xc91   :  { %6537 = vmatpush1.bf16.msra.mxu0 %v6502_v51  ;;  %6578 = vmatpush1.bf16.msra.mxu1 %v6504_v44 }
 0xc94   :  { %6539 = vmatmul.mubr.bf16.vlgmr.msra.gmra.mrb[8].mxu0 %v6440_v47  ;;  %6580 = vmatmul.mubr.bf16.vlgmr.msra.gmra.mrb[32].mxu1 %v6440_v47 }
 0xd67   :  { %v11318_v22 = vpop.f32.mrb[8].mxu0  ;;  %v11320_v53 = vpop.f32.mrb[32].mxu1 }
 0xd68   :  { %v6588_v54 = vrot.slane %v11318_v22, 4  ;;  %v6616_v55 = vmul.f32 %v11318_v22, %v11318_v22  ;;  %v6600_v57 = vrot.slane %v11320_v53, 4  ;;  %v6618_v58 = vmul.f32 %v11320_v53, %v11320_v53  ;;  %v11328_v59 = vpop.f32.mrb[9].mxu0  ;;  %v11330_v21 = vpop.f32.mrb[33].mxu1 }
 0xd69   :  { %v6594_v60 = vrot.slane %v11328_v59, 4  ;;  %v6617_v1 = vmul.f32 %v11328_v59, %v11328_v59  ;;  %v6606_v2 = vrot.slane %v11330_v21, 4  ;;  %v6619_v61 = vmul.f32 %v11330_v21, %v11330_v21  ;;  %v6544_v3 = vpop.f32.mrb[10].mxu0  ;;  %v6585_v4 = vpop.f32.mrb[34].mxu1 }
 0xd6a   :  { %v6589_v5 = vadd.f32 %v6588_v54, %v11318_v22  ;;  %v6620_v62 = vrot.slane %v6616_v55, 4  ;;  %v6601_v6 = vadd.f32 %v6600_v57, %v11320_v53  ;;  %v6632_v17 = vrot.slane %v6618_v58, 4  ;;  %v6545_v7 = vpop.f32.mrb[11].mxu0  ;;  %v6586_v26 = vpop.f32.mrb[35].mxu1 }
 0xd6b   :  { %v6595_v63 = vadd.f32 %v6594_v60, %v11328_v59  ;;  %v6626_v18 = vrot.slane %v6617_v1, 4  ;;  %v6607_v33 = vadd.f32 %v6606_v2, %v11330_v21  ;;  %v6638_v8 = vrot.slane %v6619_v61, 4 }
 0xd6c   :  { %v6590_v19 = vrot.slane %v6589_v5, 2  ;;  %v6621_v52 = vadd.f32 %v6620_v62, %v6616_v55  ;;  %v6602_v23 = vrot.slane %v6601_v6, 2  ;;  %v6633_v41 = vadd.f32 %v6632_v17, %v6618_v58 }
 0xd6d   :  { %v6596_v0 = vrot.slane %v6595_v63, 2  ;;  %v6627_v40 = vadd.f32 %v6626_v18, %v6617_v1  ;;  %v6608_v20 = vrot.slane %v6607_v33, 2  ;;  %v6639_v32 = vadd.f32 %v6638_v8, %v6619_v61 }
 0xd6e   :  { %v6591_v46 = vadd.f32 %v6590_v19, %v6589_v5  ;;  %v6622_v34 = vrot.slane %v6621_v52, 2  ;;  %v6603_v29 = vadd.f32 %v6602_v23, %v6601_v6  ;;  %v6634_v31 = vrot.slane %v6633_v41, 2 }
 0xd6f   :  { %v6597_v35 = vadd.f32 %v6596_v0, %v6595_v63  ;;  %v6628_v50 = vrot.slane %v6627_v40, 2  ;;  %v6609_v25 = vadd.f32 %v6608_v20, %v6607_v33  ;;  %v6640_v38 = vrot.slane %v6639_v32, 2 }
 0xd70   :  { %v6592_v30 = vrot.slane %v6591_v46, 1  ;;  %v6623_v24 = vadd.f32 %v6622_v34, %v6621_v52  ;;  %v6604_v56 = vrot.slane %v6603_v29, 1  ;;  %v6635_v9 = vadd.f32 %v6634_v31, %v6633_v41 }
 0xd71   :  { %v6598_v10 = vrot.slane %v6597_v35, 1  ;;  %v6629_v11 = vadd.f32 %v6628_v50, %v6627_v40  ;;  %v6610_v12 = vrot.slane %v6609_v25, 1  ;;  %v6641_v13 = vadd.f32 %v6640_v38, %v6639_v32 }
 0xd72   :  { %v6593_v36 = vadd.f32 %v6592_v30, %v6591_v46  ;;  %v6624_v39 = vrot.slane %v6623_v24, 1  ;;  %v6605_v14 = vadd.f32 %v6604_v56, %v6603_v29  ;;  %v6636_v42 = vrot.slane %v6635_v9, 1 }
 0xd73   :  { %v6599_v43 = vadd.f32 %v6598_v10, %v6597_v35  ;;  %v6630_v27 = vrot.slane %v6629_v11, 1  ;;  %v6611_v15 = vadd.f32 %v6610_v12, %v6609_v25  ;;  %v6642_v48 = vrot.slane %v6641_v13, 1 }
 0xd74   :  { %v6612_v37 = vmul.f32 0.125, %v6593_v36  ;;  %v6625_v45 = vadd.f32 %v6624_v39, %v6623_v24  ;;  %v6614_v49 = vmul.f32 0.125, %v6605_v14  ;;  %v6637_v16 = vadd.f32 %v6636_v42, %v6635_v9 }
 0xd75   :  { %v6613_v28 = vmul.f32 0.125, %v6599_v43  ;;  %v6631_v51 = vadd.f32 %v6630_v27, %v6629_v11  ;;  %v6615_v44 = vmul.f32 0.125, %v6611_v15  ;;  %v6643_v47 = vadd.f32 %v6642_v48, %v6641_v13 }
 0xd76   :  { %v6644_v54 = vmul.f32 0.125, %v6625_v45  ;;  %v6648_v55 = vmul.f32 %v6612_v37, %v6612_v37  ;;  %v6646_v57 = vmul.f32 0.125, %v6637_v16  ;;  %v6650_v58 = vmul.f32 %v6614_v49, %v6614_v49 }
 0xd77   :  { %v6645_v60 = vmul.f32 0.125, %v6631_v51  ;;  %v6649_v1 = vmul.f32 %v6613_v28, %v6613_v28  ;;  %v6647_v61 = vmul.f32 0.125, %v6643_v47  ;;  %v6651_v3 = vmul.f32 %v6615_v44, %v6615_v44 }
 0xd78   :  { %v6652_v2 = vsub.f32 %v6644_v54, %v6648_v55  ;;  %v6654_v4 = vsub.f32 %v6646_v57, %v6650_v58  ;;  %v6672_v19 = vsub.f32 0.0, %v6612_v37  ;;  %v6674_v23 = vsub.f32 0.0, %v6614_v49 }
 0xd79   :  { %v6653_v5 = vsub.f32 %v6645_v60, %v6649_v1  ;;  %v6655_v6 = vsub.f32 %v6647_v61, %v6651_v3  ;;  %v6673_v20 = vsub.f32 0.0, %v6613_v28  ;;  %v6675_v29 = vsub.f32 0.0, %v6615_v44 }
 0xd7a   :  { %v6656_v62 = vmax.f32 %v6652_v2, 0.0  ;;  %v6658_v17 = vmax.f32 %v6654_v4, 0.0 }
 0xd7b   :  { %v6657_v7 = vmax.f32 %v6653_v5, 0.0  ;;  %v6659_v63 = vmax.f32 %v6655_v6, 0.0 }
 0xd7c   :  { %v6660_v26 = vadd.f32 1e-05, %v6656_v62  ;;  %v6662_v18 = vadd.f32 1e-05, %v6658_v17 }
 0xd7d   :  { %v6661_v33 = vadd.f32 1e-05, %v6657_v7  ;;  %v6663_v8 = vadd.f32 1e-05, %v6659_v63 }
 0xd7e   :  { %7867 = vrsqrt.f32 %v6660_v26 }
 0xd7f   :  { %7869 = vrsqrt.f32 %v6662_v18 }
 0xd80   :  { %7871 = vrsqrt.f32 %v6661_v33 }
 0xd81   :  { %7873 = vrsqrt.f32 %v6663_v8 }
 0xd88   :  { %v7868_v52 = vpop.eup %7867 }
 0xd89   :  { %v7870_v41 = vpop.eup %7869  ;;  %v6668_v0 = vmul.f32 %v7868_v52, %v11318_v22  ;;  %v6676_v40 = vmul.f32 %v7868_v52, %v6672_v19 }
 0xd8a   :  { %v7872_v32 = vpop.eup %7871  ;;  %v6670_v46 = vmul.f32 %v7870_v41, %v11320_v53  ;;  %v6678_v34 = vmul.f32 %v7870_v41, %v6674_v23 }
 0xd8b   :  { %v7874_v31 = vpop.eup %7873  ;;  %v6680_v35 = vadd.f32 %v6676_v40, %v6668_v0  ;;  %v6669_v50 = vmul.f32 %v7872_v32, %v11328_v59  ;;  %v6677_v25 = vmul.f32 %v7872_v32, %v6673_v20 }
 0xd8c   :  { %v6682_v38 = vadd.f32 %v6678_v34, %v6670_v46  ;;  %v6671_v30 = vmul.f32 %v7874_v31, %v11330_v21  ;;  %v6679_v24 = vmul.f32 %v7874_v31, %v6675_v29 }
 0xd8d   :  { %vm6684_vm2 = vcmp.ge.f32.partialorder %v6680_v35, 0.0  ;;  %v6688_v56 = vmul.f32 0.01, %v6680_v35  ;;  %v6681_v9 = vadd.f32 %v6677_v25, %v6669_v50 }
 0xd8e   :  { %vm6686_vm3 = vcmp.ge.f32.partialorder %v6682_v38, 0.0  ;;  %v6690_v22 = vmul.f32 0.01, %v6682_v38  ;;  %v6683_v10 = vadd.f32 %v6679_v24, %v6671_v30 }
 0xd8f   :  { %v11346_v11 = vsel %vm6684_vm2, %v6680_v35, %v6688_v56  ;;  %vm6685_vm4 = vcmp.ge.f32.partialorder %v6681_v9, 0.0  ;;  %v6689_v53 = vmul.f32 0.01, %v6681_v9 }
 0xd90   :  { %v11348_v12 = vsel %vm6686_vm3, %v6682_v38, %v6690_v22  ;;  %vm6687_vm5 = vcmp.ge.f32.partialorder %v6683_v10, 0.0  ;;  %v6691_v13 = vmul.f32 0.01, %v6683_v10 }
 0xd91   :  { %v6693_v59 = vsel %vm6685_vm4, %v6681_v9, %v6689_v53 }
 0xd92   :  { %v11350_v36 = vsel %vm6687_vm5, %v6683_v10, %v6691_v13 }
 0xd93   :  { %7929 = dma.done.wait [#allocation12 + $0x9], 28672 }
 0xd94   :  { %7930 = vsyncadd [#allocation12 + $0x9], 4294938624  ;;  %v11352_v21 = vpack.c.bf16 %v6693_v59, %v6693_v59  ;;  %v6704_v39 = vld [vmem:[#allocation11 + $0x8] sm:$0xff]  ;;  %v6706_v14 = vld [vmem:[#allocation11 + $0x18] sm:$0xff]  ;;  %s7936_s0 = smov [#allocation13]  }
 0xd95   :  { %v6703_v42 = vld [vmem:[#allocation11] sm:$0xff]  ;;  %6927 = vmatprep.subr.bf16.mxu0 %v6704_v39  ;;  %7009 = vmatprep.subr.bf16.mxu1 %v6706_v14  ;;  %v6705_v43 = vld [vmem:[#allocation11 + $0x10] sm:$0xff]  ;;  %v6710_v48 = vld [vmem:[#allocation11 + $0x38] sm:$0xff]  ;;  %s7457_s9 = sshll.u32 %s7936_s0, 4  ;;  %s7458_s9 = int_to_ptr.vmem [resolvable:$true] %s7457_s9 }
 0xd96   :  { %6959 = vmatprep.mubr.bf16.mxu0 %v11352_v21  ;;  %7041 = vmatprep.mubr.bf16.mxu1 %v11352_v21  ;;  %v6711_v27 = vld [vmem:[#allocation11 + $0x40] sm:$0xff]  ;;  %v6713_v15 = vld [vmem:[#allocation11 + $0x50] sm:$0xff]  ;;  %v6712_v37 = vld [vmem:[#allocation11 + $0x48] sm:$0xff]  ;;  %s7889_s4 = scalar_lea.vmem %s7458_s9, 896  ;;  %p7894_p1 = scmp.lt.s32.totalorder %s7458_s9, %s7458_s9 }
 0xd97   :  { %6928 = vmatpush1.bf16.msra.mxu0 %v6703_v42  ;;  %7010 = vmatpush1.bf16.msra.mxu1 %v6705_v43  ;;  %v6718_v45 = vld [vmem:[#allocation11 + $0x78] sm:$0xff]  ;;  %v6720_v49 = vld [vmem:[#allocation11 + $0x88] sm:$0xff]  ;;  %v6717_v16 = vld [vmem:[#allocation11 + $0x70] sm:$0xff]  ;;  %p7890_p0 = scmp.ne.s32.totalorder %s7458_s9, %s7889_s4  ;;  %p7895_p2 = scmp.lt.s32.totalorder %s7889_s4, %s7889_s4 }
 0xd98   :  { %6929 = vmatprep.subr.bf16.mxu0 %v6711_v27  ;;  %7011 = vmatprep.subr.bf16.mxu1 %v6713_v15  ;;  %v6719_v28 = vld [vmem:[#allocation11 + $0x80] sm:$0xff]  ;;  %v6725_v51 = vld [vmem:[#allocation11 + $0xb0] sm:$0xff]  ;;  %v6724_v47 = vld [vmem:[#allocation11 + $0xa8] sm:$0xff] }
 0xd99   :  { %v6727_v44 = vld [vmem:[#allocation11 + $0xc0] sm:$0xff]  ;;  %v6726_v54 = vld [vmem:[#allocation11 + $0xb8] sm:$0xff]  ;;  %v6732_v55 = vld [vmem:[#allocation11 + $0xe8] sm:$0xff]  ;;  %p7896_p3 = por %p7895_p2, %p7894_p1 }
 0xd9a   :  { %v6734_v57 = vld [vmem:[#allocation11 + $0xf8] sm:$0xff]  ;;  %v6731_v58 = vld [vmem:[#allocation11 + $0xe0] sm:$0xff]  ;;  %v6733_v60 = vld [vmem:[#allocation11 + $0xf0] sm:$0xff] }
 0xd9b   :  { %6930 = vmatpush1.bf16.msra.mxu0 %v6710_v48  ;;  %7012 = vmatpush1.bf16.msra.mxu1 %v6712_v37  ;;  %v6739_v1 = vld [vmem:[#allocation11 + $0x120] sm:$0xff]  ;;  %v6741_v2 = vld [vmem:[#allocation11 + $0x130] sm:$0xff]  ;;  %v6738_v61 = vld [vmem:[#allocation11 + $0x118] sm:$0xff]  ;;  %v11358_v48 = vpack.c.bf16 %v11346_v11, %v11346_v11  ;;  %p7897_p4 = pnand %p7896_p3, %p7890_p0 }
 0xd9c   :  { %6931 = vmatprep.subr.bf16.mxu0 %v6718_v45  ;;  %7013 = vmatprep.subr.bf16.mxu1 %v6720_v49  ;;  %v6740_v3 = vld [vmem:[#allocation11 + $0x128] sm:$0xff]  ;;  %v6746_v4 = vld [vmem:[#allocation11 + $0x158] sm:$0xff]  ;;  %v6745_v62 = vld [vmem:[#allocation11 + $0x150] sm:$0xff] }
 0xd9d   :  { %v6748_v5 = vld [vmem:[#allocation11 + $0x168] sm:$0xff]  ;;  %v6747_v6 = vld [vmem:[#allocation11 + $0x160] sm:$0xff]  ;;  %v6753_v17 = vld [vmem:[#allocation11 + $0x190] sm:$0xff] }
 0xd9e   :  { %v6755_v7 = vld [vmem:[#allocation11 + $0x1a0] sm:$0xff]  ;;  %v6752_v26 = vld [vmem:[#allocation11 + $0x188] sm:$0xff]  ;;  %v6754_v63 = vld [vmem:[#allocation11 + $0x198] sm:$0xff] }
 0xd9f   :  { %6932 = vmatpush1.bf16.msra.mxu0 %v6717_v16  ;;  %7014 = vmatpush1.bf16.msra.mxu1 %v6719_v28  ;;  %v6760_v18 = vld [vmem:[#allocation11 + $0x1c8] sm:$0xff]  ;;  %v6762_v33 = vld [vmem:[#allocation11 + $0x1d8] sm:$0xff]  ;;  %v6759_v8 = vld [vmem:[#allocation11 + $0x1c0] sm:$0xff]  ;;  %v11362_v28 = vpack.c.bf16 %v11350_v36, %v11350_v36 }
 0xda0   :  { %6933 = vmatprep.subr.bf16.mxu0 %v6725_v51  ;;  %7015 = vmatprep.subr.bf16.mxu1 %v6727_v44  ;;  %v6761_v19 = vld [vmem:[#allocation11 + $0x1d0] sm:$0xff]  ;;  %v6767_v52 = vld [vmem:[#allocation11 + $0x200] sm:$0xff]  ;;  %v6766_v41 = vld [vmem:[#allocation11 + $0x1f8] sm:$0xff] }
 0xda1   :  { %v6769_v23 = vld [vmem:[#allocation11 + $0x210] sm:$0xff]  ;;  %v6768_v0 = vld [vmem:[#allocation11 + $0x208] sm:$0xff]  ;;  %v6774_v40 = vld [vmem:[#allocation11 + $0x238] sm:$0xff] }
 0xda2   :  { %v6776_v20 = vld [vmem:[#allocation11 + $0x248] sm:$0xff]  ;;  %v6773_v32 = vld [vmem:[#allocation11 + $0x230] sm:$0xff]  ;;  %v6775_v46 = vld [vmem:[#allocation11 + $0x240] sm:$0xff] }
 0xda3   :  { %6934 = vmatpush1.bf16.msra.mxu0 %v6724_v47  ;;  %7016 = vmatpush1.bf16.msra.mxu1 %v6726_v54  ;;  %v6781_v34 = vld [vmem:[#allocation11 + $0x270] sm:$0xff]  ;;  %v6783_v29 = vld [vmem:[#allocation11 + $0x280] sm:$0xff]  ;;  %v6780_v31 = vld [vmem:[#allocation11 + $0x268] sm:$0xff] }
 0xda4   :  { %6935 = vmatprep.subr.bf16.mxu0 %v6732_v55  ;;  %7017 = vmatprep.subr.bf16.mxu1 %v6734_v57  ;;  %v6782_v35 = vld [vmem:[#allocation11 + $0x278] sm:$0xff]  ;;  %v6788_v50 = vld [vmem:[#allocation11 + $0x2a8] sm:$0xff]  ;;  %v6787_v38 = vld [vmem:[#allocation11 + $0x2a0] sm:$0xff] }
 0xda5   :  { %v6790_v25 = vld [vmem:[#allocation11 + $0x2b8] sm:$0xff]  ;;  %v6789_v30 = vld [vmem:[#allocation11 + $0x2b0] sm:$0xff]  ;;  %v6795_v24 = vld [vmem:[#allocation11 + $0x2e0] sm:$0xff] }
 0xda6   :  { %v6797_v56 = vld [vmem:[#allocation11 + $0x2f0] sm:$0xff]  ;;  %v6794_v9 = vld [vmem:[#allocation11 + $0x2d8] sm:$0xff]  ;;  %v6796_v22 = vld [vmem:[#allocation11 + $0x2e8] sm:$0xff] }
 0xda7   :  { %6936 = vmatpush1.bf16.msra.mxu0 %v6731_v58  ;;  %7018 = vmatpush1.bf16.msra.mxu1 %v6733_v60  ;;  %v6802_v10 = vld [vmem:[#allocation11 + $0x318] sm:$0xff]  ;;  %v6804_v53 = vld [vmem:[#allocation11 + $0x328] sm:$0xff]  ;;  %v6801_v13 = vld [vmem:[#allocation11 + $0x310] sm:$0xff] }
 0xda8   :  { %6937 = vmatprep.subr.bf16.mxu0 %v6739_v1  ;;  %7019 = vmatprep.subr.bf16.mxu1 %v6741_v2  ;;  %v6803_v59 = vld [vmem:[#allocation11 + $0x320] sm:$0xff]  ;;  %v6809_v39 = vld [vmem:[#allocation11 + $0x350] sm:$0xff]  ;;  %v6808_v42 = vld [vmem:[#allocation11 + $0x348] sm:$0xff] }
 0xda9   :  { %v6811_v14 = vld [vmem:[#allocation11 + $0x360] sm:$0xff]  ;;  %v6810_v43 = vld [vmem:[#allocation11 + $0x358] sm:$0xff]  ;;  %v6816_v27 = vld [vmem:[#allocation11 + $0x388] sm:$0xff] }
 0xdaa   :  { %v6818_v15 = vld [vmem:[#allocation11 + $0x398] sm:$0xff]  ;;  %v6815_v37 = vld [vmem:[#allocation11 + $0x380] sm:$0xff]  ;;  %v6817_v45 = vld [vmem:[#allocation11 + $0x390] sm:$0xff] }
 0xdab   :  { %6938 = vmatpush1.bf16.msra.mxu0 %v6738_v61  ;;  %7020 = vmatpush1.bf16.msra.mxu1 %v6740_v3  ;;  %v6823_v49 = vld [vmem:[#allocation11 + $0x3c0] sm:$0xff]  ;;  %v6825_v16 = vld [vmem:[#allocation11 + $0x3d0] sm:$0xff]  ;;  %v6822_v11 = vld [vmem:[#allocation11 + $0x3b8] sm:$0xff] }
 0xdac   :  { %6939 = vmatprep.subr.bf16.mxu0 %v6746_v4  ;;  %7021 = vmatprep.subr.bf16.mxu1 %v6748_v5  ;;  %v6824_v51 = vld [vmem:[#allocation11 + $0x3c8] sm:$0xff]  ;;  %v6830_v44 = vld [vmem:[#allocation11 + $0x3f8] sm:$0xff]  ;;  %v6829_v36 = vld [vmem:[#allocation11 + $0x3f0] sm:$0xff] }
 0xdad   :  { %v6832_v47 = vld [vmem:[#allocation11 + $0x408] sm:$0xff]  ;;  %v6831_v54 = vld [vmem:[#allocation11 + $0x400] sm:$0xff]  ;;  %v6837_v55 = vld [vmem:[#allocation11 + $0x430] sm:$0xff] }
 0xdae   :  { %v6839_v57 = vld [vmem:[#allocation11 + $0x440] sm:$0xff]  ;;  %v6836_v58 = vld [vmem:[#allocation11 + $0x428] sm:$0xff]  ;;  %v6838_v60 = vld [vmem:[#allocation11 + $0x438] sm:$0xff] }
 0xdaf   :  { %6940 = vmatpush1.bf16.msra.mxu0 %v6745_v62  ;;  %7022 = vmatpush1.bf16.msra.mxu1 %v6747_v6  ;;  %v6844_v1 = vld [vmem:[#allocation11 + $0x468] sm:$0xff]  ;;  %v6846_v2 = vld [vmem:[#allocation11 + $0x478] sm:$0xff]  ;;  %v6843_v61 = vld [vmem:[#allocation11 + $0x460] sm:$0xff] }
 0xdb0   :  { %6941 = vmatprep.subr.bf16.mxu0 %v6753_v17  ;;  %7023 = vmatprep.subr.bf16.mxu1 %v6755_v7  ;;  %v6845_v3 = vld [vmem:[#allocation11 + $0x470] sm:$0xff]  ;;  %v6851_v4 = vld [vmem:[#allocation11 + $0x4a0] sm:$0xff]  ;;  %v6850_v62 = vld [vmem:[#allocation11 + $0x498] sm:$0xff] }
 0xdb1   :  { %v6853_v5 = vld [vmem:[#allocation11 + $0x4b0] sm:$0xff]  ;;  %v6852_v6 = vld [vmem:[#allocation11 + $0x4a8] sm:$0xff]  ;;  %v6858_v17 = vld [vmem:[#allocation11 + $0x4d8] sm:$0xff] }
 0xdb2   :  { %v6860_v7 = vld [vmem:[#allocation11 + $0x4e8] sm:$0xff] }
 0xdb3   :  { %6942 = vmatpush1.bf16.msra.mxu0 %v6752_v26  ;;  %7024 = vmatpush1.bf16.msra.mxu1 %v6754_v63  ;;  %v6857_v26 = vld [vmem:[#allocation11 + $0x4d0] sm:$0xff]  ;;  %v6859_v63 = vld [vmem:[#allocation11 + $0x4e0] sm:$0xff] }
 0xdb4   :  { %6943 = vmatprep.subr.bf16.mxu0 %v6760_v18  ;;  %7025 = vmatprep.subr.bf16.mxu1 %v6762_v33  ;;  %v6865_v18 = vld [vmem:[#allocation11 + $0x510] sm:$0xff]  ;;  %v6867_v33 = vld [vmem:[#allocation11 + $0x520] sm:$0xff] }
 0xdb7   :  { %6944 = vmatpush1.bf16.msra.mxu0 %v6759_v8  ;;  %7026 = vmatpush1.bf16.msra.mxu1 %v6761_v19  ;;  %v6864_v8 = vld [vmem:[#allocation11 + $0x508] sm:$0xff]  ;;  %v6866_v19 = vld [vmem:[#allocation11 + $0x518] sm:$0xff] }
 0xdb8   :  { %6945 = vmatprep.subr.bf16.mxu0 %v6767_v52  ;;  %7027 = vmatprep.subr.bf16.mxu1 %v6769_v23  ;;  %v6872_v52 = vld [vmem:[#allocation11 + $0x548] sm:$0xff]  ;;  %v6874_v23 = vld [vmem:[#allocation11 + $0x558] sm:$0xff] }
 0xdbb   :  { %6946 = vmatpush1.bf16.msra.mxu0 %v6766_v41  ;;  %7028 = vmatpush1.bf16.msra.mxu1 %v6768_v0  ;;  %v6871_v41 = vld [vmem:[#allocation11 + $0x540] sm:$0xff]  ;;  %v6873_v0 = vld [vmem:[#allocation11 + $0x550] sm:$0xff] }
 0xdbc   :  { %6947 = vmatprep.subr.bf16.mxu0 %v6774_v40  ;;  %7029 = vmatprep.subr.bf16.mxu1 %v6776_v20  ;;  %v6879_v40 = vld [vmem:[#allocation11 + $0x580] sm:$0xff]  ;;  %v6881_v20 = vld [vmem:[#allocation11 + $0x590] sm:$0xff] }
 0xdbf   :  { %6948 = vmatpush1.bf16.msra.mxu0 %v6773_v32  ;;  %7030 = vmatpush1.bf16.msra.mxu1 %v6775_v46  ;;  %v6878_v32 = vld [vmem:[#allocation11 + $0x578] sm:$0xff]  ;;  %v6880_v46 = vld [vmem:[#allocation11 + $0x588] sm:$0xff] }
 0xdc0   :  { %6949 = vmatprep.subr.bf16.mxu0 %v6781_v34  ;;  %7031 = vmatprep.subr.bf16.mxu1 %v6783_v29  ;;  %v6886_v34 = vld [vmem:[#allocation11 + $0x5b8] sm:$0xff]  ;;  %v6888_v29 = vld [vmem:[#allocation11 + $0x5c8] sm:$0xff] }
 0xdc3   :  { %6950 = vmatpush1.bf16.msra.mxu0 %v6780_v31  ;;  %7032 = vmatpush1.bf16.msra.mxu1 %v6782_v35  ;;  %v6885_v31 = vld [vmem:[#allocation11 + $0x5b0] sm:$0xff]  ;;  %v6887_v35 = vld [vmem:[#allocation11 + $0x5c0] sm:$0xff] }
 0xdc4   :  { %6951 = vmatprep.subr.bf16.mxu0 %v6788_v50  ;;  %7033 = vmatprep.subr.bf16.mxu1 %v6790_v25  ;;  %v6893_v50 = vld [vmem:[#allocation11 + $0x5f0] sm:$0xff]  ;;  %v6895_v25 = vld [vmem:[#allocation11 + $0x600] sm:$0xff] }
 0xdc7   :  { %6952 = vmatpush1.bf16.msra.mxu0 %v6787_v38  ;;  %7034 = vmatpush1.bf16.msra.mxu1 %v6789_v30  ;;  %v6892_v38 = vld [vmem:[#allocation11 + $0x5e8] sm:$0xff]  ;;  %v6894_v30 = vld [vmem:[#allocation11 + $0x5f8] sm:$0xff] }
 0xdc8   :  { %6953 = vmatprep.subr.bf16.mxu0 %v6795_v24  ;;  %7035 = vmatprep.subr.bf16.mxu1 %v6797_v56  ;;  %v6900_v24 = vld [vmem:[#allocation11 + $0x628] sm:$0xff]  ;;  %v6902_v56 = vld [vmem:[#allocation11 + $0x638] sm:$0xff] }
 0xdcb   :  { %6954 = vmatpush1.bf16.msra.mxu0 %v6794_v9  ;;  %7036 = vmatpush1.bf16.msra.mxu1 %v6796_v22  ;;  %v6899_v9 = vld [vmem:[#allocation11 + $0x620] sm:$0xff]  ;;  %v6901_v22 = vld [vmem:[#allocation11 + $0x630] sm:$0xff] }
 0xdcc   :  { %6955 = vmatprep.subr.bf16.mxu0 %v6802_v10  ;;  %7037 = vmatprep.subr.bf16.mxu1 %v6804_v53  ;;  %v6907_v10 = vld [vmem:[#allocation11 + $0x660] sm:$0xff]  ;;  %v6909_v53 = vld [vmem:[#allocation11 + $0x670] sm:$0xff] }
 0xdcf   :  { %6956 = vmatpush1.bf16.msra.mxu0 %v6801_v13  ;;  %7038 = vmatpush1.bf16.msra.mxu1 %v6803_v59  ;;  %v6906_v13 = vld [vmem:[#allocation11 + $0x658] sm:$0xff]  ;;  %v6908_v59 = vld [vmem:[#allocation11 + $0x668] sm:$0xff] }
 0xdd0   :  { %6957 = vmatprep.subr.bf16.mxu0 %v6809_v39  ;;  %7039 = vmatprep.subr.bf16.mxu1 %v6811_v14  ;;  %v6914_v39 = vld [vmem:[#allocation11 + $0x698] sm:$0xff]  ;;  %v6916_v14 = vld [vmem:[#allocation11 + $0x6a8] sm:$0xff] }
 0xdd3   :  { %6958 = vmatpush1.bf16.msra.mxu0 %v6808_v42  ;;  %7040 = vmatpush1.bf16.msra.mxu1 %v6810_v43  ;;  %v6913_v42 = vld [vmem:[#allocation11 + $0x690] sm:$0xff]  ;;  %v6915_v43 = vld [vmem:[#allocation11 + $0x6a0] sm:$0xff] }
 0xdd4   :  { %6968 = vmatprep.subr.bf16.mxu0 %v6816_v27  ;;  %7050 = vmatprep.subr.bf16.mxu1 %v6818_v15  ;;  %v6921_v27 = vld [vmem:[#allocation11 + $0x6d0] sm:$0xff]  ;;  %v6923_v15 = vld [vmem:[#allocation11 + $0x6e0] sm:$0xff] }
 0xdd6   :  { %6960 = vmatmul.mubr.bf16.vlgmr.msra.gmra.mrb[12].mxu0 %v11358_v48  ;;  %7042 = vmatmul.mubr.bf16.vlgmr.msra.gmra.mrb[36].mxu1 %v11358_v48 }
 0xdd7   :  { %6969 = vmatpush1.bf16.msra.mxu0 %v6815_v37  ;;  %7051 = vmatpush1.bf16.msra.mxu1 %v6817_v45  ;;  %v6920_v37 = vld [vmem:[#allocation11 + $0x6c8] sm:$0xff]  ;;  %v6922_v45 = vld [vmem:[#allocation11 + $0x6d8] sm:$0xff] }
 0xdd8   :  { %6970 = vmatprep.subr.bf16.mxu0 %v6823_v49  ;;  %7052 = vmatprep.subr.bf16.mxu1 %v6825_v16  ;;  %v6708_v49 = vld [vmem:[#allocation11 + $0x28] sm:$0xff]  ;;  %v6765_v16 = vld [vmem:[#allocation11 + $0x1f0] sm:$0xff] }
 0xdd9   :  { %7000 = vmatprep.mubr.bf16.mxu0 %v11362_v28  ;;  %7082 = vmatprep.mubr.bf16.mxu1 %v11362_v28 }
 0xddb   :  { %6971 = vmatpush1.bf16.msra.mxu0 %v6822_v11  ;;  %7053 = vmatpush1.bf16.msra.mxu1 %v6824_v51  ;;  %v11370_v11 = vpack.c.bf16 %v11348_v12, %v11348_v12  ;;  %v6707_v51 = vld [vmem:[#allocation11 + $0x20] sm:$0xff]  ;;  %v6722_v12 = vld [vmem:[#allocation11 + $0x98] sm:$0xff] }
 0xddc   :  { %6972 = vmatprep.subr.bf16.mxu0 %v6830_v44  ;;  %7054 = vmatprep.subr.bf16.mxu1 %v6832_v47  ;;  %v6709_v44 = vld [vmem:[#allocation11 + $0x30] sm:$0xff]  ;;  %v6715_v47 = vld [vmem:[#allocation11 + $0x60] sm:$0xff] }
 0xddf   :  { %6973 = vmatpush1.bf16.msra.mxu0 %v6829_v36  ;;  %7055 = vmatpush1.bf16.msra.mxu1 %v6831_v54  ;;  %v6772_v36 = vld [vmem:[#allocation11 + $0x228] sm:$0xff]  ;;  %v6714_v54 = vld [vmem:[#allocation11 + $0x58] sm:$0xff] }
 0xde0   :  { %6974 = vmatprep.subr.bf16.mxu0 %v6837_v55  ;;  %7056 = vmatprep.subr.bf16.mxu1 %v6839_v57  ;;  %v6716_v55 = vld [vmem:[#allocation11 + $0x68] sm:$0xff]  ;;  %v6779_v57 = vld [vmem:[#allocation11 + $0x260] sm:$0xff] }
 0xde3   :  { %6975 = vmatpush1.bf16.msra.mxu0 %v6836_v58  ;;  %7057 = vmatpush1.bf16.msra.mxu1 %v6838_v60  ;;  %v6721_v58 = vld [vmem:[#allocation11 + $0x90] sm:$0xff]  ;;  %v6723_v60 = vld [vmem:[#allocation11 + $0xa0] sm:$0xff] }
 0xde4   :  { %6976 = vmatprep.subr.bf16.mxu0 %v6844_v1  ;;  %7058 = vmatprep.subr.bf16.mxu1 %v6846_v2  ;;  %v6729_v1 = vld [vmem:[#allocation11 + $0xd0] sm:$0xff]  ;;  %v6786_v2 = vld [vmem:[#allocation11 + $0x298] sm:$0xff] }
 0xde7   :  { %6977 = vmatpush1.bf16.msra.mxu0 %v6843_v61  ;;  %7059 = vmatpush1.bf16.msra.mxu1 %v6845_v3  ;;  %v6728_v61 = vld [vmem:[#allocation11 + $0xc8] sm:$0xff]  ;;  %v6730_v3 = vld [vmem:[#allocation11 + $0xd8] sm:$0xff] }
 0xde8   :  { %6978 = vmatprep.subr.bf16.mxu0 %v6851_v4  ;;  %7060 = vmatprep.subr.bf16.mxu1 %v6853_v5  ;;  %v6736_v4 = vld [vmem:[#allocation11 + $0x108] sm:$0xff]  ;;  %v6793_v5 = vld [vmem:[#allocation11 + $0x2d0] sm:$0xff] }
 0xdeb   :  { %6979 = vmatpush1.bf16.msra.mxu0 %v6850_v62  ;;  %7061 = vmatpush1.bf16.msra.mxu1 %v6852_v6  ;;  %v6737_v62 = vld [vmem:[#allocation11 + $0x110] sm:$0xff]  ;;  %v6743_v6 = vld [vmem:[#allocation11 + $0x140] sm:$0xff] }
 0xdec   :  { %6980 = vmatprep.subr.bf16.mxu0 %v6858_v17  ;;  %7062 = vmatprep.subr.bf16.mxu1 %v6860_v7  ;;  %v6800_v17 = vld [vmem:[#allocation11 + $0x308] sm:$0xff]  ;;  %v6742_v7 = vld [vmem:[#allocation11 + $0x138] sm:$0xff] }
 0xdef   :  { %6981 = vmatpush1.bf16.msra.mxu0 %v6857_v26  ;;  %7063 = vmatpush1.bf16.msra.mxu1 %v6859_v63  ;;  %v6744_v26 = vld [vmem:[#allocation11 + $0x148] sm:$0xff]  ;;  %v6750_v63 = vld [vmem:[#allocation11 + $0x178] sm:$0xff] }
 0xdf0   :  { %6982 = vmatprep.subr.bf16.mxu0 %v6865_v18  ;;  %7064 = vmatprep.subr.bf16.mxu1 %v6867_v33  ;;  %v6807_v18 = vld [vmem:[#allocation11 + $0x340] sm:$0xff]  ;;  %v6749_v33 = vld [vmem:[#allocation11 + $0x170] sm:$0xff] }
 0xdf3   :  { %6983 = vmatpush1.bf16.msra.mxu0 %v6864_v8  ;;  %7065 = vmatpush1.bf16.msra.mxu1 %v6866_v19  ;;  %v6751_v8 = vld [vmem:[#allocation11 + $0x180] sm:$0xff]  ;;  %v6757_v19 = vld [vmem:[#allocation11 + $0x1b0] sm:$0xff] }
 0xdf4   :  { %6984 = vmatprep.subr.bf16.mxu0 %v6872_v52  ;;  %7066 = vmatprep.subr.bf16.mxu1 %v6874_v23  ;;  %v6814_v52 = vld [vmem:[#allocation11 + $0x378] sm:$0xff]  ;;  %v6756_v23 = vld [vmem:[#allocation11 + $0x1a8] sm:$0xff] }
 0xdf7   :  { %6985 = vmatpush1.bf16.msra.mxu0 %v6871_v41  ;;  %7067 = vmatpush1.bf16.msra.mxu1 %v6873_v0  ;;  %v6758_v41 = vld [vmem:[#allocation11 + $0x1b8] sm:$0xff]  ;;  %v6764_v0 = vld [vmem:[#allocation11 + $0x1e8] sm:$0xff] }
 0xdf8   :  { %6986 = vmatprep.subr.bf16.mxu0 %v6879_v40  ;;  %7068 = vmatprep.subr.bf16.mxu1 %v6881_v20  ;;  %v6877_v40 = vld [vmem:[#allocation11 + $0x570] sm:$0xff]  ;;  %v6763_v20 = vld [vmem:[#allocation11 + $0x1e0] sm:$0xff] }
 0xdfb   :  { %6987 = vmatpush1.bf16.msra.mxu0 %v6878_v32  ;;  %7069 = vmatpush1.bf16.msra.mxu1 %v6880_v46  ;;  %v6821_v32 = vld [vmem:[#allocation11 + $0x3b0] sm:$0xff]  ;;  %v6771_v46 = vld [vmem:[#allocation11 + $0x220] sm:$0xff] }
 0xdfc   :  { %6988 = vmatprep.subr.bf16.mxu0 %v6886_v34  ;;  %7070 = vmatprep.subr.bf16.mxu1 %v6888_v29  ;;  %v6884_v34 = vld [vmem:[#allocation11 + $0x5a8] sm:$0xff]  ;;  %v6770_v29 = vld [vmem:[#allocation11 + $0x218] sm:$0xff] }
 0xdff   :  { %6989 = vmatpush1.bf16.msra.mxu0 %v6885_v31  ;;  %7071 = vmatpush1.bf16.msra.mxu1 %v6887_v35  ;;  %v6828_v31 = vld [vmem:[#allocation11 + $0x3e8] sm:$0xff]  ;;  %v6778_v35 = vld [vmem:[#allocation11 + $0x258] sm:$0xff] }
 0xe00   :  { %6990 = vmatprep.subr.bf16.mxu0 %v6893_v50  ;;  %7072 = vmatprep.subr.bf16.mxu1 %v6895_v25  ;;  %v6891_v50 = vld [vmem:[#allocation11 + $0x5e0] sm:$0xff]  ;;  %v6777_v25 = vld [vmem:[#allocation11 + $0x250] sm:$0xff] }
 0xe03   :  { %6991 = vmatpush1.bf16.msra.mxu0 %v6892_v38  ;;  %7073 = vmatpush1.bf16.msra.mxu1 %v6894_v30  ;;  %v6835_v38 = vld [vmem:[#allocation11 + $0x420] sm:$0xff]  ;;  %v6785_v30 = vld [vmem:[#allocation11 + $0x290] sm:$0xff] }
 0xe04   :  { %6992 = vmatprep.subr.bf16.mxu0 %v6900_v24  ;;  %7074 = vmatprep.subr.bf16.mxu1 %v6902_v56  ;;  %v6898_v24 = vld [vmem:[#allocation11 + $0x618] sm:$0xff]  ;;  %v6784_v56 = vld [vmem:[#allocation11 + $0x288] sm:$0xff] }
 0xe07   :  { %6993 = vmatpush1.bf16.msra.mxu0 %v6899_v9  ;;  %7075 = vmatpush1.bf16.msra.mxu1 %v6901_v22  ;;  %v6842_v9 = vld [vmem:[#allocation11 + $0x458] sm:$0xff]  ;;  %v6792_v22 = vld [vmem:[#allocation11 + $0x2c8] sm:$0xff] }
 0xe08   :  { %6994 = vmatprep.subr.bf16.mxu0 %v6907_v10  ;;  %7076 = vmatprep.subr.bf16.mxu1 %v6909_v53  ;;  %v6905_v10 = vld [vmem:[#allocation11 + $0x650] sm:$0xff]  ;;  %v6791_v53 = vld [vmem:[#allocation11 + $0x2c0] sm:$0xff] }
 0xe0b   :  { %6995 = vmatpush1.bf16.msra.mxu0 %v6906_v13  ;;  %7077 = vmatpush1.bf16.msra.mxu1 %v6908_v59  ;;  %v6849_v13 = vld [vmem:[#allocation11 + $0x490] sm:$0xff]  ;;  %v6799_v59 = vld [vmem:[#allocation11 + $0x300] sm:$0xff] }
 0xe0c   :  { %6996 = vmatprep.subr.bf16.mxu0 %v6914_v39  ;;  %7078 = vmatprep.subr.bf16.mxu1 %v6916_v14  ;;  %v6912_v39 = vld [vmem:[#allocation11 + $0x688] sm:$0xff]  ;;  %v6798_v14 = vld [vmem:[#allocation11 + $0x2f8] sm:$0xff] }
 0xe0f   :  { %6997 = vmatpush1.bf16.msra.mxu0 %v6913_v42  ;;  %7079 = vmatpush1.bf16.msra.mxu1 %v6915_v43  ;;  %v6856_v42 = vld [vmem:[#allocation11 + $0x4c8] sm:$0xff]  ;;  %v6806_v43 = vld [vmem:[#allocation11 + $0x338] sm:$0xff] }
 0xe10   :  { %6998 = vmatprep.subr.bf16.mxu0 %v6921_v27  ;;  %7080 = vmatprep.subr.bf16.mxu1 %v6923_v15  ;;  %v6919_v27 = vld [vmem:[#allocation11 + $0x6c0] sm:$0xff]  ;;  %v6805_v15 = vld [vmem:[#allocation11 + $0x330] sm:$0xff] }
 0xe13   :  { %6999 = vmatpush1.bf16.msra.mxu0 %v6920_v37  ;;  %7081 = vmatpush1.bf16.msra.mxu1 %v6922_v45  ;;  %v6863_v37 = vld [vmem:[#allocation11 + $0x500] sm:$0xff]  ;;  %v6813_v45 = vld [vmem:[#allocation11 + $0x370] sm:$0xff] }
 0xe14   :  { %7091 = vmatprep.subr.bf16.mxu0 %v6708_v49  ;;  %7703 = vmatprep.subr.bf16.mxu1 %v6765_v16  ;;  %v6926_v49 = vld [vmem:[#allocation11 + $0x6f8] sm:$0xff]  ;;  %v6812_v16 = vld [vmem:[#allocation11 + $0x368] sm:$0xff] }
 0xe16   :  { %7001 = vmatmul.mubr.bf16.vlgmr.msra.gmra.mrb[12].mxu0 %v11370_v11  ;;  %7083 = vmatmul.mubr.bf16.vlgmr.msra.gmra.mrb[36].mxu1 %v11370_v11 }
 0xe17   :  { %7092 = vmatpush1.bf16.msra.mxu0 %v6707_v51  ;;  %7704 = vmatpush3.bf16.msra.mxu1 %v6709_v44  ;;  %v6870_v51 = vld [vmem:[#allocation11 + $0x538] sm:$0xff]  ;;  %v6820_v44 = vld [vmem:[#allocation11 + $0x3a8] sm:$0xff] }
 0xe18   :  { %7093 = vmatprep.subr.bf16.mxu0 %v6715_v47  ;;  %7705 = vmatprep.subr.bf16.mxu1 %v6772_v36  ;;  %v6819_v47 = vld [vmem:[#allocation11 + $0x3a0] sm:$0xff] }
 0xe19   :  { %7205 = vmatprep.mubr.bf16.mxu1 %v11352_v21  ;;  %7123 = vmatprep.mubr.bf16.mxu0 %v11352_v21  ;;  %v6735_v21 = vld [vmem:[#allocation11 + $0x100] sm:$0xff] }
 0xe1a   :  { %v6827_v36 = vld [vmem:[#allocation11 + $0x3e0] sm:$0xff] }
 0xe1b   :  { %7094 = vmatpush1.bf16.msra.mxu0 %v6714_v54  ;;  %7706 = vmatpush3.bf16.msra.mxu1 %v6716_v55  ;;  %v6826_v54 = vld [vmem:[#allocation11 + $0x3d8] sm:$0xff] }
 0xe1c   :  { %7095 = vmatprep.subr.bf16.mxu0 %v6722_v12  ;;  %7707 = vmatprep.subr.bf16.mxu1 %v6779_v57  ;;  %v6834_v55 = vld [vmem:[#allocation11 + $0x418] sm:$0xff]  ;;  %v6833_v12 = vld [vmem:[#allocation11 + $0x410] sm:$0xff] }
 0xe1d   :  { %v6841_v57 = vld [vmem:[#allocation11 + $0x450] sm:$0xff] }
 0xe1f   :  { %7096 = vmatpush1.bf16.msra.mxu0 %v6721_v58  ;;  %7708 = vmatpush3.bf16.msra.mxu1 %v6723_v60  ;;  %v6840_v58 = vld [vmem:[#allocation11 + $0x448] sm:$0xff] }
 0xe20   :  { %7097 = vmatprep.subr.bf16.mxu0 %v6729_v1  ;;  %7709 = vmatprep.subr.bf16.mxu1 %v6786_v2  ;;  %v6848_v60 = vld [vmem:[#allocation11 + $0x488] sm:$0xff]  ;;  %v6847_v1 = vld [vmem:[#allocation11 + $0x480] sm:$0xff] }
 0xe21   :  { %v6855_v2 = vld [vmem:[#allocation11 + $0x4c0] sm:$0xff] }
 0xe23   :  { %7098 = vmatpush1.bf16.msra.mxu0 %v6728_v61  ;;  %7710 = vmatpush3.bf16.msra.mxu1 %v6730_v3  ;;  %v6862_v61 = vld [vmem:[#allocation11 + $0x4f8] sm:$0xff]  ;;  %v6869_v3 = vld [vmem:[#allocation11 + $0x530] sm:$0xff] }
 0xe24   :  { %7099 = vmatprep.subr.bf16.mxu0 %v6736_v4  ;;  %7711 = vmatprep.subr.bf16.mxu1 %v6793_v5  ;;  %v6868_v4 = vld [vmem:[#allocation11 + $0x528] sm:$0xff] }
 0xe25   :  { %v6876_v5 = vld [vmem:[#allocation11 + $0x568] sm:$0xff] }
 0xe27   :  { %7100 = vmatpush1.bf16.msra.mxu0 %v6735_v21  ;;  %7712 = vmatpush3.bf16.msra.mxu1 %v6737_v62  ;;  %v6875_v21 = vld [vmem:[#allocation11 + $0x560] sm:$0xff] }
 0xe28   :  { %7101 = vmatprep.subr.bf16.mxu0 %v6743_v6  ;;  %7713 = vmatprep.subr.bf16.mxu1 %v6800_v17  ;;  %v6883_v62 = vld [vmem:[#allocation11 + $0x5a0] sm:$0xff]  ;;  %v6882_v6 = vld [vmem:[#allocation11 + $0x598] sm:$0xff] }
 0xe29   :  { %v6890_v17 = vld [vmem:[#allocation11 + $0x5d8] sm:$0xff] }
 0xe2b   :  { %7102 = vmatpush1.bf16.msra.mxu0 %v6742_v7  ;;  %7714 = vmatpush3.bf16.msra.mxu1 %v6744_v26  ;;  %v6889_v7 = vld [vmem:[#allocation11 + $0x5d0] sm:$0xff] }
 0xe2c   :  { %7103 = vmatprep.subr.bf16.mxu0 %v6750_v63  ;;  %7715 = vmatprep.subr.bf16.mxu1 %v6807_v18  ;;  %v6897_v26 = vld [vmem:[#allocation11 + $0x610] sm:$0xff]  ;;  %v6896_v63 = vld [vmem:[#allocation11 + $0x608] sm:$0xff] }
 0xe2d   :  { %v6904_v18 = vld [vmem:[#allocation11 + $0x648] sm:$0xff] }
 0xe2f   :  { %7104 = vmatpush1.bf16.msra.mxu0 %v6749_v33  ;;  %7716 = vmatpush3.bf16.msra.mxu1 %v6751_v8  ;;  %v6903_v33 = vld [vmem:[#allocation11 + $0x640] sm:$0xff] }
 0xe30   :  { %7105 = vmatprep.subr.bf16.mxu0 %v6757_v19  ;;  %7717 = vmatprep.subr.bf16.mxu1 %v6814_v52  ;;  %v6911_v8 = vld [vmem:[#allocation11 + $0x680] sm:$0xff]  ;;  %v6910_v19 = vld [vmem:[#allocation11 + $0x678] sm:$0xff] }
 0xe31   :  { %v6918_v52 = vld [vmem:[#allocation11 + $0x6b8] sm:$0xff] }
 0xe33   :  { %7106 = vmatpush1.bf16.msra.mxu0 %v6756_v23  ;;  %7718 = vmatpush3.bf16.msra.mxu1 %v6758_v41  ;;  %v6917_v23 = vld [vmem:[#allocation11 + $0x6b0] sm:$0xff] }
 0xe34   :  { %7107 = vmatprep.subr.bf16.mxu0 %v6764_v0  ;;  %7725 = vmatprep.subr.bf16.mxu1 %v6877_v40  ;;  %v6925_v41 = vld [vmem:[#allocation11 + $0x6f0] sm:$0xff]  ;;  %v6924_v0 = vld [vmem:[#allocation11 + $0x6e8] sm:$0xff] }
 0xe36   :  { %7206 = vmatmul.mubr.bf16.vlgmr.msra.gmra.mrb[40].mxu1 %v11358_v48 }
 0xe37   :  { %7108 = vmatpush1.bf16.msra.mxu0 %v6763_v20  ;;  %7726 = vmatpush3.bf16.msra.mxu1 %v6821_v32 }
 0xe38   :  { %7109 = vmatprep.subr.bf16.mxu0 %v6771_v46  ;;  %7727 = vmatprep.subr.bf16.mxu1 %v6884_v34 }
 0xe39   :  { %7245 = vmatprep.mubr.bf16.mxu1 %v11362_v28 }
 0xe3b   :  { %7110 = vmatpush1.bf16.msra.mxu0 %v6770_v29  ;;  %7728 = vmatpush3.bf16.msra.mxu1 %v6828_v31 }
 0xe3c   :  { %7111 = vmatprep.subr.bf16.mxu0 %v6778_v35  ;;  %7729 = vmatprep.subr.bf16.mxu1 %v6891_v50 }
 0xe3f   :  { %7112 = vmatpush1.bf16.msra.mxu0 %v6777_v25  ;;  %7730 = vmatpush3.bf16.msra.mxu1 %v6835_v38 }
 0xe40   :  { %7113 = vmatprep.subr.bf16.mxu0 %v6785_v30  ;;  %7731 = vmatprep.subr.bf16.mxu1 %v6898_v24 }
 0xe43   :  { %7114 = vmatpush1.bf16.msra.mxu0 %v6784_v56  ;;  %7732 = vmatpush3.bf16.msra.mxu1 %v6842_v9 }
 0xe44   :  { %7115 = vmatprep.subr.bf16.mxu0 %v6792_v22  ;;  %7733 = vmatprep.subr.bf16.mxu1 %v6905_v10 }
 0xe47   :  { %7116 = vmatpush1.bf16.msra.mxu0 %v6791_v53  ;;  %7734 = vmatpush3.bf16.msra.mxu1 %v6849_v13 }
 0xe48   :  { %7117 = vmatprep.subr.bf16.mxu0 %v6799_v59  ;;  %7735 = vmatprep.subr.bf16.mxu1 %v6912_v39 }
 0xe4b   :  { %7118 = vmatpush1.bf16.msra.mxu0 %v6798_v14  ;;  %7736 = vmatpush3.bf16.msra.mxu1 %v6856_v42 }
 0xe4c   :  { %7119 = vmatprep.subr.bf16.mxu0 %v6806_v43  ;;  %7737 = vmatprep.subr.bf16.mxu1 %v6919_v27 }
 0xe4f   :  { %7120 = vmatpush1.bf16.msra.mxu0 %v6805_v15  ;;  %7738 = vmatpush3.bf16.msra.mxu1 %v6863_v37 }
 0xe50   :  { %7121 = vmatprep.subr.bf16.mxu0 %v6813_v45  ;;  %7739 = vmatprep.subr.bf16.mxu1 %v6926_v49 }
 0xe53   :  { %7122 = vmatpush1.bf16.msra.mxu0 %v6812_v16  ;;  %7740 = vmatpush3.bf16.msra.mxu1 %v6870_v51 }
 0xe54   :  { %7132 = vmatprep.subr.bf16.mxu0 %v6820_v44 }
 0xe56   :  { %7246 = vmatmul.mubr.bf16.vlgmr.msra.gmra.mrb[44].mxu1 %v11370_v11  ;;  %7124 = vmatmul.mubr.bf16.vlgmr.msra.gmra.mrb[16].mxu0 %v11358_v48  ;;  %v6854_v48 = vld [vmem:[#allocation11 + $0x4b8] sm:$0xff] }
 0xe57   :  { %7133 = vmatpush1.bf16.msra.mxu0 %v6819_v47  ;;  %7164 = vmatprep.mubr.bf16.mxu0 %v11362_v28  ;;  %v6861_v28 = vld [vmem:[#allocation11 + $0x4f0] sm:$0xff] }
 0xe58   :  { %7134 = vmatprep.subr.bf16.mxu0 %v6827_v36 }
 0xe5b   :  { %7135 = vmatpush1.bf16.msra.mxu0 %v6826_v54 }
 0xe5c   :  { %7136 = vmatprep.subr.bf16.mxu0 %v6834_v55 }
 0xe5f   :  { %7137 = vmatpush1.bf16.msra.mxu0 %v6833_v12 }
 0xe60   :  { %7138 = vmatprep.subr.bf16.mxu0 %v6841_v57 }
 0xe63   :  { %7139 = vmatpush1.bf16.msra.mxu0 %v6840_v58 }
 0xe64   :  { %7140 = vmatprep.subr.bf16.mxu0 %v6848_v60 }
 0xe67   :  { %7141 = vmatpush1.bf16.msra.mxu0 %v6847_v1 }
 0xe68   :  { %7142 = vmatprep.subr.bf16.mxu0 %v6855_v2 }
 0xe6b   :  { %7143 = vmatpush1.bf16.msra.mxu0 %v6854_v48 }
 0xe6c   :  { %7144 = vmatprep.subr.bf16.mxu0 %v6862_v61 }
 0xe6f   :  { %7145 = vmatpush1.bf16.msra.mxu0 %v6861_v28 }
 0xe70   :  { %7146 = vmatprep.subr.bf16.mxu0 %v6869_v3 }
 0xe73   :  { %7147 = vmatpush1.bf16.msra.mxu0 %v6868_v4 }
 0xe74   :  { %7148 = vmatprep.subr.bf16.mxu0 %v6876_v5 }
 0xe77   :  { %7149 = vmatpush1.bf16.msra.mxu0 %v6875_v21 }
 0xe78   :  { %7150 = vmatprep.subr.bf16.mxu0 %v6883_v62 }
 0xe7b   :  { %7151 = vmatpush1.bf16.msra.mxu0 %v6882_v6 }
 0xe7c   :  { %7152 = vmatprep.subr.bf16.mxu0 %v6890_v17 }
 0xe7f   :  { %7153 = vmatpush1.bf16.msra.mxu0 %v6889_v7 }
 0xe80   :  { %7154 = vmatprep.subr.bf16.mxu0 %v6897_v26 }
 0xe83   :  { %7155 = vmatpush1.bf16.msra.mxu0 %v6896_v63 }
 0xe84   :  { %7156 = vmatprep.subr.bf16.mxu0 %v6904_v18 }
 0xe87   :  { %7157 = vmatpush1.bf16.msra.mxu0 %v6903_v33 }
 0xe88   :  { %7158 = vmatprep.subr.bf16.mxu0 %v6911_v8 }
 0xe8b   :  { %7159 = vmatpush1.bf16.msra.mxu0 %v6910_v19 }
 0xe8c   :  { %7160 = vmatprep.subr.bf16.mxu0 %v6918_v52 }
 0xe8f   :  { %7161 = vmatpush1.bf16.msra.mxu0 %v6917_v23 }
 0xe90   :  { %7162 = vmatprep.subr.bf16.mxu0 %v6925_v41 }
 0xe93   :  { %7163 = vmatpush1.bf16.msra.mxu0 %v6924_v0 }
 0xe96   :  { %7165 = vmatmul.mubr.bf16.vlgmr.msra.gmra.mrb[16].mxu0 %v11370_v11 }
 0xee9   :  { %v11382_v40 = vpop.f32.mrb[12].mxu0  ;;  %v11384_v20 = vpop.f32.mrb[36].mxu1 }
 0xeea   :  { %v7253_v32 = vrot.slane %v11382_v40, 4  ;;  %v7303_v46 = vmul.f32 %v11382_v40, %v11382_v40  ;;  %v7265_v34 = vrot.slane %v11384_v20, 4  ;;  %v7305_v29 = vmul.f32 %v11384_v20, %v11384_v20  ;;  %v11392_v31 = vpop.f32.mrb[13].mxu0  ;;  %v11394_v35 = vpop.f32.mrb[37].mxu1 }
 0xeeb   :  { %v7259_v11 = vrot.slane %v11392_v31, 4  ;;  %v7304_v50 = vmul.f32 %v11392_v31, %v11392_v31  ;;  %v7271_v25 = vrot.slane %v11394_v35, 4  ;;  %v7306_v38 = vmul.f32 %v11394_v35, %v11394_v35  ;;  %v7006_v30 = vpop.f32.mrb[14].mxu0  ;;  %v7088_v24 = vpop.f32.mrb[38].mxu1 }
 0xeec   :  { %v7254_v56 = vadd.f32 %v7253_v32, %v11382_v40  ;;  %v7310_v9 = vrot.slane %v7303_v46, 4  ;;  %v7266_v22 = vadd.f32 %v7265_v34, %v11384_v20  ;;  %v7322_v10 = vrot.slane %v7305_v29, 4  ;;  %v7007_v53 = vpop.f32.mrb[15].mxu0  ;;  %v7089_v13 = vpop.f32.mrb[39].mxu1 }
 0xeed   :  { %v7260_v59 = vadd.f32 %v7259_v11, %v11392_v31  ;;  %v7316_v39 = vrot.slane %v7304_v50, 4  ;;  %v7272_v14 = vadd.f32 %v7271_v25, %v11394_v35  ;;  %v7328_v42 = vrot.slane %v7306_v38, 4 }
 0xeee   :  { %v7255_v43 = vrot.slane %v7254_v56, 2  ;;  %v7311_v27 = vadd.f32 %v7310_v9, %v7303_v46  ;;  %v7267_v15 = vrot.slane %v7266_v22, 2  ;;  %v7323_v37 = vadd.f32 %v7322_v10, %v7305_v29 }
 0xeef   :  { %v7261_v45 = vrot.slane %v7260_v59, 2  ;;  %v7317_v49 = vadd.f32 %v7316_v39, %v7304_v50  ;;  %v7273_v16 = vrot.slane %v7272_v14, 2  ;;  %v7329_v51 = vadd.f32 %v7328_v42, %v7306_v38 }
 0xef0   :  { %v7256_v44 = vadd.f32 %v7255_v43, %v7254_v56  ;;  %v7312_v47 = vrot.slane %v7311_v27, 2  ;;  %v7268_v36 = vadd.f32 %v7267_v15, %v7266_v22  ;;  %v7324_v54 = vrot.slane %v7323_v37, 2 }
 0xef1   :  { %v7262_v55 = vadd.f32 %v7261_v45, %v7260_v59  ;;  %v7318_v12 = vrot.slane %v7317_v49, 2  ;;  %v7274_v57 = vadd.f32 %v7273_v16, %v7272_v14  ;;  %v7330_v58 = vrot.slane %v7329_v51, 2 }
 0xef2   :  { %v7257_v60 = vrot.slane %v7256_v44, 1  ;;  %v7313_v1 = vadd.f32 %v7312_v47, %v7311_v27  ;;  %v7269_v2 = vrot.slane %v7268_v36, 1  ;;  %v7325_v48 = vadd.f32 %v7324_v54, %v7323_v37 }
 0xef3   :  { %v7263_v61 = vrot.slane %v7262_v55, 1  ;;  %v7319_v28 = vadd.f32 %v7318_v12, %v7317_v49  ;;  %v7275_v3 = vrot.slane %v7274_v57, 1  ;;  %v7331_v4 = vadd.f32 %v7330_v58, %v7329_v51 }
 0xef4   :  { %v7258_v5 = vadd.f32 %v7257_v60, %v7256_v44  ;;  %v7314_v21 = vrot.slane %v7313_v1, 1  ;;  %v7270_v62 = vadd.f32 %v7269_v2, %v7268_v36  ;;  %v7326_v6 = vrot.slane %v7325_v48, 1 }
 0xef5   :  { %v7264_v17 = vadd.f32 %v7263_v61, %v7262_v55  ;;  %v7320_v7 = vrot.slane %v7319_v28, 1  ;;  %v7276_v26 = vadd.f32 %v7275_v3, %v7274_v57  ;;  %v7332_v63 = vrot.slane %v7331_v4, 1 }
 0xef6   :  { %v7296_v18 = vmul.f32 0.125, %v7258_v5  ;;  %v7315_v33 = vadd.f32 %v7314_v21, %v7313_v1  ;;  %v7298_v8 = vmul.f32 0.125, %v7270_v62  ;;  %v7327_v19 = vadd.f32 %v7326_v6, %v7325_v48 }
 0xef7   :  { %v7297_v52 = vmul.f32 0.125, %v7264_v17  ;;  %v7321_v23 = vadd.f32 %v7320_v7, %v7319_v28  ;;  %v7299_v41 = vmul.f32 0.125, %v7276_v26  ;;  %v7333_v0 = vadd.f32 %v7332_v63, %v7331_v4 }
 0xef8   :  { %v7353_v32 = vmul.f32 0.125, %v7315_v33  ;;  %v7360_v46 = vmul.f32 %v7296_v18, %v7296_v18  ;;  %v7355_v34 = vmul.f32 0.125, %v7327_v19  ;;  %v7362_v29 = vmul.f32 %v7298_v8, %v7298_v8 }
 0xef9   :  { %v7354_v11 = vmul.f32 0.125, %v7321_v23  ;;  %v7361_v50 = vmul.f32 %v7297_v52, %v7297_v52  ;;  %v7356_v38 = vmul.f32 0.125, %v7333_v0  ;;  %v7363_v30 = vmul.f32 %v7299_v41, %v7299_v41 }
 0xefa   :  { %v7367_v25 = vsub.f32 %v7353_v32, %v7360_v46  ;;  %v7369_v24 = vsub.f32 %v7355_v34, %v7362_v29  ;;  %v7402_v43 = vsub.f32 0.0, %v7296_v18  ;;  %v7404_v37 = vsub.f32 0.0, %v7298_v8 }
 0xefb   :  { %v7368_v56 = vsub.f32 %v7354_v11, %v7361_v50  ;;  %v7370_v22 = vsub.f32 %v7356_v38, %v7363_v30  ;;  %v7403_v44 = vsub.f32 0.0, %v7297_v52  ;;  %v7405_v57 = vsub.f32 0.0, %v7299_v41 }
 0xefc   :  { %v7374_v9 = vmax.f32 %v7367_v25, 0.0  ;;  %v7376_v10 = vmax.f32 %v7369_v24, 0.0 }
 0xefd   :  { %v7375_v53 = vmax.f32 %v7368_v56, 0.0  ;;  %v7377_v59 = vmax.f32 %v7370_v22, 0.0 }
 0xefe   :  { %v7381_v13 = vadd.f32 1e-05, %v7374_v9  ;;  %v7383_v39 = vadd.f32 1e-05, %v7376_v10 }
 0xeff   :  { %v7382_v14 = vadd.f32 1e-05, %v7375_v53  ;;  %v7384_v42 = vadd.f32 1e-05, %v7377_v59 }
 0xf00   :  { %7875 = vrsqrt.f32 %v7381_v13 }
 0xf01   :  { %7877 = vrsqrt.f32 %v7383_v39 }
 0xf02   :  { %7879 = vrsqrt.f32 %v7382_v14 }
 0xf03   :  { %7881 = vrsqrt.f32 %v7384_v42 }
 0xf09   :  { %v7719_v27 = vpop.f32.mrb[40].mxu1 }
 0xf0a   :  { %v7876_v15 = vpop.eup %7875  ;;  %v7720_v45 = vpop.f32.mrb[41].mxu1 }
 0xf0b   :  { %v7878_v49 = vpop.eup %7877  ;;  %v7395_v16 = vmul.f32 %v7876_v15, %v11382_v40  ;;  %v7409_v51 = vmul.f32 %v7876_v15, %v7402_v43  ;;  %v7721_v47 = vadd.f32 %v7720_v45, %v7719_v27  ;;  %v7722_v36 = vpop.f32.mrb[42].mxu1 }
 0xf0c   :  { %v7880_v54 = vpop.eup %7879  ;;  %v7397_v55 = vmul.f32 %v7878_v49, %v11384_v20  ;;  %v7411_v12 = vmul.f32 %v7878_v49, %v7404_v37  ;;  %v7723_v58 = vpop.f32.mrb[43].mxu1 }
 0xf0d   :  { %v7882_v60 = vpop.eup %7881  ;;  %v7416_v1 = vadd.f32 %v7409_v51, %v7395_v16  ;;  %v7396_v2 = vmul.f32 %v7880_v54, %v11392_v31  ;;  %v7410_v48 = vmul.f32 %v7880_v54, %v7403_v44 }
 0xf0e   :  { %v7418_v61 = vadd.f32 %v7411_v12, %v7397_v55  ;;  %v7398_v28 = vmul.f32 %v7882_v60, %v11394_v35  ;;  %v7412_v3 = vmul.f32 %v7882_v60, %v7405_v57 }
 0xf0f   :  { %vm7423_vm6 = vcmp.ge.f32.partialorder %v7416_v1, 0.0  ;;  %v7430_v40 = vmul.f32 0.01, %v7416_v1  ;;  %v7417_v4 = vadd.f32 %v7410_v48, %v7396_v2 }
 0xf10   :  { %vm7425_vm7 = vcmp.ge.f32.partialorder %v7418_v61, 0.0  ;;  %v7432_v5 = vmul.f32 0.01, %v7418_v61  ;;  %v7419_v21 = vadd.f32 %v7412_v3, %v7398_v28 }
 0xf11   :  { %v7437_v62 = vsel %vm7423_vm6, %v7416_v1, %v7430_v40  ;;  %vm7424_vm8 = vcmp.ge.f32.partialorder %v7417_v4, 0.0  ;;  %v7431_v20 = vmul.f32 0.01, %v7417_v4 }
 0xf12   :  { %7444 = vst [vmem:[#allocation13] sm:$0xff] %v7437_v62  ;;  %v7439_v6 = vsel %vm7425_vm7, %v7418_v61, %v7432_v5  ;;  %vm7426_vm9 = vcmp.ge.f32.partialorder %v7419_v21, 0.0  ;;  %v7433_v17 = vmul.f32 0.01, %v7419_v21 }
 0xf13   :  { %7446 = vst [vmem:[#allocation13 + $0x10] sm:$0xff] %v7439_v6  ;;  %v7438_v31 = vsel %vm7424_vm8, %v7417_v4, %v7431_v20 }
 0xf14   :  { %7445 = vst [vmem:[#allocation13 + $0x8] sm:$0xff] %v7438_v31  ;;  %v7440_v7 = vsel %vm7426_vm9, %v7419_v21, %v7433_v17 }
 0xf15   :  { %7447 = vst [vmem:[#allocation13 + $0x18] sm:$0xff] %v7440_v7 }
 0xf29   :  { %v7741_v35 = vpop.f32.mrb[44].mxu1 }
 0xf2a   :  { %v7742_v26 = vpop.f32.mrb[45].mxu1 }
 0xf2b   :  { %v7743_v63 = vadd.f32 %v7742_v26, %v7741_v35  ;;  %v7744_v18 = vpop.f32.mrb[46].mxu1 }
 0xf2c   :  { %v7745_v33 = vpop.f32.mrb[47].mxu1 }
 0xf2d   :  { %v7248_v8 = vadd.f32 %v7743_v63, %v7721_v47 }
 0xf2f   :  { %v7289_v19 = vsel %vm5263_vm0, %v7248_v8, 0.0  ;;  %v7309_v52 = vmul.f32 %v7248_v8, %v7248_v8 }
 0xf30   :  { %v7290_v23 = vrot.slane %v7289_v19, 4 }
 0xf31   :  { %v7346_v41 = vsel %vm5263_vm0, %v7309_v52, 0.0 }
 0xf32   :  { %v7291_v0 = vadd.f32 %v7290_v23, %v7289_v19  ;;  %v7347_v32 = vrot.slane %v7346_v41, 4 }
 0xf34   :  { %v7292_v46 = vrot.slane %v7291_v0, 2  ;;  %v7348_v34 = vadd.f32 %v7347_v32, %v7346_v41 }
 0xf36   :  { %v7293_v29 = vadd.f32 %v7292_v46, %v7291_v0  ;;  %v7349_v11 = vrot.slane %v7348_v34, 2 }
 0xf38   :  { %v7294_v50 = vrot.slane %v7293_v29, 1  ;;  %v7350_v25 = vadd.f32 %v7349_v11, %v7348_v34 }
 0xf3a   :  { %v7295_v38 = vadd.f32 %v7294_v50, %v7293_v29  ;;  %v7351_v30 = vrot.slane %v7350_v25, 1 }
 0xf3c   :  { %v7302_v24 = vmul.f32 0.125, %v7295_v38  ;;  %v7352_v56 = vadd.f32 %v7351_v30, %v7350_v25 }
 0xf3e   :  { %v7359_v9 = vmul.f32 0.125, %v7352_v56  ;;  %v7366_v22 = vmul.f32 %v7302_v24, %v7302_v24  ;;  %v7408_v59 = vsub.f32 0.0, %v7302_v24 }
 0xf40   :  { %v7373_v10 = vsub.f32 %v7359_v9, %v7366_v22 }
 0xf42   :  { %v7380_v53 = vmax.f32 %v7373_v10, 0.0 }
 0xf44   :  { %v7387_v13 = vadd.f32 1e-05, %v7380_v53 }
 0xf46   :  { %7883 = vrsqrt.f32 %v7387_v13 }
 0xf50   :  { %v7884_v39 = vpop.eup %7883 }
 0xf51   :  { %v7401_v14 = vmul.f32 %v7884_v39, %v7248_v8  ;;  %v7415_v42 = vmul.f32 %v7884_v39, %v7408_v59 }
 0xf53   :  { %v7422_v43 = vadd.f32 %v7415_v42, %v7401_v14 }
 0xf55   :  { %vm7429_vm10 = vcmp.ge.f32.partialorder %v7422_v43, 0.0  ;;  %v7436_v27 = vmul.f32 0.01, %v7422_v43 }
 0xf57   :  { %v7443_v15 = vsel %vm7429_vm10, %v7422_v43, %v7436_v27 }
 0xf58   :  { %7450 = vst.msk [vmem:[#allocation13 + $0x30] sm:$0xff] %vm5263_vm0, %v7443_v15 }
 0xf69   :  { %v7166_v37 = vpop.f32.mrb[16].mxu0 }
 0xf6a   :  { %v7277_v45 = vrot.slane %v7166_v37, 4  ;;  %v7307_v49 = vmul.f32 %v7166_v37, %v7166_v37  ;;  %v7168_v16 = vpop.f32.mrb[17].mxu0 }
 0xf6b   :  { %v7283_v51 = vrot.slane %v7168_v16, 4  ;;  %v7308_v44 = vmul.f32 %v7168_v16, %v7168_v16  ;;  %v7170_v47 = vpop.f32.mrb[18].mxu0 }
 0xf6c   :  { %v7278_v36 = vadd.f32 %v7277_v45, %v7166_v37  ;;  %v7334_v54 = vrot.slane %v7307_v49, 4  ;;  %v7171_v55 = vpop.f32.mrb[19].mxu0 }
 0xf6d   :  { %v7284_v12 = vadd.f32 %v7283_v51, %v7168_v16  ;;  %v7340_v57 = vrot.slane %v7308_v44, 4 }
 0xf6e   :  { %v7279_v58 = vrot.slane %v7278_v36, 2  ;;  %v7335_v60 = vadd.f32 %v7334_v54, %v7307_v49 }
 0xf6f   :  { %v7285_v1 = vrot.slane %v7284_v12, 2  ;;  %v7341_v2 = vadd.f32 %v7340_v57, %v7308_v44 }
 0xf70   :  { %v7280_v48 = vadd.f32 %v7279_v58, %v7278_v36  ;;  %v7336_v61 = vrot.slane %v7335_v60, 2 }
 0xf71   :  { %v7286_v28 = vadd.f32 %v7285_v1, %v7284_v12  ;;  %v7342_v3 = vrot.slane %v7341_v2, 2 }
 0xf72   :  { %v7281_v40 = vrot.slane %v7280_v48, 1  ;;  %v7337_v4 = vadd.f32 %v7336_v61, %v7335_v60 }
 0xf73   :  { %v7287_v5 = vrot.slane %v7286_v28, 1  ;;  %v7343_v21 = vadd.f32 %v7342_v3, %v7341_v2 }
 0xf74   :  { %v7282_v62 = vadd.f32 %v7281_v40, %v7280_v48  ;;  %v7338_v20 = vrot.slane %v7337_v4, 1 }
 0xf75   :  { %v7288_v6 = vadd.f32 %v7287_v5, %v7286_v28  ;;  %v7344_v17 = vrot.slane %v7343_v21, 1 }
 0xf76   :  { %v7300_v31 = vmul.f32 0.125, %v7282_v62  ;;  %v7339_v7 = vadd.f32 %v7338_v20, %v7337_v4 }
 0xf77   :  { %v7301_v35 = vmul.f32 0.125, %v7288_v6  ;;  %v7345_v26 = vadd.f32 %v7344_v17, %v7343_v21 }
 0xf78   :  { %v7357_v63 = vmul.f32 0.125, %v7339_v7  ;;  %v7364_v18 = vmul.f32 %v7300_v31, %v7300_v31  ;;  %v7406_v46 = vsub.f32 0.0, %v7300_v31 }
 0xf79   :  { %v7358_v33 = vmul.f32 0.125, %v7345_v26  ;;  %v7365_v8 = vmul.f32 %v7301_v35, %v7301_v35  ;;  %v7407_v29 = vsub.f32 0.0, %v7301_v35 }
 0xf7a   :  { %v7371_v19 = vsub.f32 %v7357_v63, %v7364_v18 }
 0xf7b   :  { %v7372_v52 = vsub.f32 %v7358_v33, %v7365_v8 }
 0xf7c   :  { %v7378_v23 = vmax.f32 %v7371_v19, 0.0 }
 0xf7d   :  { %v7379_v41 = vmax.f32 %v7372_v52, 0.0 }
 0xf7e   :  { %v7385_v0 = vadd.f32 1e-05, %v7378_v23 }
 0xf7f   :  { %v7386_v32 = vadd.f32 1e-05, %v7379_v41 }
 0xf80   :  { %7885 = vrsqrt.f32 %v7385_v0 }
 0xf81   :  { %7887 = vrsqrt.f32 %v7386_v32 }
 0xf8a   :  { %v7886_v34 = vpop.eup %7885 }
 0xf8b   :  { %v7888_v11 = vpop.eup %7887  ;;  %v7399_v50 = vmul.f32 %v7886_v34, %v7166_v37  ;;  %v7413_v25 = vmul.f32 %v7886_v34, %v7406_v46 }
 0xf8c   :  { %v7400_v38 = vmul.f32 %v7888_v11, %v7168_v16  ;;  %v7414_v30 = vmul.f32 %v7888_v11, %v7407_v29 }
 0xf8d   :  { %v7420_v24 = vadd.f32 %v7413_v25, %v7399_v50 }
 0xf8e   :  { %v7421_v56 = vadd.f32 %v7414_v30, %v7400_v38 }
 0xf8f   :  { %vm7427_vm0 = vcmp.ge.f32.partialorder %v7420_v24, 0.0  ;;  %v7434_v9 = vmul.f32 0.01, %v7420_v24 }
 0xf90   :  { %vm7428_vm11 = vcmp.ge.f32.partialorder %v7421_v56, 0.0  ;;  %v7435_v22 = vmul.f32 0.01, %v7421_v56 }
 0xf91   :  { %v7441_v10 = vsel %vm7427_vm0, %v7420_v24, %v7434_v9 }
 0xf92   :  { %7448 = vst [vmem:[#allocation13 + $0x20] sm:$0xff] %v7441_v10  ;;  %v7442_v53 = vsel %vm7428_vm11, %v7421_v56, %v7435_v22 }
 0xf93   :  { %7449 = vst [vmem:[#allocation13 + $0x28] sm:$0xff] %v7442_v53 }
 0xf94   :  { %7900 = shalt.err (!%p7897_p4)
}
 0xf95   :  { %s7901_s28 = scalar_lea.hbm %s11436_s11, 896 }
 0xf96   :  { %p7902_p5 = scmp.ne.s32.totalorder %s11436_s11, %s7901_s28  ;;  %p7905_p6 = scmp.lt.u32.totalorder %s7901_s28, %s11436_s11 }
 0xf98   :  { %p7907_p7 = pnand %p7905_p6, %p7902_p5 }
 0xf9a   :  { %7910 = shalt.err (!%p7907_p7)
}
 0xf9b   :  { %7460 = dma.vmem_to_hbm [thread:$0]  %s7458_s9, 896, %s11436_s11, [#allocation14]  }
 0xf9c   :  { %7931 = dma.done.wait [#allocation14], 896  }
 0xf9d   :  { %7932 = vsyncadd [#allocation14], 4294966400 }
 0xf9e   :  { %7464 = vsyncpa [#allocation14], 1 }
 0xf9f   :  { %7465 = vsyncmov [#allocation12] }
 0xfa2   :  { %s7466_s14 = vpop.sfrf %7465 }
 0xfa3   :  { %p7649_p8 = scmp.ne.s32.totalorder %s7466_s14, 0 }
 0xfa5   :  { %7470 = shalt.err (%p7649_p8)  }
 0xfa6   :  { %7472 = vsyncmov [#allocation12 + $0x1] }
 0xfa9   :  { %s7473_s15 = vpop.sfrf %7472 }
 0xfaa   :  { %p7650_p9 = scmp.ne.s32.totalorder %s7473_s15, 0 }
 0xfac   :  { %7477 = shalt.err (%p7650_p9)  }
 0xfad   :  { %7479 = vsyncmov [#allocation12 + $0x2] }
 0xfb0   :  { %s7480_s6 = vpop.sfrf %7479 }
 0xfb1   :  { %p7651_p10 = scmp.ne.s32.totalorder %s7480_s6, 0 }
 0xfb3   :  { %7484 = shalt.err (%p7651_p10)  }
 0xfb4   :  { %7486 = vsyncmov [#allocation12 + $0x3] }
 0xfb7   :  { %s7487_s16 = vpop.sfrf %7486 }
 0xfb8   :  { %p7652_p11 = scmp.ne.s32.totalorder %s7487_s16, 0 }
 0xfba   :  { %7491 = shalt.err (%p7652_p11)  }
 0xfbb   :  { %7493 = vsyncmov [#allocation12 + $0x4] }
 0xfbe   :  { %s7494_s11 = vpop.sfrf %7493 }
 0xfbf   :  { %p7653_p12 = scmp.ne.s32.totalorder %s7494_s11, 0 }
 0xfc1   :  { %7498 = shalt.err (%p7653_p12)  }
 0xfc2   :  { %7500 = vsyncmov [#allocation12 + $0x5] }
 0xfc5   :  { %s7501_s17 = vpop.sfrf %7500 }
 0xfc6   :  { %p7654_p13 = scmp.ne.s32.totalorder %s7501_s17, 0 }
 0xfc8   :  { %7505 = shalt.err (%p7654_p13)  }
 0xfc9   :  { %7507 = vsyncmov [#allocation12 + $0x6] }
 0xfcc   :  { %s7508_s18 = vpop.sfrf %7507 }
 0xfcd   :  { %p7655_p0 = scmp.ne.s32.totalorder %s7508_s18, 0 }
 0xfcf   :  { %7512 = shalt.err (%p7655_p0)  }
 0xfd0   :  { %7514 = vsyncmov [#allocation12 + $0x7] }
 0xfd3   :  { %s7515_s19 = vpop.sfrf %7514 }
 0xfd4   :  { %p7656_p1 = scmp.ne.s32.totalorder %s7515_s19, 0 }
 0xfd6   :  { %7519 = shalt.err (%p7656_p1)  }
 0xfd7   :  { %7521 = vsyncmov [#allocation12 + $0x8] }
 0xfda   :  { %s7522_s20 = vpop.sfrf %7521 }
 0xfdb   :  { %p7657_p2 = scmp.ne.s32.totalorder %s7522_s20, 0 }
 0xfdd   :  { %7526 = shalt.err (%p7657_p2)  }
 0xfde   :  { %7528 = vsyncmov [#allocation12 + $0x9] }
 0xfe1   :  { %s7529_s8 = vpop.sfrf %7528 }
 0xfe2   :  { %p7658_p3 = scmp.ne.s32.totalorder %s7529_s8, 0 }
 0xfe4   :  { %7533 = shalt.err (%p7658_p3)  }

</bundles_post_ra>
